<compile_context>
chip_gen: v5e
topology: v5e:2x2
jax: 0.10.0
libtpu: 0.0.40
codegen_flags: <defaults>
</compile_context>

<pallas_src>
import jax
import jax.numpy as jnp
import numpy as np
from jax.experimental import pallas as pl
from jax.experimental.pallas import tpu as pltpu


# ----------------------------------------------------------------------------
# Fused multi-layer LSTM stack kernel, time-chunked over the grid.
# ----------------------------------------------------------------------------
def _make_stack_kernel(t_chunk, B, H, nlayers):
    """Kernel ref layout:
        inputs : x_chunk (t_chunk*B, E) bf16,
                 then per layer: w_ih (E_l,4H) bf16, w_hh (H,4H) bf16,
                                 bias (1,4H) f32, h0 (B,H) f32, c0 (B,H) f32
        outputs: out_chunk (t_chunk*B, H) f32, then per layer: hN, cN (B,H) f32
        scratch: gx_sc (t_chunk*B, 4H) f32, act_sc (t_chunk*B, H) f32,
                 h_sc (nlayers, B, H) f32, c_sc (nlayers, B, H) f32
    """

    def kernel(*refs):
        x_ref = refs[0]
        layer_refs = refs[1:1 + 5 * nlayers]
        out_ref = refs[1 + 5 * nlayers]
        state_refs = refs[2 + 5 * nlayers:2 + 5 * nlayers + 2 * nlayers]
        gx_sc, act_sc, h_sc, c_sc = refs[-4:]

        # First chunk: load the initial (h, c) for every layer into the
        # persistent VMEM state scratch (carried across grid steps).
        @pl.when(pl.program_id(0) == 0)
        def _():
            for l in range(nlayers):
                h_sc[l] = layer_refs[5 * l + 3][...]
                c_sc[l] = layer_refs[5 * l + 4][...]

        for l in range(nlayers):
            w_ih_ref, w_hh_ref, b_ref = layer_refs[5 * l:5 * l + 3]

            # Layer input for this chunk: embedded tokens for layer 0,
            # otherwise the previous layer's chunk output in VMEM scratch.
            # (act_sc is fully consumed by the matmul below before this
            # layer's time loop overwrites it.)
            if l == 0:
                x_in = x_ref[...]                       # already bf16
            else:
                x_in = act_sc[...].astype(jnp.bfloat16)

            # Hoisted input projection + bias: one (t_chunk*B, E) @ (E, 4H)
            # MXU call per layer per chunk; only h @ W_hh stays on the
            # serial recurrent path.
            gx_sc[...] = (jnp.dot(x_in, w_ih_ref[...],
                                  preferred_element_type=jnp.float32)
                          + b_ref[...])

            whh = w_hh_ref[...]                          # bf16, VMEM-resident
            # TODO(synk): keep W_hh resident in the MXU across the time loop
            # via pltpu.matmul_push_rhs / matmul_acc_lhs / matmul_pop to take
            # the weight re-push off the serial critical path.

            last = (l == nlayers - 1)
            dst = out_ref if last else act_sc

            def step(t, carry, whh=whh, dst=dst):
                h, c = carry                             # f32 state
                row = pl.multiple_of(t * B, B)
                g = gx_sc[pl.ds(row, B), :] + jnp.dot(
                    h.astype(jnp.bfloat16), whh,
                    preferred_element_type=jnp.float32)
                i_g = jax.nn.sigmoid(g[:, 0 * H:1 * H])
                f_g = jax.nn.sigmoid(g[:, 1 * H:2 * H])
                g_g = jnp.tanh(g[:, 2 * H:3 * H])
                o_g = jax.nn.sigmoid(g[:, 3 * H:4 * H])
                c_new = f_g * c + i_g * g_g
                h_new = o_g * jnp.tanh(c_new)
                dst[pl.ds(row, B), :] = h_new
                return (h_new, c_new)

            # Bounded unroll: keeps LLO scheduler visibility without blowing
            # up bundle count / vreg pressure at realistic T.
            h_fin, c_fin = jax.lax.fori_loop(
                0, t_chunk, step, (h_sc[l], c_sc[l]),
                unroll=min(t_chunk, 4))

            h_sc[l] = h_fin
            c_sc[l] = c_fin

        # Last chunk: publish the final per-layer states.
        @pl.when(pl.program_id(0) == pl.num_programs(0) - 1)
        def _():
            for l in range(nlayers):
                state_refs[2 * l][...] = h_sc[l]
                state_refs[2 * l + 1][...] = c_sc[l]

    return kernel


def lstm_stack(x_flat, layers, hidden, *, T, B, t_chunk=None):
    """x_flat: (T*B, E) bf16 (time-major).  layers: list of dicts with
    w_ih (E_l, 4H) bf16, w_hh (H, 4H) bf16, bias (1, 4H) f32.
    hidden: list of (h (1,B,H), c (1,B,H)) f32.
    Returns (out_flat (T*B, H) f32, [(hN, cN)] per layer)."""
    NB, E = x_flat.shape
    H = layers[0]["w_hh"].shape[0]
    nlayers = len(layers)

    if t_chunk is None:
        t_chunk = next(c for c in (16, 8, 4, 2, 1) if T % c == 0)
    assert T % t_chunk == 0
    num_chunks = T // t_chunk
    rows = t_chunk * B

    # TODO(synk): pad/mask for sizes that violate these alignment rules
    # (e.g. H=1150, odd vocab) — typical PyTorch LM sizes need padding.
    assert H % 128 == 0 and B % 8 == 0 and rows % 16 == 0

    layer_inputs = []
    for l, layer in enumerate(layers):
        layer_inputs += [layer["w_ih"], layer["w_hh"], layer["bias"],
                         hidden[l][0][0], hidden[l][1][0]]

    def run(single_buffer):
        # Constant-index operands: nothing to pipeline, so a single VMEM
        # buffer is enough (halves their resident VMEM).
        resident = ({"pipeline_mode": pl.Buffered(1)}
                    if single_buffer else {})

        in_specs = [pl.BlockSpec((rows, E), lambda t: (t, 0))]
        for layer in layers:
            in_sz = layer["w_ih"].shape[0]
            in_specs += [
                pl.BlockSpec((in_sz, 4 * H), lambda t: (0, 0), **resident),
                pl.BlockSpec((H, 4 * H), lambda t: (0, 0), **resident),
                pl.BlockSpec((1, 4 * H), lambda t: (0, 0), **resident),
                pl.BlockSpec((B, H), lambda t: (0, 0), **resident),
                pl.BlockSpec((B, H), lambda t: (0, 0), **resident),
            ]

        out_shapes = [jax.ShapeDtypeStruct((NB, H), jnp.float32)]
        out_specs = [pl.BlockSpec((rows, H), lambda t: (t, 0))]
        for _ in range(nlayers):
            out_shapes += [jax.ShapeDtypeStruct((B, H), jnp.float32)] * 2
            out_specs += [pl.BlockSpec((B, H), lambda t: (0, 0))] * 2

        return pl.pallas_call(
            _make_stack_kernel(t_chunk, B, H, nlayers),
            out_shape=tuple(out_shapes),
            grid_spec=pltpu.PrefetchScalarGridSpec(
                num_scalar_prefetch=0,
                grid=(num_chunks,),              # serial time chunks
                in_specs=in_specs,
                out_specs=out_specs,
                scratch_shapes=[
                    pltpu.VMEM((rows, 4 * H), jnp.float32),   # hoisted gates_x
                    pltpu.VMEM((rows, H), jnp.float32),       # inter-layer act
                    pltpu.VMEM((nlayers, B, H), jnp.float32),  # carried h
                    pltpu.VMEM((nlayers, B, H), jnp.float32),  # carried c
                ]),
            compiler_params=pltpu.CompilerParams(
                dimension_semantics=("arbitrary",),   # recurrence is serial
                vmem_limit_bytes=56 * 1024 * 1024),   # <= v7x 64 MiB physical
        )(x_flat, *layer_inputs)

    # TODO(synk): on v7x add a leading "parallel" grid axis splitting the
    # batch across the two TensorCores (B/2 rows each).
    try:
        outs = run(True)
    except Exception:
        # pl.Buffered(1) not accepted by this jax build: fall back to default
        # double-buffering (extra VMEM, identical numerics).
        outs = run(False)

    out_flat = outs[0]
    states = [(outs[1 + 2 * l], outs[2 + 2 * l]) for l in range(nlayers)]
    return out_flat, states


# ----------------------------------------------------------------------------
# Scoring head: (T*B, H) @ (H, V) + bias, tiled over (vocab, rows).
# Vocab is the OUTER grid axis so each (H, tv) weight tile is DMA'd once
# (block index unchanged across the inner row steps) — the head is
# weight-streaming bound at realistic V.
# ----------------------------------------------------------------------------
def _head_kernel(x_ref, w_ref, b_ref, o_ref):
    o_ref[...] = (jnp.dot(x_ref[...].astype(jnp.bfloat16), w_ref[...],
                          preferred_element_type=jnp.float32)
                  + b_ref[...])


def scoring_head(x_flat, w, b):
    """x_flat: (N, H) f32; w: (H, V) bf16; b: (1, V) f32  ->  (N, V) f32."""
    N, H = x_flat.shape
    V = w.shape[1]
    tn = N if N <= 256 else 256
    tv = V if V <= 1024 else 1024
    assert N % tn == 0 and V % tv == 0 and tv % 128 == 0
    grid = (V // tv, N // tn)           # vocab outer, rows inner
    return pl.pallas_call(
        _head_kernel,
        out_shape=jax.ShapeDtypeStruct((N, V), jnp.float32),
        grid_spec=pltpu.PrefetchScalarGridSpec(
            num_scalar_prefetch=0,
            grid=grid,
            in_specs=[
                pl.BlockSpec((tn, H), lambda v, i: (i, 0)),
                pl.BlockSpec((H, tv), lambda v, i: (0, v)),   # fetched once/tile
                pl.BlockSpec((1, tv), lambda v, i: (0, v)),
            ],
            out_specs=pl.BlockSpec((tn, tv), lambda v, i: (i, v)),
        ),
        compiler_params=pltpu.CompilerParams(
            dimension_semantics=("parallel", "parallel"),
            vmem_limit_bytes=32 * 1024 * 1024),
    )(x_flat, w, b)


# ----------------------------------------------------------------------------
# Full forward pass (glue in plain JAX: embedding gather, reshapes).
# ----------------------------------------------------------------------------
def language_model_forward(tokens, hidden, params, *, t_chunk=None):
    """tokens: (T, B) int32; hidden: list of (h (1,B,H), c (1,B,H)).
    Returns (logits (T, B, V), new_hidden)."""
    T, B = tokens.shape
    E = params["embedding"].shape[1]
    V = params["scoring_w"].shape[1]
    # TODO(synk): fuse the embedding gather into the stack kernel (scalar
    # prefetch + pl.Element row gather / manual DMA gather) to avoid one HBM
    # round trip of the (T*B, E) activation.
    embed = jnp.take(params["embedding"], tokens, axis=0)        # (T,B,E) bf16
    # TODO(synk): LockedDropout / WeightDrop are stochastic training-time ops;
    # forward here matches eval mode (identity).
    x_flat = embed.reshape(T * B, E)
    out_flat, states = lstm_stack(x_flat, params["rnns"], hidden,
                                  T=T, B=B, t_chunk=t_chunk)
    logits_flat = scoring_head(out_flat, params["scoring_w"], params["scoring_b"])
    new_hidden = [(h[None, ...], c[None, ...]) for (h, c) in states]
    return logits_flat.reshape(T, B, V), new_hidden


# ----------------------------------------------------------------------------
# Pure-JAX reference mirroring the kernel's precision policy
# (bf16 matmul operands / weights, f32 accumulation, f32 elementwise/state).
# ----------------------------------------------------------------------------
def reference_forward(tokens, hidden, params):
    T, B = tokens.shape
    raw = jnp.take(params["embedding"], tokens, axis=0)          # (T,B,E) bf16
    new_hidden = []
    for l, layer in enumerate(params["rnns"]):
        h = hidden[l][0][0]
        c = hidden[l][1][0]
        H = h.shape[-1]
        E_in = layer["w_ih"].shape[0]
        gx = (jnp.dot(raw.reshape(T * B, E_in).astype(jnp.bfloat16),
                      layer["w_ih"],
                      preferred_element_type=jnp.float32)
              + layer["bias"]).reshape(T, B, 4 * H)
        whh = layer["w_hh"]

        def step(carry, g_x, whh=whh, H=H):
            h, c = carry
            g = g_x + jnp.dot(h.astype(jnp.bfloat16), whh,
                              preferred_element_type=jnp.float32)
            i = jax.nn.sigmoid(g[:, :H])
            f = jax.nn.sigmoid(g[:, H:2 * H])
            gg = jnp.tanh(g[:, 2 * H:3 * H])
            o = jax.nn.sigmoid(g[:, 3 * H:])
            c = f * c + i * gg
            h = o * jnp.tanh(c)
            return (h, c), h

        (h, c), outs = jax.lax.scan(step, (h, c), gx)
        new_hidden.append((h[None], c[None]))
        raw = outs                                               # f32
    H = raw.shape[-1]
    logits = (jnp.dot(raw.reshape(T * B, H).astype(jnp.bfloat16),
                      params["scoring_w"],
                      preferred_element_type=jnp.float32)
              + params["scoring_b"][0])
    return logits.reshape(T, B, -1), new_hidden


# ----------------------------------------------------------------------------
# Deterministic parameter init (matches module's __init__ shapes); weights are
# stored bf16 in HBM, biases f32.
# ----------------------------------------------------------------------------
def init_params(key, vocab_size, embed_size, hidden_size, nlayers):
    keys = jax.random.split(key, 2 + 4 * nlayers)
    initrange = 0.1
    emb = jax.random.uniform(keys[0], (vocab_size, embed_size), jnp.float32,
                             -initrange, initrange)
    sw = jax.random.uniform(keys[1], (hidden_size, vocab_size), jnp.float32,
                            -initrange, initrange)
    params = {
        "embedding": emb.astype(jnp.bfloat16),
        "scoring_w": sw.astype(jnp.bfloat16),
        "scoring_b": jnp.zeros((1, vocab_size), jnp.float32),
        "rnns": [],
    }
    k = 1.0 / np.sqrt(hidden_size)
    for l in range(nlayers):
        in_sz = embed_size if l == 0 else hidden_size
        kk = keys[2 + 4 * l: 2 + 4 * (l + 1)]
        w_ih = jax.random.uniform(kk[0], (in_sz, 4 * hidden_size), jnp.float32, -k, k)
        w_hh = jax.random.uniform(kk[1], (hidden_size, 4 * hidden_size), jnp.float32, -k, k)
        b_ih = jax.random.uniform(kk[2], (4 * hidden_size,), jnp.float32, -k, k)
        b_hh = jax.random.uniform(kk[3], (4 * hidden_size,), jnp.float32, -k, k)
        params["rnns"].append({"w_ih": w_ih.astype(jnp.bfloat16),
                               "w_hh": w_hh.astype(jnp.bfloat16),
                               "bias": (b_ih + b_hh)[None, :]})
    return params


if __name__ == "__main__":
    VOCAB, EMBED, HIDDEN, NLAYERS = 256, 128, 128, 2
    T, B = 8, 8

    key = jax.random.PRNGKey(0)
    kp, kx = jax.random.split(key)
    params = init_params(kp, VOCAB, EMBED, HIDDEN, NLAYERS)
    tokens = jax.random.randint(kx, (T, B), 0, VOCAB, dtype=jnp.int32)

    # init_hidden(bsz): zeros of shape (1, B, H) per layer.
    hidden = [(jnp.zeros((1, B, HIDDEN), jnp.float32),
               jnp.zeros((1, B, HIDDEN), jnp.float32)) for _ in range(NLAYERS)]

    # t_chunk=4 -> 2 time chunks: exercises the chunked grid + carried state.
    logits, new_hidden = language_model_forward(tokens, hidden, params, t_chunk=4)
    logits = jax.block_until_ready(logits)

    ref_logits, ref_hidden = reference_forward(tokens, hidden, params)
    np.testing.assert_allclose(np.asarray(logits), np.asarray(ref_logits),
                               rtol=2e-3, atol=2e-3)
    for (h, c), (hr, cr) in zip(new_hidden, ref_hidden):
        np.testing.assert_allclose(np.asarray(h), np.asarray(hr), rtol=2e-3, atol=2e-3)
        np.testing.assert_allclose(np.asarray(c), np.asarray(cr), rtol=2e-3, atol=2e-3)

    print("KERNEL_OK")
</pallas_src>

<mosaic_0001>
module attributes {stable_mosaic.version = 11 : i64} {
  func.func @kernel(%arg0: i32, %arg1: memref<32x128xbf16, #tpu.memory_space<vmem>>, %arg2: memref<128x512xbf16, #tpu.memory_space<vmem>>, %arg3: memref<128x512xbf16, #tpu.memory_space<vmem>>, %arg4: memref<1x512xf32, #tpu.memory_space<vmem>>, %arg5: memref<8x128xf32, #tpu.memory_space<vmem>>, %arg6: memref<8x128xf32, #tpu.memory_space<vmem>>, %arg7: memref<128x512xbf16, #tpu.memory_space<vmem>>, %arg8: memref<128x512xbf16, #tpu.memory_space<vmem>>, %arg9: memref<1x512xf32, #tpu.memory_space<vmem>>, %arg10: memref<8x128xf32, #tpu.memory_space<vmem>>, %arg11: memref<8x128xf32, #tpu.memory_space<vmem>>, %arg12: memref<32x128xf32, #tpu.memory_space<vmem>>, %arg13: memref<8x128xf32, #tpu.memory_space<vmem>>, %arg14: memref<8x128xf32, #tpu.memory_space<vmem>>, %arg15: memref<8x128xf32, #tpu.memory_space<vmem>>, %arg16: memref<8x128xf32, #tpu.memory_space<vmem>>, %arg17: memref<32x512xf32, #tpu.memory_space<vmem>>, %arg18: memref<32x128xf32, #tpu.memory_space<vmem>>, %arg19: memref<2x8x128xf32, #tpu.memory_space<vmem>>, %arg20: memref<2x8x128xf32, #tpu.memory_space<vmem>>) attributes {dimension_semantics = [#tpu.dimension_semantics<arbitrary>], iteration_bounds = array<i64: 2>, scalar_prefetch = 0 : i64, scratch_operands = 4 : i64, tpu.core_type = #tpu.core_type<tc>, window_params = [{transform_indices = @transform_0, window_bounds = array<i64: 32, 128>}, {pipeline_mode = #tpu.pipeline_mode<synchronous>, transform_indices = @transform_1, window_bounds = array<i64: 128, 512>}, {pipeline_mode = #tpu.pipeline_mode<synchronous>, transform_indices = @transform_2, window_bounds = array<i64: 128, 512>}, {pipeline_mode = #tpu.pipeline_mode<synchronous>, transform_indices = @transform_3, window_bounds = array<i64: 1, 512>}, {pipeline_mode = #tpu.pipeline_mode<synchronous>, transform_indices = @transform_4, window_bounds = array<i64: 8, 128>}, {pipeline_mode = #tpu.pipeline_mode<synchronous>, transform_indices = @transform_5, window_bounds = array<i64: 8, 128>}, {pipeline_mode = #tpu.pipeline_mode<synchronous>, transform_indices = @transform_6, window_bounds = array<i64: 128, 512>}, {pipeline_mode = #tpu.pipeline_mode<synchronous>, transform_indices = @transform_7, window_bounds = array<i64: 128, 512>}, {pipeline_mode = #tpu.pipeline_mode<synchronous>, transform_indices = @transform_8, window_bounds = array<i64: 1, 512>}, {pipeline_mode = #tpu.pipeline_mode<synchronous>, transform_indices = @transform_9, window_bounds = array<i64: 8, 128>}, {pipeline_mode = #tpu.pipeline_mode<synchronous>, transform_indices = @transform_10, window_bounds = array<i64: 8, 128>}, {transform_indices = @transform_11, window_bounds = array<i64: 32, 128>}, {pipeline_mode = #tpu.pipeline_mode<synchronous>, transform_indices = @transform_12, window_bounds = array<i64: 8, 128>}, {pipeline_mode = #tpu.pipeline_mode<synchronous>, transform_indices = @transform_13, window_bounds = array<i64: 8, 128>}, {pipeline_mode = #tpu.pipeline_mode<synchronous>, transform_indices = @transform_14, window_bounds = array<i64: 8, 128>}, {pipeline_mode = #tpu.pipeline_mode<synchronous>, transform_indices = @transform_15, window_bounds = array<i64: 8, 128>}]} {
    %c0_i32 = arith.constant 0 : i32
    %0 = arith.cmpi eq, %arg0, %c0_i32 : i32
    %1 = arith.extui %0 : i1 to i32
    %c0_i32_0 = arith.constant 0 : i32
    %2 = arith.cmpi ne, %1, %c0_i32_0 : i32
    scf.if %2 {
      %c0_107 = arith.constant 0 : index
      %c0_108 = arith.constant 0 : index
      %315 = vector.load %arg5[%c0_107, %c0_108] : memref<8x128xf32, #tpu.memory_space<vmem>>, vector<8x128xf32>
      %c0_109 = arith.constant 0 : index
      %c0_110 = arith.constant 0 : index
      %c0_111 = arith.constant 0 : index
      %316 = vector.load %arg19[%c0_109, %c0_110, %c0_111] : memref<2x8x128xf32, #tpu.memory_space<vmem>>, vector<1x8x128xf32>
      %317 = vector.shape_cast %316 : vector<1x8x128xf32> to vector<8x128xf32>
      %318 = vector.shape_cast %315 : vector<8x128xf32> to vector<1x8x128xf32>
      tpu.vector_store %arg19[%c0_109, %c0_110, %c0_111], %318 {strides = array<i32>} : memref<2x8x128xf32, #tpu.memory_space<vmem>>, vector<1x8x128xf32>,
      %c0_112 = arith.constant 0 : index
      %c0_113 = arith.constant 0 : index
      %319 = vector.load %arg6[%c0_112, %c0_113] : memref<8x128xf32, #tpu.memory_space<vmem>>, vector<8x128xf32>
      %c0_114 = arith.constant 0 : index
      %c0_115 = arith.constant 0 : index
      %c0_116 = arith.constant 0 : index
      %320 = vector.load %arg20[%c0_114, %c0_115, %c0_116] : memref<2x8x128xf32, #tpu.memory_space<vmem>>, vector<1x8x128xf32>
      %321 = vector.shape_cast %320 : vector<1x8x128xf32> to vector<8x128xf32>
      %322 = vector.shape_cast %319 : vector<8x128xf32> to vector<1x8x128xf32>
      tpu.vector_store %arg20[%c0_114, %c0_115, %c0_116], %322 {strides = array<i32>} : memref<2x8x128xf32, #tpu.memory_space<vmem>>, vector<1x8x128xf32>,
      %c0_117 = arith.constant 0 : index
      %c0_118 = arith.constant 0 : index
      %323 = vector.load %arg10[%c0_117, %c0_118] : memref<8x128xf32, #tpu.memory_space<vmem>>, vector<8x128xf32>
      %c1_119 = arith.constant 1 : index
      %c0_120 = arith.constant 0 : index
      %c0_121 = arith.constant 0 : index
      %324 = vector.load %arg19[%c1_119, %c0_120, %c0_121] : memref<2x8x128xf32, #tpu.memory_space<vmem>>, vector<1x8x128xf32>
      %325 = vector.shape_cast %324 : vector<1x8x128xf32> to vector<8x128xf32>
      %326 = vector.shape_cast %323 : vector<8x128xf32> to vector<1x8x128xf32>
      tpu.vector_store %arg19[%c1_119, %c0_120, %c0_121], %326 {strides = array<i32>} : memref<2x8x128xf32, #tpu.memory_space<vmem>>, vector<1x8x128xf32>,
      %c0_122 = arith.constant 0 : index
      %c0_123 = arith.constant 0 : index
      %327 = vector.load %arg11[%c0_122, %c0_123] : memref<8x128xf32, #tpu.memory_space<vmem>>, vector<8x128xf32>
      %c1_124 = arith.constant 1 : index
      %c0_125 = arith.constant 0 : index
      %c0_126 = arith.constant 0 : index
      %328 = vector.load %arg20[%c1_124, %c0_125, %c0_126] : memref<2x8x128xf32, #tpu.memory_space<vmem>>, vector<1x8x128xf32>
      %329 = vector.shape_cast %328 : vector<1x8x128xf32> to vector<8x128xf32>
      %330 = vector.shape_cast %327 : vector<8x128xf32> to vector<1x8x128xf32>
      tpu.vector_store %arg20[%c1_124, %c0_125, %c0_126], %330 {strides = array<i32>} : memref<2x8x128xf32, #tpu.memory_space<vmem>>, vector<1x8x128xf32>,
    } else {
    }
    %c0 = arith.constant 0 : index
    %c0_1 = arith.constant 0 : index
    %3 = vector.load %arg1[%c0, %c0_1] : memref<32x128xbf16, #tpu.memory_space<vmem>>, vector<32x128xbf16>
    %c0_2 = arith.constant 0 : index
    %c0_3 = arith.constant 0 : index
    %4 = vector.load %arg2[%c0_2, %c0_3] : memref<128x512xbf16, #tpu.memory_space<vmem>>, vector<128x512xbf16>
    %cst = arith.constant dense<0.000000e+00> : vector<32x512xf32>
    %5 = tpu.matmul %3, %4, %cst {dimension_numbers = #tpu.dot_dimension_numbers<[1], [0], [0], [1], [0, 0, 1, 1], [], []>} : vector<32x128xbf16>, vector<128x512xbf16>, vector<32x512xf32> -> vector<32x512xf32>
    %c0_4 = arith.constant 0 : index
    %c0_5 = arith.constant 0 : index
    %6 = vector.load %arg4[%c0_4, %c0_5] : memref<1x512xf32, #tpu.memory_space<vmem>>, vector<1x512xf32>
    %7 = vector.broadcast %6 : vector<1x512xf32> to vector<32x512xf32>
    %8 = arith.addf %5, %7 : vector<32x512xf32>
    %c0_6 = arith.constant 0 : index
    %c0_7 = arith.constant 0 : index
    %9 = vector.load %arg17[%c0_6, %c0_7] : memref<32x512xf32, #tpu.memory_space<vmem>>, vector<32x512xf32>
    tpu.vector_store %arg17[%c0_6, %c0_7], %8 {strides = array<i32>} : memref<32x512xf32, #tpu.memory_space<vmem>>, vector<32x512xf32>,
    %c0_8 = arith.constant 0 : index
    %c0_9 = arith.constant 0 : index
    %10 = vector.load %arg3[%c0_8, %c0_9] : memref<128x512xbf16, #tpu.memory_space<vmem>>, vector<128x512xbf16>
    %c0_10 = arith.constant 0 : index
    %c0_11 = arith.constant 0 : index
    %c0_12 = arith.constant 0 : index
    %11 = vector.load %arg19[%c0_10, %c0_11, %c0_12] : memref<2x8x128xf32, #tpu.memory_space<vmem>>, vector<1x8x128xf32>
    %12 = vector.shape_cast %11 : vector<1x8x128xf32> to vector<8x128xf32>
    %c0_13 = arith.constant 0 : index
    %c0_14 = arith.constant 0 : index
    %c0_15 = arith.constant 0 : index
    %13 = vector.load %arg20[%c0_13, %c0_14, %c0_15] : memref<2x8x128xf32, #tpu.memory_space<vmem>>, vector<1x8x128xf32>
    %14 = vector.shape_cast %13 : vector<1x8x128xf32> to vector<8x128xf32>
    %c0_i32_16 = arith.constant 0 : i32
    %c8_i32 = arith.constant 8 : i32
    %15 = arith.muli %c0_i32_16, %c8_i32 : i32
    %16 = tpu.assume_multiple %15, 8 : i32
    %17 = arith.index_cast %16 : i32 to index
    %c0_17 = arith.constant 0 : index
    %18 = vector.load %arg17[%17, %c0_17] : memref<32x512xf32, #tpu.memory_space<vmem>>, vector<8x512xf32>
    %19 = arith.truncf %12 : vector<8x128xf32> to vector<8x128xbf16>
    %cst_18 = arith.constant dense<0.000000e+00> : vector<8x512xf32>
    %20 = tpu.matmul %19, %10, %cst_18 {dimension_numbers = #tpu.dot_dimension_numbers<[1], [0], [0], [1], [0, 0, 1, 1], [], []>} : vector<8x128xbf16>, vector<128x512xbf16>, vector<8x512xf32> -> vector<8x512xf32>
    %21 = arith.addf %18, %20 : vector<8x512xf32>
    %22 = vector.extract_strided_slice %21 {offsets = [0, 0], sizes = [8, 128], strides = [1, 1]} : vector<8x512xf32> to vector<8x128xf32>
    %23 = arith.negf %22 : vector<8x128xf32>
    %24 = math.exp %23 : vector<8x128xf32>
    %cst_19 = arith.constant 1.000000e+00 : f32
    %25 = vector.broadcast %cst_19 : f32 to vector<8x128xf32>
    %26 = arith.addf %25, %24 : vector<8x128xf32>
    %27 = arith.divf %25, %26 : vector<8x128xf32>
    %28 = vector.extract_strided_slice %21 {offsets = [0, 128], sizes = [8, 128], strides = [1, 1]} : vector<8x512xf32> to vector<8x128xf32>
    %29 = arith.negf %28 : vector<8x128xf32>
    %30 = math.exp %29 : vector<8x128xf32>
    %cst_20 = arith.constant 1.000000e+00 : f32
    %31 = vector.broadcast %cst_20 : f32 to vector<8x128xf32>
    %32 = arith.addf %31, %30 : vector<8x128xf32>
    %33 = arith.divf %31, %32 : vector<8x128xf32>
    %34 = vector.extract_strided_slice %21 {offsets = [0, 256], sizes = [8, 128], strides = [1, 1]} : vector<8x512xf32> to vector<8x128xf32>
    %35 = math.tanh %34 : vector<8x128xf32>
    %36 = vector.extract_strided_slice %21 {offsets = [0, 384], sizes = [8, 128], strides = [1, 1]} : vector<8x512xf32> to vector<8x128xf32>
    %37 = arith.negf %36 : vector<8x128xf32>
    %38 = math.exp %37 : vector<8x128xf32>
    %cst_21 = arith.constant 1.000000e+00 : f32
    %39 = vector.broadcast %cst_21 : f32 to vector<8x128xf32>
    %40 = arith.addf %39, %38 : vector<8x128xf32>
    %41 = arith.divf %39, %40 : vector<8x128xf32>
    %42 = arith.mulf %33, %14 : vector<8x128xf32>
    %43 = arith.mulf %27, %35 : vector<8x128xf32>
    %44 = arith.addf %42, %43 : vector<8x128xf32>
    %45 = math.tanh %44 : vector<8x128xf32>
    %46 = arith.mulf %41, %45 : vector<8x128xf32>
    %47 = arith.index_cast %16 : i32 to index
    %c0_22 = arith.constant 0 : index
    %48 = vector.load %arg18[%47, %c0_22] : memref<32x128xf32, #tpu.memory_space<vmem>>, vector<8x128xf32>
    tpu.vector_store %arg18[%47, %c0_22], %46 {strides = array<i32>} : memref<32x128xf32, #tpu.memory_space<vmem>>, vector<8x128xf32>,
    %c1_i32 = arith.constant 1 : i32
    %c8_i32_23 = arith.constant 8 : i32
    %49 = arith.muli %c1_i32, %c8_i32_23 : i32
    %50 = tpu.assume_multiple %49, 8 : i32
    %51 = arith.index_cast %50 : i32 to index
    %c0_24 = arith.constant 0 : index
    %52 = vector.load %arg17[%51, %c0_24] : memref<32x512xf32, #tpu.memory_space<vmem>>, vector<8x512xf32>
    %53 = arith.truncf %46 : vector<8x128xf32> to vector<8x128xbf16>
    %cst_25 = arith.constant dense<0.000000e+00> : vector<8x512xf32>
    %54 = tpu.matmul %53, %10, %cst_25 {dimension_numbers = #tpu.dot_dimension_numbers<[1], [0], [0], [1], [0, 0, 1, 1], [], []>} : vector<8x128xbf16>, vector<128x512xbf16>, vector<8x512xf32> -> vector<8x512xf32>
    %55 = arith.addf %52, %54 : vector<8x512xf32>
    %56 = vector.extract_strided_slice %55 {offsets = [0, 0], sizes = [8, 128], strides = [1, 1]} : vector<8x512xf32> to vector<8x128xf32>
    %57 = arith.negf %56 : vector<8x128xf32>
    %58 = math.exp %57 : vector<8x128xf32>
    %cst_26 = arith.constant 1.000000e+00 : f32
    %59 = vector.broadcast %cst_26 : f32 to vector<8x128xf32>
    %60 = arith.addf %59, %58 : vector<8x128xf32>
    %61 = arith.divf %59, %60 : vector<8x128xf32>
    %62 = vector.extract_strided_slice %55 {offsets = [0, 128], sizes = [8, 128], strides = [1, 1]} : vector<8x512xf32> to vector<8x128xf32>
    %63 = arith.negf %62 : vector<8x128xf32>
    %64 = math.exp %63 : vector<8x128xf32>
    %cst_27 = arith.constant 1.000000e+00 : f32
    %65 = vector.broadcast %cst_27 : f32 to vector<8x128xf32>
    %66 = arith.addf %65, %64 : vector<8x128xf32>
    %67 = arith.divf %65, %66 : vector<8x128xf32>
    %68 = vector.extract_strided_slice %55 {offsets = [0, 256], sizes = [8, 128], strides = [1, 1]} : vector<8x512xf32> to vector<8x128xf32>
    %69 = math.tanh %68 : vector<8x128xf32>
    %70 = vector.extract_strided_slice %55 {offsets = [0, 384], sizes = [8, 128], strides = [1, 1]} : vector<8x512xf32> to vector<8x128xf32>
    %71 = arith.negf %70 : vector<8x128xf32>
    %72 = math.exp %71 : vector<8x128xf32>
    %cst_28 = arith.constant 1.000000e+00 : f32
    %73 = vector.broadcast %cst_28 : f32 to vector<8x128xf32>
    %74 = arith.addf %73, %72 : vector<8x128xf32>
    %75 = arith.divf %73, %74 : vector<8x128xf32>
    %76 = arith.mulf %67, %44 : vector<8x128xf32>
    %77 = arith.mulf %61, %69 : vector<8x128xf32>
    %78 = arith.addf %76, %77 : vector<8x128xf32>
    %79 = math.tanh %78 : vector<8x128xf32>
    %80 = arith.mulf %75, %79 : vector<8x128xf32>
    %81 = arith.index_cast %50 : i32 to index
    %c0_29 = arith.constant 0 : index
    %82 = vector.load %arg18[%81, %c0_29] : memref<32x128xf32, #tpu.memory_space<vmem>>, vector<8x128xf32>
    tpu.vector_store %arg18[%81, %c0_29], %80 {strides = array<i32>} : memref<32x128xf32, #tpu.memory_space<vmem>>, vector<8x128xf32>,
    %c2_i32 = arith.constant 2 : i32
    %c8_i32_30 = arith.constant 8 : i32
    %83 = arith.muli %c2_i32, %c8_i32_30 : i32
    %84 = tpu.assume_multiple %83, 8 : i32
    %85 = arith.index_cast %84 : i32 to index
    %c0_31 = arith.constant 0 : index
    %86 = vector.load %arg17[%85, %c0_31] : memref<32x512xf32, #tpu.memory_space<vmem>>, vector<8x512xf32>
    %87 = arith.truncf %80 : vector<8x128xf32> to vector<8x128xbf16>
    %cst_32 = arith.constant dense<0.000000e+00> : vector<8x512xf32>
    %88 = tpu.matmul %87, %10, %cst_32 {dimension_numbers = #tpu.dot_dimension_numbers<[1], [0], [0], [1], [0, 0, 1, 1], [], []>} : vector<8x128xbf16>, vector<128x512xbf16>, vector<8x512xf32> -> vector<8x512xf32>
    %89 = arith.addf %86, %88 : vector<8x512xf32>
    %90 = vector.extract_strided_slice %89 {offsets = [0, 0], sizes = [8, 128], strides = [1, 1]} : vector<8x512xf32> to vector<8x128xf32>
    %91 = arith.negf %90 : vector<8x128xf32>
    %92 = math.exp %91 : vector<8x128xf32>
    %cst_33 = arith.constant 1.000000e+00 : f32
    %93 = vector.broadcast %cst_33 : f32 to vector<8x128xf32>
    %94 = arith.addf %93, %92 : vector<8x128xf32>
    %95 = arith.divf %93, %94 : vector<8x128xf32>
    %96 = vector.extract_strided_slice %89 {offsets = [0, 128], sizes = [8, 128], strides = [1, 1]} : vector<8x512xf32> to vector<8x128xf32>
    %97 = arith.negf %96 : vector<8x128xf32>
    %98 = math.exp %97 : vector<8x128xf32>
    %cst_34 = arith.constant 1.000000e+00 : f32
    %99 = vector.broadcast %cst_34 : f32 to vector<8x128xf32>
    %100 = arith.addf %99, %98 : vector<8x128xf32>
    %101 = arith.divf %99, %100 : vector<8x128xf32>
    %102 = vector.extract_strided_slice %89 {offsets = [0, 256], sizes = [8, 128], strides = [1, 1]} : vector<8x512xf32> to vector<8x128xf32>
    %103 = math.tanh %102 : vector<8x128xf32>
    %104 = vector.extract_strided_slice %89 {offsets = [0, 384], sizes = [8, 128], strides = [1, 1]} : vector<8x512xf32> to vector<8x128xf32>
    %105 = arith.negf %104 : vector<8x128xf32>
    %106 = math.exp %105 : vector<8x128xf32>
    %cst_35 = arith.constant 1.000000e+00 : f32
    %107 = vector.broadcast %cst_35 : f32 to vector<8x128xf32>
    %108 = arith.addf %107, %106 : vector<8x128xf32>
    %109 = arith.divf %107, %108 : vector<8x128xf32>
    %110 = arith.mulf %101, %78 : vector<8x128xf32>
    %111 = arith.mulf %95, %103 : vector<8x128xf32>
    %112 = arith.addf %110, %111 : vector<8x128xf32>
    %113 = math.tanh %112 : vector<8x128xf32>
    %114 = arith.mulf %109, %113 : vector<8x128xf32>
    %115 = arith.index_cast %84 : i32 to index
    %c0_36 = arith.constant 0 : index
    %116 = vector.load %arg18[%115, %c0_36] : memref<32x128xf32, #tpu.memory_space<vmem>>, vector<8x128xf32>
    tpu.vector_store %arg18[%115, %c0_36], %114 {strides = array<i32>} : memref<32x128xf32, #tpu.memory_space<vmem>>, vector<8x128xf32>,
    %c3_i32 = arith.constant 3 : i32
    %c8_i32_37 = arith.constant 8 : i32
    %117 = arith.muli %c3_i32, %c8_i32_37 : i32
    %118 = tpu.assume_multiple %117, 8 : i32
    %119 = arith.index_cast %118 : i32 to index
    %c0_38 = arith.constant 0 : index
    %120 = vector.load %arg17[%119, %c0_38] : memref<32x512xf32, #tpu.memory_space<vmem>>, vector<8x512xf32>
    %121 = arith.truncf %114 : vector<8x128xf32> to vector<8x128xbf16>
    %cst_39 = arith.constant dense<0.000000e+00> : vector<8x512xf32>
    %122 = tpu.matmul %121, %10, %cst_39 {dimension_numbers = #tpu.dot_dimension_numbers<[1], [0], [0], [1], [0, 0, 1, 1], [], []>} : vector<8x128xbf16>, vector<128x512xbf16>, vector<8x512xf32> -> vector<8x512xf32>
    %123 = arith.addf %120, %122 : vector<8x512xf32>
    %124 = vector.extract_strided_slice %123 {offsets = [0, 0], sizes = [8, 128], strides = [1, 1]} : vector<8x512xf32> to vector<8x128xf32>
    %125 = arith.negf %124 : vector<8x128xf32>
    %126 = math.exp %125 : vector<8x128xf32>
    %cst_40 = arith.constant 1.000000e+00 : f32
    %127 = vector.broadcast %cst_40 : f32 to vector<8x128xf32>
    %128 = arith.addf %127, %126 : vector<8x128xf32>
    %129 = arith.divf %127, %128 : vector<8x128xf32>
    %130 = vector.extract_strided_slice %123 {offsets = [0, 128], sizes = [8, 128], strides = [1, 1]} : vector<8x512xf32> to vector<8x128xf32>
    %131 = arith.negf %130 : vector<8x128xf32>
    %132 = math.exp %131 : vector<8x128xf32>
    %cst_41 = arith.constant 1.000000e+00 : f32
    %133 = vector.broadcast %cst_41 : f32 to vector<8x128xf32>
    %134 = arith.addf %133, %132 : vector<8x128xf32>
    %135 = arith.divf %133, %134 : vector<8x128xf32>
    %136 = vector.extract_strided_slice %123 {offsets = [0, 256], sizes = [8, 128], strides = [1, 1]} : vector<8x512xf32> to vector<8x128xf32>
    %137 = math.tanh %136 : vector<8x128xf32>
    %138 = vector.extract_strided_slice %123 {offsets = [0, 384], sizes = [8, 128], strides = [1, 1]} : vector<8x512xf32> to vector<8x128xf32>
    %139 = arith.negf %138 : vector<8x128xf32>
    %140 = math.exp %139 : vector<8x128xf32>
    %cst_42 = arith.constant 1.000000e+00 : f32
    %141 = vector.broadcast %cst_42 : f32 to vector<8x128xf32>
    %142 = arith.addf %141, %140 : vector<8x128xf32>
    %143 = arith.divf %141, %142 : vector<8x128xf32>
    %144 = arith.mulf %135, %112 : vector<8x128xf32>
    %145 = arith.mulf %129, %137 : vector<8x128xf32>
    %146 = arith.addf %144, %145 : vector<8x128xf32>
    %147 = math.tanh %146 : vector<8x128xf32>
    %148 = arith.mulf %143, %147 : vector<8x128xf32>
    %149 = arith.index_cast %118 : i32 to index
    %c0_43 = arith.constant 0 : index
    %150 = vector.load %arg18[%149, %c0_43] : memref<32x128xf32, #tpu.memory_space<vmem>>, vector<8x128xf32>
    tpu.vector_store %arg18[%149, %c0_43], %148 {strides = array<i32>} : memref<32x128xf32, #tpu.memory_space<vmem>>, vector<8x128xf32>,
    %c4_i32 = arith.constant 4 : i32
    %c0_44 = arith.constant 0 : index
    %c0_45 = arith.constant 0 : index
    %c0_46 = arith.constant 0 : index
    %151 = vector.load %arg19[%c0_44, %c0_45, %c0_46] : memref<2x8x128xf32, #tpu.memory_space<vmem>>, vector<1x8x128xf32>
    %152 = vector.shape_cast %151 : vector<1x8x128xf32> to vector<8x128xf32>
    %153 = vector.shape_cast %148 : vector<8x128xf32> to vector<1x8x128xf32>
    tpu.vector_store %arg19[%c0_44, %c0_45, %c0_46], %153 {strides = array<i32>} : memref<2x8x128xf32, #tpu.memory_space<vmem>>, vector<1x8x128xf32>,
    %c0_47 = arith.constant 0 : index
    %c0_48 = arith.constant 0 : index
    %c0_49 = arith.constant 0 : index
    %154 = vector.load %arg20[%c0_47, %c0_48, %c0_49] : memref<2x8x128xf32, #tpu.memory_space<vmem>>, vector<1x8x128xf32>
    %155 = vector.shape_cast %154 : vector<1x8x128xf32> to vector<8x128xf32>
    %156 = vector.shape_cast %146 : vector<8x128xf32> to vector<1x8x128xf32>
    tpu.vector_store %arg20[%c0_47, %c0_48, %c0_49], %156 {strides = array<i32>} : memref<2x8x128xf32, #tpu.memory_space<vmem>>, vector<1x8x128xf32>,
    %c0_50 = arith.constant 0 : index
    %c0_51 = arith.constant 0 : index
    %157 = vector.load %arg18[%c0_50, %c0_51] : memref<32x128xf32, #tpu.memory_space<vmem>>, vector<32x128xf32>
    %158 = arith.truncf %157 : vector<32x128xf32> to vector<32x128xbf16>
    %c0_52 = arith.constant 0 : index
    %c0_53 = arith.constant 0 : index
    %159 = vector.load %arg7[%c0_52, %c0_53] : memref<128x512xbf16, #tpu.memory_space<vmem>>, vector<128x512xbf16>
    %cst_54 = arith.constant dense<0.000000e+00> : vector<32x512xf32>
    %160 = tpu.matmul %158, %159, %cst_54 {dimension_numbers = #tpu.dot_dimension_numbers<[1], [0], [0], [1], [0, 0, 1, 1], [], []>} : vector<32x128xbf16>, vector<128x512xbf16>, vector<32x512xf32> -> vector<32x512xf32>
    %c0_55 = arith.constant 0 : index
    %c0_56 = arith.constant 0 : index
    %161 = vector.load %arg9[%c0_55, %c0_56] : memref<1x512xf32, #tpu.memory_space<vmem>>, vector<1x512xf32>
    %162 = vector.broadcast %161 : vector<1x512xf32> to vector<32x512xf32>
    %163 = arith.addf %160, %162 : vector<32x512xf32>
    %c0_57 = arith.constant 0 : index
    %c0_58 = arith.constant 0 : index
    %164 = vector.load %arg17[%c0_57, %c0_58] : memref<32x512xf32, #tpu.memory_space<vmem>>, vector<32x512xf32>
    tpu.vector_store %arg17[%c0_57, %c0_58], %163 {strides = array<i32>} : memref<32x512xf32, #tpu.memory_space<vmem>>, vector<32x512xf32>,
    %c0_59 = arith.constant 0 : index
    %c0_60 = arith.constant 0 : index
    %165 = vector.load %arg8[%c0_59, %c0_60] : memref<128x512xbf16, #tpu.memory_space<vmem>>, vector<128x512xbf16>
    %c1 = arith.constant 1 : index
    %c0_61 = arith.constant 0 : index
    %c0_62 = arith.constant 0 : index
    %166 = vector.load %arg19[%c1, %c0_61, %c0_62] : memref<2x8x128xf32, #tpu.memory_space<vmem>>, vector<1x8x128xf32>
    %167 = vector.shape_cast %166 : vector<1x8x128xf32> to vector<8x128xf32>
    %c1_63 = arith.constant 1 : index
    %c0_64 = arith.constant 0 : index
    %c0_65 = arith.constant 0 : index
    %168 = vector.load %arg20[%c1_63, %c0_64, %c0_65] : memref<2x8x128xf32, #tpu.memory_space<vmem>>, vector<1x8x128xf32>
    %169 = vector.shape_cast %168 : vector<1x8x128xf32> to vector<8x128xf32>
    %c0_i32_66 = arith.constant 0 : i32
    %c8_i32_67 = arith.constant 8 : i32
    %170 = arith.muli %c0_i32_66, %c8_i32_67 : i32
    %171 = tpu.assume_multiple %170, 8 : i32
    %172 = arith.index_cast %171 : i32 to index
    %c0_68 = arith.constant 0 : index
    %173 = vector.load %arg17[%172, %c0_68] : memref<32x512xf32, #tpu.memory_space<vmem>>, vector<8x512xf32>
    %174 = arith.truncf %167 : vector<8x128xf32> to vector<8x128xbf16>
    %cst_69 = arith.constant dense<0.000000e+00> : vector<8x512xf32>
    %175 = tpu.matmul %174, %165, %cst_69 {dimension_numbers = #tpu.dot_dimension_numbers<[1], [0], [0], [1], [0, 0, 1, 1], [], []>} : vector<8x128xbf16>, vector<128x512xbf16>, vector<8x512xf32> -> vector<8x512xf32>
    %176 = arith.addf %173, %175 : vector<8x512xf32>
    %177 = vector.extract_strided_slice %176 {offsets = [0, 0], sizes = [8, 128], strides = [1, 1]} : vector<8x512xf32> to vector<8x128xf32>
    %178 = arith.negf %177 : vector<8x128xf32>
    %179 = math.exp %178 : vector<8x128xf32>
    %cst_70 = arith.constant 1.000000e+00 : f32
    %180 = vector.broadcast %cst_70 : f32 to vector<8x128xf32>
    %181 = arith.addf %180, %179 : vector<8x128xf32>
    %182 = arith.divf %180, %181 : vector<8x128xf32>
    %183 = vector.extract_strided_slice %176 {offsets = [0, 128], sizes = [8, 128], strides = [1, 1]} : vector<8x512xf32> to vector<8x128xf32>
    %184 = arith.negf %183 : vector<8x128xf32>
    %185 = math.exp %184 : vector<8x128xf32>
    %cst_71 = arith.constant 1.000000e+00 : f32
    %186 = vector.broadcast %cst_71 : f32 to vector<8x128xf32>
    %187 = arith.addf %186, %185 : vector<8x128xf32>
    %188 = arith.divf %186, %187 : vector<8x128xf32>
    %189 = vector.extract_strided_slice %176 {offsets = [0, 256], sizes = [8, 128], strides = [1, 1]} : vector<8x512xf32> to vector<8x128xf32>
    %190 = math.tanh %189 : vector<8x128xf32>
    %191 = vector.extract_strided_slice %176 {offsets = [0, 384], sizes = [8, 128], strides = [1, 1]} : vector<8x512xf32> to vector<8x128xf32>
    %192 = arith.negf %191 : vector<8x128xf32>
    %193 = math.exp %192 : vector<8x128xf32>
    %cst_72 = arith.constant 1.000000e+00 : f32
    %194 = vector.broadcast %cst_72 : f32 to vector<8x128xf32>
    %195 = arith.addf %194, %193 : vector<8x128xf32>
    %196 = arith.divf %194, %195 : vector<8x128xf32>
    %197 = arith.mulf %188, %169 : vector<8x128xf32>
    %198 = arith.mulf %182, %190 : vector<8x128xf32>
    %199 = arith.addf %197, %198 : vector<8x128xf32>
    %200 = math.tanh %199 : vector<8x128xf32>
    %201 = arith.mulf %196, %200 : vector<8x128xf32>
    %202 = arith.index_cast %171 : i32 to index
    %c0_73 = arith.constant 0 : index
    %203 = vector.load %arg12[%202, %c0_73] : memref<32x128xf32, #tpu.memory_space<vmem>>, vector<8x128xf32>
    tpu.vector_store %arg12[%202, %c0_73], %201 {strides = array<i32>} : memref<32x128xf32, #tpu.memory_space<vmem>>, vector<8x128xf32>,
    %c1_i32_74 = arith.constant 1 : i32
    %c8_i32_75 = arith.constant 8 : i32
    %204 = arith.muli %c1_i32_74, %c8_i32_75 : i32
    %205 = tpu.assume_multiple %204, 8 : i32
    %206 = arith.index_cast %205 : i32 to index
    %c0_76 = arith.constant 0 : index
    %207 = vector.load %arg17[%206, %c0_76] : memref<32x512xf32, #tpu.memory_space<vmem>>, vector<8x512xf32>
    %208 = arith.truncf %201 : vector<8x128xf32> to vector<8x128xbf16>
    %cst_77 = arith.constant dense<0.000000e+00> : vector<8x512xf32>
    %209 = tpu.matmul %208, %165, %cst_77 {dimension_numbers = #tpu.dot_dimension_numbers<[1], [0], [0], [1], [0, 0, 1, 1], [], []>} : vector<8x128xbf16>, vector<128x512xbf16>, vector<8x512xf32> -> vector<8x512xf32>
    %210 = arith.addf %207, %209 : vector<8x512xf32>
    %211 = vector.extract_strided_slice %210 {offsets = [0, 0], sizes = [8, 128], strides = [1, 1]} : vector<8x512xf32> to vector<8x128xf32>
    %212 = arith.negf %211 : vector<8x128xf32>
    %213 = math.exp %212 : vector<8x128xf32>
    %cst_78 = arith.constant 1.000000e+00 : f32
    %214 = vector.broadcast %cst_78 : f32 to vector<8x128xf32>
    %215 = arith.addf %214, %213 : vector<8x128xf32>
    %216 = arith.divf %214, %215 : vector<8x128xf32>
    %217 = vector.extract_strided_slice %210 {offsets = [0, 128], sizes = [8, 128], strides = [1, 1]} : vector<8x512xf32> to vector<8x128xf32>
    %218 = arith.negf %217 : vector<8x128xf32>
    %219 = math.exp %218 : vector<8x128xf32>
    %cst_79 = arith.constant 1.000000e+00 : f32
    %220 = vector.broadcast %cst_79 : f32 to vector<8x128xf32>
    %221 = arith.addf %220, %219 : vector<8x128xf32>
    %222 = arith.divf %220, %221 : vector<8x128xf32>
    %223 = vector.extract_strided_slice %210 {offsets = [0, 256], sizes = [8, 128], strides = [1, 1]} : vector<8x512xf32> to vector<8x128xf32>
    %224 = math.tanh %223 : vector<8x128xf32>
    %225 = vector.extract_strided_slice %210 {offsets = [0, 384], sizes = [8, 128], strides = [1, 1]} : vector<8x512xf32> to vector<8x128xf32>
    %226 = arith.negf %225 : vector<8x128xf32>
    %227 = math.exp %226 : vector<8x128xf32>
    %cst_80 = arith.constant 1.000000e+00 : f32
    %228 = vector.broadcast %cst_80 : f32 to vector<8x128xf32>
    %229 = arith.addf %228, %227 : vector<8x128xf32>
    %230 = arith.divf %228, %229 : vector<8x128xf32>
    %231 = arith.mulf %222, %199 : vector<8x128xf32>
    %232 = arith.mulf %216, %224 : vector<8x128xf32>
    %233 = arith.addf %231, %232 : vector<8x128xf32>
    %234 = math.tanh %233 : vector<8x128xf32>
    %235 = arith.mulf %230, %234 : vector<8x128xf32>
    %236 = arith.index_cast %205 : i32 to index
    %c0_81 = arith.constant 0 : index
    %237 = vector.load %arg12[%236, %c0_81] : memref<32x128xf32, #tpu.memory_space<vmem>>, vector<8x128xf32>
    tpu.vector_store %arg12[%236, %c0_81], %235 {strides = array<i32>} : memref<32x128xf32, #tpu.memory_space<vmem>>, vector<8x128xf32>,
    %c2_i32_82 = arith.constant 2 : i32
    %c8_i32_83 = arith.constant 8 : i32
    %238 = arith.muli %c2_i32_82, %c8_i32_83 : i32
    %239 = tpu.assume_multiple %238, 8 : i32
    %240 = arith.index_cast %239 : i32 to index
    %c0_84 = arith.constant 0 : index
    %241 = vector.load %arg17[%240, %c0_84] : memref<32x512xf32, #tpu.memory_space<vmem>>, vector<8x512xf32>
    %242 = arith.truncf %235 : vector<8x128xf32> to vector<8x128xbf16>
    %cst_85 = arith.constant dense<0.000000e+00> : vector<8x512xf32>
    %243 = tpu.matmul %242, %165, %cst_85 {dimension_numbers = #tpu.dot_dimension_numbers<[1], [0], [0], [1], [0, 0, 1, 1], [], []>} : vector<8x128xbf16>, vector<128x512xbf16>, vector<8x512xf32> -> vector<8x512xf32>
    %244 = arith.addf %241, %243 : vector<8x512xf32>
    %245 = vector.extract_strided_slice %244 {offsets = [0, 0], sizes = [8, 128], strides = [1, 1]} : vector<8x512xf32> to vector<8x128xf32>
    %246 = arith.negf %245 : vector<8x128xf32>
    %247 = math.exp %246 : vector<8x128xf32>
    %cst_86 = arith.constant 1.000000e+00 : f32
    %248 = vector.broadcast %cst_86 : f32 to vector<8x128xf32>
    %249 = arith.addf %248, %247 : vector<8x128xf32>
    %250 = arith.divf %248, %249 : vector<8x128xf32>
    %251 = vector.extract_strided_slice %244 {offsets = [0, 128], sizes = [8, 128], strides = [1, 1]} : vector<8x512xf32> to vector<8x128xf32>
    %252 = arith.negf %251 : vector<8x128xf32>
    %253 = math.exp %252 : vector<8x128xf32>
    %cst_87 = arith.constant 1.000000e+00 : f32
    %254 = vector.broadcast %cst_87 : f32 to vector<8x128xf32>
    %255 = arith.addf %254, %253 : vector<8x128xf32>
    %256 = arith.divf %254, %255 : vector<8x128xf32>
    %257 = vector.extract_strided_slice %244 {offsets = [0, 256], sizes = [8, 128], strides = [1, 1]} : vector<8x512xf32> to vector<8x128xf32>
    %258 = math.tanh %257 : vector<8x128xf32>
    %259 = vector.extract_strided_slice %244 {offsets = [0, 384], sizes = [8, 128], strides = [1, 1]} : vector<8x512xf32> to vector<8x128xf32>
    %260 = arith.negf %259 : vector<8x128xf32>
    %261 = math.exp %260 : vector<8x128xf32>
    %cst_88 = arith.constant 1.000000e+00 : f32
    %262 = vector.broadcast %cst_88 : f32 to vector<8x128xf32>
    %263 = arith.addf %262, %261 : vector<8x128xf32>
    %264 = arith.divf %262, %263 : vector<8x128xf32>
    %265 = arith.mulf %256, %233 : vector<8x128xf32>
    %266 = arith.mulf %250, %258 : vector<8x128xf32>
    %267 = arith.addf %265, %266 : vector<8x128xf32>
    %268 = math.tanh %267 : vector<8x128xf32>
    %269 = arith.mulf %264, %268 : vector<8x128xf32>
    %270 = arith.index_cast %239 : i32 to index
    %c0_89 = arith.constant 0 : index
    %271 = vector.load %arg12[%270, %c0_89] : memref<32x128xf32, #tpu.memory_space<vmem>>, vector<8x128xf32>
    tpu.vector_store %arg12[%270, %c0_89], %269 {strides = array<i32>} : memref<32x128xf32, #tpu.memory_space<vmem>>, vector<8x128xf32>,
    %c3_i32_90 = arith.constant 3 : i32
    %c8_i32_91 = arith.constant 8 : i32
    %272 = arith.muli %c3_i32_90, %c8_i32_91 : i32
    %273 = tpu.assume_multiple %272, 8 : i32
    %274 = arith.index_cast %273 : i32 to index
    %c0_92 = arith.constant 0 : index
    %275 = vector.load %arg17[%274, %c0_92] : memref<32x512xf32, #tpu.memory_space<vmem>>, vector<8x512xf32>
    %276 = arith.truncf %269 : vector<8x128xf32> to vector<8x128xbf16>
    %cst_93 = arith.constant dense<0.000000e+00> : vector<8x512xf32>
    %277 = tpu.matmul %276, %165, %cst_93 {dimension_numbers = #tpu.dot_dimension_numbers<[1], [0], [0], [1], [0, 0, 1, 1], [], []>} : vector<8x128xbf16>, vector<128x512xbf16>, vector<8x512xf32> -> vector<8x512xf32>
    %278 = arith.addf %275, %277 : vector<8x512xf32>
    %279 = vector.extract_strided_slice %278 {offsets = [0, 0], sizes = [8, 128], strides = [1, 1]} : vector<8x512xf32> to vector<8x128xf32>
    %280 = arith.negf %279 : vector<8x128xf32>
    %281 = math.exp %280 : vector<8x128xf32>
    %cst_94 = arith.constant 1.000000e+00 : f32
    %282 = vector.broadcast %cst_94 : f32 to vector<8x128xf32>
    %283 = arith.addf %282, %281 : vector<8x128xf32>
    %284 = arith.divf %282, %283 : vector<8x128xf32>
    %285 = vector.extract_strided_slice %278 {offsets = [0, 128], sizes = [8, 128], strides = [1, 1]} : vector<8x512xf32> to vector<8x128xf32>
    %286 = arith.negf %285 : vector<8x128xf32>
    %287 = math.exp %286 : vector<8x128xf32>
    %cst_95 = arith.constant 1.000000e+00 : f32
    %288 = vector.broadcast %cst_95 : f32 to vector<8x128xf32>
    %289 = arith.addf %288, %287 : vector<8x128xf32>
    %290 = arith.divf %288, %289 : vector<8x128xf32>
    %291 = vector.extract_strided_slice %278 {offsets = [0, 256], sizes = [8, 128], strides = [1, 1]} : vector<8x512xf32> to vector<8x128xf32>
    %292 = math.tanh %291 : vector<8x128xf32>
    %293 = vector.extract_strided_slice %278 {offsets = [0, 384], sizes = [8, 128], strides = [1, 1]} : vector<8x512xf32> to vector<8x128xf32>
    %294 = arith.negf %293 : vector<8x128xf32>
    %295 = math.exp %294 : vector<8x128xf32>
    %cst_96 = arith.constant 1.000000e+00 : f32
    %296 = vector.broadcast %cst_96 : f32 to vector<8x128xf32>
    %297 = arith.addf %296, %295 : vector<8x128xf32>
    %298 = arith.divf %296, %297 : vector<8x128xf32>
    %299 = arith.mulf %290, %267 : vector<8x128xf32>
    %300 = arith.mulf %284, %292 : vector<8x128xf32>
    %301 = arith.addf %299, %300 : vector<8x128xf32>
    %302 = math.tanh %301 : vector<8x128xf32>
    %303 = arith.mulf %298, %302 : vector<8x128xf32>
    %304 = arith.index_cast %273 : i32 to index
    %c0_97 = arith.constant 0 : index
    %305 = vector.load %arg12[%304, %c0_97] : memref<32x128xf32, #tpu.memory_space<vmem>>, vector<8x128xf32>
    tpu.vector_store %arg12[%304, %c0_97], %303 {strides = array<i32>} : memref<32x128xf32, #tpu.memory_space<vmem>>, vector<8x128xf32>,
    %c4_i32_98 = arith.constant 4 : i32
    %c1_99 = arith.constant 1 : index
    %c0_100 = arith.constant 0 : index
    %c0_101 = arith.constant 0 : index
    %306 = vector.load %arg19[%c1_99, %c0_100, %c0_101] : memref<2x8x128xf32, #tpu.memory_space<vmem>>, vector<1x8x128xf32>
    %307 = vector.shape_cast %306 : vector<1x8x128xf32> to vector<8x128xf32>
    %308 = vector.shape_cast %303 : vector<8x128xf32> to vector<1x8x128xf32>
    tpu.vector_store %arg19[%c1_99, %c0_100, %c0_101], %308 {strides = array<i32>} : memref<2x8x128xf32, #tpu.memory_space<vmem>>, vector<1x8x128xf32>,
    %c1_102 = arith.constant 1 : index
    %c0_103 = arith.constant 0 : index
    %c0_104 = arith.constant 0 : index
    %309 = vector.load %arg20[%c1_102, %c0_103, %c0_104] : memref<2x8x128xf32, #tpu.memory_space<vmem>>, vector<1x8x128xf32>
    %310 = vector.shape_cast %309 : vector<1x8x128xf32> to vector<8x128xf32>
    %311 = vector.shape_cast %301 : vector<8x128xf32> to vector<1x8x128xf32>
    tpu.vector_store %arg20[%c1_102, %c0_103, %c0_104], %311 {strides = array<i32>} : memref<2x8x128xf32, #tpu.memory_space<vmem>>, vector<1x8x128xf32>,
    %c1_i32_105 = arith.constant 1 : i32
    %312 = arith.cmpi eq, %arg0, %c1_i32_105 : i32
    %313 = arith.extui %312 : i1 to i32
    %c0_i32_106 = arith.constant 0 : i32
    %314 = arith.cmpi ne, %313, %c0_i32_106 : i32
    scf.if %314 {
      %c0_107 = arith.constant 0 : index
      %c0_108 = arith.constant 0 : index
      %c0_109 = arith.constant 0 : index
      %315 = vector.load %arg19[%c0_107, %c0_108, %c0_109] : memref<2x8x128xf32, #tpu.memory_space<vmem>>, vector<1x8x128xf32>
      %316 = vector.shape_cast %315 : vector<1x8x128xf32> to vector<8x128xf32>
      %c0_110 = arith.constant 0 : index
      %c0_111 = arith.constant 0 : index
      %317 = vector.load %arg13[%c0_110, %c0_111] : memref<8x128xf32, #tpu.memory_space<vmem>>, vector<8x128xf32>
      tpu.vector_store %arg13[%c0_110, %c0_111], %316 {strides = array<i32>} : memref<8x128xf32, #tpu.memory_space<vmem>>, vector<8x128xf32>,
      %c0_112 = arith.constant 0 : index
      %c0_113 = arith.constant 0 : index
      %c0_114 = arith.constant 0 : index
      %318 = vector.load %arg20[%c0_112, %c0_113, %c0_114] : memref<2x8x128xf32, #tpu.memory_space<vmem>>, vector<1x8x128xf32>
      %319 = vector.shape_cast %318 : vector<1x8x128xf32> to vector<8x128xf32>
      %c0_115 = arith.constant 0 : index
      %c0_116 = arith.constant 0 : index
      %320 = vector.load %arg14[%c0_115, %c0_116] : memref<8x128xf32, #tpu.memory_space<vmem>>, vector<8x128xf32>
      tpu.vector_store %arg14[%c0_115, %c0_116], %319 {strides = array<i32>} : memref<8x128xf32, #tpu.memory_space<vmem>>, vector<8x128xf32>,
      %c1_117 = arith.constant 1 : index
      %c0_118 = arith.constant 0 : index
      %c0_119 = arith.constant 0 : index
      %321 = vector.load %arg19[%c1_117, %c0_118, %c0_119] : memref<2x8x128xf32, #tpu.memory_space<vmem>>, vector<1x8x128xf32>
      %322 = vector.shape_cast %321 : vector<1x8x128xf32> to vector<8x128xf32>
      %c0_120 = arith.constant 0 : index
      %c0_121 = arith.constant 0 : index
      %323 = vector.load %arg15[%c0_120, %c0_121] : memref<8x128xf32, #tpu.memory_space<vmem>>, vector<8x128xf32>
      tpu.vector_store %arg15[%c0_120, %c0_121], %322 {strides = array<i32>} : memref<8x128xf32, #tpu.memory_space<vmem>>, vector<8x128xf32>,
      %c1_122 = arith.constant 1 : index
      %c0_123 = arith.constant 0 : index
      %c0_124 = arith.constant 0 : index
      %324 = vector.load %arg20[%c1_122, %c0_123, %c0_124] : memref<2x8x128xf32, #tpu.memory_space<vmem>>, vector<1x8x128xf32>
      %325 = vector.shape_cast %324 : vector<1x8x128xf32> to vector<8x128xf32>
      %c0_125 = arith.constant 0 : index
      %c0_126 = arith.constant 0 : index
      %326 = vector.load %arg16[%c0_125, %c0_126] : memref<8x128xf32, #tpu.memory_space<vmem>>, vector<8x128xf32>
      tpu.vector_store %arg16[%c0_125, %c0_126], %325 {strides = array<i32>} : memref<8x128xf32, #tpu.memory_space<vmem>>, vector<8x128xf32>,
    } else {
    }
    return
  }
  func.func @transform_0(%arg0: i32) -> (i32, i32) {
    %c0_i32 = arith.constant 0 : i32
    %c0_i32_0 = arith.constant 0 : i32
    return %arg0, %c0_i32 : i32, i32
  }
  func.func @transform_1(%arg0: i32) -> (i32, i32) {
    %c0_i32 = arith.constant 0 : i32
    %c0_i32_0 = arith.constant 0 : i32
    %c0_i32_1 = arith.constant 0 : i32
    return %c0_i32, %c0_i32_0 : i32, i32
  }
  func.func @transform_2(%arg0: i32) -> (i32, i32) {
    %c0_i32 = arith.constant 0 : i32
    %c0_i32_0 = arith.constant 0 : i32
    %c0_i32_1 = arith.constant 0 : i32
    return %c0_i32, %c0_i32_0 : i32, i32
  }
  func.func @transform_3(%arg0: i32) -> (i32, i32) {
    %c0_i32 = arith.constant 0 : i32
    %c0_i32_0 = arith.constant 0 : i32
    %c0_i32_1 = arith.constant 0 : i32
    return %c0_i32, %c0_i32_0 : i32, i32
  }
  func.func @transform_4(%arg0: i32) -> (i32, i32) {
    %c0_i32 = arith.constant 0 : i32
    %c0_i32_0 = arith.constant 0 : i32
    %c0_i32_1 = arith.constant 0 : i32
    return %c0_i32, %c0_i32_0 : i32, i32
  }
  func.func @transform_5(%arg0: i32) -> (i32, i32) {
    %c0_i32 = arith.constant 0 : i32
    %c0_i32_0 = arith.constant 0 : i32
    %c0_i32_1 = arith.constant 0 : i32
    return %c0_i32, %c0_i32_0 : i32, i32
  }
  func.func @transform_6(%arg0: i32) -> (i32, i32) {
    %c0_i32 = arith.constant 0 : i32
    %c0_i32_0 = arith.constant 0 : i32
    %c0_i32_1 = arith.constant 0 : i32
    return %c0_i32, %c0_i32_0 : i32, i32
  }
  func.func @transform_7(%arg0: i32) -> (i32, i32) {
    %c0_i32 = arith.constant 0 : i32
    %c0_i32_0 = arith.constant 0 : i32
    %c0_i32_1 = arith.constant 0 : i32
    return %c0_i32, %c0_i32_0 : i32, i32
  }
  func.func @transform_8(%arg0: i32) -> (i32, i32) {
    %c0_i32 = arith.constant 0 : i32
    %c0_i32_0 = arith.constant 0 : i32
    %c0_i32_1 = arith.constant 0 : i32
    return %c0_i32, %c0_i32_0 : i32, i32
  }
  func.func @transform_9(%arg0: i32) -> (i32, i32) {
    %c0_i32 = arith.constant 0 : i32
    %c0_i32_0 = arith.constant 0 : i32
    %c0_i32_1 = arith.constant 0 : i32
    return %c0_i32, %c0_i32_0 : i32, i32
  }
  func.func @transform_10(%arg0: i32) -> (i32, i32) {
    %c0_i32 = arith.constant 0 : i32
    %c0_i32_0 = arith.constant 0 : i32
    %c0_i32_1 = arith.constant 0 : i32
    return %c0_i32, %c0_i32_0 : i32, i32
  }
  func.func @transform_11(%arg0: i32) -> (i32, i32) {
    %c0_i32 = arith.constant 0 : i32
    %c0_i32_0 = arith.constant 0 : i32
    return %arg0, %c0_i32 : i32, i32
  }
  func.func @transform_12(%arg0: i32) -> (i32, i32) {
    %c0_i32 = arith.constant 0 : i32
    %c0_i32_0 = arith.constant 0 : i32
    %c0_i32_1 = arith.constant 0 : i32
    return %c0_i32, %c0_i32_0 : i32, i32
  }
  func.func @transform_13(%arg0: i32) -> (i32, i32) {
    %c0_i32 = arith.constant 0 : i32
    %c0_i32_0 = arith.constant 0 : i32
    %c0_i32_1 = arith.constant 0 : i32
    return %c0_i32, %c0_i32_0 : i32, i32
  }
  func.func @transform_14(%arg0: i32) -> (i32, i32) {
    %c0_i32 = arith.constant 0 : i32
    %c0_i32_0 = arith.constant 0 : i32
    %c0_i32_1 = arith.constant 0 : i32
    return %c0_i32, %c0_i32_0 : i32, i32
  }
  func.func @transform_15(%arg0: i32) -> (i32, i32) {
    %c0_i32 = arith.constant 0 : i32
    %c0_i32_0 = arith.constant 0 : i32
    %c0_i32_1 = arith.constant 0 : i32
    return %c0_i32, %c0_i32_0 : i32, i32
  }
}

module attributes {stable_mosaic.version = 11 : i64} {
  func.func @kernel(%arg0: i32, %arg1: memref<32x128xbf16, #tpu.memory_space<vmem>>, %arg2: memref<128x512xbf16, #tpu.memory_space<vmem>>, %arg3: memref<128x512xbf16, #tpu.memory_space<vmem>>, %arg4: memref<1x512xf32, #tpu.memory_space<vmem>>, %arg5: memref<8x128xf32, #tpu.memory_space<vmem>>, %arg6: memref<8x128xf32, #tpu.memory_space<vmem>>, %arg7: memref<128x512xbf16, #tpu.memory_space<vmem>>, %arg8: memref<128x512xbf16, #tpu.memory_space<vmem>>, %arg9: memref<1x512xf32, #tpu.memory_space<vmem>>, %arg10: memref<8x128xf32, #tpu.memory_space<vmem>>, %arg11: memref<8x128xf32, #tpu.memory_space<vmem>>, %arg12: memref<32x128xf32, #tpu.memory_space<vmem>>, %arg13: memref<8x128xf32, #tpu.memory_space<vmem>>, %arg14: memref<8x128xf32, #tpu.memory_space<vmem>>, %arg15: memref<8x128xf32, #tpu.memory_space<vmem>>, %arg16: memref<8x128xf32, #tpu.memory_space<vmem>>, %arg17: memref<32x512xf32, #tpu.memory_space<vmem>>, %arg18: memref<32x128xf32, #tpu.memory_space<vmem>>, %arg19: memref<2x8x128xf32, #tpu.memory_space<vmem>>, %arg20: memref<2x8x128xf32, #tpu.memory_space<vmem>>) attributes {dimension_semantics = [#tpu.dimension_semantics<arbitrary>], iteration_bounds = array<i64: 2>, scalar_prefetch = 0 : i64, scratch_operands = 4 : i64, tpu.core_type = #tpu.core_type<tc>, window_params = [{transform_indices = @transform_0, window_bounds = array<i64: 32, 128>}, {pipeline_mode = #tpu.pipeline_mode<synchronous>, transform_indices = @transform_1, window_bounds = array<i64: 128, 512>}, {pipeline_mode = #tpu.pipeline_mode<synchronous>, transform_indices = @transform_2, window_bounds = array<i64: 128, 512>}, {pipeline_mode = #tpu.pipeline_mode<synchronous>, transform_indices = @transform_3, window_bounds = array<i64: 1, 512>}, {pipeline_mode = #tpu.pipeline_mode<synchronous>, transform_indices = @transform_4, window_bounds = array<i64: 8, 128>}, {pipeline_mode = #tpu.pipeline_mode<synchronous>, transform_indices = @transform_5, window_bounds = array<i64: 8, 128>}, {pipeline_mode = #tpu.pipeline_mode<synchronous>, transform_indices = @transform_6, window_bounds = array<i64: 128, 512>}, {pipeline_mode = #tpu.pipeline_mode<synchronous>, transform_indices = @transform_7, window_bounds = array<i64: 128, 512>}, {pipeline_mode = #tpu.pipeline_mode<synchronous>, transform_indices = @transform_8, window_bounds = array<i64: 1, 512>}, {pipeline_mode = #tpu.pipeline_mode<synchronous>, transform_indices = @transform_9, window_bounds = array<i64: 8, 128>}, {pipeline_mode = #tpu.pipeline_mode<synchronous>, transform_indices = @transform_10, window_bounds = array<i64: 8, 128>}, {transform_indices = @transform_11, window_bounds = array<i64: 32, 128>}, {pipeline_mode = #tpu.pipeline_mode<synchronous>, transform_indices = @transform_12, window_bounds = array<i64: 8, 128>}, {pipeline_mode = #tpu.pipeline_mode<synchronous>, transform_indices = @transform_13, window_bounds = array<i64: 8, 128>}, {pipeline_mode = #tpu.pipeline_mode<synchronous>, transform_indices = @transform_14, window_bounds = array<i64: 8, 128>}, {pipeline_mode = #tpu.pipeline_mode<synchronous>, transform_indices = @transform_15, window_bounds = array<i64: 8, 128>}]} {
    %c0_i32 = arith.constant 0 : i32
    %0 = arith.cmpi eq, %arg0, %c0_i32 : i32
    %1 = arith.extui %0 : i1 to i32
    %c0_i32_0 = arith.constant 0 : i32
    %2 = arith.cmpi ne, %1, %c0_i32_0 : i32
    scf.if %2 {
      %c0_107 = arith.constant 0 : index
      %c0_108 = arith.constant 0 : index
      %315 = vector.load %arg5[%c0_107, %c0_108] : memref<8x128xf32, #tpu.memory_space<vmem>>, vector<8x128xf32>
      %c0_109 = arith.constant 0 : index
      %c0_110 = arith.constant 0 : index
      %c0_111 = arith.constant 0 : index
      %316 = vector.load %arg19[%c0_109, %c0_110, %c0_111] : memref<2x8x128xf32, #tpu.memory_space<vmem>>, vector<1x8x128xf32>
      %317 = vector.shape_cast %316 : vector<1x8x128xf32> to vector<8x128xf32>
      %318 = vector.shape_cast %315 : vector<8x128xf32> to vector<1x8x128xf32>
      tpu.vector_store %arg19[%c0_109, %c0_110, %c0_111], %318 {strides = array<i32>} : memref<2x8x128xf32, #tpu.memory_space<vmem>>, vector<1x8x128xf32>,
      %c0_112 = arith.constant 0 : index
      %c0_113 = arith.constant 0 : index
      %319 = vector.load %arg6[%c0_112, %c0_113] : memref<8x128xf32, #tpu.memory_space<vmem>>, vector<8x128xf32>
      %c0_114 = arith.constant 0 : index
      %c0_115 = arith.constant 0 : index
      %c0_116 = arith.constant 0 : index
      %320 = vector.load %arg20[%c0_114, %c0_115, %c0_116] : memref<2x8x128xf32, #tpu.memory_space<vmem>>, vector<1x8x128xf32>
      %321 = vector.shape_cast %320 : vector<1x8x128xf32> to vector<8x128xf32>
      %322 = vector.shape_cast %319 : vector<8x128xf32> to vector<1x8x128xf32>
      tpu.vector_store %arg20[%c0_114, %c0_115, %c0_116], %322 {strides = array<i32>} : memref<2x8x128xf32, #tpu.memory_space<vmem>>, vector<1x8x128xf32>,
      %c0_117 = arith.constant 0 : index
      %c0_118 = arith.constant 0 : index
      %323 = vector.load %arg10[%c0_117, %c0_118] : memref<8x128xf32, #tpu.memory_space<vmem>>, vector<8x128xf32>
      %c1_119 = arith.constant 1 : index
      %c0_120 = arith.constant 0 : index
      %c0_121 = arith.constant 0 : index
      %324 = vector.load %arg19[%c1_119, %c0_120, %c0_121] : memref<2x8x128xf32, #tpu.memory_space<vmem>>, vector<1x8x128xf32>
      %325 = vector.shape_cast %324 : vector<1x8x128xf32> to vector<8x128xf32>
      %326 = vector.shape_cast %323 : vector<8x128xf32> to vector<1x8x128xf32>
      tpu.vector_store %arg19[%c1_119, %c0_120, %c0_121], %326 {strides = array<i32>} : memref<2x8x128xf32, #tpu.memory_space<vmem>>, vector<1x8x128xf32>,
      %c0_122 = arith.constant 0 : index
      %c0_123 = arith.constant 0 : index
      %327 = vector.load %arg11[%c0_122, %c0_123] : memref<8x128xf32, #tpu.memory_space<vmem>>, vector<8x128xf32>
      %c1_124 = arith.constant 1 : index
      %c0_125 = arith.constant 0 : index
      %c0_126 = arith.constant 0 : index
      %328 = vector.load %arg20[%c1_124, %c0_125, %c0_126] : memref<2x8x128xf32, #tpu.memory_space<vmem>>, vector<1x8x128xf32>
      %329 = vector.shape_cast %328 : vector<1x8x128xf32> to vector<8x128xf32>
      %330 = vector.shape_cast %327 : vector<8x128xf32> to vector<1x8x128xf32>
      tpu.vector_store %arg20[%c1_124, %c0_125, %c0_126], %330 {strides = array<i32>} : memref<2x8x128xf32, #tpu.memory_space<vmem>>, vector<1x8x128xf32>,
    } else {
    }
    %c0 = arith.constant 0 : index
    %c0_1 = arith.constant 0 : index
    %3 = vector.load %arg1[%c0, %c0_1] : memref<32x128xbf16, #tpu.memory_space<vmem>>, vector<32x128xbf16>
    %c0_2 = arith.constant 0 : index
    %c0_3 = arith.constant 0 : index
    %4 = vector.load %arg2[%c0_2, %c0_3] : memref<128x512xbf16, #tpu.memory_space<vmem>>, vector<128x512xbf16>
    %cst = arith.constant dense<0.000000e+00> : vector<32x512xf32>
    %5 = tpu.matmul %3, %4, %cst {dimension_numbers = #tpu.dot_dimension_numbers<[1], [0], [0], [1], [0, 0, 1, 1], [], []>} : vector<32x128xbf16>, vector<128x512xbf16>, vector<32x512xf32> -> vector<32x512xf32>
    %c0_4 = arith.constant 0 : index
    %c0_5 = arith.constant 0 : index
    %6 = vector.load %arg4[%c0_4, %c0_5] : memref<1x512xf32, #tpu.memory_space<vmem>>, vector<1x512xf32>
    %7 = vector.broadcast %6 : vector<1x512xf32> to vector<32x512xf32>
    %8 = arith.addf %5, %7 : vector<32x512xf32>
    %c0_6 = arith.constant 0 : index
    %c0_7 = arith.constant 0 : index
    %9 = vector.load %arg17[%c0_6, %c0_7] : memref<32x512xf32, #tpu.memory_space<vmem>>, vector<32x512xf32>
    tpu.vector_store %arg17[%c0_6, %c0_7], %8 {strides = array<i32>} : memref<32x512xf32, #tpu.memory_space<vmem>>, vector<32x512xf32>,
    %c0_8 = arith.constant 0 : index
    %c0_9 = arith.constant 0 : index
    %10 = vector.load %arg3[%c0_8, %c0_9] : memref<128x512xbf16, #tpu.memory_space<vmem>>, vector<128x512xbf16>
    %c0_10 = arith.constant 0 : index
    %c0_11 = arith.constant 0 : index
    %c0_12 = arith.constant 0 : index
    %11 = vector.load %arg19[%c0_10, %c0_11, %c0_12] : memref<2x8x128xf32, #tpu.memory_space<vmem>>, vector<1x8x128xf32>
    %12 = vector.shape_cast %11 : vector<1x8x128xf32> to vector<8x128xf32>
    %c0_13 = arith.constant 0 : index
    %c0_14 = arith.constant 0 : index
    %c0_15 = arith.constant 0 : index
    %13 = vector.load %arg20[%c0_13, %c0_14, %c0_15] : memref<2x8x128xf32, #tpu.memory_space<vmem>>, vector<1x8x128xf32>
    %14 = vector.shape_cast %13 : vector<1x8x128xf32> to vector<8x128xf32>
    %c0_i32_16 = arith.constant 0 : i32
    %c8_i32 = arith.constant 8 : i32
    %15 = arith.muli %c0_i32_16, %c8_i32 : i32
    %16 = tpu.assume_multiple %15, 8 : i32
    %17 = arith.index_cast %16 : i32 to index
    %c0_17 = arith.constant 0 : index
    %18 = vector.load %arg17[%17, %c0_17] : memref<32x512xf32, #tpu.memory_space<vmem>>, vector<8x512xf32>
    %19 = arith.truncf %12 : vector<8x128xf32> to vector<8x128xbf16>
    %cst_18 = arith.constant dense<0.000000e+00> : vector<8x512xf32>
    %20 = tpu.matmul %19, %10, %cst_18 {dimension_numbers = #tpu.dot_dimension_numbers<[1], [0], [0], [1], [0, 0, 1, 1], [], []>} : vector<8x128xbf16>, vector<128x512xbf16>, vector<8x512xf32> -> vector<8x512xf32>
    %21 = arith.addf %18, %20 : vector<8x512xf32>
    %22 = vector.extract_strided_slice %21 {offsets = [0, 0], sizes = [8, 128], strides = [1, 1]} : vector<8x512xf32> to vector<8x128xf32>
    %23 = arith.negf %22 : vector<8x128xf32>
    %24 = math.exp %23 : vector<8x128xf32>
    %cst_19 = arith.constant 1.000000e+00 : f32
    %25 = vector.broadcast %cst_19 : f32 to vector<8x128xf32>
    %26 = arith.addf %25, %24 : vector<8x128xf32>
    %27 = arith.divf %25, %26 : vector<8x128xf32>
    %28 = vector.extract_strided_slice %21 {offsets = [0, 128], sizes = [8, 128], strides = [1, 1]} : vector<8x512xf32> to vector<8x128xf32>
    %29 = arith.negf %28 : vector<8x128xf32>
    %30 = math.exp %29 : vector<8x128xf32>
    %cst_20 = arith.constant 1.000000e+00 : f32
    %31 = vector.broadcast %cst_20 : f32 to vector<8x128xf32>
    %32 = arith.addf %31, %30 : vector<8x128xf32>
    %33 = arith.divf %31, %32 : vector<8x128xf32>
    %34 = vector.extract_strided_slice %21 {offsets = [0, 256], sizes = [8, 128], strides = [1, 1]} : vector<8x512xf32> to vector<8x128xf32>
    %35 = math.tanh %34 : vector<8x128xf32>
    %36 = vector.extract_strided_slice %21 {offsets = [0, 384], sizes = [8, 128], strides = [1, 1]} : vector<8x512xf32> to vector<8x128xf32>
    %37 = arith.negf %36 : vector<8x128xf32>
    %38 = math.exp %37 : vector<8x128xf32>
    %cst_21 = arith.constant 1.000000e+00 : f32
    %39 = vector.broadcast %cst_21 : f32 to vector<8x128xf32>
    %40 = arith.addf %39, %38 : vector<8x128xf32>
    %41 = arith.divf %39, %40 : vector<8x128xf32>
    %42 = arith.mulf %33, %14 : vector<8x128xf32>
    %43 = arith.mulf %27, %35 : vector<8x128xf32>
    %44 = arith.addf %42, %43 : vector<8x128xf32>
    %45 = math.tanh %44 : vector<8x128xf32>
    %46 = arith.mulf %41, %45 : vector<8x128xf32>
    %47 = arith.index_cast %16 : i32 to index
    %c0_22 = arith.constant 0 : index
    %48 = vector.load %arg18[%47, %c0_22] : memref<32x128xf32, #tpu.memory_space<vmem>>, vector<8x128xf32>
    tpu.vector_store %arg18[%47, %c0_22], %46 {strides = array<i32>} : memref<32x128xf32, #tpu.memory_space<vmem>>, vector<8x128xf32>,
    %c1_i32 = arith.constant 1 : i32
    %c8_i32_23 = arith.constant 8 : i32
    %49 = arith.muli %c1_i32, %c8_i32_23 : i32
    %50 = tpu.assume_multiple %49, 8 : i32
    %51 = arith.index_cast %50 : i32 to index
    %c0_24 = arith.constant 0 : index
    %52 = vector.load %arg17[%51, %c0_24] : memref<32x512xf32, #tpu.memory_space<vmem>>, vector<8x512xf32>
    %53 = arith.truncf %46 : vector<8x128xf32> to vector<8x128xbf16>
    %cst_25 = arith.constant dense<0.000000e+00> : vector<8x512xf32>
    %54 = tpu.matmul %53, %10, %cst_25 {dimension_numbers = #tpu.dot_dimension_numbers<[1], [0], [0], [1], [0, 0, 1, 1], [], []>} : vector<8x128xbf16>, vector<128x512xbf16>, vector<8x512xf32> -> vector<8x512xf32>
    %55 = arith.addf %52, %54 : vector<8x512xf32>
    %56 = vector.extract_strided_slice %55 {offsets = [0, 0], sizes = [8, 128], strides = [1, 1]} : vector<8x512xf32> to vector<8x128xf32>
    %57 = arith.negf %56 : vector<8x128xf32>
    %58 = math.exp %57 : vector<8x128xf32>
    %cst_26 = arith.constant 1.000000e+00 : f32
    %59 = vector.broadcast %cst_26 : f32 to vector<8x128xf32>
    %60 = arith.addf %59, %58 : vector<8x128xf32>
    %61 = arith.divf %59, %60 : vector<8x128xf32>
    %62 = vector.extract_strided_slice %55 {offsets = [0, 128], sizes = [8, 128], strides = [1, 1]} : vector<8x512xf32> to vector<8x128xf32>
    %63 = arith.negf %62 : vector<8x128xf32>
    %64 = math.exp %63 : vector<8x128xf32>
    %cst_27 = arith.constant 1.000000e+00 : f32
    %65 = vector.broadcast %cst_27 : f32 to vector<8x128xf32>
    %66 = arith.addf %65, %64 : vector<8x128xf32>
    %67 = arith.divf %65, %66 : vector<8x128xf32>
    %68 = vector.extract_strided_slice %55 {offsets = [0, 256], sizes = [8, 128], strides = [1, 1]} : vector<8x512xf32> to vector<8x128xf32>
    %69 = math.tanh %68 : vector<8x128xf32>
    %70 = vector.extract_strided_slice %55 {offsets = [0, 384], sizes = [8, 128], strides = [1, 1]} : vector<8x512xf32> to vector<8x128xf32>
    %71 = arith.negf %70 : vector<8x128xf32>
    %72 = math.exp %71 : vector<8x128xf32>
    %cst_28 = arith.constant 1.000000e+00 : f32
    %73 = vector.broadcast %cst_28 : f32 to vector<8x128xf32>
    %74 = arith.addf %73, %72 : vector<8x128xf32>
    %75 = arith.divf %73, %74 : vector<8x128xf32>
    %76 = arith.mulf %67, %44 : vector<8x128xf32>
    %77 = arith.mulf %61, %69 : vector<8x128xf32>
    %78 = arith.addf %76, %77 : vector<8x128xf32>
    %79 = math.tanh %78 : vector<8x128xf32>
    %80 = arith.mulf %75, %79 : vector<8x128xf32>
    %81 = arith.index_cast %50 : i32 to index
    %c0_29 = arith.constant 0 : index
    %82 = vector.load %arg18[%81, %c0_29] : memref<32x128xf32, #tpu.memory_space<vmem>>, vector<8x128xf32>
    tpu.vector_store %arg18[%81, %c0_29], %80 {strides = array<i32>} : memref<32x128xf32, #tpu.memory_space<vmem>>, vector<8x128xf32>,
    %c2_i32 = arith.constant 2 : i32
    %c8_i32_30 = arith.constant 8 : i32
    %83 = arith.muli %c2_i32, %c8_i32_30 : i32
    %84 = tpu.assume_multiple %83, 8 : i32
    %85 = arith.index_cast %84 : i32 to index
    %c0_31 = arith.constant 0 : index
    %86 = vector.load %arg17[%85, %c0_31] : memref<32x512xf32, #tpu.memory_space<vmem>>, vector<8x512xf32>
    %87 = arith.truncf %80 : vector<8x128xf32> to vector<8x128xbf16>
    %cst_32 = arith.constant dense<0.000000e+00> : vector<8x512xf32>
    %88 = tpu.matmul %87, %10, %cst_32 {dimension_numbers = #tpu.dot_dimension_numbers<[1], [0], [0], [1], [0, 0, 1, 1], [], []>} : vector<8x128xbf16>, vector<128x512xbf16>, vector<8x512xf32> -> vector<8x512xf32>
    %89 = arith.addf %86, %88 : vector<8x512xf32>
    %90 = vector.extract_strided_slice %89 {offsets = [0, 0], sizes = [8, 128], strides = [1, 1]} : vector<8x512xf32> to vector<8x128xf32>
    %91 = arith.negf %90 : vector<8x128xf32>
    %92 = math.exp %91 : vector<8x128xf32>
    %cst_33 = arith.constant 1.000000e+00 : f32
    %93 = vector.broadcast %cst_33 : f32 to vector<8x128xf32>
    %94 = arith.addf %93, %92 : vector<8x128xf32>
    %95 = arith.divf %93, %94 : vector<8x128xf32>
    %96 = vector.extract_strided_slice %89 {offsets = [0, 128], sizes = [8, 128], strides = [1, 1]} : vector<8x512xf32> to vector<8x128xf32>
    %97 = arith.negf %96 : vector<8x128xf32>
    %98 = math.exp %97 : vector<8x128xf32>
    %cst_34 = arith.constant 1.000000e+00 : f32
    %99 = vector.broadcast %cst_34 : f32 to vector<8x128xf32>
    %100 = arith.addf %99, %98 : vector<8x128xf32>
    %101 = arith.divf %99, %100 : vector<8x128xf32>
    %102 = vector.extract_strided_slice %89 {offsets = [0, 256], sizes = [8, 128], strides = [1, 1]} : vector<8x512xf32> to vector<8x128xf32>
    %103 = math.tanh %102 : vector<8x128xf32>
    %104 = vector.extract_strided_slice %89 {offsets = [0, 384], sizes = [8, 128], strides = [1, 1]} : vector<8x512xf32> to vector<8x128xf32>
    %105 = arith.negf %104 : vector<8x128xf32>
    %106 = math.exp %105 : vector<8x128xf32>
    %cst_35 = arith.constant 1.000000e+00 : f32
    %107 = vector.broadcast %cst_35 : f32 to vector<8x128xf32>
    %108 = arith.addf %107, %106 : vector<8x128xf32>
    %109 = arith.divf %107, %108 : vector<8x128xf32>
    %110 = arith.mulf %101, %78 : vector<8x128xf32>
    %111 = arith.mulf %95, %103 : vector<8x128xf32>
    %112 = arith.addf %110, %111 : vector<8x128xf32>
    %113 = math.tanh %112 : vector<8x128xf32>
    %114 = arith.mulf %109, %113 : vector<8x128xf32>
    %115 = arith.index_cast %84 : i32 to index
    %c0_36 = arith.constant 0 : index
    %116 = vector.load %arg18[%115, %c0_36] : memref<32x128xf32, #tpu.memory_space<vmem>>, vector<8x128xf32>
    tpu.vector_store %arg18[%115, %c0_36], %114 {strides = array<i32>} : memref<32x128xf32, #tpu.memory_space<vmem>>, vector<8x128xf32>,
    %c3_i32 = arith.constant 3 : i32
    %c8_i32_37 = arith.constant 8 : i32
    %117 = arith.muli %c3_i32, %c8_i32_37 : i32
    %118 = tpu.assume_multiple %117, 8 : i32
    %119 = arith.index_cast %118 : i32 to index
    %c0_38 = arith.constant 0 : index
    %120 = vector.load %arg17[%119, %c0_38] : memref<32x512xf32, #tpu.memory_space<vmem>>, vector<8x512xf32>
    %121 = arith.truncf %114 : vector<8x128xf32> to vector<8x128xbf16>
    %cst_39 = arith.constant dense<0.000000e+00> : vector<8x512xf32>
    %122 = tpu.matmul %121, %10, %cst_39 {dimension_numbers = #tpu.dot_dimension_numbers<[1], [0], [0], [1], [0, 0, 1, 1], [], []>} : vector<8x128xbf16>, vector<128x512xbf16>, vector<8x512xf32> -> vector<8x512xf32>
    %123 = arith.addf %120, %122 : vector<8x512xf32>
    %124 = vector.extract_strided_slice %123 {offsets = [0, 0], sizes = [8, 128], strides = [1, 1]} : vector<8x512xf32> to vector<8x128xf32>
    %125 = arith.negf %124 : vector<8x128xf32>
    %126 = math.exp %125 : vector<8x128xf32>
    %cst_40 = arith.constant 1.000000e+00 : f32
    %127 = vector.broadcast %cst_40 : f32 to vector<8x128xf32>
    %128 = arith.addf %127, %126 : vector<8x128xf32>
    %129 = arith.divf %127, %128 : vector<8x128xf32>
    %130 = vector.extract_strided_slice %123 {offsets = [0, 128], sizes = [8, 128], strides = [1, 1]} : vector<8x512xf32> to vector<8x128xf32>
    %131 = arith.negf %130 : vector<8x128xf32>
    %132 = math.exp %131 : vector<8x128xf32>
    %cst_41 = arith.constant 1.000000e+00 : f32
    %133 = vector.broadcast %cst_41 : f32 to vector<8x128xf32>
    %134 = arith.addf %133, %132 : vector<8x128xf32>
    %135 = arith.divf %133, %134 : vector<8x128xf32>
    %136 = vector.extract_strided_slice %123 {offsets = [0, 256], sizes = [8, 128], strides = [1, 1]} : vector<8x512xf32> to vector<8x128xf32>
    %137 = math.tanh %136 : vector<8x128xf32>
    %138 = vector.extract_strided_slice %123 {offsets = [0, 384], sizes = [8, 128], strides = [1, 1]} : vector<8x512xf32> to vector<8x128xf32>
    %139 = arith.negf %138 : vector<8x128xf32>
    %140 = math.exp %139 : vector<8x128xf32>
    %cst_42 = arith.constant 1.000000e+00 : f32
    %141 = vector.broadcast %cst_42 : f32 to vector<8x128xf32>
    %142 = arith.addf %141, %140 : vector<8x128xf32>
    %143 = arith.divf %141, %142 : vector<8x128xf32>
    %144 = arith.mulf %135, %112 : vector<8x128xf32>
    %145 = arith.mulf %129, %137 : vector<8x128xf32>
    %146 = arith.addf %144, %145 : vector<8x128xf32>
    %147 = math.tanh %146 : vector<8x128xf32>
    %148 = arith.mulf %143, %147 : vector<8x128xf32>
    %149 = arith.index_cast %118 : i32 to index
    %c0_43 = arith.constant 0 : index
    %150 = vector.load %arg18[%149, %c0_43] : memref<32x128xf32, #tpu.memory_space<vmem>>, vector<8x128xf32>
    tpu.vector_store %arg18[%149, %c0_43], %148 {strides = array<i32>} : memref<32x128xf32, #tpu.memory_space<vmem>>, vector<8x128xf32>,
    %c4_i32 = arith.constant 4 : i32
    %c0_44 = arith.constant 0 : index
    %c0_45 = arith.constant 0 : index
    %c0_46 = arith.constant 0 : index
    %151 = vector.load %arg19[%c0_44, %c0_45, %c0_46] : memref<2x8x128xf32, #tpu.memory_space<vmem>>, vector<1x8x128xf32>
    %152 = vector.shape_cast %151 : vector<1x8x128xf32> to vector<8x128xf32>
    %153 = vector.shape_cast %148 : vector<8x128xf32> to vector<1x8x128xf32>
    tpu.vector_store %arg19[%c0_44, %c0_45, %c0_46], %153 {strides = array<i32>} : memref<2x8x128xf32, #tpu.memory_space<vmem>>, vector<1x8x128xf32>,
    %c0_47 = arith.constant 0 : index
    %c0_48 = arith.constant 0 : index
    %c0_49 = arith.constant 0 : index
    %154 = vector.load %arg20[%c0_47, %c0_48, %c0_49] : memref<2x8x128xf32, #tpu.memory_space<vmem>>, vector<1x8x128xf32>
    %155 = vector.shape_cast %154 : vector<1x8x128xf32> to vector<8x128xf32>
    %156 = vector.shape_cast %146 : vector<8x128xf32> to vector<1x8x128xf32>
    tpu.vector_store %arg20[%c0_47, %c0_48, %c0_49], %156 {strides = array<i32>} : memref<2x8x128xf32, #tpu.memory_space<vmem>>, vector<1x8x128xf32>,
    %c0_50 = arith.constant 0 : index
    %c0_51 = arith.constant 0 : index
    %157 = vector.load %arg18[%c0_50, %c0_51] : memref<32x128xf32, #tpu.memory_space<vmem>>, vector<32x128xf32>
    %158 = arith.truncf %157 : vector<32x128xf32> to vector<32x128xbf16>
    %c0_52 = arith.constant 0 : index
    %c0_53 = arith.constant 0 : index
    %159 = vector.load %arg7[%c0_52, %c0_53] : memref<128x512xbf16, #tpu.memory_space<vmem>>, vector<128x512xbf16>
    %cst_54 = arith.constant dense<0.000000e+00> : vector<32x512xf32>
    %160 = tpu.matmul %158, %159, %cst_54 {dimension_numbers = #tpu.dot_dimension_numbers<[1], [0], [0], [1], [0, 0, 1, 1], [], []>} : vector<32x128xbf16>, vector<128x512xbf16>, vector<32x512xf32> -> vector<32x512xf32>
    %c0_55 = arith.constant 0 : index
    %c0_56 = arith.constant 0 : index
    %161 = vector.load %arg9[%c0_55, %c0_56] : memref<1x512xf32, #tpu.memory_space<vmem>>, vector<1x512xf32>
    %162 = vector.broadcast %161 : vector<1x512xf32> to vector<32x512xf32>
    %163 = arith.addf %160, %162 : vector<32x512xf32>
    %c0_57 = arith.constant 0 : index
    %c0_58 = arith.constant 0 : index
    %164 = vector.load %arg17[%c0_57, %c0_58] : memref<32x512xf32, #tpu.memory_space<vmem>>, vector<32x512xf32>
    tpu.vector_store %arg17[%c0_57, %c0_58], %163 {strides = array<i32>} : memref<32x512xf32, #tpu.memory_space<vmem>>, vector<32x512xf32>,
    %c0_59 = arith.constant 0 : index
    %c0_60 = arith.constant 0 : index
    %165 = vector.load %arg8[%c0_59, %c0_60] : memref<128x512xbf16, #tpu.memory_space<vmem>>, vector<128x512xbf16>
    %c1 = arith.constant 1 : index
    %c0_61 = arith.constant 0 : index
    %c0_62 = arith.constant 0 : index
    %166 = vector.load %arg19[%c1, %c0_61, %c0_62] : memref<2x8x128xf32, #tpu.memory_space<vmem>>, vector<1x8x128xf32>
    %167 = vector.shape_cast %166 : vector<1x8x128xf32> to vector<8x128xf32>
    %c1_63 = arith.constant 1 : index
    %c0_64 = arith.constant 0 : index
    %c0_65 = arith.constant 0 : index
    %168 = vector.load %arg20[%c1_63, %c0_64, %c0_65] : memref<2x8x128xf32, #tpu.memory_space<vmem>>, vector<1x8x128xf32>
    %169 = vector.shape_cast %168 : vector<1x8x128xf32> to vector<8x128xf32>
    %c0_i32_66 = arith.constant 0 : i32
    %c8_i32_67 = arith.constant 8 : i32
    %170 = arith.muli %c0_i32_66, %c8_i32_67 : i32
    %171 = tpu.assume_multiple %170, 8 : i32
    %172 = arith.index_cast %171 : i32 to index
    %c0_68 = arith.constant 0 : index
    %173 = vector.load %arg17[%172, %c0_68] : memref<32x512xf32, #tpu.memory_space<vmem>>, vector<8x512xf32>
    %174 = arith.truncf %167 : vector<8x128xf32> to vector<8x128xbf16>
    %cst_69 = arith.constant dense<0.000000e+00> : vector<8x512xf32>
    %175 = tpu.matmul %174, %165, %cst_69 {dimension_numbers = #tpu.dot_dimension_numbers<[1], [0], [0], [1], [0, 0, 1, 1], [], []>} : vector<8x128xbf16>, vector<128x512xbf16>, vector<8x512xf32> -> vector<8x512xf32>
    %176 = arith.addf %173, %175 : vector<8x512xf32>
    %177 = vector.extract_strided_slice %176 {offsets = [0, 0], sizes = [8, 128], strides = [1, 1]} : vector<8x512xf32> to vector<8x128xf32>
    %178 = arith.negf %177 : vector<8x128xf32>
    %179 = math.exp %178 : vector<8x128xf32>
    %cst_70 = arith.constant 1.000000e+00 : f32
    %180 = vector.broadcast %cst_70 : f32 to vector<8x128xf32>
    %181 = arith.addf %180, %179 : vector<8x128xf32>
    %182 = arith.divf %180, %181 : vector<8x128xf32>
    %183 = vector.extract_strided_slice %176 {offsets = [0, 128], sizes = [8, 128], strides = [1, 1]} : vector<8x512xf32> to vector<8x128xf32>
    %184 = arith.negf %183 : vector<8x128xf32>
    %185 = math.exp %184 : vector<8x128xf32>
    %cst_71 = arith.constant 1.000000e+00 : f32
    %186 = vector.broadcast %cst_71 : f32 to vector<8x128xf32>
    %187 = arith.addf %186, %185 : vector<8x128xf32>
    %188 = arith.divf %186, %187 : vector<8x128xf32>
    %189 = vector.extract_strided_slice %176 {offsets = [0, 256], sizes = [8, 128], strides = [1, 1]} : vector<8x512xf32> to vector<8x128xf32>
    %190 = math.tanh %189 : vector<8x128xf32>
    %191 = vector.extract_strided_slice %176 {offsets = [0, 384], sizes = [8, 128], strides = [1, 1]} : vector<8x512xf32> to vector<8x128xf32>
    %192 = arith.negf %191 : vector<8x128xf32>
    %193 = math.exp %192 : vector<8x128xf32>
    %cst_72 = arith.constant 1.000000e+00 : f32
    %194 = vector.broadcast %cst_72 : f32 to vector<8x128xf32>
    %195 = arith.addf %194, %193 : vector<8x128xf32>
    %196 = arith.divf %194, %195 : vector<8x128xf32>
    %197 = arith.mulf %188, %169 : vector<8x128xf32>
    %198 = arith.mulf %182, %190 : vector<8x128xf32>
    %199 = arith.addf %197, %198 : vector<8x128xf32>
    %200 = math.tanh %199 : vector<8x128xf32>
    %201 = arith.mulf %196, %200 : vector<8x128xf32>
    %202 = arith.index_cast %171 : i32 to index
    %c0_73 = arith.constant 0 : index
    %203 = vector.load %arg12[%202, %c0_73] : memref<32x128xf32, #tpu.memory_space<vmem>>, vector<8x128xf32>
    tpu.vector_store %arg12[%202, %c0_73], %201 {strides = array<i32>} : memref<32x128xf32, #tpu.memory_space<vmem>>, vector<8x128xf32>,
    %c1_i32_74 = arith.constant 1 : i32
    %c8_i32_75 = arith.constant 8 : i32
    %204 = arith.muli %c1_i32_74, %c8_i32_75 : i32
    %205 = tpu.assume_multiple %204, 8 : i32
    %206 = arith.index_cast %205 : i32 to index
    %c0_76 = arith.constant 0 : index
    %207 = vector.load %arg17[%206, %c0_76] : memref<32x512xf32, #tpu.memory_space<vmem>>, vector<8x512xf32>
    %208 = arith.truncf %201 : vector<8x128xf32> to vector<8x128xbf16>
    %cst_77 = arith.constant dense<0.000000e+00> : vector<8x512xf32>
    %209 = tpu.matmul %208, %165, %cst_77 {dimension_numbers = #tpu.dot_dimension_numbers<[1], [0], [0], [1], [0, 0, 1, 1], [], []>} : vector<8x128xbf16>, vector<128x512xbf16>, vector<8x512xf32> -> vector<8x512xf32>
    %210 = arith.addf %207, %209 : vector<8x512xf32>
    %211 = vector.extract_strided_slice %210 {offsets = [0, 0], sizes = [8, 128], strides = [1, 1]} : vector<8x512xf32> to vector<8x128xf32>
    %212 = arith.negf %211 : vector<8x128xf32>
    %213 = math.exp %212 : vector<8x128xf32>
    %cst_78 = arith.constant 1.000000e+00 : f32
    %214 = vector.broadcast %cst_78 : f32 to vector<8x128xf32>
    %215 = arith.addf %214, %213 : vector<8x128xf32>
    %216 = arith.divf %214, %215 : vector<8x128xf32>
    %217 = vector.extract_strided_slice %210 {offsets = [0, 128], sizes = [8, 128], strides = [1, 1]} : vector<8x512xf32> to vector<8x128xf32>
    %218 = arith.negf %217 : vector<8x128xf32>
    %219 = math.exp %218 : vector<8x128xf32>
    %cst_79 = arith.constant 1.000000e+00 : f32
    %220 = vector.broadcast %cst_79 : f32 to vector<8x128xf32>
    %221 = arith.addf %220, %219 : vector<8x128xf32>
    %222 = arith.divf %220, %221 : vector<8x128xf32>
    %223 = vector.extract_strided_slice %210 {offsets = [0, 256], sizes = [8, 128], strides = [1, 1]} : vector<8x512xf32> to vector<8x128xf32>
    %224 = math.tanh %223 : vector<8x128xf32>
    %225 = vector.extract_strided_slice %210 {offsets = [0, 384], sizes = [8, 128], strides = [1, 1]} : vector<8x512xf32> to vector<8x128xf32>
    %226 = arith.negf %225 : vector<8x128xf32>
    %227 = math.exp %226 : vector<8x128xf32>
    %cst_80 = arith.constant 1.000000e+00 : f32
    %228 = vector.broadcast %cst_80 : f32 to vector<8x128xf32>
    %229 = arith.addf %228, %227 : vector<8x128xf32>
    %230 = arith.divf %228, %229 : vector<8x128xf32>
    %231 = arith.mulf %222, %199 : vector<8x128xf32>
    %232 = arith.mulf %216, %224 : vector<8x128xf32>
    %233 = arith.addf %231, %232 : vector<8x128xf32>
    %234 = math.tanh %233 : vector<8x128xf32>
    %235 = arith.mulf %230, %234 : vector<8x128xf32>
    %236 = arith.index_cast %205 : i32 to index
    %c0_81 = arith.constant 0 : index
    %237 = vector.load %arg12[%236, %c0_81] : memref<32x128xf32, #tpu.memory_space<vmem>>, vector<8x128xf32>
    tpu.vector_store %arg12[%236, %c0_81], %235 {strides = array<i32>} : memref<32x128xf32, #tpu.memory_space<vmem>>, vector<8x128xf32>,
    %c2_i32_82 = arith.constant 2 : i32
    %c8_i32_83 = arith.constant 8 : i32
    %238 = arith.muli %c2_i32_82, %c8_i32_83 : i32
    %239 = tpu.assume_multiple %238, 8 : i32
    %240 = arith.index_cast %239 : i32 to index
    %c0_84 = arith.constant 0 : index
    %241 = vector.load %arg17[%240, %c0_84] : memref<32x512xf32, #tpu.memory_space<vmem>>, vector<8x512xf32>
    %242 = arith.truncf %235 : vector<8x128xf32> to vector<8x128xbf16>
    %cst_85 = arith.constant dense<0.000000e+00> : vector<8x512xf32>
    %243 = tpu.matmul %242, %165, %cst_85 {dimension_numbers = #tpu.dot_dimension_numbers<[1], [0], [0], [1], [0, 0, 1, 1], [], []>} : vector<8x128xbf16>, vector<128x512xbf16>, vector<8x512xf32> -> vector<8x512xf32>
    %244 = arith.addf %241, %243 : vector<8x512xf32>
    %245 = vector.extract_strided_slice %244 {offsets = [0, 0], sizes = [8, 128], strides = [1, 1]} : vector<8x512xf32> to vector<8x128xf32>
    %246 = arith.negf %245 : vector<8x128xf32>
    %247 = math.exp %246 : vector<8x128xf32>
    %cst_86 = arith.constant 1.000000e+00 : f32
    %248 = vector.broadcast %cst_86 : f32 to vector<8x128xf32>
    %249 = arith.addf %248, %247 : vector<8x128xf32>
    %250 = arith.divf %248, %249 : vector<8x128xf32>
    %251 = vector.extract_strided_slice %244 {offsets = [0, 128], sizes = [8, 128], strides = [1, 1]} : vector<8x512xf32> to vector<8x128xf32>
    %252 = arith.negf %251 : vector<8x128xf32>
    %253 = math.exp %252 : vector<8x128xf32>
    %cst_87 = arith.constant 1.000000e+00 : f32
    %254 = vector.broadcast %cst_87 : f32 to vector<8x128xf32>
    %255 = arith.addf %254, %253 : vector<8x128xf32>
    %256 = arith.divf %254, %255 : vector<8x128xf32>
    %257 = vector.extract_strided_slice %244 {offsets = [0, 256], sizes = [8, 128], strides = [1, 1]} : vector<8x512xf32> to vector<8x128xf32>
    %258 = math.tanh %257 : vector<8x128xf32>
    %259 = vector.extract_strided_slice %244 {offsets = [0, 384], sizes = [8, 128], strides = [1, 1]} : vector<8x512xf32> to vector<8x128xf32>
    %260 = arith.negf %259 : vector<8x128xf32>
    %261 = math.exp %260 : vector<8x128xf32>
    %cst_88 = arith.constant 1.000000e+00 : f32
    %262 = vector.broadcast %cst_88 : f32 to vector<8x128xf32>
    %263 = arith.addf %262, %261 : vector<8x128xf32>
    %264 = arith.divf %262, %263 : vector<8x128xf32>
    %265 = arith.mulf %256, %233 : vector<8x128xf32>
    %266 = arith.mulf %250, %258 : vector<8x128xf32>
    %267 = arith.addf %265, %266 : vector<8x128xf32>
    %268 = math.tanh %267 : vector<8x128xf32>
    %269 = arith.mulf %264, %268 : vector<8x128xf32>
    %270 = arith.index_cast %239 : i32 to index
    %c0_89 = arith.constant 0 : index
    %271 = vector.load %arg12[%270, %c0_89] : memref<32x128xf32, #tpu.memory_space<vmem>>, vector<8x128xf32>
    tpu.vector_store %arg12[%270, %c0_89], %269 {strides = array<i32>} : memref<32x128xf32, #tpu.memory_space<vmem>>, vector<8x128xf32>,
    %c3_i32_90 = arith.constant 3 : i32
    %c8_i32_91 = arith.constant 8 : i32
    %272 = arith.muli %c3_i32_90, %c8_i32_91 : i32
    %273 = tpu.assume_multiple %272, 8 : i32
    %274 = arith.index_cast %273 : i32 to index
    %c0_92 = arith.constant 0 : index
    %275 = vector.load %arg17[%274, %c0_92] : memref<32x512xf32, #tpu.memory_space<vmem>>, vector<8x512xf32>
    %276 = arith.truncf %269 : vector<8x128xf32> to vector<8x128xbf16>
    %cst_93 = arith.constant dense<0.000000e+00> : vector<8x512xf32>
    %277 = tpu.matmul %276, %165, %cst_93 {dimension_numbers = #tpu.dot_dimension_numbers<[1], [0], [0], [1], [0, 0, 1, 1], [], []>} : vector<8x128xbf16>, vector<128x512xbf16>, vector<8x512xf32> -> vector<8x512xf32>
    %278 = arith.addf %275, %277 : vector<8x512xf32>
    %279 = vector.extract_strided_slice %278 {offsets = [0, 0], sizes = [8, 128], strides = [1, 1]} : vector<8x512xf32> to vector<8x128xf32>
    %280 = arith.negf %279 : vector<8x128xf32>
    %281 = math.exp %280 : vector<8x128xf32>
    %cst_94 = arith.constant 1.000000e+00 : f32
    %282 = vector.broadcast %cst_94 : f32 to vector<8x128xf32>
    %283 = arith.addf %282, %281 : vector<8x128xf32>
    %284 = arith.divf %282, %283 : vector<8x128xf32>
    %285 = vector.extract_strided_slice %278 {offsets = [0, 128], sizes = [8, 128], strides = [1, 1]} : vector<8x512xf32> to vector<8x128xf32>
    %286 = arith.negf %285 : vector<8x128xf32>
    %287 = math.exp %286 : vector<8x128xf32>
    %cst_95 = arith.constant 1.000000e+00 : f32
    %288 = vector.broadcast %cst_95 : f32 to vector<8x128xf32>
    %289 = arith.addf %288, %287 : vector<8x128xf32>
    %290 = arith.divf %288, %289 : vector<8x128xf32>
    %291 = vector.extract_strided_slice %278 {offsets = [0, 256], sizes = [8, 128], strides = [1, 1]} : vector<8x512xf32> to vector<8x128xf32>
    %292 = math.tanh %291 : vector<8x128xf32>
    %293 = vector.extract_strided_slice %278 {offsets = [0, 384], sizes = [8, 128], strides = [1, 1]} : vector<8x512xf32> to vector<8x128xf32>
    %294 = arith.negf %293 : vector<8x128xf32>
    %295 = math.exp %294 : vector<8x128xf32>
    %cst_96 = arith.constant 1.000000e+00 : f32
    %296 = vector.broadcast %cst_96 : f32 to vector<8x128xf32>
    %297 = arith.addf %296, %295 : vector<8x128xf32>
    %298 = arith.divf %296, %297 : vector<8x128xf32>
    %299 = arith.mulf %290, %267 : vector<8x128xf32>
    %300 = arith.mulf %284, %292 : vector<8x128xf32>
    %301 = arith.addf %299, %300 : vector<8x128xf32>
    %302 = math.tanh %301 : vector<8x128xf32>
    %303 = arith.mulf %298, %302 : vector<8x128xf32>
    %304 = arith.index_cast %273 : i32 to index
    %c0_97 = arith.constant 0 : index
    %305 = vector.load %arg12[%304, %c0_97] : memref<32x128xf32, #tpu.memory_space<vmem>>, vector<8x128xf32>
    tpu.vector_store %arg12[%304, %c0_97], %303 {strides = array<i32>} : memref<32x128xf32, #tpu.memory_space<vmem>>, vector<8x128xf32>,
    %c4_i32_98 = arith.constant 4 : i32
    %c1_99 = arith.constant 1 : index
    %c0_100 = arith.constant 0 : index
    %c0_101 = arith.constant 0 : index
    %306 = vector.load %arg19[%c1_99, %c0_100, %c0_101] : memref<2x8x128xf32, #tpu.memory_space<vmem>>, vector<1x8x128xf32>
    %307 = vector.shape_cast %306 : vector<1x8x128xf32> to vector<8x128xf32>
    %308 = vector.shape_cast %303 : vector<8x128xf32> to vector<1x8x128xf32>
    tpu.vector_store %arg19[%c1_99, %c0_100, %c0_101], %308 {strides = array<i32>} : memref<2x8x128xf32, #tpu.memory_space<vmem>>, vector<1x8x128xf32>,
    %c1_102 = arith.constant 1 : index
    %c0_103 = arith.constant 0 : index
    %c0_104 = arith.constant 0 : index
    %309 = vector.load %arg20[%c1_102, %c0_103, %c0_104] : memref<2x8x128xf32, #tpu.memory_space<vmem>>, vector<1x8x128xf32>
    %310 = vector.shape_cast %309 : vector<1x8x128xf32> to vector<8x128xf32>
    %311 = vector.shape_cast %301 : vector<8x128xf32> to vector<1x8x128xf32>
    tpu.vector_store %arg20[%c1_102, %c0_103, %c0_104], %311 {strides = array<i32>} : memref<2x8x128xf32, #tpu.memory_space<vmem>>, vector<1x8x128xf32>,
    %c1_i32_105 = arith.constant 1 : i32
    %312 = arith.cmpi eq, %arg0, %c1_i32_105 : i32
    %313 = arith.extui %312 : i1 to i32
    %c0_i32_106 = arith.constant 0 : i32
    %314 = arith.cmpi ne, %313, %c0_i32_106 : i32
    scf.if %314 {
      %c0_107 = arith.constant 0 : index
      %c0_108 = arith.constant 0 : index
      %c0_109 = arith.constant 0 : index
      %315 = vector.load %arg19[%c0_107, %c0_108, %c0_109] : memref<2x8x128xf32, #tpu.memory_space<vmem>>, vector<1x8x128xf32>
      %316 = vector.shape_cast %315 : vector<1x8x128xf32> to vector<8x128xf32>
      %c0_110 = arith.constant 0 : index
      %c0_111 = arith.constant 0 : index
      %317 = vector.load %arg13[%c0_110, %c0_111] : memref<8x128xf32, #tpu.memory_space<vmem>>, vector<8x128xf32>
      tpu.vector_store %arg13[%c0_110, %c0_111], %316 {strides = array<i32>} : memref<8x128xf32, #tpu.memory_space<vmem>>, vector<8x128xf32>,
      %c0_112 = arith.constant 0 : index
      %c0_113 = arith.constant 0 : index
      %c0_114 = arith.constant 0 : index
      %318 = vector.load %arg20[%c0_112, %c0_113, %c0_114] : memref<2x8x128xf32, #tpu.memory_space<vmem>>, vector<1x8x128xf32>
      %319 = vector.shape_cast %318 : vector<1x8x128xf32> to vector<8x128xf32>
      %c0_115 = arith.constant 0 : index
      %c0_116 = arith.constant 0 : index
      %320 = vector.load %arg14[%c0_115, %c0_116] : memref<8x128xf32, #tpu.memory_space<vmem>>, vector<8x128xf32>
      tpu.vector_store %arg14[%c0_115, %c0_116], %319 {strides = array<i32>} : memref<8x128xf32, #tpu.memory_space<vmem>>, vector<8x128xf32>,
      %c1_117 = arith.constant 1 : index
      %c0_118 = arith.constant 0 : index
      %c0_119 = arith.constant 0 : index
      %321 = vector.load %arg19[%c1_117, %c0_118, %c0_119] : memref<2x8x128xf32, #tpu.memory_space<vmem>>, vector<1x8x128xf32>
      %322 = vector.shape_cast %321 : vector<1x8x128xf32> to vector<8x128xf32>
      %c0_120 = arith.constant 0 : index
      %c0_121 = arith.constant 0 : index
      %323 = vector.load %arg15[%c0_120, %c0_121] : memref<8x128xf32, #tpu.memory_space<vmem>>, vector<8x128xf32>
      tpu.vector_store %arg15[%c0_120, %c0_121], %322 {strides = array<i32>} : memref<8x128xf32, #tpu.memory_space<vmem>>, vector<8x128xf32>,
      %c1_122 = arith.constant 1 : index
      %c0_123 = arith.constant 0 : index
      %c0_124 = arith.constant 0 : index
      %324 = vector.load %arg20[%c1_122, %c0_123, %c0_124] : memref<2x8x128xf32, #tpu.memory_space<vmem>>, vector<1x8x128xf32>
      %325 = vector.shape_cast %324 : vector<1x8x128xf32> to vector<8x128xf32>
      %c0_125 = arith.constant 0 : index
      %c0_126 = arith.constant 0 : index
      %326 = vector.load %arg16[%c0_125, %c0_126] : memref<8x128xf32, #tpu.memory_space<vmem>>, vector<8x128xf32>
      tpu.vector_store %arg16[%c0_125, %c0_126], %325 {strides = array<i32>} : memref<8x128xf32, #tpu.memory_space<vmem>>, vector<8x128xf32>,
    } else {
    }
    return
  }
  func.func @transform_0(%arg0: i32) -> (i32, i32) {
    %c0_i32 = arith.constant 0 : i32
    %c0_i32_0 = arith.constant 0 : i32
    return %arg0, %c0_i32 : i32, i32
  }
  func.func @transform_1(%arg0: i32) -> (i32, i32) {
    %c0_i32 = arith.constant 0 : i32
    %c0_i32_0 = arith.constant 0 : i32
    %c0_i32_1 = arith.constant 0 : i32
    return %c0_i32, %c0_i32_0 : i32, i32
  }
  func.func @transform_2(%arg0: i32) -> (i32, i32) {
    %c0_i32 = arith.constant 0 : i32
    %c0_i32_0 = arith.constant 0 : i32
    %c0_i32_1 = arith.constant 0 : i32
    return %c0_i32, %c0_i32_0 : i32, i32
  }
  func.func @transform_3(%arg0: i32) -> (i32, i32) {
    %c0_i32 = arith.constant 0 : i32
    %c0_i32_0 = arith.constant 0 : i32
    %c0_i32_1 = arith.constant 0 : i32
    return %c0_i32, %c0_i32_0 : i32, i32
  }
  func.func @transform_4(%arg0: i32) -> (i32, i32) {
    %c0_i32 = arith.constant 0 : i32
    %c0_i32_0 = arith.constant 0 : i32
    %c0_i32_1 = arith.constant 0 : i32
    return %c0_i32, %c0_i32_0 : i32, i32
  }
  func.func @transform_5(%arg0: i32) -> (i32, i32) {
    %c0_i32 = arith.constant 0 : i32
    %c0_i32_0 = arith.constant 0 : i32
    %c0_i32_1 = arith.constant 0 : i32
    return %c0_i32, %c0_i32_0 : i32, i32
  }
  func.func @transform_6(%arg0: i32) -> (i32, i32) {
    %c0_i32 = arith.constant 0 : i32
    %c0_i32_0 = arith.constant 0 : i32
    %c0_i32_1 = arith.constant 0 : i32
    return %c0_i32, %c0_i32_0 : i32, i32
  }
  func.func @transform_7(%arg0: i32) -> (i32, i32) {
    %c0_i32 = arith.constant 0 : i32
    %c0_i32_0 = arith.constant 0 : i32
    %c0_i32_1 = arith.constant 0 : i32
    return %c0_i32, %c0_i32_0 : i32, i32
  }
  func.func @transform_8(%arg0: i32) -> (i32, i32) {
    %c0_i32 = arith.constant 0 : i32
    %c0_i32_0 = arith.constant 0 : i32
    %c0_i32_1 = arith.constant 0 : i32
    return %c0_i32, %c0_i32_0 : i32, i32
  }
  func.func @transform_9(%arg0: i32) -> (i32, i32) {
    %c0_i32 = arith.constant 0 : i32
    %c0_i32_0 = arith.constant 0 : i32
    %c0_i32_1 = arith.constant 0 : i32
    return %c0_i32, %c0_i32_0 : i32, i32
  }
  func.func @transform_10(%arg0: i32) -> (i32, i32) {
    %c0_i32 = arith.constant 0 : i32
    %c0_i32_0 = arith.constant 0 : i32
    %c0_i32_1 = arith.constant 0 : i32
    return %c0_i32, %c0_i32_0 : i32, i32
  }
  func.func @transform_11(%arg0: i32) -> (i32, i32) {
    %c0_i32 = arith.constant 0 : i32
    %c0_i32_0 = arith.constant 0 : i32
    return %arg0, %c0_i32 : i32, i32
  }
  func.func @transform_12(%arg0: i32) -> (i32, i32) {
    %c0_i32 = arith.constant 0 : i32
    %c0_i32_0 = arith.constant 0 : i32
    %c0_i32_1 = arith.constant 0 : i32
    return %c0_i32, %c0_i32_0 : i32, i32
  }
  func.func @transform_13(%arg0: i32) -> (i32, i32) {
    %c0_i32 = arith.constant 0 : i32
    %c0_i32_0 = arith.constant 0 : i32
    %c0_i32_1 = arith.constant 0 : i32
    return %c0_i32, %c0_i32_0 : i32, i32
  }
  func.func @transform_14(%arg0: i32) -> (i32, i32) {
    %c0_i32 = arith.constant 0 : i32
    %c0_i32_0 = arith.constant 0 : i32
    %c0_i32_1 = arith.constant 0 : i32
    return %c0_i32, %c0_i32_0 : i32, i32
  }
  func.func @transform_15(%arg0: i32) -> (i32, i32) {
    %c0_i32 = arith.constant 0 : i32
    %c0_i32_0 = arith.constant 0 : i32
    %c0_i32_1 = arith.constant 0 : i32
    return %c0_i32, %c0_i32_0 : i32, i32
  }
}

</mosaic_0001>

<bundles_post_ra>
// kernel: tpu_custom_call.1
= control target key start
LH: loop header
LB: loop body
LE: loop exit
PB: predicated region body
PF: predicated region fallthrough
CT: control target
= control target key end

     0   :  { %s5476_s0 = inlined_call_operand.hbm [shape: bf16[64,128], index: 0, kind: input, shape index: {}]   ;;  %s5477_s1 = inlined_call_operand.hbm [shape: bf16[128,512], index: 1, kind: input, shape index: {}]   ;;  %s5478_s2 = inlined_call_operand.hbm [shape: bf16[128,512], index: 2, kind: input, shape index: {}]   ;;  %s5479_s3 = inlined_call_operand.hbm [shape: f32[1,512], index: 3, kind: input, shape index: {}]   ;;  %s5480_s4 = inlined_call_operand.hbm [shape: f32[8,128], index: 4, kind: input, shape index: {}]   ;;  %s5481_s5 = inlined_call_operand.hbm [shape: f32[8,128], index: 5, kind: input, shape index: {}]   ;;  %s5482_s6 = inlined_call_operand.hbm [shape: bf16[128,512], index: 6, kind: input, shape index: {}]   ;;  %s5483_s7 = inlined_call_operand.hbm [shape: bf16[128,512], index: 7, kind: input, shape index: {}]   ;;  %s5484_s8 = inlined_call_operand.hbm [shape: f32[1,512], index: 8, kind: input, shape index: {}]   ;;  %s5485_s9 = inlined_call_operand.vmem [shape: f32[8,128], index: 9, kind: input, shape index: {}]   ;;  %s5486_s10 = inlined_call_operand.hbm [shape: f32[8,128], index: 10, kind: input, shape index: {}]   ;;  %s5487_s11 = inlined_call_operand.hbm [shape: f32[64,128], index: 11, kind: output, shape index: {0}]   ;;  %s5488_s12 = inlined_call_operand.hbm [shape: f32[8,128], index: 12, kind: output, shape index: {1}]   ;;  %s5489_s13 = inlined_call_operand.hbm [shape: f32[8,128], index: 13, kind: output, shape index: {2}]   ;;  %s5490_s14 = inlined_call_operand.hbm [shape: f32[8,128], index: 14, kind: output, shape index: {3}]   ;;  %s5491_s15 = inlined_call_operand.hbm [shape: f32[8,128], index: 15, kind: output, shape index: {4}]  }
   0x1   :  { %5497 = sst [smem:[#allocation49_spill]] %s5476_s0 }
   0x2   :  { %5498 = sst [smem:[#allocation50_spill]] %s5477_s1 }
   0x3   :  { %5499 = sst [smem:[#allocation51_spill]] %s5478_s2 }
   0x4   :  { %5500 = sst [smem:[#allocation52_spill]] %s5479_s3 }
   0x5   :  { %5501 = sst [smem:[#allocation53_spill]] %s5480_s4 }
   0x6   :  { %5502 = sst [smem:[#allocation54_spill]] %s5481_s5 }
   0x7   :  { %5503 = sst [smem:[#allocation55_spill]] %s5487_s11 }
   0x8   :  { %5504 = sst [smem:[#allocation56_spill]] %s5488_s12 }
   0x9   :  { %5505 = sst [smem:[#allocation57_spill]] %s5489_s13 }
   0xa   :  { %5506 = sst [smem:[#allocation58_spill]] %s5490_s14 }
   0xb   :  { %5507 = sst [smem:[#allocation59_spill]] %s5491_s15 }
   0xc   :  { %21 = vsyncpa [#allocation7], 0 }
   0xd   :  { %23 = vsyncpa [#allocation7 + $0x1], 0 }
   0xe   :  { %24 = vsyncpa [#allocation10], 0 }
   0xf   :  { %25 = vsyncpa [#allocation13], 0 }
  0x10   :  { %26 = vsyncpa [#allocation16], 0 }
  0x11   :  { %27 = vsyncpa [#allocation19], 0 }
  0x12   :  { %28 = vsyncpa [#allocation22], 0 }
  0x13   :  { %29 = vsyncpa [#allocation8], 0 }
  0x14   :  { %31 = vsyncpa [#allocation8 + $0x1], 0 }
  0x15   :  { %32 = vsyncpa [#allocation25], 0 }
  0x16   :  { %33 = vsyncpa [#allocation28], 0  ;;  %s4594_s18 = smov 0   ;;  %s4596_s19 = smov 0  }
  0x17   :  { %s4598_s20 = smov 0   ;;  %s4600_s21 = smov 0  }
  0x18 LB: > { %s5508_s1 = sld [smem:[#allocation50_spill]]  ;;  %s4618_s25 = sadd.s32 4294967295, %s4493_s21   ;;  %s4493_s21 = sphi %s4600_s21, %s5577_s21   ;;  %s4489_s20 = sphi %s4598_s20, %s5576_s20   ;;  %s4485_s19 = sphi %s4596_s19, %s5575_s19   ;;  %s4481_s18 = sphi %s4594_s18, %s5574_s18  }
  0x19   : > { %p2968_p0 = scmp.ge.s32.totalorder %s4493_s21, 1  ;;  %p60_p1 = scmp.eq.s32.totalorder %s4618_s25, 0 }
  0x1a   : > { %p390_p2 = scmp.lt.s32.totalorder %s4493_s21, 3  ;;  %s4495_s27 = smov [#allocation9]  }
  0x1b   : > { %s403_s28 = sshll.u32 %s4495_s27, 4  ;;  %s5510_s3 = sld [smem:[#allocation52_spill]]  ;;  %s404_s28 = int_to_ptr.vmem [resolvable:$true] %s403_s28 }
  0x1c   : > { %p4624_p4 = pnand %p2968_p0, %p390_p2  ;;  %s5512_s5 = sld [smem:[#allocation54_spill]] }
  0x1d   : > { %s4497_s13 = smov 256   ;;  %s4498_s11 = smov 16  }
  0x1e   : > { %s401_s24 = sshll.u32 %s5508_s1, 4  ;;  %p3744_p5 = pneg %p4624_p4  ;;  %s402_s24 = int_to_ptr.hbm [resolvable:$true] %s401_s24 }
  0x1f   : > { %s4496_s1 = smov [#allocation12]   ;;  %s4499_s22 = smov [#allocation15]  }
  0x20   : > { %p4636_p7 = pnand %p3744_p5, %p60_p1  ;;  %s432_s15 = sshll.u32 %s4496_s1, 4  ;;  %s433_s15 = int_to_ptr.vmem [resolvable:$true] %s432_s15 }
  0x21   : > { %s430_s16 = sshll.u32 %s5510_s3, 4  ;;  %s479_s3 = sshll.u32 %s5483_s7, 4  ;;  %s431_s16 = int_to_ptr.hbm [resolvable:$true] %s430_s16  ;;  %s480_s3 = int_to_ptr.hbm [resolvable:$true] %s479_s3 }
  0x22   : > { %s454_s27 = sshll.u32 %s5512_s5, 4  ;;  %s456_s23 = sshll.u32 %s4499_s22, 4  ;;  %s455_s27 = int_to_ptr.hbm [resolvable:$true] %s454_s27  ;;  %s457_s23 = int_to_ptr.vmem [resolvable:$true] %s456_s23 }
  0x23   : > { %3747 = dma.hbm_to_vmem [thread:$0]  (!%p4636_p7), %s402_s24, 4096, %s404_s28, [#allocation10], %s4497_s13, %s4497_s13, %s4498_s11  }
  0x24   : > { %3753 = dma.hbm_to_vmem [thread:$0]  (!%p4636_p7), %s431_s16, 64, %s433_s15, [#allocation13]  }
  0x25   : > { %3759 = dma.hbm_to_vmem [thread:$0]  (!%p4636_p7), %s455_s27, 128, %s457_s23, [#allocation16]  }
  0x26   : > { %s4500_s1 = smov [#allocation18]   ;;  %s5513_s2 = sld [smem:[#allocation51_spill]] }
  0x27   : > { %s481_s5 = sshll.u32 %s4500_s1, 4  ;;  %s5514_s4 = sld [smem:[#allocation53_spill]]  ;;  %s482_s5 = int_to_ptr.vmem [resolvable:$true] %s481_s5 }
  0x28   : > { %3765 = dma.hbm_to_vmem [thread:$0]  (!%p4636_p7), %s480_s3, 4096, %s482_s5, [#allocation19], %s4497_s13, %s4497_s13, %s4498_s11  }
  0x29   : > { %s4501_s29 = smov [#allocation11]   ;;  %s4502_s12 = smov [#allocation14]  }
  0x2a   : > { %s417_s27 = sshll.u32 %s4501_s29, 4  ;;  %s444_s14 = sshll.u32 %s4502_s12, 4  ;;  %s418_s27 = int_to_ptr.vmem [resolvable:$true] %s417_s27  ;;  %s445_s14 = int_to_ptr.vmem [resolvable:$true] %s444_s14 }
  0x2b   : > { %s465_s3 = sshll.u32 %s5482_s6, 4  ;;  %s494_s1 = sshll.u32 %s5484_s8, 4  ;;  %s466_s3 = int_to_ptr.hbm [resolvable:$true] %s465_s3  ;;  %s495_s1 = int_to_ptr.hbm [resolvable:$true] %s494_s1 }
  0x2c   : > { %s415_s24 = sshll.u32 %s5513_s2, 4  ;;  %s4503_s15 = smov [#allocation17]   ;;  %s416_s24 = int_to_ptr.hbm [resolvable:$true] %s415_s24 }
  0x2d   : > { %s442_s16 = sshll.u32 %s5514_s4, 4  ;;  %s4504_s28 = smov [#allocation20]   ;;  %s443_s16 = int_to_ptr.hbm [resolvable:$true] %s442_s16 }
  0x2e   : > { %3750 = dma.hbm_to_vmem [thread:$0]  (!%p4636_p7), %s416_s24, 4096, %s418_s27, [#allocation10], %s4497_s13, %s4497_s13, %s4498_s11  }
  0x2f   : > { %3756 = dma.hbm_to_vmem [thread:$0]  (!%p4636_p7), %s443_s16, 128, %s445_s14, [#allocation13]  }
  0x30   : > { %s467_s24 = sshll.u32 %s4503_s15, 4  ;;  %s496_s16 = sshll.u32 %s4504_s28, 4  ;;  %s468_s24 = int_to_ptr.vmem [resolvable:$true] %s467_s24  ;;  %s497_s16 = int_to_ptr.vmem [resolvable:$true] %s496_s16 }
  0x31   : > { %3762 = dma.hbm_to_vmem [thread:$0]  (!%p4636_p7), %s466_s3, 4096, %s468_s24, [#allocation16], %s4497_s13, %s4497_s13, %s4498_s11  }
  0x32   : > { %s509_s12 = sshll.u32 %s5486_s10, 4  ;;  %s4505_s14 = smov [#allocation21]   ;;  %s510_s12 = int_to_ptr.hbm [resolvable:$true] %s509_s12 }
  0x33   : > { %3768 = dma.hbm_to_vmem [thread:$0]  (!%p4636_p7), %s495_s1, 64, %s497_s16, [#allocation19]  }
  0x34   : > { %s511_s30 = sshll.u32 %s4505_s14, 4  ;;  %s2967_s11 = sadd.s32 4294967294, %s4493_s21   ;;  %s512_s30 = int_to_ptr.vmem [resolvable:$true] %s511_s30 }
  0x35   : > { %3771 = dma.hbm_to_vmem [thread:$0]  (!%p4636_p7), %s510_s12, 128, %s512_s30, [#allocation22]  }
  0x36   : > { %s4693_s13 = sadd.s32 1, %s4493_s21   ;;  %s46_s22 = sadd.s32 1, %s4489_s20 }
  0x37   : > { %s43_s3 = ssub.s32 %s4493_s21, %s4693_s13  ;;  %p53_p8 = scmp.ne.s32.totalorder %s4489_s20, %s4485_s19 }
  0x38   : > { %p44_p9 = scmp.eq.s32.totalorder %s43_s3, 0  ;;  %p54_p10 = scmp.eq.s32.totalorder %s4493_s21, 0 }
  0x39   : > { %p59_p11 = scmp.ne.s32.totalorder %s4485_s19, %s4481_s18  ;;  %p5493_p12 = scmp.eq.s32.totalorder %s4618_s25, 1 }
  0x3a   : > { %s4705_s5 = scalar_select %p44_p9, %s4489_s20, %s46_s22  }
  0x3b   : > { %p4707_p13 = por %p54_p10, %p53_p8  ;;  %p4713_p0 = por %p60_p1, %p59_p11 }
  0x3c   : > { %p4719_p2 = por %p5493_p12, %p53_p8  ;;  %p299_p5 = scmp.eq.s32.totalorder %s2967_s11, 1 }
  0x3d   : > { %p3789_p7 = scmp.lt.s32.totalorder %s4493_s21, 2  ;;  %s522_s15 = sand.u32 1, %s4489_s20  }
  0x3e   : > { %p4725_p9 = por %p299_p5, %p59_p11  ;;  %s2979_s28 = sshll.u32 %s522_s15, 4 }
  0x3f   : > { %s3556_s16 = sshll.u32 %s4493_s21, 4  ;;  %s5519_s0 = sld [smem:[#allocation49_spill]] }
  0x40   : > { %s526_s30 = scalar_lea.vmem [#allocation6], %s2979_s28  ;;  %p4735_p8 = pnand %p3789_p7, %p4707_p13 }
  0x41   : > { %s534_s22 = sshll.u32 %s526_s30, 4  ;;  %s523_s3 = scalar_lea.sflag [#allocation7], %s522_s15  ;;  %s535_s22 = int_to_ptr.vmem [resolvable:$true] %s534_s22 }
  0x42   : > { %p4261_p11 = pneg %p4735_p8 }
  0x45   : > { %s531_s12 = scalar_lea.hbm %s5519_s0, %s3556_s16  ;;  %s4264_s29 = scalar_lea.hbm %s5519_s0, 32 }
  0x46   : > { %s532_s14 = sshll.u32 %s531_s12, 4  ;;  %s533_s14 = int_to_ptr.hbm [resolvable:$true] %s532_s14 }
  0x47   : > { %s4257_s2 = sshra.s32 %s533_s14, 4  ;;  %s4258_s2 = int_to_ptr.hbm [resolvable:$true] %s4257_s2 }
  0x48   : > { %s4259_s4 = scalar_lea.hbm %s4258_s2, 16  ;;  %p4265_p13 = scmp.lt.s32.totalorder %s4258_s2, %s5519_s0 }
  0x49   : > { %p4260_p10 = scmp.ne.s32.totalorder %s4258_s2, %s4259_s4  ;;  %p4266_p7 = scmp.lt.s32.totalorder %s4264_s29, %s4259_s4 }
  0x4b   : > { %p4262_p5 = pnand %p4261_p11, %p4260_p10  ;;  %p4267_p12 = por %p4266_p7, %p4265_p13 }
  0x4d   : > { %p4263_p6 = pneg %p4262_p5 }
  0x4f   : > { %p4268_p3 = pnand %p4267_p12, %p4263_p6 }
  0x51   : > { %4271 = shalt.err (!%p4268_p3)
}
  0x52   : > { %s4506_s15 = smov 64   ;;  %s4507_s12 = smov 4  }
  0x53   : > { %3775 = dma.hbm_to_vmem [thread:$0]  (!%p4735_p8), %s533_s14, 256, %s535_s22, %s523_s3, %s4506_s15, %s4506_s15, %s4507_s12  }
  0x54   : > { %546 = sbr.rel (%p4624_p4) target bundleno = 1623 (0x657), region = 64 }
  0x59   : > { %s4752_s30 = sand.u32 1, %s4485_s19  }
  0x5a   : > { %s2983_s16 = sshll.u32 %s4752_s30, 4  ;;  %s549_s2 = scalar_lea.sflag [#allocation7], %s4752_s30 }
  0x5b   : > { %s4756_s4 = scalar_lea.vmem [#allocation6], %s2983_s16 }
  0x5c   : > { %4444 = dma.done.wait (%p4713_p0), %s549_s2, 256  }
  0x5d   : > { %4446 = vsyncadd (%p4713_p0), %s549_s2, 4294967040 }
  0x5e   : > { %4448 = dma.done.wait (%p60_p1), [#allocation10], 8192  }
  0x5f   : > { %4450 = vsyncadd (%p60_p1), [#allocation10], 4294959104 }
  0x60   : > { %4452 = dma.done.wait (%p60_p1), [#allocation13], 192  }
  0x61   : > { %4454 = vsyncadd (%p60_p1), [#allocation13], 4294967104 }
  0x62   : > { %4456 = dma.done.wait (%p60_p1), [#allocation16], 4224  }
  0x63   : > { %4458 = vsyncadd (%p60_p1), [#allocation16], 4294963072 }
  0x64   : > { %4460 = dma.done.wait (%p60_p1), [#allocation19], 4160  }
  0x65   : > { %4462 = vsyncadd (%p60_p1), [#allocation19], 4294963136 }
  0x66   : > { %4464 = dma.done.wait (%p60_p1), [#allocation22], 128  }
  0x67   : > { %4466 = vsyncadd (%p60_p1), [#allocation22], 4294967168  ;;  %s2993_s26 = sshll.u32 %s4752_s30, 5  ;;  %p5521_p3 = scmp.ne.s32.totalorder %s4618_s25, 0 }
  0x68   : > { %s4783_s17 = scalar_lea.vmem [#allocation23], %s2993_s26 }
  0x69   : > { %650 = sbr.rel (%p5521_p3) target bundleno = 115 (0x73), region = 108 }
  0x6e   : > { %v651_v0 = vld [vmem:[#allocation14] sm:$0xff]  ;;  %v653_v1 = vld [vmem:[#allocation15] sm:$0xff]  ;;  %v658_v3 = vld [vmem:[#allocation21] sm:$0xff] }
  0x6f   : > { %v655_v2 = vld [vmem:[%s5485_s9] sm:$0xff]  ;;  %652 = vst [vmem:[#allocation4] sm:$0xff] %v651_v0 }
  0x70   : > { %654 = vst [vmem:[#allocation5 + $0x8] sm:$0xff] %v653_v1 }
  0x71   : > { %657 = vst [vmem:[#allocation4 + $0x8] sm:$0xff] %v655_v2 }
  0x72   : > { %660 = vst [vmem:[#allocation5] sm:$0xff] %v658_v3 }
  0x73 PF: > { %v3117_v4 = vld [vmem:[#allocation9 + $0xe0] sm:$0xf]  ;;  %v3589_v5 = vld [vmem:[#allocation9 + $0xec] sm:$0xf0]  ;;  %v3587_v6 = vld [vmem:[#allocation9 + $0xe4] sm:$0xf] }
  0x74   : > { %v3118_v7 = vor.u32 %v3589_v5, %v3117_v4  ;;  %v3119_v8 = vld [vmem:[#allocation9 + $0xf0] sm:$0xf0]  ;;  %v3125_v9 = vld [vmem:[#allocation9 + $0xe8] sm:$0xf]  ;;  %v3590_v10 = vld [vmem:[#allocation9 + $0xf4] sm:$0xf0] }
  0x75   : > { %v3122_v11 = vor.u32 %v3587_v6, %v3119_v8  ;;  %v3126_v12 = vor.u32 %v3590_v10, %v3125_v9  ;;  %v3588_v13 = vld [vmem:[#allocation9 + $0xec] sm:$0xf]  ;;  %v3127_v14 = vld [vmem:[#allocation9 + $0xf8] sm:$0xf0]  ;;  %v3101_v15 = vld [vmem:[#allocation9 + $0xc0] sm:$0xf] }
  0x76   : > { %879 = vmatpush.bf16.msra.mxu0 %v3118_v7  ;;  %v3130_v16 = vor.u32 %v3588_v13, %v3127_v14  ;;  %v3585_v17 = vld [vmem:[#allocation9 + $0xcc] sm:$0xf0]  ;;  %v3583_v18 = vld [vmem:[#allocation9 + $0xc4] sm:$0xf]  ;;  %v3103_v19 = vld [vmem:[#allocation9 + $0xd0] sm:$0xf0] }
  0x77   : > { %898 = vmatpush.bf16.msra.mxu1 %v3122_v11  ;;  %917 = vmatpush.bf16.msra.mxu2 %v3126_v12  ;;  %v3102_v20 = vor.u32 %v3585_v17, %v3101_v15  ;;  %v3106_v21 = vor.u32 %v3583_v18, %v3103_v19  ;;  %v3109_v22 = vld [vmem:[#allocation9 + $0xc8] sm:$0xf]  ;;  %v3586_v23 = vld [vmem:[#allocation9 + $0xd4] sm:$0xf0]  ;;  %v3584_v24 = vld [vmem:[#allocation9 + $0xcc] sm:$0xf] }
  0x78   : > { %936 = vmatpush.bf16.msra.mxu3 %v3130_v16  ;;  %v3110_v25 = vor.u32 %v3586_v23, %v3109_v22  ;;  %v3111_v26 = vld [vmem:[#allocation9 + $0xd8] sm:$0xf0]  ;;  %v3085_v27 = vld [vmem:[#allocation9 + $0xa0] sm:$0xf]  ;;  %v3581_v28 = vld [vmem:[#allocation9 + $0xac] sm:$0xf0] }
  0x79   : > { %v3114_v29 = vor.u32 %v3584_v24, %v3111_v26  ;;  %v3579_v30 = vld [vmem:[#allocation9 + $0xa4] sm:$0xf]  ;;  %v3087_v31 = vld [vmem:[#allocation9 + $0xb0] sm:$0xf0]  ;;  %v3093_v32 = vld [vmem:[#allocation9 + $0xa8] sm:$0xf]  ;;  %v3086_v33 = vor.u32 %v3581_v28, %v3085_v27 }
  0x7a   : > { %880 = vmatpush.bf16.msra.mxu0 %v3102_v20  ;;  %v3582_v34 = vld [vmem:[#allocation9 + $0xb4] sm:$0xf0]  ;;  %v3580_v35 = vld [vmem:[#allocation9 + $0xac] sm:$0xf]  ;;  %v3095_v36 = vld [vmem:[#allocation9 + $0xb8] sm:$0xf0]  ;;  %v3090_v37 = vor.u32 %v3579_v30, %v3087_v31 }
  0x7b   : > { %899 = vmatpush.bf16.msra.mxu1 %v3106_v21  ;;  %918 = vmatpush.bf16.msra.mxu2 %v3110_v25  ;;  %v3094_v38 = vor.u32 %v3582_v34, %v3093_v32  ;;  %v3069_v39 = vld [vmem:[#allocation9 + $0x80] sm:$0xf]  ;;  %v3577_v40 = vld [vmem:[#allocation9 + $0x8c] sm:$0xf0]  ;;  %v3575_v41 = vld [vmem:[#allocation9 + $0x84] sm:$0xf]  ;;  %v3098_v42 = vor.u32 %v3580_v35, %v3095_v36 }
  0x7c   : > { %937 = vmatpush.bf16.msra.mxu3 %v3114_v29  ;;  %v3071_v43 = vld [vmem:[#allocation9 + $0x90] sm:$0xf0]  ;;  %v3077_v44 = vld [vmem:[#allocation9 + $0x88] sm:$0xf]  ;;  %v3578_v45 = vld [vmem:[#allocation9 + $0x94] sm:$0xf0]  ;;  %v3070_v48 = vor.u32 %v3577_v40, %v3069_v39 }
  0x7d   : > { %v3576_v46 = vld [vmem:[#allocation9 + $0x8c] sm:$0xf]  ;;  %v3079_v47 = vld [vmem:[#allocation9 + $0x98] sm:$0xf0]  ;;  %v3074_v49 = vor.u32 %v3575_v41, %v3071_v43  ;;  %v3078_v50 = vor.u32 %v3578_v45, %v3077_v44  ;;  %v3053_v51 = vld [vmem:[#allocation9 + $0x60] sm:$0xf] }
  0x7e   : > { %881 = vmatpush.bf16.msra.mxu0 %v3086_v33  ;;  %v3573_v52 = vld [vmem:[#allocation9 + $0x6c] sm:$0xf0]  ;;  %v3571_v53 = vld [vmem:[#allocation9 + $0x64] sm:$0xf]  ;;  %v3082_v54 = vor.u32 %v3576_v46, %v3079_v47  ;;  %v3055_v55 = vld [vmem:[#allocation9 + $0x70] sm:$0xf0] }
  0x7f   : > { %900 = vmatpush.bf16.msra.mxu1 %v3090_v37  ;;  %919 = vmatpush.bf16.msra.mxu2 %v3094_v38  ;;  %v3061_v56 = vld [vmem:[#allocation9 + $0x68] sm:$0xf]  ;;  %v3574_v57 = vld [vmem:[#allocation9 + $0x74] sm:$0xf0]  ;;  %v3572_v58 = vld [vmem:[#allocation9 + $0x6c] sm:$0xf]  ;;  %v3054_v60 = vor.u32 %v3573_v52, %v3053_v51  ;;  %v3058_v61 = vor.u32 %v3571_v53, %v3055_v55 }
  0x80   : > { %938 = vmatpush.bf16.msra.mxu3 %v3098_v42  ;;  %v3063_v59 = vld [vmem:[#allocation9 + $0x78] sm:$0xf0]  ;;  %v3062_v62 = vor.u32 %v3574_v57, %v3061_v56  ;;  %v3037_v63 = vld [vmem:[#allocation9 + $0x40] sm:$0xf]  ;;  %v3569_v0 = vld [vmem:[#allocation9 + $0x4c] sm:$0xf0] }
  0x81   : > { %v3567_v1 = vld [vmem:[#allocation9 + $0x44] sm:$0xf]  ;;  %v3066_v2 = vor.u32 %v3572_v58, %v3063_v59  ;;  %v3039_v3 = vld [vmem:[#allocation9 + $0x50] sm:$0xf0]  ;;  %v3045_v4 = vld [vmem:[#allocation9 + $0x48] sm:$0xf]  ;;  %v3038_v8 = vor.u32 %v3569_v0, %v3037_v63 }
  0x82   : > { %882 = vmatpush.bf16.msra.mxu0 %v3070_v48  ;;  %v3570_v5 = vld [vmem:[#allocation9 + $0x54] sm:$0xf0]  ;;  %v3568_v6 = vld [vmem:[#allocation9 + $0x4c] sm:$0xf]  ;;  %v3047_v7 = vld [vmem:[#allocation9 + $0x58] sm:$0xf0]  ;;  %v3042_v9 = vor.u32 %v3567_v1, %v3039_v3 }
  0x83   : > { %901 = vmatpush.bf16.msra.mxu1 %v3074_v49  ;;  %920 = vmatpush.bf16.msra.mxu2 %v3078_v50  ;;  %v3046_v10 = vor.u32 %v3570_v5, %v3045_v4  ;;  %v3021_v11 = vld [vmem:[#allocation9 + $0x20] sm:$0xf]  ;;  %v3565_v12 = vld [vmem:[#allocation9 + $0x2c] sm:$0xf0]  ;;  %v3563_v13 = vld [vmem:[#allocation9 + $0x24] sm:$0xf]  ;;  %v3050_v14 = vor.u32 %v3568_v6, %v3047_v7 }
  0x84   : > { %939 = vmatpush.bf16.msra.mxu3 %v3082_v54  ;;  %v3023_v15 = vld [vmem:[#allocation9 + $0x30] sm:$0xf0]  ;;  %v3029_v16 = vld [vmem:[#allocation9 + $0x28] sm:$0xf]  ;;  %v3566_v17 = vld [vmem:[#allocation9 + $0x34] sm:$0xf0]  ;;  %v3022_v20 = vor.u32 %v3565_v12, %v3021_v11 }
  0x85   : > { %v3564_v18 = vld [vmem:[#allocation9 + $0x2c] sm:$0xf]  ;;  %v3031_v19 = vld [vmem:[#allocation9 + $0x38] sm:$0xf0]  ;;  %v3005_v21 = vld [vmem:[#allocation9] sm:$0xf]  ;;  %v3026_v22 = vor.u32 %v3563_v13, %v3023_v15  ;;  %v3030_v23 = vor.u32 %v3566_v17, %v3029_v16 }
  0x86   : > { %883 = vmatpush.bf16.msra.mxu0 %v3054_v60  ;;  %v3561_v24 = vld [vmem:[#allocation9 + $0xc] sm:$0xf0]  ;;  %v3559_v25 = vld [vmem:[#allocation9 + $0x4] sm:$0xf]  ;;  %v3007_v26 = vld [vmem:[#allocation9 + $0x10] sm:$0xf0]  ;;  %v3034_v27 = vor.u32 %v3564_v18, %v3031_v19 }
  0x87   : > { %902 = vmatpush.bf16.msra.mxu1 %v3058_v61  ;;  %921 = vmatpush.bf16.msra.mxu2 %v3062_v62  ;;  %v3013_v28 = vld [vmem:[#allocation9 + $0x8] sm:$0xf]  ;;  %v3562_v29 = vld [vmem:[#allocation9 + $0x14] sm:$0xf0]  ;;  %v3560_v30 = vld [vmem:[#allocation9 + $0xc] sm:$0xf]  ;;  %v3006_v34 = vor.u32 %v3561_v24, %v3005_v21  ;;  %v3010_v37 = vor.u32 %v3559_v25, %v3007_v26 }
  0x88   : > { %940 = vmatpush.bf16.msra.mxu3 %v3066_v2  ;;  %v3015_v31 = vld [vmem:[#allocation9 + $0x18] sm:$0xf0]  ;;  %v3245_v32 = vld [vmem:[#allocation11 + $0xe0] sm:$0xf]  ;;  %v3621_v33 = vld [vmem:[#allocation11 + $0xec] sm:$0xf0]  ;;  %v3014_v38 = vor.u32 %v3562_v29, %v3013_v28 }
  0x89   : > { %v3619_v35 = vld [vmem:[#allocation11 + $0xe4] sm:$0xf]  ;;  %v3247_v36 = vld [vmem:[#allocation11 + $0xf0] sm:$0xf0]  ;;  %v3018_v40 = vor.u32 %v3560_v30, %v3015_v31  ;;  %v4791_v41 = vor.u32 %v3621_v33, %v3245_v32  ;;  %v3253_v42 = vld [vmem:[#allocation11 + $0xe8] sm:$0xf] }
  0x8a   : > { %884 = vmatpush.bf16.msra.mxu0 %v3038_v8  ;;  %v3557_v39 = vld [vmem:[%s4756_s4] sm:$0xff]  ;;  %v3622_v43 = vld [vmem:[#allocation11 + $0xf4] sm:$0xf0]  ;;  %v3620_v44 = vld [vmem:[#allocation11 + $0xec] sm:$0xf]  ;;  %v4793_v45 = vor.u32 %v3619_v35, %v3247_v36  ;;  %p3542_p1 = scmp.ne.s32.totalorder %s4618_s25, 1 }
  0x8b   : > { %903 = vmatpush.bf16.msra.mxu1 %v3042_v9  ;;  %922 = vmatpush.bf16.msra.mxu2 %v3046_v10  ;;  %v3255_v46 = vld [vmem:[#allocation11 + $0xf8] sm:$0xf0]  ;;  %v3229_v47 = vld [vmem:[#allocation11 + $0xc0] sm:$0xf]  ;;  %v3617_v48 = vld [vmem:[#allocation11 + $0xcc] sm:$0xf0]  ;;  %v4795_v51 = vor.u32 %v3622_v43, %v3253_v42 }
  0x8c   : > { %941 = vmatpush.bf16.msra.mxu3 %v3050_v14  ;;  %v3615_v49 = vld [vmem:[#allocation11 + $0xc4] sm:$0xf]  ;;  %v3231_v50 = vld [vmem:[#allocation11 + $0xd0] sm:$0xf0]  ;;  %v4798_v52 = vor.u32 %v3620_v44, %v3255_v46  ;;  %v4800_v53 = vor.u32 %v3617_v48, %v3229_v47  ;;  %v3237_v54 = vld [vmem:[#allocation11 + $0xc8] sm:$0xf] }
  0x8d   : > { %v3618_v55 = vld [vmem:[#allocation11 + $0xd4] sm:$0xf0]  ;;  %v3616_v56 = vld [vmem:[#allocation11 + $0xcc] sm:$0xf]  ;;  %v4803_v57 = vor.u32 %v3615_v49, %v3231_v50  ;;  %v3239_v58 = vld [vmem:[#allocation11 + $0xd8] sm:$0xf0] }
  0x8e   : > { %885 = vmatpush.bf16.msra.mxu0 %v3022_v20  ;;  %v3213_v59 = vld [vmem:[#allocation11 + $0xa0] sm:$0xf]  ;;  %v3613_v60 = vld [vmem:[#allocation11 + $0xac] sm:$0xf0]  ;;  %v3611_v61 = vld [vmem:[#allocation11 + $0xa4] sm:$0xf]  ;;  %v4806_v63 = vor.u32 %v3618_v55, %v3237_v54  ;;  %v4810_v0 = vor.u32 %v3616_v56, %v3239_v58 }
  0x8f   : > { %904 = vmatpush.bf16.msra.mxu1 %v3026_v22  ;;  %923 = vmatpush.bf16.msra.mxu2 %v3030_v23  ;;  %v3215_v62 = vld [vmem:[#allocation11 + $0xb0] sm:$0xf0]  ;;  %v4812_v1 = vor.u32 %v3613_v60, %v3213_v59  ;;  %v3221_v2 = vld [vmem:[#allocation11 + $0xa8] sm:$0xf]  ;;  %v3614_v3 = vld [vmem:[#allocation11 + $0xb4] sm:$0xf0] }
  0x90   : > { %942 = vmatpush.bf16.msra.mxu3 %v3034_v27  ;;  %v3612_v4 = vld [vmem:[#allocation11 + $0xac] sm:$0xf]  ;;  %v4815_v5 = vor.u32 %v3611_v61, %v3215_v62  ;;  %v3223_v6 = vld [vmem:[#allocation11 + $0xb8] sm:$0xf0]  ;;  %v3197_v7 = vld [vmem:[#allocation11 + $0x80] sm:$0xf]  ;;  %v4818_v11 = vor.u32 %v3614_v3, %v3221_v2 }
  0x91   : > { %v3609_v8 = vld [vmem:[#allocation11 + $0x8c] sm:$0xf0]  ;;  %v3607_v9 = vld [vmem:[#allocation11 + $0x84] sm:$0xf]  ;;  %v3199_v10 = vld [vmem:[#allocation11 + $0x90] sm:$0xf0]  ;;  %v4822_v12 = vor.u32 %v3612_v4, %v3223_v6 }
  0x92   : > { %886 = vmatpush.bf16.msra.mxu0 %v3006_v34  ;;  %v4824_v13 = vor.u32 %v3609_v8, %v3197_v7  ;;  %v3205_v14 = vld [vmem:[#allocation11 + $0x88] sm:$0xf]  ;;  %v3610_v15 = vld [vmem:[#allocation11 + $0x94] sm:$0xf0]  ;;  %v3608_v16 = vld [vmem:[#allocation11 + $0x8c] sm:$0xf]  ;;  %v4827_v17 = vor.u32 %v3607_v9, %v3199_v10 }
  0x93   : > { %905 = vmatpush.bf16.msra.mxu1 %v3010_v37  ;;  %924 = vmatpush.bf16.msra.mxu2 %v3014_v38  ;;  %v3207_v18 = vld [vmem:[#allocation11 + $0x98] sm:$0xf0]  ;;  %v3181_v19 = vld [vmem:[#allocation11 + $0x60] sm:$0xf]  ;;  %v3605_v20 = vld [vmem:[#allocation11 + $0x6c] sm:$0xf0]  ;;  %v4830_v23 = vor.u32 %v3610_v15, %v3205_v14 }
  0x94   : > { %943 = vmatpush.bf16.msra.mxu3 %v3018_v40  ;;  %v3603_v21 = vld [vmem:[#allocation11 + $0x64] sm:$0xf]  ;;  %v3183_v22 = vld [vmem:[#allocation11 + $0x70] sm:$0xf0]  ;;  %v3558_v24 = vld [vmem:[%s4756_s4 + $0x8] sm:$0xff]  ;;  %v4835_v25 = vor.u32 %v3608_v16, %v3207_v18  ;;  %v4837_v26 = vor.u32 %v3605_v20, %v3181_v19 }
  0x95   : > { %887 = vmatmul.bf16.vlgmr.msra.gmra.mxu0 %v3557_v39  ;;  %v3189_v27 = vld [vmem:[#allocation11 + $0x68] sm:$0xf]  ;;  %v3606_v28 = vld [vmem:[#allocation11 + $0x74] sm:$0xf0]  ;;  %v3604_v29 = vld [vmem:[#allocation11 + $0x6c] sm:$0xf]  ;;  %v4840_v30 = vor.u32 %v3603_v21, %v3183_v22 }
  0x96   : > { %1173 = vmatpush.bf16.msrb.mxu0 %v4791_v41  ;;  %906 = vmatmul.bf16.vlgmr.msra.gmra.mxu1 %v3557_v39  ;;  %v3191_v31 = vld [vmem:[#allocation11 + $0x78] sm:$0xf0]  ;;  %v3165_v32 = vld [vmem:[#allocation11 + $0x40] sm:$0xf]  ;;  %v3601_v33 = vld [vmem:[#allocation11 + $0x4c] sm:$0xf0]  ;;  %v4843_v36 = vor.u32 %v3606_v28, %v3189_v27 }
  0x97   : > { %1186 = vmatpush.bf16.msrb.mxu1 %v4793_v45  ;;  %925 = vmatmul.bf16.vlgmr.msra.gmra.mxu2 %v3557_v39  ;;  %v3599_v34 = vld [vmem:[#allocation11 + $0x44] sm:$0xf]  ;;  %v3167_v35 = vld [vmem:[#allocation11 + $0x50] sm:$0xf0]  ;;  %v4847_v37 = vor.u32 %v3604_v29, %v3191_v31  ;;  %v4849_v38 = vor.u32 %v3601_v33, %v3165_v32  ;;  %v3602_v40 = vld [vmem:[#allocation11 + $0x54] sm:$0xf0] }
  0x98   : > { %944 = vmatmul.bf16.vlgmr.msra.gmra.mxu3 %v3557_v39  ;;  %1199 = vmatpush.bf16.msrb.mxu2 %v4795_v51  ;;  %v3173_v39 = vld [vmem:[#allocation11 + $0x48] sm:$0xf]  ;;  %v3600_v42 = vld [vmem:[#allocation11 + $0x4c] sm:$0xf]  ;;  %v4852_v43 = vor.u32 %v3599_v34, %v3167_v35  ;;  %v3175_v44 = vld [vmem:[#allocation11 + $0x58] sm:$0xf0] }
  0x99   : > { %1212 = vmatpush.bf16.msrb.mxu3 %v4798_v52  ;;  %v3149_v46 = vld [vmem:[#allocation11 + $0x20] sm:$0xf]  ;;  %v3597_v47 = vld [vmem:[#allocation11 + $0x2c] sm:$0xf0]  ;;  %v3595_v48 = vld [vmem:[#allocation11 + $0x24] sm:$0xf]  ;;  %v4855_v50 = vor.u32 %v3602_v40, %v3173_v39  ;;  %v4859_v54 = vor.u32 %v3600_v42, %v3175_v44 }
  0x9a   : > { %1174 = vmatpush.bf16.msrb.mxu0 %v4800_v53  ;;  %v3151_v49 = vld [vmem:[#allocation11 + $0x30] sm:$0xf0]  ;;  %v4861_v55 = vor.u32 %v3597_v47, %v3149_v46  ;;  %v3157_v56 = vld [vmem:[#allocation11 + $0x28] sm:$0xf]  ;;  %v3598_v58 = vld [vmem:[#allocation11 + $0x34] sm:$0xf0] }
  0x9b   : > { %1187 = vmatpush.bf16.msrb.mxu1 %v4803_v57  ;;  %v3596_v59 = vld [vmem:[#allocation11 + $0x2c] sm:$0xf]  ;;  %v4864_v60 = vor.u32 %v3595_v48, %v3151_v49  ;;  %v3159_v61 = vld [vmem:[#allocation11 + $0x38] sm:$0xf0]  ;;  %v3133_v62 = vld [vmem:[#allocation11] sm:$0xf]  ;;  %v4867_v6 = vor.u32 %v3598_v58, %v3157_v56 }
  0x9c   : > { %1200 = vmatpush.bf16.msrb.mxu2 %v4806_v63  ;;  %v3593_v2 = vld [vmem:[#allocation11 + $0xc] sm:$0xf0]  ;;  %v3591_v3 = vld [vmem:[#allocation11 + $0x4] sm:$0xf]  ;;  %v3135_v4 = vld [vmem:[#allocation11 + $0x10] sm:$0xf0]  ;;  %v4871_v7 = vor.u32 %v3596_v59, %v3159_v61 }
  0x9d   : > { %1213 = vmatpush.bf16.msrb.mxu3 %v4810_v0  ;;  %v4873_v8 = vor.u32 %v3593_v2, %v3133_v62  ;;  %v3141_v9 = vld [vmem:[#allocation11 + $0x8] sm:$0xf]  ;;  %v3594_v10 = vld [vmem:[#allocation11 + $0x14] sm:$0xf0]  ;;  %v4876_v14 = vor.u32 %v3591_v3, %v3135_v4  ;;  %v3592_v15 = vld [vmem:[#allocation11 + $0xc] sm:$0xf] }
  0x9e   : > { %1175 = vmatpush.bf16.msrb.mxu0 %v4812_v1  ;;  %v3143_v16 = vld [vmem:[#allocation11 + $0x18] sm:$0xf0]  ;;  %v1003_v18 = vld [vmem:[#allocation4] sm:$0xff]  ;;  %v4879_v19 = vor.u32 %v3594_v10, %v3141_v9 }
  0x9f   : > { %1188 = vmatpush.bf16.msrb.mxu1 %v4815_v5  ;;  %v4883_v20 = vor.u32 %v3592_v15, %v3143_v16  ;;  %v1012_v21 = vpack.c.bf16 %v1003_v18, %v1003_v18  ;;  %v697_v27 = vld [vmem:[#allocation12] sm:$0xf] }
  0xa0   : > { %1201 = vmatpush.bf16.msrb.mxu2 %v4818_v11  ;;  %v699_v28 = vperm.slane %v697_v27, 0  ;;  %v700_v31 = vperm.slane %v697_v27, 1  ;;  %v701_v40 = vperm.slane %v697_v27, 2  ;;  %v702_v42 = vperm.slane %v697_v27, 3 }
  0xa1   : > { %1214 = vmatpush.bf16.msrb.mxu3 %v4822_v12 }
  0xa2   : > { %1176 = vmatpush.bf16.msrb.mxu0 %v4824_v13 }
  0xa3   : > { %1189 = vmatpush.bf16.msrb.mxu1 %v4827_v17 }
  0xa4   : > { %1202 = vmatpush.bf16.msrb.mxu2 %v4830_v23 }
  0xa5   : > { %1215 = vmatpush.bf16.msrb.mxu3 %v4835_v25  ;;  %892 = vmatmul.bf16.gmra.mxu0 %v3558_v24 }
  0xa6   : > { %1177 = vmatpush.bf16.msrb.mxu0 %v4837_v26  ;;  %911 = vmatmul.bf16.gmra.mxu1 %v3558_v24 }
  0xa7   : > { %1190 = vmatpush.bf16.msrb.mxu1 %v4840_v30  ;;  %930 = vmatmul.bf16.gmra.mxu2 %v3558_v24 }
  0xa8   : > { %949 = vmatmul.bf16.gmra.mxu3 %v3558_v24  ;;  %1203 = vmatpush.bf16.msrb.mxu2 %v4843_v36 }
  0xa9   : > { %1216 = vmatpush.bf16.msrb.mxu3 %v4847_v37 }
  0xaa   : > { %1178 = vmatpush.bf16.msrb.mxu0 %v4849_v38 }
  0xab   : > { %1191 = vmatpush.bf16.msrb.mxu1 %v4852_v43 }
  0xac   : > { %1204 = vmatpush.bf16.msrb.mxu2 %v4855_v50 }
  0xad   : > { %1217 = vmatpush.bf16.msrb.mxu3 %v4859_v54 }
  0xae   : > { %1179 = vmatpush.bf16.msrb.mxu0 %v4861_v55 }
  0xaf   : > { %1192 = vmatpush.bf16.msrb.mxu1 %v4864_v60 }
  0xb0   : > { %1205 = vmatpush.bf16.msrb.mxu2 %v4867_v6 }
  0xb1   : > { %1218 = vmatpush.bf16.msrb.mxu3 %v4871_v7 }
  0xb2   : > { %1180 = vmatpush.bf16.msrb.mxu0 %v4873_v8 }
  0xb3   : > { %1193 = vmatpush.bf16.msrb.mxu1 %v4876_v14 }
  0xb4   : > { %1206 = vmatpush.bf16.msrb.mxu2 %v4879_v19 }
  0xb5   : > { %1219 = vmatpush.bf16.msrb.mxu3 %v4883_v20  ;;  %1181 = vmatmul.bf16.vlgmr.msrb.gmra.mxu0 %v1012_v21 }
  0xb6   : > { %1301 = vmatpush.bf16.msra.mxu0 %v4791_v41  ;;  %1194 = vmatmul.bf16.vlgmr.msrb.gmra.mxu1 %v1012_v21 }
  0xb7   : > { %1314 = vmatpush.bf16.msra.mxu1 %v4793_v45  ;;  %1207 = vmatmul.bf16.vlgmr.msrb.gmra.mxu2 %v1012_v21 }
  0xb8   : > { %1327 = vmatpush.bf16.msra.mxu2 %v4795_v51  ;;  %1220 = vmatmul.bf16.vlgmr.msrb.gmra.mxu3 %v1012_v21 }
  0xb9   : > { %1340 = vmatpush.bf16.msra.mxu3 %v4798_v52 }
  0xba   : > { %1302 = vmatpush.bf16.msra.mxu0 %v4800_v53 }
  0xbb   : > { %1315 = vmatpush.bf16.msra.mxu1 %v4803_v57 }
  0xbc   : > { %1328 = vmatpush.bf16.msra.mxu2 %v4806_v63 }
  0xbd   : > { %1341 = vmatpush.bf16.msra.mxu3 %v4810_v0 }
  0xbe   : > { %1303 = vmatpush.bf16.msra.mxu0 %v4812_v1 }
  0xbf   : > { %1316 = vmatpush.bf16.msra.mxu1 %v4815_v5 }
  0xc0   : > { %1329 = vmatpush.bf16.msra.mxu2 %v4818_v11 }
  0xc1   : > { %1342 = vmatpush.bf16.msra.mxu3 %v4822_v12 }
  0xc2   : > { %1304 = vmatpush.bf16.msra.mxu0 %v4824_v13 }
  0xc3   : > { %1317 = vmatpush.bf16.msra.mxu1 %v4827_v17 }
  0xc4   : > { %1330 = vmatpush.bf16.msra.mxu2 %v4830_v23 }
  0xc5   : > { %1343 = vmatpush.bf16.msra.mxu3 %v4835_v25 }
  0xc6   : > { %1305 = vmatpush.bf16.msra.mxu0 %v4837_v26 }
  0xc7   : > { %1318 = vmatpush.bf16.msra.mxu1 %v4840_v30 }
  0xc8   : > { %1331 = vmatpush.bf16.msra.mxu2 %v4843_v36 }
  0xc9   : > { %1344 = vmatpush.bf16.msra.mxu3 %v4847_v37 }
  0xca   : > { %1306 = vmatpush.bf16.msra.mxu0 %v4849_v38 }
  0xcb   : > { %1319 = vmatpush.bf16.msra.mxu1 %v4852_v43 }
  0xcc   : > { %1332 = vmatpush.bf16.msra.mxu2 %v4855_v50 }
  0xcd   : > { %1345 = vmatpush.bf16.msra.mxu3 %v4859_v54 }
  0xce   : > { %1307 = vmatpush.bf16.msra.mxu0 %v4861_v55 }
  0xcf   : > { %1320 = vmatpush.bf16.msra.mxu1 %v4864_v60 }
  0xd0   : > { %1333 = vmatpush.bf16.msra.mxu2 %v4867_v6 }
  0xd1   : > { %1346 = vmatpush.bf16.msra.mxu3 %v4871_v7 }
  0xd2   : > { %1308 = vmatpush.bf16.msra.mxu0 %v4873_v8 }
  0xd3   : > { %1321 = vmatpush.bf16.msra.mxu1 %v4876_v14 }
  0xd4   : > { %1334 = vmatpush.bf16.msra.mxu2 %v4879_v19 }
  0xd5   : > { %1347 = vmatpush.bf16.msra.mxu3 %v4883_v20 }
  0xd6   : > { %1430 = vmatpush.bf16.msrb.mxu0 %v4791_v41 }
  0xd7   : > { %1443 = vmatpush.bf16.msrb.mxu1 %v4793_v45 }
  0xd8   : > { %1456 = vmatpush.bf16.msrb.mxu2 %v4795_v51 }
  0xd9   : > { %1469 = vmatpush.bf16.msrb.mxu3 %v4798_v52 }
  0xda   : > { %1431 = vmatpush.bf16.msrb.mxu0 %v4800_v53 }
  0xdb   : > { %1444 = vmatpush.bf16.msrb.mxu1 %v4803_v57 }
  0xdc   : > { %1457 = vmatpush.bf16.msrb.mxu2 %v4806_v63 }
  0xdd   : > { %1470 = vmatpush.bf16.msrb.mxu3 %v4810_v0 }
  0xde   : > { %1432 = vmatpush.bf16.msrb.mxu0 %v4812_v1 }
  0xdf   : > { %1445 = vmatpush.bf16.msrb.mxu1 %v4815_v5 }
  0xe0   : > { %1458 = vmatpush.bf16.msrb.mxu2 %v4818_v11 }
  0xe1   : > { %1471 = vmatpush.bf16.msrb.mxu3 %v4822_v12 }
  0xe2   : > { %1433 = vmatpush.bf16.msrb.mxu0 %v4824_v13 }
  0xe3   : > { %1446 = vmatpush.bf16.msrb.mxu1 %v4827_v17 }
  0xe4   : > { %1459 = vmatpush.bf16.msrb.mxu2 %v4830_v23 }
  0xe5   : > { %1472 = vmatpush.bf16.msrb.mxu3 %v4835_v25 }
  0xe6   : > { %1434 = vmatpush.bf16.msrb.mxu0 %v4837_v26 }
  0xe7   : > { %1447 = vmatpush.bf16.msrb.mxu1 %v4840_v30 }
  0xe8   : > { %1460 = vmatpush.bf16.msrb.mxu2 %v4843_v36 }
  0xe9   : > { %1473 = vmatpush.bf16.msrb.mxu3 %v4847_v37 }
  0xea   : > { %1435 = vmatpush.bf16.msrb.mxu0 %v4849_v38 }
  0xeb   : > { %1448 = vmatpush.bf16.msrb.mxu1 %v4852_v43 }
  0xec   : > { %1461 = vmatpush.bf16.msrb.mxu2 %v4855_v50 }
  0xed   : > { %1474 = vmatpush.bf16.msrb.mxu3 %v4859_v54 }
  0xee   : > { %1436 = vmatpush.bf16.msrb.mxu0 %v4861_v55 }
  0xef   : > { %1449 = vmatpush.bf16.msrb.mxu1 %v4864_v60 }
  0xf0   : > { %1462 = vmatpush.bf16.msrb.mxu2 %v4867_v6 }
  0xf1   : > { %1475 = vmatpush.bf16.msrb.mxu3 %v4871_v7 }
  0xf2   : > { %1437 = vmatpush.bf16.msrb.mxu0 %v4873_v8 }
  0xf3   : > { %1450 = vmatpush.bf16.msrb.mxu1 %v4876_v14 }
  0xf4   : > { %1463 = vmatpush.bf16.msrb.mxu2 %v4879_v19 }
  0xf5   : > { %1476 = vmatpush.bf16.msrb.mxu3 %v4883_v20 }
 0x112   : > { %v888_v22 = vpop.f32.mrf.mxu0 }
 0x113   : > { %v907_v24 = vpop.f32.mrf.mxu1  ;;  %v889_v16 = vadd.f32 %v888_v22, %v699_v28 }
 0x114   : > { %v908_v21 = vadd.f32 %v907_v24, %v700_v31 }
 0x11a   : > { %v926_v29 = vpop.f32.mrf.mxu2  ;;  %v890_v33 = vpop.f32.mrf.mxu0 }
 0x11b   : > { %v945_v32 = vpop.f32.mrf.mxu3  ;;  %v4952_v34 = vadd.f32 %v890_v33, %v699_v28  ;;  %v909_v35 = vpop.f32.mrf.mxu1 }
 0x11c   : > { %v4954_v39 = vadd.f32 %v909_v35, %v700_v31 }
 0x122   : > { %v928_v44 = vpop.f32.mrf.mxu2  ;;  %v893_v48 = vpop.f32.mrf.mxu0 }
 0x123   : > { %v4956_v46 = vadd.f32 %v928_v44, %v701_v40  ;;  %v947_v47 = vpop.f32.mrf.mxu3  ;;  %v4960_v56 = vadd.f32 %v893_v48, %v699_v28  ;;  %v912_v58 = vpop.f32.mrf.mxu1 }
 0x124   : > { %v4958_v49 = vadd.f32 %v947_v47, %v702_v42  ;;  %v4962_v59 = vadd.f32 %v912_v58, %v700_v31 }
 0x12a   : > { %v931_v61 = vpop.f32.mrf.mxu2  ;;  %v895_v3 = vpop.f32.mrf.mxu0 }
 0x12b   : > { %v4964_v62 = vadd.f32 %v931_v61, %v701_v40  ;;  %v950_v2 = vpop.f32.mrf.mxu3  ;;  %v4968_v9 = vadd.f32 %v895_v3, %v699_v28  ;;  %v914_v10 = vpop.f32.mrf.mxu1  ;;  %v946_v3 = vadd.f32 %v945_v32, %v702_v42 }
 0x12c   : > { %v4966_v4 = vadd.f32 %v950_v2, %v702_v42  ;;  %v4970_v15 = vadd.f32 %v914_v10, %v700_v31 }
 0x12d   : > { %5522 = vst [vmem:[#allocation39_spill] sm:$0xff] %v4964_v62 }
 0x12e   : > { %5523 = vst [vmem:[#allocation40_spill] sm:$0xff] %v4966_v4 }
 0x12f   : > { %5524 = vst [vmem:[#allocation41_spill] sm:$0xff] %v4968_v9 }
 0x130   : > { %5525 = vst [vmem:[#allocation42_spill] sm:$0xff] %v4970_v15 }
 0x132   : > { %v933_v18 = vpop.f32.mrf.mxu2  ;;  %v1182_v35 = vpop.f32.mrf.mxu0 }
 0x133   : > { %v4972_v27 = vadd.f32 %v933_v18, %v701_v40  ;;  %v952_v33 = vpop.f32.mrf.mxu3  ;;  %v1225_v47 = vadd.f32 %v1182_v35, %v889_v16  ;;  %v1195_v48 = vpop.f32.mrf.mxu1 }
 0x134   : > { %v4974_v44 = vadd.f32 %v952_v33, %v702_v42  ;;  %v1226_v58 = vadd.f32 %v1195_v48, %v908_v21  ;;  %v927_v33 = vadd.f32 %v926_v29, %v701_v40 }
 0x135   : > { %5526 = vst [vmem:[#allocation43_spill] sm:$0xff] %v4972_v27  ;;  %v3259_v61 = vmul.f32 -1.442695, %v1225_v47 }
 0x136   : > { %5527 = vst [vmem:[#allocation44_spill] sm:$0xff] %v4974_v44  ;;  %v3260_v2 = vmul.f32 -1.442695, %v1226_v58 }
 0x137   : > { %3859 = vpow2.f32 %v3259_v61 }
 0x138   : > { %3861 = vpow2.f32 %v3260_v2 }
 0x13a   : > { %v1208_v9 = vpop.f32.mrf.mxu2  ;;  %v1184_v15 = vpop.f32.mrf.mxu0 }
 0x13b   : > { %v1221_v10 = vpop.f32.mrf.mxu3  ;;  %v1197_v28 = vpop.f32.mrf.mxu1  ;;  %v1227_v48 = vadd.f32 %v1208_v9, %v927_v33 }
 0x13c   : > { %v1228_v22 = vadd.f32 %v1221_v10, %v946_v3 }
 0x13d   : > { %v3860_v24 = vpop.eup %3859 }
 0x13e   : > { %v3261_v31 = vmul.f32 -1.442695, %v1228_v22  ;;  %v3862_v18 = vpop.eup %3861  ;;  %v1232_v27 = vadd.f32 1.0, %v3860_v24 }
 0x13f   : > { %v1251_v62 = vadd.f32 1.0, %v3862_v18 }
 0x140   : > { %3863 = vpow2.f32 %v3261_v31  ;;  %v1244_v3 = vand.u32 2147483648, %v1232_v27  ;;  %v1242_v28 = vand.u32 2147483647, %v1232_v27  ;;  %vm1238_vm2 = vweird.f32 %v1232_v27 }
 0x141   : > { %3865 = vrcp.f32 %v1232_v27  ;;  %v1263_v10 = vand.u32 2147483648, %v1251_v62  ;;  %v1261_v31 = vand.u32 2147483647, %v1251_v62  ;;  %vm1257_vm3 = vweird.f32 %v1251_v62 }
 0x142   : > { %3867 = vrcp.f32 %v1251_v62  ;;  %v1210_v16 = vpop.f32.mrf.mxu2  ;;  %v1245_v9 = vor.u32 1.1754944e-38, %v1244_v3  ;;  %vm1243_vm6 = vcmp.eq.f32.partialorder %v1242_v28, 8.507059e+37 }
 0x143   : > { %v1223_v21 = vpop.f32.mrf.mxu3  ;;  %v1264_v16 = vor.u32 1.1754944e-38, %v1263_v10  ;;  %vm1262_vm7 = vcmp.eq.f32.partialorder %v1261_v31, 8.507059e+37 }
 0x144   : > { %v1004_v21 = vld [vmem:[#allocation5 + $0x8] sm:$0xff] }
 0x146   : > { %v3864_v35 = vpop.eup %3863 }
 0x147   : > { %v3866_v47 = vpop.eup %3865  ;;  %v1271_v32 = vadd.f32 1.0, %v3864_v35 }
 0x148   : > { %v3868_v42 = vpop.eup %3867  ;;  %v1234_v58 = vmul.f32 %v3866_v47, %v1232_v27  ;;  %vm1239_vm0 = vweird.f32 %v3866_v47 }
 0x149   : > { %v1253_v15 = vmul.f32 %v3868_v42, %v1251_v62  ;;  %3869 = vrcp.f32 %v1271_v32  ;;  %vm1258_vm1 = vweird.f32 %v3868_v42  ;;  %vm1240_vm4 = vmor %vm1238_vm2, %vm1239_vm0  ;;  %v1283_v3 = vand.u32 2147483648, %v1271_v32 }
 0x14a   : > { %v1235_v61 = vsub.f32 1.0, %v1234_v58  ;;  %3871 = vtanh.f32 %v1227_v48  ;;  %vm1259_vm5 = vmor %vm1257_vm3, %vm1258_vm1  ;;  %vm1277_vm9 = vweird.f32 %v1271_v32 }
 0x14b   : > { %v1254_v2 = vsub.f32 1.0, %v1253_v15  ;;  %v1284_v28 = vor.u32 1.1754944e-38, %v1283_v3 }
 0x14c   : > { %v1236_v22 = vmul.f32 %v3866_v47, %v1235_v61 }
 0x14d   : > { %v1255_v24 = vmul.f32 %v3868_v42, %v1254_v2 }
 0x14e   : > { %v1237_v29 = vadd.f32 %v3866_v47, %v1236_v22 }
 0x14f   : > { %v3870_v40 = vpop.eup %3869  ;;  %v1256_v18 = vadd.f32 %v3868_v42, %v1255_v24 }
 0x150   : > { %v1241_v33 = vsel %vm1240_vm4, %v3866_v47, %v1237_v29  ;;  %v1273_v35 = vmul.f32 %v3870_v40, %v1271_v32  ;;  %v3872_v48 = vpop.eup %3871  ;;  %vm1278_vm8 = vweird.f32 %v3870_v40  ;;  %v1281_v47 = vand.u32 2147483647, %v1271_v32 }
 0x151   : > { %v1246_v58 = vsel %vm1243_vm6, %v1245_v9, %v1241_v33  ;;  %v1260_v15 = vsel %vm1259_vm5, %v3868_v42, %v1256_v18  ;;  %vm1279_vm10 = vmor %vm1277_vm9, %vm1278_vm8 }
 0x152   : > { %v1265_v61 = vsel %vm1262_vm7, %v1264_v16, %v1260_v15  ;;  %v1288_v2 = vmul.f32 %v3872_v48, %v1246_v58  ;;  %v1274_v44 = vsub.f32 1.0, %v1273_v35  ;;  %vm1282_vm11 = vcmp.eq.f32.partialorder %v1281_v47, 8.507059e+37 }
 0x153   : > { %v1287_v22 = vmul.f32 %v1265_v61, %v1004_v21 }
 0x154   : > { %v1275_v27 = vmul.f32 %v3870_v40, %v1274_v44 }
 0x155   : > { %v4976_v4 = vadd.f32 %v1288_v2, %v1287_v22 }
 0x156   : > { %v1276_v62 = vadd.f32 %v3870_v40, %v1275_v27 }
 0x157   : > { %3873 = vtanh.f32 %v4976_v4 }
 0x158   : > { %v1280_v10 = vsel %vm1279_vm10, %v3870_v40, %v1276_v62 }
 0x159   : > { %v1285_v24 = vsel %vm1282_vm11, %v1284_v28, %v1280_v10 }
 0x15d   : > { %v3874_v42 = vpop.eup %3873 }
 0x15e   : > { %v4979_v31 = vmul.f32 %v3874_v42, %v1285_v24  ;;  %v3385_v42 = vld [vmem:[#allocation17 + $0xe0] sm:$0xf]  ;;  %v3653_v24 = vld [vmem:[#allocation17 + $0xec] sm:$0xf0] }
 0x160   : > { %v1300_v44 = vpack.c.bf16 %v4979_v31, %v4979_v31 }
 0x162   : > { %1309 = vmatmul.bf16.vlgmr.msra.gmra.mxu0 %v1300_v44  ;;  %1322 = vmatmul.bf16.vlgmr.msra.gmra.mxu1 %v1300_v44 }
 0x163   : > { %1335 = vmatmul.bf16.vlgmr.msra.gmra.mxu2 %v1300_v44  ;;  %1348 = vmatmul.bf16.vlgmr.msra.gmra.mxu3 %v1300_v44  ;;  %v3651_v44 = vld [vmem:[#allocation17 + $0xe4] sm:$0xf] }
 0x164   : > { %1559 = vmatpush.bf16.msra.mxu0 %v4791_v41  ;;  %1572 = vmatpush.bf16.msra.mxu1 %v4793_v45 }
 0x165   : > { %1585 = vmatpush.bf16.msra.mxu2 %v4795_v51  ;;  %1598 = vmatpush.bf16.msra.mxu3 %v4798_v52 }
 0x168   : > { %1560 = vmatpush.bf16.msra.mxu0 %v4800_v53  ;;  %1573 = vmatpush.bf16.msra.mxu1 %v4803_v57 }
 0x169   : > { %1586 = vmatpush.bf16.msra.mxu2 %v4806_v63  ;;  %1599 = vmatpush.bf16.msra.mxu3 %v4810_v0 }
 0x16c   : > { %1561 = vmatpush.bf16.msra.mxu0 %v4812_v1  ;;  %1574 = vmatpush.bf16.msra.mxu1 %v4815_v5 }
 0x16d   : > { %1587 = vmatpush.bf16.msra.mxu2 %v4818_v11  ;;  %1600 = vmatpush.bf16.msra.mxu3 %v4822_v12 }
 0x170   : > { %1562 = vmatpush.bf16.msra.mxu0 %v4824_v13  ;;  %1575 = vmatpush.bf16.msra.mxu1 %v4827_v17 }
 0x171   : > { %1588 = vmatpush.bf16.msra.mxu2 %v4830_v23  ;;  %1601 = vmatpush.bf16.msra.mxu3 %v4835_v25 }
 0x174   : > { %1563 = vmatpush.bf16.msra.mxu0 %v4837_v26  ;;  %1576 = vmatpush.bf16.msra.mxu1 %v4840_v30 }
 0x175   : > { %1589 = vmatpush.bf16.msra.mxu2 %v4843_v36  ;;  %1602 = vmatpush.bf16.msra.mxu3 %v4847_v37 }
 0x178   : > { %1564 = vmatpush.bf16.msra.mxu0 %v4849_v38  ;;  %1577 = vmatpush.bf16.msra.mxu1 %v4852_v43 }
 0x179   : > { %1590 = vmatpush.bf16.msra.mxu2 %v4855_v50  ;;  %1603 = vmatpush.bf16.msra.mxu3 %v4859_v54 }
 0x17c   : > { %1565 = vmatpush.bf16.msra.mxu0 %v4861_v55  ;;  %1578 = vmatpush.bf16.msra.mxu1 %v4864_v60 }
 0x17d   : > { %1591 = vmatpush.bf16.msra.mxu2 %v4867_v6  ;;  %1604 = vmatpush.bf16.msra.mxu3 %v4871_v7 }
 0x180   : > { %1566 = vmatpush.bf16.msra.mxu0 %v4873_v8  ;;  %1579 = vmatpush.bf16.msra.mxu1 %v4876_v14 }
 0x181   : > { %1592 = vmatpush.bf16.msra.mxu2 %v4879_v19  ;;  %1605 = vmatpush.bf16.msra.mxu3 %v4883_v20 }
 0x1df   : > { %v1310_v41 = vpop.f32.mrf.mxu0  ;;  %v1323_v45 = vpop.f32.mrf.mxu1 }
 0x1e0   : > { %v1353_v51 = vadd.f32 %v1310_v41, %v4952_v34  ;;  %v1354_v52 = vadd.f32 %v1323_v45, %v4954_v39  ;;  %v3386_v41 = vor.u32 %v3653_v24, %v3385_v42  ;;  %v3387_v45 = vld [vmem:[#allocation17 + $0xf0] sm:$0xf0] }
 0x1e2   : > { %v3262_v53 = vmul.f32 -1.442695, %v1353_v51  ;;  %v3263_v57 = vmul.f32 -1.442695, %v1354_v52  ;;  %v3393_v51 = vld [vmem:[#allocation17 + $0xe8] sm:$0xf] }
 0x1e3   : > { %v3654_v52 = vld [vmem:[#allocation17 + $0xf4] sm:$0xf0] }
 0x1e4   : > { %3875 = vpow2.f32 %v3262_v53  ;;  %v3390_v53 = vor.u32 %v3651_v44, %v3387_v45  ;;  %v3321_v45 = vld [vmem:[#allocation17 + $0x60] sm:$0xf] }
 0x1e5   : > { %3877 = vpow2.f32 %v3263_v57  ;;  %v3394_v57 = vor.u32 %v3654_v52, %v3393_v51 }
 0x1e6   : > { %v1336_v63 = vpop.f32.mrf.mxu2  ;;  %v1349_v0 = vpop.f32.mrf.mxu3 }
 0x1e7   : > { %v1356_v1 = vadd.f32 %v1349_v0, %v4958_v49  ;;  %v1312_v5 = vpop.f32.mrf.mxu0  ;;  %v1325_v11 = vpop.f32.mrf.mxu1  ;;  %v1355_v43 = vadd.f32 %v1336_v63, %v4956_v46  ;;  %v3652_v63 = vld [vmem:[#allocation17 + $0xec] sm:$0xf]  ;;  %v3395_v0 = vld [vmem:[#allocation17 + $0xf8] sm:$0xf0] }
 0x1e8   : > { %v3398_v11 = vor.u32 %v3652_v63, %v3395_v0  ;;  %v3635_v63 = vld [vmem:[#allocation17 + $0x64] sm:$0xf]  ;;  %v3323_v0 = vld [vmem:[#allocation17 + $0x70] sm:$0xf0] }
 0x1e9   : > { %v3264_v12 = vmul.f32 -1.442695, %v1356_v1 }
 0x1ea   : > { %v3876_v13 = vpop.eup %3875 }
 0x1eb   : > { %v3878_v17 = vpop.eup %3877  ;;  %v1360_v23 = vadd.f32 1.0, %v3876_v13  ;;  %3879 = vpow2.f32 %v3264_v12 }
 0x1ec   : > { %v1379_v25 = vadd.f32 1.0, %v3878_v17  ;;  %v3369_v17 = vld [vmem:[#allocation17 + $0xc0] sm:$0xf] }
 0x1ed   : > { %3881 = vrcp.f32 %v1360_v23  ;;  %v1372_v7 = vand.u32 2147483648, %v1360_v23  ;;  %v1370_v19 = vand.u32 2147483647, %v1360_v23  ;;  %vm1366_vm14 = vweird.f32 %v1360_v23 }
 0x1ee   : > { %3883 = vrcp.f32 %v1379_v25  ;;  %v1338_v26 = vpop.f32.mrf.mxu2  ;;  %v1351_v30 = vpop.f32.mrf.mxu3  ;;  %v1391_v8 = vand.u32 2147483648, %v1379_v25  ;;  %v1389_v34 = vand.u32 2147483647, %v1379_v25  ;;  %vm1385_vm15 = vweird.f32 %v1379_v25 }
 0x1ef   : > { %v1373_v46 = vor.u32 1.1754944e-38, %v1372_v7  ;;  %vm1371_vm2 = vcmp.eq.f32.partialorder %v1370_v19, 8.507059e+37  ;;  %v3371_v30 = vld [vmem:[#allocation17 + $0xd0] sm:$0xf0]  ;;  %v3361_v19 = vld [vmem:[#allocation17 + $0xa8] sm:$0xf] }
 0x1f0   : > { %v1392_v40 = vor.u32 1.1754944e-38, %v1391_v8  ;;  %vm1390_vm3 = vcmp.eq.f32.partialorder %v1389_v34, 8.507059e+37  ;;  %v3643_v8 = vld [vmem:[#allocation17 + $0xa4] sm:$0xf]  ;;  %v3646_v34 = vld [vmem:[#allocation17 + $0xb4] sm:$0xf0] }
 0x1f1   : > { %v3880_v36 = vpop.eup %3879 }
 0x1f2   : > { %v1399_v37 = vadd.f32 1.0, %v3880_v36  ;;  %v3377_v36 = vld [vmem:[#allocation17 + $0xc8] sm:$0xf] }
 0x1f3   : > { %v3882_v38 = vpop.eup %3881 }
 0x1f4   : > { %v3884_v50 = vpop.eup %3883  ;;  %v1362_v54 = vmul.f32 %v3882_v38, %v1360_v23  ;;  %3885 = vrcp.f32 %v1399_v37  ;;  %vm1367_vm12 = vweird.f32 %v3882_v38  ;;  %v1411_v22 = vand.u32 2147483648, %v1399_v37  ;;  %v3649_v23 = vld [vmem:[#allocation17 + $0xcc] sm:$0xf0] }
 0x1f5   : > { %v1381_v55 = vmul.f32 %v3884_v50, %v1379_v25  ;;  %3887 = vtanh.f32 %v1355_v43  ;;  %vm1386_vm13 = vweird.f32 %v3884_v50  ;;  %vm1368_vm0 = vmor %vm1366_vm14, %vm1367_vm12  ;;  %vm1405_vm5 = vweird.f32 %v1399_v37  ;;  %v3647_v25 = vld [vmem:[#allocation17 + $0xc4] sm:$0xf] }
 0x1f6   : > { %v1363_v60 = vsub.f32 1.0, %v1362_v54  ;;  %vm1387_vm1 = vmor %vm1385_vm15, %vm1386_vm13  ;;  %v1409_v27 = vand.u32 2147483647, %v1399_v37  ;;  %v1412_v3 = vor.u32 1.1754944e-38, %v1411_v22  ;;  %v3370_v26 = vor.u32 %v3649_v23, %v3369_v17  ;;  %v3642_v22 = vld [vmem:[#allocation17 + $0x94] sm:$0xf0] }
 0x1f7   : > { %v1382_v6 = vsub.f32 1.0, %v1381_v55  ;;  %v3648_v55 = vld [vmem:[#allocation17 + $0xcc] sm:$0xf] }
 0x1f8   : > { %v1364_v14 = vmul.f32 %v3882_v38, %v1363_v60  ;;  %vm1410_vm7 = vcmp.eq.f32.partialorder %v1409_v27, 8.507059e+37  ;;  %v3379_v60 = vld [vmem:[#allocation17 + $0xd8] sm:$0xf0]  ;;  %v5529_v17 = vld [vmem:[#allocation39_spill] sm:$0xff] }
 0x1f9   : > { %v1383_v20 = vmul.f32 %v3884_v50, %v1382_v6  ;;  %v3645_v6 = vld [vmem:[#allocation17 + $0xac] sm:$0xf0] }
 0x1fa   : > { %v3886_v39 = vpop.eup %3885  ;;  %v1365_v49 = vadd.f32 %v3882_v38, %v1364_v14  ;;  %v3355_v14 = vld [vmem:[#allocation17 + $0xb0] sm:$0xf0] }
 0x1fb   : > { %v1384_v32 = vadd.f32 %v3884_v50, %v1383_v20  ;;  %v1401_v29 = vmul.f32 %v3886_v39, %v1399_v37  ;;  %v3888_v18 = vpop.eup %3887  ;;  %vm1406_vm4 = vweird.f32 %v3886_v39  ;;  %v3650_v37 = vld [vmem:[#allocation17 + $0xd4] sm:$0xf0]  ;;  %v3358_v20 = vor.u32 %v3643_v8, %v3355_v14  ;;  %v3632_v8 = vld [vmem:[#allocation17 + $0x4c] sm:$0xf]  ;;  %v3315_v14 = vld [vmem:[#allocation17 + $0x58] sm:$0xf0] }
 0x1fc   : > { %v1369_v9 = vsel %vm1368_vm0, %v3882_v38, %v1365_v49  ;;  %vm1407_vm6 = vmor %vm1405_vm5, %vm1406_vm4  ;;  %v3378_v54 = vor.u32 %v3650_v37, %v3377_v36  ;;  %v3363_v49 = vld [vmem:[#allocation17 + $0xb8] sm:$0xf0]  ;;  %v3305_v36 = vld [vmem:[#allocation17 + $0x40] sm:$0xf] }
 0x1fd   : > { %v1374_v16 = vsel %vm1371_vm2, %v1373_v46, %v1369_v9  ;;  %v1388_v21 = vsel %vm1387_vm1, %v3884_v50, %v1384_v32  ;;  %v1402_v33 = vsub.f32 1.0, %v1401_v29  ;;  %v3374_v50 = vor.u32 %v3647_v25, %v3371_v30  ;;  %v3337_v9 = vld [vmem:[#allocation17 + $0x80] sm:$0xf]  ;;  %v3331_v30 = vld [vmem:[#allocation17 + $0x78] sm:$0xf0] }
 0x1fe   : > { %v1393_v35 = vsel %vm1390_vm3, %v1392_v40, %v1388_v21  ;;  %v1416_v48 = vmul.f32 %v3888_v18, %v1374_v16  ;;  %v3362_v29 = vor.u32 %v3646_v34, %v3361_v19  ;;  %v3641_v18 = vld [vmem:[#allocation17 + $0x8c] sm:$0xf0]  ;;  %v3639_v16 = vld [vmem:[#allocation17 + $0x84] sm:$0xf]  ;;  %v5528_v21 = vld [vmem:[#allocation40_spill] sm:$0xff] }
 0x1ff   : > { %v1415_v58 = vmul.f32 %v1393_v35, %v4976_v4  ;;  %v1403_v15 = vmul.f32 %v3886_v39, %v1402_v33  ;;  %v3289_v19 = vld [vmem:[#allocation17 + $0x20] sm:$0xf] }
 0x201   : > { %v5020_v61 = vadd.f32 %v1416_v48, %v1415_v58  ;;  %v1404_v2 = vadd.f32 %v3886_v39, %v1403_v15  ;;  %v3338_v58 = vor.u32 %v3641_v18, %v3337_v9  ;;  %v3339_v15 = vld [vmem:[#allocation17 + $0x90] sm:$0xf0]  ;;  %v3627_v9 = vld [vmem:[#allocation17 + $0x24] sm:$0xf] }
 0x202   : > { %v3342_v27 = vor.u32 %v3639_v16, %v3339_v15  ;;  %v3291_v18 = vld [vmem:[#allocation17 + $0x30] sm:$0xf0] }
 0x203   : > { %3889 = vtanh.f32 %v5020_v61  ;;  %v1408_v62 = vsel %vm1407_vm6, %v3886_v39, %v1404_v2  ;;  %v3644_v39 = vld [vmem:[#allocation17 + $0xac] sm:$0xf]  ;;  %v3345_v2 = vld [vmem:[#allocation17 + $0x88] sm:$0xf]  ;;  %v3294_v15 = vor.u32 %v3627_v9, %v3291_v18  ;;  %v3523_v18 = vld [vmem:[#allocation18 + $0xf8] sm:$0xf0] }
 0x204   : > { %v1413_v10 = vsel %vm1410_vm7, %v1412_v3, %v1408_v62  ;;  %v3366_v40 = vor.u32 %v3644_v39, %v3363_v49  ;;  %v3346_v62 = vor.u32 %v3642_v22, %v3345_v2  ;;  %v3640_v3 = vld [vmem:[#allocation17 + $0x8c] sm:$0xf]  ;;  %v3629_v49 = vld [vmem:[#allocation17 + $0x2c] sm:$0xf0]  ;;  %v3630_v2 = vld [vmem:[#allocation17 + $0x34] sm:$0xf0] }
 0x205   : > { %v3628_v22 = vld [vmem:[#allocation17 + $0x2c] sm:$0xf] }
 0x206   : > { %v3684_v9 = vld [vmem:[#allocation18 + $0xec] sm:$0xf] }
 0x209   : > { %v3890_v47 = vpop.eup %3889 }
 0x20a   : > { %v5023_v28 = vmul.f32 %v3890_v47, %v1413_v10  ;;  %v3347_v47 = vld [vmem:[#allocation17 + $0x98] sm:$0xf0] }
 0x20b   : > { %v3350_v42 = vor.u32 %v3640_v3, %v3347_v47 }
 0x20c   : > { %v1429_v4 = vpack.c.bf16 %v5023_v28, %v5023_v28 }
 0x20e   : > { %1438 = vmatmul.bf16.vlgmr.msrb.gmra.mxu0 %v1429_v4  ;;  %1451 = vmatmul.bf16.vlgmr.msrb.gmra.mxu1 %v1429_v4 }
 0x20f   : > { %1464 = vmatmul.bf16.vlgmr.msrb.gmra.mxu2 %v1429_v4  ;;  %1477 = vmatmul.bf16.vlgmr.msrb.gmra.mxu3 %v1429_v4 }
 0x210   : > { %1890 = vmatpush.bf16.msrb.mxu0 %v3386_v41  ;;  %1909 = vmatpush.bf16.msrb.mxu1 %v3390_v53  ;;  %v3637_v53 = vld [vmem:[#allocation17 + $0x6c] sm:$0xf0] }
 0x211   : > { %1928 = vmatpush.bf16.msrb.mxu2 %v3394_v57  ;;  %1947 = vmatpush.bf16.msrb.mxu3 %v3398_v11  ;;  %v3322_v57 = vor.u32 %v3637_v53, %v3321_v45  ;;  %v3329_v11 = vld [vmem:[#allocation17 + $0x68] sm:$0xf] }
 0x212   : > { %v3281_v53 = vld [vmem:[#allocation17 + $0x8] sm:$0xf] }
 0x214   : > { %1891 = vmatpush.bf16.msrb.mxu0 %v3370_v26  ;;  %1910 = vmatpush.bf16.msrb.mxu1 %v3374_v50  ;;  %v3636_v26 = vld [vmem:[#allocation17 + $0x6c] sm:$0xf]  ;;  %v3631_v50 = vld [vmem:[#allocation17 + $0x44] sm:$0xf] }
 0x215   : > { %1929 = vmatpush.bf16.msrb.mxu2 %v3378_v54 }
 0x218   : > { %1911 = vmatpush.bf16.msrb.mxu1 %v3358_v20 }
 0x219   : > { %1930 = vmatpush.bf16.msrb.mxu2 %v3362_v29 }
 0x21c   : > { %1912 = vmatpush.bf16.msrb.mxu1 %v3342_v27  ;;  %v3299_v27 = vld [vmem:[#allocation17 + $0x38] sm:$0xf0] }
 0x21d   : > { %1931 = vmatpush.bf16.msrb.mxu2 %v3346_v62  ;;  %v3302_v47 = vor.u32 %v3628_v22, %v3299_v27  ;;  %v3499_v27 = vld [vmem:[#allocation18 + $0xd0] sm:$0xf0] }
 0x28b   : > { %v1439_v1 = vpop.f32.mrf.mxu0  ;;  %v1452_v5 = vpop.f32.mrf.mxu1 }
 0x28c   : > { %v1482_v12 = vadd.f32 %v1439_v1, %v4960_v56  ;;  %v1483_v13 = vadd.f32 %v1452_v5, %v4962_v59  ;;  %v3353_v56 = vld [vmem:[#allocation17 + $0xa0] sm:$0xf]  ;;  %v3382_v59 = vor.u32 %v3648_v55, %v3379_v60  ;;  %v3326_v5 = vor.u32 %v3635_v63, %v3323_v0  ;;  %v3307_v60 = vld [vmem:[#allocation17 + $0x50] sm:$0xf0] }
 0x28d   : > { %v3354_v7 = vor.u32 %v3645_v6, %v3353_v56  ;;  %v3313_v56 = vld [vmem:[#allocation17 + $0x48] sm:$0xf]  ;;  %v3634_v6 = vld [vmem:[#allocation17 + $0x54] sm:$0xf0] }
 0x28e   : > { %v3265_v38 = vmul.f32 -1.442695, %v1482_v12  ;;  %v3266_v43 = vmul.f32 -1.442695, %v1483_v13  ;;  %1948 = vmatpush.bf16.msrb.mxu3 %v3382_v59  ;;  %v3638_v12 = vld [vmem:[#allocation17 + $0x74] sm:$0xf0]  ;;  %1913 = vmatpush.bf16.msrb.mxu1 %v3326_v5  ;;  %v3314_v29 = vor.u32 %v3634_v6, %v3313_v56 }
 0x28f   : > { %1892 = vmatpush.bf16.msrb.mxu0 %v3354_v7  ;;  %v3330_v25 = vor.u32 %v3638_v12, %v3329_v11  ;;  %v3624_v12 = vld [vmem:[#allocation17 + $0xc] sm:$0xf] }
 0x290   : > { %3891 = vpow2.f32 %v3265_v38  ;;  %v3334_v38 = vor.u32 %v3636_v26, %v3331_v30 }
 0x291   : > { %3893 = vpow2.f32 %v3266_v43  ;;  %v3633_v43 = vld [vmem:[#allocation17 + $0x4c] sm:$0xf0]  ;;  %1932 = vmatpush.bf16.msrb.mxu2 %v3330_v25 }
 0x292   : > { %v1465_v46 = vpop.f32.mrf.mxu2  ;;  %v1478_v32 = vpop.f32.mrf.mxu3  ;;  %1949 = vmatpush.bf16.msrb.mxu3 %v3366_v40  ;;  %v3306_v55 = vor.u32 %v3633_v43, %v3305_v36  ;;  %v3318_v40 = vor.u32 %v3632_v8, %v3315_v14 }
 0x293   : > { %v1485_v33 = vadd.f32 %v1478_v32, %v5528_v21  ;;  %v1441_v35 = vpop.f32.mrf.mxu0  ;;  %v1454_v48 = vpop.f32.mrf.mxu1  ;;  %1893 = vmatpush.bf16.msrb.mxu0 %v3338_v58  ;;  %v1484_v23 = vadd.f32 %v1465_v46, %v5529_v17  ;;  %v3310_v32 = vor.u32 %v3631_v50, %v3307_v60  ;;  %v5532_v21 = vld [vmem:[#allocation41_spill] sm:$0xff] }
 0x294   : > { %v3290_v35 = vor.u32 %v3629_v49, %v3289_v19  ;;  %v3297_v48 = vld [vmem:[#allocation17 + $0x28] sm:$0xf]  ;;  %v1686_v19 = vpack.c.bf16 %v5023_v28, %v4979_v31  ;;  %v3515_v49 = vld [vmem:[#allocation18 + $0xf0] sm:$0xf0]  ;;  %v5095_v28 = vor.u32 %v3684_v9, %v3523_v18  ;;  %v3449_v18 = vld [vmem:[#allocation18 + $0x60] sm:$0xf] }
 0x295   : > { %v3267_v10 = vmul.f32 -1.442695, %v1485_v33  ;;  %1914 = vmatpush.bf16.msrb.mxu1 %v3310_v32  ;;  %1933 = vmatpush.bf16.msrb.mxu2 %v3314_v29  ;;  %v3298_v3 = vor.u32 %v3630_v2, %v3297_v48  ;;  %v3686_v32 = vld [vmem:[#allocation18 + $0xf4] sm:$0xf0]  ;;  %v3679_v2 = vld [vmem:[#allocation18 + $0xc4] sm:$0xf] }
 0x296   : > { %v3892_v4 = vpop.eup %3891  ;;  %1950 = vmatpush.bf16.msrb.mxu3 %v3350_v42  ;;  %v3623_v42 = vld [vmem:[#allocation17 + $0x4] sm:$0xf] }
 0x297   : > { %v3894_v24 = vpop.eup %3893  ;;  %v5030_v44 = vadd.f32 1.0, %v3892_v4  ;;  %3895 = vpow2.f32 %v3267_v10  ;;  %1894 = vmatpush.bf16.msrb.mxu0 %v3322_v57  ;;  %v3273_v10 = vld [vmem:[#allocation17] sm:$0xf]  ;;  %v3625_v4 = vld [vmem:[#allocation17 + $0xc] sm:$0xf0] }
 0x298   : > { %v5032_v41 = vadd.f32 1.0, %v3894_v24  ;;  %v3626_v57 = vld [vmem:[#allocation17 + $0x14] sm:$0xf0] }
 0x299   : > { %3897 = vrcp.f32 %v5030_v44  ;;  %v1499_v1 = vand.u32 2147483647, %v5030_v44  ;;  %v1501_v39 = vand.u32 2147483648, %v5030_v44  ;;  %vm1495_vm12 = vweird.f32 %v5030_v44  ;;  %1915 = vmatpush.bf16.msrb.mxu1 %v3294_v15  ;;  %1934 = vmatpush.bf16.msrb.mxu2 %v3298_v3  ;;  %v3681_v15 = vld [vmem:[#allocation18 + $0xcc] sm:$0xf0] }
 0x29a   : > { %3899 = vrcp.f32 %v5032_v41  ;;  %v1467_v51 = vpop.f32.mrf.mxu2  ;;  %v1480_v52 = vpop.f32.mrf.mxu3  ;;  %1951 = vmatpush.bf16.msrb.mxu3 %v3334_v38  ;;  %v1520_v34 = vand.u32 2147483648, %v5032_v41  ;;  %v1518_v33 = vand.u32 2147483647, %v5032_v41  ;;  %vm1514_vm11 = vweird.f32 %v5032_v41  ;;  %v3682_v3 = vld [vmem:[#allocation18 + $0xd4] sm:$0xf0] }
 0x29b   : > { %1895 = vmatpush.bf16.msrb.mxu0 %v3306_v55  ;;  %vm5051_vm8 = vcmp.eq.f32.partialorder %v1499_v1, 8.507059e+37  ;;  %v3274_v51 = vor.u32 %v3625_v4, %v3273_v10  ;;  %v3275_v52 = vld [vmem:[#allocation17 + $0x10] sm:$0xf0]  ;;  %v1502_v1 = vor.u32 1.1754944e-38, %v1501_v39  ;;  %v5104_v4 = vor.u32 %v3679_v2, %v3499_v27  ;;  %v3670_v27 = vld [vmem:[#allocation18 + $0x74] sm:$0xf0] }
 0x29c   : > { %v1521_v0 = vor.u32 1.1754944e-38, %v1520_v34  ;;  %vm1519_vm15 = vcmp.eq.f32.partialorder %v1518_v33, 8.507059e+37  ;;  %v3278_v17 = vor.u32 %v3623_v42, %v3275_v52  ;;  %v3683_v34 = vld [vmem:[#allocation18 + $0xe4] sm:$0xf]  ;;  %v3677_v52 = vld [vmem:[#allocation18 + $0xac] sm:$0xf0] }
 0x29d   : > { %v3896_v13 = vpop.eup %3895  ;;  %v5090_v29 = vor.u32 %v3683_v34, %v3515_v49 }
 0x29e   : > { %v5038_v37 = vadd.f32 1.0, %v3896_v13  ;;  %1952 = vmatpush.bf16.msrb.mxu3 %v3318_v40  ;;  %v3283_v13 = vld [vmem:[#allocation17 + $0x18] sm:$0xf0]  ;;  %1916 = vmatpush.bf16.msrb.mxu1 %v3278_v17 }
 0x29f   : > { %v5040_v54 = vpop.eup %3897  ;;  %1896 = vmatpush.bf16.msrb.mxu0 %v3290_v35  ;;  %v3286_v36 = vor.u32 %v3624_v12, %v3283_v13  ;;  %v5533_v35 = vld [vmem:[#allocation42_spill] sm:$0xff]  ;;  %v3676_v12 = vld [vmem:[#allocation18 + $0xac] sm:$0xf]  ;;  %v3491_v13 = vld [vmem:[#allocation18 + $0xb8] sm:$0xf0] }
 0x2a0   : > { %v5042_v59 = vpop.eup %3899  ;;  %v1491_v7 = vmul.f32 %v5040_v54, %v5030_v44  ;;  %3901 = vrcp.f32 %v5038_v37  ;;  %vm1496_vm9 = vweird.f32 %v5040_v54  ;;  %v1540_v60 = vand.u32 2147483648, %v5038_v37 }
 0x2a1   : > { %v1510_v20 = vmul.f32 %v5042_v59, %v5032_v41  ;;  %3903 = vtanh.f32 %v1484_v23  ;;  %vm1515_vm10 = vweird.f32 %v5042_v59  ;;  %vm1497_vm13 = vmor %vm1495_vm12, %vm1496_vm9  ;;  %v3282_v23 = vor.u32 %v3626_v57, %v3281_v53 }
 0x2a2   : > { %v1492_v46 = vsub.f32 1.0, %v1491_v7  ;;  %vm1516_vm14 = vmor %vm1514_vm11, %vm1515_vm10  ;;  %1953 = vmatpush.bf16.msrb.mxu3 %v3302_v47  ;;  %vm1534_vm1 = vweird.f32 %v5038_v37  ;;  %v1538_v56 = vand.u32 2147483647, %v5038_v37 }
 0x2a3   : > { %v1511_v16 = vsub.f32 1.0, %v1510_v20  ;;  %1897 = vmatpush.bf16.msrb.mxu0 %v3274_v51  ;;  %1935 = vmatpush.bf16.msrb.mxu2 %v3282_v23  ;;  %v3685_v20 = vld [vmem:[#allocation18 + $0xec] sm:$0xf0]  ;;  %v3481_v51 = vld [vmem:[#allocation18 + $0xa0] sm:$0xf] }
 0x2a4   : > { %v1493_v58 = vmul.f32 %v5040_v54, %v1492_v46  ;;  %vm1539_vm3 = vcmp.eq.f32.partialorder %v1538_v56, 8.507059e+37  ;;  %v3521_v46 = vld [vmem:[#allocation18 + $0xe8] sm:$0xf]  ;;  %v5113_v57 = vor.u32 %v3677_v52, %v3481_v51  ;;  %v3433_v51 = vld [vmem:[#allocation18 + $0x40] sm:$0xf] }
 0x2a5   : > { %v1512_v62 = vmul.f32 %v5042_v59, %v1511_v16  ;;  %v5092_v40 = vor.u32 %v3686_v32, %v3521_v46  ;;  %v3473_v56 = vld [vmem:[#allocation18 + $0x88] sm:$0xf]  ;;  %v3665_v52 = vld [vmem:[#allocation18 + $0x4c] sm:$0xf0] }
 0x2a6   : > { %v3902_v24 = vpop.eup %3901  ;;  %v1494_v45 = vadd.f32 %v5040_v54, %v1493_v58  ;;  %1954 = vmatpush.bf16.msrb.mxu3 %v3286_v36  ;;  %v3497_v58 = vld [vmem:[#allocation18 + $0xc0] sm:$0xf]  ;;  %v3671_v36 = vld [vmem:[#allocation18 + $0x84] sm:$0xf] }
 0x2a7   : > { %v3904_v63 = vpop.eup %3903  ;;  %v1513_v5 = vadd.f32 %v5042_v59, %v1512_v62  ;;  %v1530_v11 = vmul.f32 %v3902_v24, %v5038_v37  ;;  %vm1535_vm0 = vweird.f32 %v3902_v24  ;;  %v3513_v37 = vld [vmem:[#allocation18 + $0xe0] sm:$0xf]  ;;  %v5102_v22 = vor.u32 %v3681_v15, %v3497_v58  ;;  %v3505_v62 = vld [vmem:[#allocation18 + $0xc8] sm:$0xf] }
 0x2a8   : > { %v1498_v44 = vsel %vm1497_vm13, %v5040_v54, %v1494_v45  ;;  %vm1536_vm2 = vmor %vm1534_vm1, %vm1535_vm0  ;;  %v5088_v39 = vor.u32 %v3685_v20, %v3513_v37  ;;  %v5106_v42 = vor.u32 %v3682_v3, %v3505_v62  ;;  %v3507_v45 = vld [vmem:[#allocation18 + $0xd8] sm:$0xf0]  ;;  %v3668_v62 = vld [vmem:[#allocation18 + $0x6c] sm:$0xf] }
 0x2a9   : > { %v1503_v25 = vsel %vm5051_vm8, %v1502_v1, %v1498_v44  ;;  %v1517_v26 = vsel %vm1516_vm14, %v5042_v59, %v1513_v5  ;;  %v1531_v30 = vsub.f32 1.0, %v1530_v11  ;;  %v1541_v59 = vor.u32 1.1754944e-38, %v1540_v60  ;;  %v3489_v1 = vld [vmem:[#allocation18 + $0xa8] sm:$0xf]  ;;  %v3678_v11 = vld [vmem:[#allocation18 + $0xb4] sm:$0xf0] }
 0x2aa   : > { %v1522_v38 = vsel %vm1519_vm15, %v1521_v0, %v1517_v26  ;;  %v1545_v43 = vmul.f32 %v3904_v63, %v1503_v25  ;;  %v3675_v63 = vld [vmem:[#allocation18 + $0xa4] sm:$0xf]  ;;  %v3483_v0 = vld [vmem:[#allocation18 + $0xb0] sm:$0xf0]  ;;  %v5118_v23 = vor.u32 %v3678_v11, %v3489_v1  ;;  %v5120_v25 = vor.u32 %v3676_v12, %v3491_v13  ;;  %v3465_v26 = vld [vmem:[#allocation18 + $0x80] sm:$0xf] }
 0x2ab   : > { %v1544_v41 = vmul.f32 %v1522_v38, %v5020_v61  ;;  %v1532_v50 = vmul.f32 %v3902_v24, %v1531_v30  ;;  %v5115_v5 = vor.u32 %v3675_v63, %v3483_v0  ;;  %v3673_v30 = vld [vmem:[#allocation18 + $0x8c] sm:$0xf0]  ;;  %v5534_v38 = vld [vmem:[#allocation44_spill] sm:$0xff]  ;;  %v3459_v3 = vld [vmem:[#allocation18 + $0x78] sm:$0xf0]  ;;  %v5163_v11 = vor.u32 %v3665_v52, %v3433_v51 }
 0x2ac   : > { %v3467_v60 = vld [vmem:[#allocation18 + $0x90] sm:$0xf0]  ;;  %v5535_v0 = vld [vmem:[#allocation43_spill] sm:$0xff]  ;;  %v3663_v12 = vld [vmem:[#allocation18 + $0x44] sm:$0xf] }
 0x2ad   : > { %v5076_v54 = vadd.f32 %v1545_v43, %v1544_v41  ;;  %v1533_v55 = vadd.f32 %v3902_v24, %v1532_v50  ;;  %v3435_v13 = vld [vmem:[#allocation18 + $0x50] sm:$0xf0]  ;;  %v3657_v51 = vld [vmem:[#allocation18 + $0xc] sm:$0xf0] }
 0x2af   : > { %3905 = vtanh.f32 %v5076_v54  ;;  %v1537_v6 = vsel %vm1536_vm2, %v3902_v24, %v1533_v55  ;;  %v3680_v24 = vld [vmem:[#allocation18 + $0xcc] sm:$0xf]  ;;  %v5124_v55 = vor.u32 %v3673_v30, %v3465_v26 }
 0x2b0   : > { %v1542_v7 = vsel %vm1539_vm3, %v1541_v59, %v1537_v6  ;;  %v5111_v53 = vor.u32 %v3680_v24, %v3507_v45  ;;  %v3674_v6 = vld [vmem:[#allocation18 + $0x94] sm:$0xf0]  ;;  %v5128_v59 = vor.u32 %v3671_v36, %v3467_v60  ;;  %v5156_v45 = vor.u32 %v3668_v62, %v3459_v3  ;;  %v3664_v36 = vld [vmem:[#allocation18 + $0x4c] sm:$0xf]  ;;  %v3427_v3 = vld [vmem:[#allocation18 + $0x38] sm:$0xf0] }
 0x2b5   : > { %v3906_v61 = vpop.eup %3905 }
 0x2b6   : > { %v5082_v8 = vmul.f32 %v3906_v61, %v1542_v7  ;;  %v5130_v61 = vor.u32 %v3674_v6, %v3473_v56  ;;  %v3672_v7 = vld [vmem:[#allocation18 + $0x8c] sm:$0xf]  ;;  %v5176_v56 = vor.u32 %v3663_v12, %v3435_v13  ;;  %v3403_v12 = vld [vmem:[#allocation18 + $0x10] sm:$0xf0]  ;;  %v3409_v13 = vld [vmem:[#allocation18 + $0x8] sm:$0xf] }
 0x2b8   : > { %v1558_v14 = vpack.c.bf16 %v5082_v8, %v5082_v8 }
 0x2ba   : > { %1567 = vmatmul.bf16.vlgmr.msra.gmra.mxu0 %v1558_v14  ;;  %1580 = vmatmul.bf16.vlgmr.msra.gmra.mxu1 %v1558_v14 }
 0x2bb   : > { %1593 = vmatmul.bf16.vlgmr.msra.gmra.mxu2 %v1558_v14  ;;  %1606 = vmatmul.bf16.vlgmr.msra.gmra.mxu3 %v1558_v14  ;;  %v3475_v14 = vld [vmem:[#allocation18 + $0x98] sm:$0xf0] }
 0x2bc   : > { %2183 = vmatpush.bf16.msra.mxu0 %v5088_v39  ;;  %2196 = vmatpush.bf16.msra.mxu1 %v5090_v29  ;;  %v5133_v20 = vor.u32 %v3672_v7, %v3475_v14  ;;  %v3661_v14 = vld [vmem:[#allocation18 + $0x2c] sm:$0xf0] }
 0x2bd   : > { %2209 = vmatpush.bf16.msra.mxu2 %v5092_v40  ;;  %2222 = vmatpush.bf16.msra.mxu3 %v5095_v28 }
 0x2c0   : > { %2184 = vmatpush.bf16.msra.mxu0 %v5102_v22  ;;  %2197 = vmatpush.bf16.msra.mxu1 %v5104_v4 }
 0x2c1   : > { %2210 = vmatpush.bf16.msra.mxu2 %v5106_v42  ;;  %2223 = vmatpush.bf16.msra.mxu3 %v5111_v53 }
 0x2c4   : > { %2185 = vmatpush.bf16.msra.mxu0 %v5113_v57  ;;  %2198 = vmatpush.bf16.msra.mxu1 %v5115_v5 }
 0x2c5   : > { %2211 = vmatpush.bf16.msra.mxu2 %v5118_v23  ;;  %2224 = vmatpush.bf16.msra.mxu3 %v5120_v25 }
 0x2c8   : > { %2186 = vmatpush.bf16.msra.mxu0 %v5124_v55  ;;  %2199 = vmatpush.bf16.msra.mxu1 %v5128_v59 }
 0x2c9   : > { %2212 = vmatpush.bf16.msra.mxu2 %v5130_v61  ;;  %2225 = vmatpush.bf16.msra.mxu3 %v5133_v20 }
 0x2ca   : > { %1898 = vmatmul.bf16.vlgmr.msrb.gmra.mxu0 %v1686_v19  ;;  %1917 = vmatmul.bf16.vlgmr.msrb.gmra.mxu1 %v1686_v19 }
 0x2cb   : > { %1936 = vmatmul.bf16.vlgmr.msrb.gmra.mxu2 %v1686_v19  ;;  %1955 = vmatmul.bf16.vlgmr.msrb.gmra.mxu3 %v1686_v19 }
 0x2cd   : > { %2226 = vmatpush.bf16.msra.mxu3 %v5156_v45 }
 0x337   : > { %v1568_v16 = vpop.f32.mrf.mxu0  ;;  %v1581_v31 = vpop.f32.mrf.mxu1 }
 0x338   : > { %v1611_v33 = vadd.f32 %v1568_v16, %v5532_v21  ;;  %v1612_v48 = vadd.f32 %v1581_v31, %v5533_v35  ;;  %v3669_v31 = vld [vmem:[#allocation18 + $0x6c] sm:$0xf0]  ;;  %v3667_v21 = vld [vmem:[#allocation18 + $0x64] sm:$0xf]  ;;  %v3451_v35 = vld [vmem:[#allocation18 + $0x70] sm:$0xf0] }
 0x339   : > { %v5147_v15 = vor.u32 %v3669_v31, %v3449_v18  ;;  %v5149_v2 = vor.u32 %v3667_v21, %v3451_v35  ;;  %v3660_v35 = vld [vmem:[#allocation18 + $0x2c] sm:$0xf] }
 0x33a   : > { %v3268_v47 = vmul.f32 -1.442695, %v1611_v33  ;;  %v3269_v10 = vmul.f32 -1.442695, %v1612_v48  ;;  %v3457_v48 = vld [vmem:[#allocation18 + $0x68] sm:$0xf] }
 0x33b   : > { %v5154_v24 = vor.u32 %v3670_v27, %v3457_v48  ;;  %2187 = vmatpush.bf16.msra.mxu0 %v5147_v15  ;;  %2200 = vmatpush.bf16.msra.mxu1 %v5149_v2 }
 0x33c   : > { %3907 = vpow2.f32 %v3268_v47 }
 0x33d   : > { %3909 = vpow2.f32 %v3269_v10  ;;  %2213 = vmatpush.bf16.msra.mxu2 %v5154_v24 }
 0x33e   : > { %v1594_v44 = vpop.f32.mrf.mxu2  ;;  %v1607_v17 = vpop.f32.mrf.mxu3 }
 0x33f   : > { %v1614_v43 = vadd.f32 %v1607_v17, %v5534_v38  ;;  %v1570_v41 = vpop.f32.mrf.mxu0  ;;  %v1583_v50 = vpop.f32.mrf.mxu1  ;;  %v1613_v1 = vadd.f32 %v1594_v44, %v5535_v0  ;;  %v3441_v17 = vld [vmem:[#allocation18 + $0x48] sm:$0xf]  ;;  %v3666_v44 = vld [vmem:[#allocation18 + $0x54] sm:$0xf0]  ;;  %v3443_v38 = vld [vmem:[#allocation18 + $0x58] sm:$0xf0]  ;;  %2188 = vmatpush.bf16.msra.mxu0 %v5163_v11  ;;  %2201 = vmatpush.bf16.msra.mxu1 %v5176_v56  ;;  %v5207_v0 = vor.u32 %v3660_v35, %v3427_v3 }
 0x340   : > { %v3417_v50 = vld [vmem:[#allocation18 + $0x20] sm:$0xf]  ;;  %v5178_v6 = vor.u32 %v3666_v44, %v3441_v17  ;;  %v5180_v7 = vor.u32 %v3664_v36, %v3443_v38  ;;  %v3658_v36 = vld [vmem:[#allocation18 + $0x14] sm:$0xf0]  ;;  %v3656_v38 = vld [vmem:[#allocation18 + $0xc] sm:$0xf] }
 0x341   : > { %v3270_v19 = vmul.f32 -1.442695, %v1614_v43 }
 0x342   : > { %v3908_v37 = vpop.eup %3907  ;;  %2214 = vmatpush.bf16.msra.mxu2 %v5178_v6  ;;  %2227 = vmatpush.bf16.msra.mxu3 %v5180_v7 }
 0x343   : > { %v3910_v34 = vpop.eup %3909  ;;  %v5135_v49 = vadd.f32 1.0, %v3908_v37  ;;  %3911 = vpow2.f32 %v3270_v19  ;;  %v3659_v19 = vld [vmem:[#allocation18 + $0x24] sm:$0xf] }
 0x344   : > { %v5138_v46 = vadd.f32 1.0, %v3910_v34 }
 0x345   : > { %3913 = vrcp.f32 %v5135_v49  ;;  %v1628_v16 = vand.u32 2147483647, %v5135_v49  ;;  %v1630_v33 = vand.u32 2147483648, %v5135_v49  ;;  %vm1624_vm5 = vweird.f32 %v5135_v49 }
 0x346   : > { %3915 = vrcp.f32 %v5138_v46  ;;  %v1596_v32 = vpop.f32.mrf.mxu2  ;;  %v1609_v9 = vpop.f32.mrf.mxu3  ;;  %v1649_v47 = vand.u32 2147483648, %v5138_v46  ;;  %v1647_v41 = vand.u32 2147483647, %v5138_v46  ;;  %vm1643_vm9 = vweird.f32 %v5138_v46  ;;  %2228 = vmatpush.bf16.msra.mxu3 %v5207_v0 }
 0x347   : > { %vm5183_vm6 = vcmp.eq.f32.partialorder %v1628_v16, 8.507059e+37  ;;  %v3419_v32 = vld [vmem:[#allocation18 + $0x30] sm:$0xf0]  ;;  %v3425_v9 = vld [vmem:[#allocation18 + $0x28] sm:$0xf] }
 0x348   : > { %v1650_v18 = vor.u32 1.1754944e-38, %v1649_v47  ;;  %v3662_v16 = vld [vmem:[#allocation18 + $0x34] sm:$0xf0]  ;;  %v5202_v27 = vor.u32 %v3659_v19, %v3419_v32  ;;  %v3401_v47 = vld [vmem:[#allocation18] sm:$0xf]  ;;  %vm1648_vm11 = vcmp.eq.f32.partialorder %v1647_v41, 8.507059e+37 }
 0x349   : > { %v3912_v58 = vpop.eup %3911  ;;  %v5204_v62 = vor.u32 %v3662_v16, %v3425_v9  ;;  %v5213_v44 = vor.u32 %v3657_v51, %v3401_v47  ;;  %v1899_v51 = vpop.f32.mrf.mxu0 }
 0x34a   : > { %v5152_v10 = vadd.f32 1.0, %v3912_v58  ;;  %v5200_v58 = vor.u32 %v3661_v14, %v3417_v50  ;;  %2202 = vmatpush.bf16.msra.mxu1 %v5202_v27 }
 0x34b   : > { %v5158_v63 = vpop.eup %3913  ;;  %2215 = vmatpush.bf16.msra.mxu2 %v5204_v62 }
 0x34c   : > { %v5165_v26 = vpop.eup %3915  ;;  %v1620_v30 = vmul.f32 %v5158_v63, %v5135_v49  ;;  %3917 = vrcp.f32 %v5152_v10  ;;  %vm1625_vm4 = vweird.f32 %v5158_v63  ;;  %v1631_v49 = vor.u32 1.1754944e-38, %v1630_v33  ;;  %2189 = vmatpush.bf16.msra.mxu0 %v5200_v58 }
 0x34d   : > { %v1639_v43 = vmul.f32 %v5165_v26, %v5138_v46  ;;  %3919 = vtanh.f32 %v1613_v1  ;;  %vm1644_vm7 = vweird.f32 %v5165_v26  ;;  %vm5192_vm8 = vmor %vm1624_vm5, %vm1625_vm4  ;;  %v3655_v1 = vld [vmem:[#allocation18 + $0x4] sm:$0xf]  ;;  %vm1663_vm13 = vweird.f32 %v5152_v10 }
 0x34e   : > { %v1621_v60 = vsub.f32 1.0, %v1620_v30  ;;  %vm1645_vm10 = vmor %vm1643_vm9, %vm1644_vm7  ;;  %v5222_v46 = vor.u32 %v3655_v1, %v3403_v12  ;;  %v1956_v1 = vpop.f32.mrf.mxu3 }
 0x34f   : > { %v1640_v37 = vsub.f32 1.0, %v1639_v43  ;;  %v3411_v43 = vld [vmem:[#allocation18 + $0x18] sm:$0xf0] }
 0x350   : > { %v1622_v31 = vmul.f32 %v5158_v63, %v1621_v60  ;;  %v5224_v60 = vor.u32 %v3658_v36, %v3409_v13  ;;  %v5230_v9 = vor.u32 %v3656_v38, %v3411_v43  ;;  %2190 = vmatpush.bf16.msra.mxu0 %v5213_v44  ;;  %2203 = vmatpush.bf16.msra.mxu1 %v5222_v46 }
 0x351   : > { %v1641_v48 = vmul.f32 %v5165_v26, %v1640_v37  ;;  %v5305_v12 = vpop.f32.mrf.mxu0 }
 0x352   : > { %v3918_v33 = vpop.eup %3917  ;;  %v1623_v52 = vadd.f32 %v5158_v63, %v1622_v31  ;;  %2216 = vmatpush.bf16.msra.mxu2 %v5224_v60  ;;  %2229 = vmatpush.bf16.msra.mxu3 %v5230_v9 }
 0x353   : > { %v1642_v17 = vadd.f32 %v5165_v26, %v1641_v48  ;;  %v1659_v30 = vmul.f32 %v3918_v33, %v5152_v10  ;;  %v3920_v14 = vpop.eup %3919  ;;  %vm1664_vm12 = vweird.f32 %v3918_v33 }
 0x354   : > { %v1627_v50 = vsel %vm5192_vm8, %v5158_v63, %v1623_v52  ;;  %2308 = vmatpush.bf16.msrb.mxu0 %v5088_v39  ;;  %2321 = vmatpush.bf16.msrb.mxu1 %v5090_v29  ;;  %vm1665_vm14 = vmor %vm1663_vm13, %vm1664_vm12  ;;  %v1937_v52 = vpop.f32.mrf.mxu2 }
 0x355   : > { %v1632_v19 = vsel %vm5183_vm6, %v1631_v49, %v1627_v50  ;;  %v1646_v37 = vsel %vm1645_vm10, %v5165_v26, %v1642_v17  ;;  %v1660_v32 = vsub.f32 1.0, %v1659_v30 }
 0x356   : > { %v1651_v63 = vsel %vm1648_vm11, %v1650_v18, %v1646_v37  ;;  %v1674_v41 = vmul.f32 %v3920_v14, %v1632_v19  ;;  %2334 = vmatpush.bf16.msrb.mxu2 %v5092_v40  ;;  %2347 = vmatpush.bf16.msrb.mxu3 %v5095_v28  ;;  %v1667_v18 = vand.u32 2147483647, %v5152_v10  ;;  %v5311_v30 = vpop.f32.mrf.mxu3  ;;  %v1720_v14 = vld [vmem:[#allocation20] sm:$0xf] }
 0x357   : > { %v1673_v31 = vmul.f32 %v1651_v63, %v5076_v54  ;;  %v1661_v21 = vmul.f32 %v3918_v33, %v1660_v32  ;;  %v1669_v54 = vand.u32 2147483648, %v5152_v10  ;;  %v5325_v32 = vperm.slane %v1720_v14, 0 }
 0x358   : > { %2309 = vmatpush.bf16.msrb.mxu0 %v5102_v22  ;;  %2322 = vmatpush.bf16.msrb.mxu1 %v5104_v4  ;;  %vm1668_vm15 = vcmp.eq.f32.partialorder %v1667_v18, 8.507059e+37  ;;  %v5327_v63 = vperm.slane %v1720_v14, 1 }
 0x359   : > { %v1675_v34 = vadd.f32 %v1674_v41, %v1673_v31  ;;  %v1662_v26 = vadd.f32 %v3918_v33, %v1661_v21  ;;  %v1670_v16 = vor.u32 1.1754944e-38, %v1669_v54  ;;  %v1900_v41 = vadd.f32 %v1899_v51, %v5325_v32 }
 0x35a   : > { %2335 = vmatpush.bf16.msrb.mxu2 %v5106_v42  ;;  %2348 = vmatpush.bf16.msrb.mxu3 %v5111_v53 }
 0x35b   : > { %3921 = vtanh.f32 %v1675_v34  ;;  %1681 = vst [vmem:[#allocation5 + $0x8] sm:$0xff] %v1675_v34  ;;  %v1666_v49 = vsel %vm1665_vm14, %v3918_v33, %v1662_v26  ;;  %v1918_v33 = vpop.f32.mrf.mxu1 }
 0x35c   : > { %v1671_v48 = vsel %vm1668_vm15, %v1670_v16, %v1666_v49  ;;  %2310 = vmatpush.bf16.msrb.mxu0 %v5113_v57  ;;  %2323 = vmatpush.bf16.msrb.mxu1 %v5115_v5  ;;  %v5309_v17 = vpop.f32.mrf.mxu2  ;;  %v1919_v31 = vadd.f32 %v1918_v33, %v5327_v63  ;;  %v5335_v16 = vperm.slane %v1720_v14, 3 }
 0x35d   : > { %5540 = vst [vmem:[#allocation40_spill] sm:$0xff] %v5309_v17 }
 0x35e   : > { %2336 = vmatpush.bf16.msrb.mxu2 %v5118_v23  ;;  %2349 = vmatpush.bf16.msrb.mxu3 %v5120_v25 }
 0x360   : > { %2311 = vmatpush.bf16.msrb.mxu0 %v5124_v55  ;;  %2324 = vmatpush.bf16.msrb.mxu1 %v5128_v59 }
 0x361   : > { %v3922_v35 = vpop.eup %3921 }
 0x362   : > { %v1677_v3 = vmul.f32 %v3922_v35, %v1671_v48  ;;  %2337 = vmatpush.bf16.msrb.mxu2 %v5130_v61  ;;  %2350 = vmatpush.bf16.msrb.mxu3 %v5133_v20 }
 0x363   : > { %v5307_v13 = vpop.f32.mrf.mxu1 }
 0x364   : > { %1680 = vst [vmem:[#allocation4] sm:$0xff] %v1677_v3  ;;  %v1687_v10 = vpack.c.bf16 %v1677_v3, %v5082_v8  ;;  %2312 = vmatpush.bf16.msrb.mxu0 %v5147_v15  ;;  %2325 = vmatpush.bf16.msrb.mxu1 %v5149_v2  ;;  %v2015_v8 = vld [vmem:[#allocation4 + $0x8] sm:$0xff]  ;;  %v1957_v3 = vadd.f32 %v1956_v1, %v5335_v16 }
 0x365   : > { %v2022_v47 = vpack.c.bf16 %v2015_v8, %v2015_v8 }
 0x366   : > { %1903 = vmatmul.bf16.gmra.mxu0 %v1687_v10  ;;  %1922 = vmatmul.bf16.gmra.mxu1 %v1687_v10 }
 0x367   : > { %1941 = vmatmul.bf16.gmra.mxu2 %v1687_v10  ;;  %1960 = vmatmul.bf16.gmra.mxu3 %v1687_v10 }
 0x368   : > { %2338 = vmatpush.bf16.msrb.mxu2 %v5154_v24  ;;  %2351 = vmatpush.bf16.msrb.mxu3 %v5156_v45 }
 0x369   : > { %2313 = vmatpush.bf16.msrb.mxu0 %v5163_v11  ;;  %2326 = vmatpush.bf16.msrb.mxu1 %v5176_v56 }
 0x36c   : > { %2339 = vmatpush.bf16.msrb.mxu2 %v5178_v6  ;;  %2352 = vmatpush.bf16.msrb.mxu3 %v5180_v7 }
 0x36d   : > { %2314 = vmatpush.bf16.msrb.mxu0 %v5200_v58  ;;  %2327 = vmatpush.bf16.msrb.mxu1 %v5202_v27 }
 0x370   : > { %2340 = vmatpush.bf16.msrb.mxu2 %v5204_v62  ;;  %2353 = vmatpush.bf16.msrb.mxu3 %v5207_v0 }
 0x371   : > { %2315 = vmatpush.bf16.msrb.mxu0 %v5213_v44  ;;  %2328 = vmatpush.bf16.msrb.mxu1 %v5222_v46 }
 0x374   : > { %2341 = vmatpush.bf16.msrb.mxu2 %v5224_v60  ;;  %2354 = vmatpush.bf16.msrb.mxu3 %v5230_v9 }
 0x376   : > { %2191 = vmatmul.bf16.vlgmr.msra.gmra.mxu0 %v2022_v47  ;;  %2204 = vmatmul.bf16.vlgmr.msra.gmra.mxu1 %v2022_v47 }
 0x377   : > { %2217 = vmatmul.bf16.vlgmr.msra.gmra.mxu2 %v2022_v47  ;;  %2230 = vmatmul.bf16.vlgmr.msra.gmra.mxu3 %v2022_v47 }
 0x378   : > { %2434 = vmatpush.bf16.msra.mxu0 %v5088_v39  ;;  %2447 = vmatpush.bf16.msra.mxu1 %v5090_v29 }
 0x379   : > { %2460 = vmatpush.bf16.msra.mxu2 %v5092_v40  ;;  %2473 = vmatpush.bf16.msra.mxu3 %v5095_v28 }
 0x37c   : > { %2435 = vmatpush.bf16.msra.mxu0 %v5102_v22  ;;  %2448 = vmatpush.bf16.msra.mxu1 %v5104_v4 }
 0x37d   : > { %2461 = vmatpush.bf16.msra.mxu2 %v5106_v42  ;;  %2474 = vmatpush.bf16.msra.mxu3 %v5111_v53 }
 0x380   : > { %2436 = vmatpush.bf16.msra.mxu0 %v5113_v57  ;;  %2449 = vmatpush.bf16.msra.mxu1 %v5115_v5 }
 0x381   : > { %2462 = vmatpush.bf16.msra.mxu2 %v5118_v23  ;;  %2475 = vmatpush.bf16.msra.mxu3 %v5120_v25 }
 0x384   : > { %2437 = vmatpush.bf16.msra.mxu0 %v5124_v55  ;;  %2450 = vmatpush.bf16.msra.mxu1 %v5128_v59 }
 0x385   : > { %2463 = vmatpush.bf16.msra.mxu2 %v5130_v61  ;;  %2476 = vmatpush.bf16.msra.mxu3 %v5133_v20 }
 0x388   : > { %2438 = vmatpush.bf16.msra.mxu0 %v5147_v15  ;;  %2451 = vmatpush.bf16.msra.mxu1 %v5149_v2 }
 0x389   : > { %2464 = vmatpush.bf16.msra.mxu2 %v5154_v24  ;;  %2477 = vmatpush.bf16.msra.mxu3 %v5156_v45 }
 0x38c   : > { %2439 = vmatpush.bf16.msra.mxu0 %v5163_v11  ;;  %2452 = vmatpush.bf16.msra.mxu1 %v5176_v56 }
 0x38d   : > { %2465 = vmatpush.bf16.msra.mxu2 %v5178_v6  ;;  %2478 = vmatpush.bf16.msra.mxu3 %v5180_v7 }
 0x390   : > { %2440 = vmatpush.bf16.msra.mxu0 %v5200_v58  ;;  %2453 = vmatpush.bf16.msra.mxu1 %v5202_v27 }
 0x391   : > { %2466 = vmatpush.bf16.msra.mxu2 %v5204_v62  ;;  %2479 = vmatpush.bf16.msra.mxu3 %v5207_v0 }
 0x394   : > { %2441 = vmatpush.bf16.msra.mxu0 %v5213_v44  ;;  %2454 = vmatpush.bf16.msra.mxu1 %v5222_v46 }
 0x395   : > { %2467 = vmatpush.bf16.msra.mxu2 %v5224_v60  ;;  %2480 = vmatpush.bf16.msra.mxu3 %v5230_v9 }
 0x3e3   : > { %v5313_v36 = vpop.f32.mrf.mxu0  ;;  %v5315_v38 = vpop.f32.mrf.mxu1 }
 0x3e4   : > { %5541 = vst [vmem:[#allocation39_spill] sm:$0xff] %v5313_v36 }
 0x3e5   : > { %5542 = vst [vmem:[#allocation41_spill] sm:$0xff] %v5315_v38 }
 0x3ea   : > { %v5317_v43 = vpop.f32.mrf.mxu2  ;;  %v5319_v50 = vpop.f32.mrf.mxu3 }
 0x3eb   : > { %5543 = vst [vmem:[#allocation42_spill] sm:$0xff] %v5317_v43  ;;  %v5321_v19 = vpop.f32.mrf.mxu0  ;;  %v5323_v37 = vpop.f32.mrf.mxu1 }
 0x3ec   : > { %5544 = vst [vmem:[#allocation44_spill] sm:$0xff] %v5319_v50 }
 0x3ed   : > { %5545 = vst [vmem:[#allocation43_spill] sm:$0xff] %v5321_v19 }
 0x3ee   : > { %5546 = vst [vmem:[#allocation45_spill] sm:$0xff] %v5323_v37 }
 0x3f2   : > { %v5331_v21 = vpop.f32.mrf.mxu2  ;;  %v5333_v34 = vpop.f32.mrf.mxu3 }
 0x3f3   : > { %5547 = vst [vmem:[#allocation46_spill] sm:$0xff] %v5331_v21  ;;  %v2192_v26 = vpop.f32.mrf.mxu0  ;;  %v2205_v54 = vpop.f32.mrf.mxu1 }
 0x3f4   : > { %5548 = vst [vmem:[#allocation47_spill] sm:$0xff] %v5333_v34  ;;  %v2235_v18 = vadd.f32 %v2192_v26, %v1900_v41  ;;  %v2236_v49 = vadd.f32 %v2205_v54, %v1919_v31  ;;  %v5338_v31 = vperm.slane %v1720_v14, 2 }
 0x3f6   : > { %v3527_v35 = vmul.f32 -1.442695, %v2235_v18  ;;  %v3528_v48 = vmul.f32 -1.442695, %v2236_v49  ;;  %5549 = vst [vmem:[#allocation48_spill] sm:$0xff] %v5338_v31  ;;  %v1938_v1 = vadd.f32 %v1937_v52, %v5338_v31 }
 0x3f8   : > { %3923 = vpow2.f32 %v3527_v35 }
 0x3f9   : > { %3925 = vpow2.f32 %v3528_v48 }
 0x3fa   : > { %v2218_v10 = vpop.f32.mrf.mxu2  ;;  %v2231_v8 = vpop.f32.mrf.mxu3 }
 0x3fb   : > { %v2238_v47 = vadd.f32 %v2231_v8, %v1957_v3  ;;  %v2194_v51 = vpop.f32.mrf.mxu0  ;;  %v2207_v33 = vpop.f32.mrf.mxu1  ;;  %v2237_v48 = vadd.f32 %v2218_v10, %v1938_v1 }
 0x3fd   : > { %v3529_v21 = vmul.f32 -1.442695, %v2238_v47 }
 0x3fe   : > { %v3924_v37 = vpop.eup %3923 }
 0x3ff   : > { %v3926_v34 = vpop.eup %3925  ;;  %v2242_v19 = vadd.f32 1.0, %v3924_v37  ;;  %3927 = vpow2.f32 %v3529_v21 }
 0x400   : > { %v2261_v41 = vadd.f32 1.0, %v3926_v34 }
 0x401   : > { %3929 = vrcp.f32 %v2242_v19  ;;  %v2254_v21 = vand.u32 2147483648, %v2242_v19  ;;  %v2252_v33 = vand.u32 2147483647, %v2242_v19  ;;  %vm2248_vm2 = vweird.f32 %v2242_v19 }
 0x402   : > { %3931 = vrcp.f32 %v2261_v41  ;;  %v2233_v26 = vpop.f32.mrf.mxu3  ;;  %v2220_v54 = vpop.f32.mrf.mxu2  ;;  %v2273_v14 = vand.u32 2147483648, %v2261_v41  ;;  %vm2267_vm3 = vweird.f32 %v2261_v41 }
 0x403   : > { %v2271_v54 = vand.u32 2147483647, %v2261_v41  ;;  %v2255_v10 = vor.u32 1.1754944e-38, %v2254_v21  ;;  %vm2253_vm6 = vcmp.eq.f32.partialorder %v2252_v33, 8.507059e+37 }
 0x405   : > { %v3928_v18 = vpop.eup %3927  ;;  %vm2272_vm7 = vcmp.eq.f32.partialorder %v2271_v54, 8.507059e+37 }
 0x406   : > { %v2281_v49 = vadd.f32 1.0, %v3928_v18 }
 0x407   : > { %v3930_v35 = vpop.eup %3929 }
 0x408   : > { %v3932_v3 = vpop.eup %3931  ;;  %v2244_v8 = vmul.f32 %v3930_v35, %v2242_v19  ;;  %3933 = vrcp.f32 %v2281_v49  ;;  %vm2249_vm0 = vweird.f32 %v3930_v35  ;;  %vm2287_vm9 = vweird.f32 %v2281_v49 }
 0x409   : > { %v2263_v47 = vmul.f32 %v3932_v3, %v2261_v41  ;;  %3935 = vtanh.f32 %v2237_v48  ;;  %vm2268_vm1 = vweird.f32 %v3932_v3  ;;  %vm2250_vm4 = vmor %vm2248_vm2, %vm2249_vm0 }
 0x40a   : > { %v2245_v51 = vsub.f32 1.0, %v2244_v8  ;;  %vm2269_vm5 = vmor %vm2267_vm3, %vm2268_vm1  ;;  %v2274_v8 = vor.u32 1.1754944e-38, %v2273_v14  ;;  %v2293_v14 = vand.u32 2147483648, %v2281_v49 }
 0x40b   : > { %v2264_v37 = vsub.f32 1.0, %v2263_v47  ;;  %v2017_v47 = vld [vmem:[#allocation5] sm:$0xff] }
 0x40c   : > { %v2246_v34 = vmul.f32 %v3930_v35, %v2245_v51 }
 0x40d   : > { %v2265_v26 = vmul.f32 %v3932_v3, %v2264_v37 }
 0x40e   : > { %v3934_v43 = vpop.eup %3933  ;;  %v2247_v52 = vadd.f32 %v3930_v35, %v2246_v34 }
 0x40f   : > { %v2266_v18 = vadd.f32 %v3932_v3, %v2265_v26  ;;  %v2283_v1 = vmul.f32 %v3934_v43, %v2281_v49  ;;  %v3936_v48 = vpop.eup %3935  ;;  %vm2288_vm8 = vweird.f32 %v3934_v43 }
 0x410   : > { %v2251_v50 = vsel %vm2250_vm4, %v3930_v35, %v2247_v52  ;;  %v2291_v35 = vand.u32 2147483647, %v2281_v49  ;;  %vm2289_vm10 = vmor %vm2287_vm9, %vm2288_vm8 }
 0x411   : > { %v2256_v51 = vsel %vm2253_vm6, %v2255_v10, %v2251_v50  ;;  %v2270_v38 = vsel %vm2269_vm5, %v3932_v3, %v2266_v18  ;;  %v2284_v37 = vsub.f32 1.0, %v2283_v1  ;;  %v2294_v50 = vor.u32 1.1754944e-38, %v2293_v14 }
 0x412   : > { %v2275_v36 = vsel %vm2272_vm7, %v2274_v8, %v2270_v38  ;;  %v2298_v17 = vmul.f32 %v3936_v48, %v2256_v51  ;;  %vm2292_vm11 = vcmp.eq.f32.partialorder %v2291_v35, 8.507059e+37 }
 0x413   : > { %v2297_v31 = vmul.f32 %v2275_v36, %v2017_v47  ;;  %v2285_v19 = vmul.f32 %v3934_v43, %v2284_v37 }
 0x415   : > { %v5341_v41 = vadd.f32 %v2298_v17, %v2297_v31  ;;  %v2286_v21 = vadd.f32 %v3934_v43, %v2285_v19 }
 0x417   : > { %3937 = vtanh.f32 %v5341_v41  ;;  %v2290_v34 = vsel %vm2289_vm10, %v3934_v43, %v2286_v21 }
 0x418   : > { %v2295_v33 = vsel %vm2292_vm11, %v2294_v50, %v2290_v34 }
 0x41d   : > { %v3938_v3 = vpop.eup %3937 }
 0x41e   : > { %v2301_v38 = vmul.f32 %v3938_v3, %v2295_v33 }
 0x420   : > { %2302 = vst [vmem:[%s4783_s17] sm:$0xff] %v2301_v38  ;;  %v2307_v36 = vpack.c.bf16 %v2301_v38, %v2301_v38 }
 0x422   : > { %2316 = vmatmul.bf16.vlgmr.msrb.gmra.mxu0 %v2307_v36  ;;  %2329 = vmatmul.bf16.vlgmr.msrb.gmra.mxu1 %v2307_v36 }
 0x423   : > { %2342 = vmatmul.bf16.vlgmr.msrb.gmra.mxu2 %v2307_v36  ;;  %2355 = vmatmul.bf16.vlgmr.msrb.gmra.mxu3 %v2307_v36 }
 0x424   : > { %2560 = vmatpush.bf16.msrb.mxu0 %v5088_v39  ;;  %2573 = vmatpush.bf16.msrb.mxu1 %v5090_v29  ;;  %v1902_v39 = vadd.f32 %v5305_v12, %v5325_v32  ;;  %v1921_v29 = vadd.f32 %v5307_v13, %v5327_v63 }
 0x425   : > { %2586 = vmatpush.bf16.msrb.mxu2 %v5092_v40  ;;  %2599 = vmatpush.bf16.msrb.mxu3 %v5095_v28 }
 0x428   : > { %2561 = vmatpush.bf16.msrb.mxu0 %v5102_v22  ;;  %2574 = vmatpush.bf16.msrb.mxu1 %v5104_v4 }
 0x429   : > { %2587 = vmatpush.bf16.msrb.mxu2 %v5106_v42  ;;  %2600 = vmatpush.bf16.msrb.mxu3 %v5111_v53 }
 0x42c   : > { %2562 = vmatpush.bf16.msrb.mxu0 %v5113_v57  ;;  %2575 = vmatpush.bf16.msrb.mxu1 %v5115_v5  ;;  %v1959_v57 = vadd.f32 %v5311_v30, %v5335_v16 }
 0x42d   : > { %2588 = vmatpush.bf16.msrb.mxu2 %v5118_v23  ;;  %2601 = vmatpush.bf16.msrb.mxu3 %v5120_v25 }
 0x430   : > { %2563 = vmatpush.bf16.msrb.mxu0 %v5124_v55  ;;  %2576 = vmatpush.bf16.msrb.mxu1 %v5128_v59 }
 0x431   : > { %2589 = vmatpush.bf16.msrb.mxu2 %v5130_v61  ;;  %2602 = vmatpush.bf16.msrb.mxu3 %v5133_v20 }
 0x434   : > { %2564 = vmatpush.bf16.msrb.mxu0 %v5147_v15  ;;  %2577 = vmatpush.bf16.msrb.mxu1 %v5149_v2 }
 0x435   : > { %2590 = vmatpush.bf16.msrb.mxu2 %v5154_v24  ;;  %2603 = vmatpush.bf16.msrb.mxu3 %v5156_v45 }
 0x438   : > { %2565 = vmatpush.bf16.msrb.mxu0 %v5163_v11  ;;  %2578 = vmatpush.bf16.msrb.mxu1 %v5176_v56 }
 0x439   : > { %2591 = vmatpush.bf16.msrb.mxu2 %v5178_v6  ;;  %2604 = vmatpush.bf16.msrb.mxu3 %v5180_v7  ;;  %v5550_v6 = vld [vmem:[#allocation48_spill] sm:$0xff] }
 0x43a   : > { %v5551_v7 = vld [vmem:[#allocation40_spill] sm:$0xff] }
 0x43c   : > { %2566 = vmatpush.bf16.msrb.mxu0 %v5200_v58  ;;  %2579 = vmatpush.bf16.msrb.mxu1 %v5202_v27  ;;  %v1940_v58 = vadd.f32 %v5551_v7, %v5550_v6 }
 0x43d   : > { %2592 = vmatpush.bf16.msrb.mxu2 %v5204_v62  ;;  %2605 = vmatpush.bf16.msrb.mxu3 %v5207_v0 }
 0x440   : > { %2567 = vmatpush.bf16.msrb.mxu0 %v5213_v44  ;;  %2580 = vmatpush.bf16.msrb.mxu1 %v5222_v46 }
 0x441   : > { %2593 = vmatpush.bf16.msrb.mxu2 %v5224_v60  ;;  %2606 = vmatpush.bf16.msrb.mxu3 %v5230_v9 }
 0x49f   : > { %v2317_v40 = vpop.f32.mrf.mxu0  ;;  %v2330_v28 = vpop.f32.mrf.mxu1 }
 0x4a0   : > { %v2360_v22 = vadd.f32 %v2317_v40, %v1902_v39  ;;  %v2361_v4 = vadd.f32 %v2330_v28, %v1921_v29  ;;  %v5552_v28 = vld [vmem:[#allocation39_spill] sm:$0xff] }
 0x4a2   : > { %v3530_v42 = vmul.f32 -1.442695, %v2360_v22  ;;  %v3531_v53 = vmul.f32 -1.442695, %v2361_v4  ;;  %v1905_v22 = vadd.f32 %v5552_v28, %v5325_v32  ;;  %v5553_v4 = vld [vmem:[#allocation41_spill] sm:$0xff] }
 0x4a4   : > { %3939 = vpow2.f32 %v3530_v42  ;;  %v1924_v42 = vadd.f32 %v5553_v4, %v5327_v63 }
 0x4a5   : > { %3941 = vpow2.f32 %v3531_v53 }
 0x4a6   : > { %v2343_v5 = vpop.f32.mrf.mxu2  ;;  %v2356_v23 = vpop.f32.mrf.mxu3 }
 0x4a7   : > { %v2363_v25 = vadd.f32 %v2356_v23, %v1959_v57  ;;  %v2319_v55 = vpop.f32.mrf.mxu0  ;;  %v2332_v59 = vpop.f32.mrf.mxu1  ;;  %v2362_v0 = vadd.f32 %v2343_v5, %v1940_v58 }
 0x4a8   : > { %v5554_v59 = vld [vmem:[#allocation44_spill] sm:$0xff] }
 0x4a9   : > { %v3532_v61 = vmul.f32 -1.442695, %v2363_v25 }
 0x4aa   : > { %v3940_v20 = vpop.eup %3939 }
 0x4ab   : > { %v3942_v15 = vpop.eup %3941  ;;  %v2367_v2 = vadd.f32 1.0, %v3940_v20  ;;  %3943 = vpow2.f32 %v3532_v61  ;;  %v1962_v61 = vadd.f32 %v5554_v59, %v5335_v16 }
 0x4ac   : > { %v2386_v24 = vadd.f32 1.0, %v3942_v15 }
 0x4ad   : > { %3945 = vrcp.f32 %v2367_v2  ;;  %v2379_v13 = vand.u32 2147483648, %v2367_v2  ;;  %v2377_v43 = vand.u32 2147483647, %v2367_v2  ;;  %vm2373_vm14 = vweird.f32 %v2367_v2 }
 0x4ae   : > { %3947 = vrcp.f32 %v2386_v24  ;;  %v2345_v45 = vpop.f32.mrf.mxu2  ;;  %v2358_v11 = vpop.f32.mrf.mxu3  ;;  %v2398_v17 = vand.u32 2147483648, %v2386_v24  ;;  %v2396_v49 = vand.u32 2147483647, %v2386_v24  ;;  %vm2392_vm15 = vweird.f32 %v2386_v24 }
 0x4af   : > { %v2380_v52 = vor.u32 1.1754944e-38, %v2379_v13  ;;  %vm2378_vm2 = vcmp.eq.f32.partialorder %v2377_v43, 8.507059e+37 }
 0x4b0   : > { %v2399_v1 = vor.u32 1.1754944e-38, %v2398_v17  ;;  %vm2397_vm3 = vcmp.eq.f32.partialorder %v2396_v49, 8.507059e+37 }
 0x4b1   : > { %v3944_v56 = vpop.eup %3943 }
 0x4b2   : > { %v2406_v27 = vadd.f32 1.0, %v3944_v56 }
 0x4b3   : > { %v3946_v62 = vpop.eup %3945 }
 0x4b4   : > { %v3948_v44 = vpop.eup %3947  ;;  %v2369_v46 = vmul.f32 %v3946_v62, %v2367_v2  ;;  %3949 = vrcp.f32 %v2406_v27  ;;  %vm2374_vm12 = vweird.f32 %v3946_v62  ;;  %v2418_v3 = vand.u32 2147483648, %v2406_v27 }
 0x4b5   : > { %v2388_v60 = vmul.f32 %v3948_v44, %v2386_v24  ;;  %3951 = vtanh.f32 %v2362_v0  ;;  %vm2393_vm13 = vweird.f32 %v3948_v44  ;;  %vm2375_vm0 = vmor %vm2373_vm14, %vm2374_vm12  ;;  %vm2412_vm5 = vweird.f32 %v2406_v27 }
 0x4b6   : > { %v2370_v9 = vsub.f32 1.0, %v2369_v46  ;;  %vm2394_vm1 = vmor %vm2392_vm15, %vm2393_vm13  ;;  %v2416_v33 = vand.u32 2147483647, %v2406_v27  ;;  %v2419_v36 = vor.u32 1.1754944e-38, %v2418_v3  ;;  %v5555_v46 = vld [vmem:[#allocation42_spill] sm:$0xff] }
 0x4b7   : > { %v2389_v12 = vsub.f32 1.0, %v2388_v60  ;;  %v1943_v60 = vadd.f32 %v5555_v46, %v5550_v6 }
 0x4b8   : > { %v2371_v30 = vmul.f32 %v3946_v62, %v2370_v9  ;;  %vm2417_vm7 = vcmp.eq.f32.partialorder %v2416_v33, 8.507059e+37 }
 0x4b9   : > { %v2390_v31 = vmul.f32 %v3948_v44, %v2389_v12 }
 0x4ba   : > { %v3950_v26 = vpop.eup %3949  ;;  %v2372_v54 = vadd.f32 %v3946_v62, %v2371_v30 }
 0x4bb   : > { %v2391_v10 = vadd.f32 %v3948_v44, %v2390_v31  ;;  %v2408_v18 = vmul.f32 %v3950_v26, %v2406_v27  ;;  %v3952_v47 = vpop.eup %3951  ;;  %vm2413_vm4 = vweird.f32 %v3950_v26 }
 0x4bc   : > { %v2376_v8 = vsel %vm2375_vm0, %v3946_v62, %v2372_v54  ;;  %vm2414_vm6 = vmor %vm2412_vm5, %vm2413_vm4 }
 0x4bd   : > { %v2381_v48 = vsel %vm2378_vm2, %v2380_v52, %v2376_v8  ;;  %v2395_v51 = vsel %vm2394_vm1, %v3948_v44, %v2391_v10  ;;  %v2409_v37 = vsub.f32 1.0, %v2408_v18 }
 0x4be   : > { %v2400_v19 = vsel %vm2397_vm3, %v2399_v1, %v2395_v51  ;;  %v2423_v21 = vmul.f32 %v3952_v47, %v2381_v48 }
 0x4bf   : > { %v2422_v14 = vmul.f32 %v2400_v19, %v5341_v41  ;;  %v2410_v35 = vmul.f32 %v3950_v26, %v2409_v37 }
 0x4c1   : > { %v5386_v34 = vadd.f32 %v2423_v21, %v2422_v14  ;;  %v2411_v50 = vadd.f32 %v3950_v26, %v2410_v35 }
 0x4c3   : > { %3953 = vtanh.f32 %v5386_v34  ;;  %v2415_v38 = vsel %vm2414_vm6, %v3950_v26, %v2411_v50 }
 0x4c4   : > { %v2420_v29 = vsel %vm2417_vm7, %v2419_v36, %v2415_v38 }
 0x4c9   : > { %v3954_v39 = vpop.eup %3953 }
 0x4ca   : > { %v2426_v40 = vmul.f32 %v3954_v39, %v2420_v29 }
 0x4cc   : > { %3533 = vst [vmem:[%s4783_s17 + $0x8] sm:$0xff] %v2426_v40  ;;  %v2433_v41 = vpack.c.bf16 %v2426_v40, %v2426_v40 }
 0x4ce   : > { %2442 = vmatmul.bf16.vlgmr.msra.gmra.mxu0 %v2433_v41  ;;  %2455 = vmatmul.bf16.vlgmr.msra.gmra.mxu1 %v2433_v41 }
 0x4cf   : > { %2468 = vmatmul.bf16.vlgmr.msra.gmra.mxu2 %v2433_v41  ;;  %2481 = vmatmul.bf16.vlgmr.msra.gmra.mxu3 %v2433_v41 }
 0x54b   : > { %v2443_v53 = vpop.f32.mrf.mxu0  ;;  %v2456_v57 = vpop.f32.mrf.mxu1 }
 0x54c   : > { %v2486_v5 = vadd.f32 %v2443_v53, %v1905_v22  ;;  %v2487_v23 = vadd.f32 %v2456_v57, %v1924_v42 }
 0x54e   : > { %v3534_v25 = vmul.f32 -1.442695, %v2486_v5  ;;  %v3535_v55 = vmul.f32 -1.442695, %v2487_v23  ;;  %v5556_v5 = vld [vmem:[#allocation43_spill] sm:$0xff] }
 0x54f   : > { %v1907_v23 = vadd.f32 %v5556_v5, %v5325_v32 }
 0x550   : > { %3955 = vpow2.f32 %v3534_v25  ;;  %v5557_v25 = vld [vmem:[#allocation45_spill] sm:$0xff] }
 0x551   : > { %3957 = vpow2.f32 %v3535_v55  ;;  %v1926_v55 = vadd.f32 %v5557_v25, %v5327_v63 }
 0x552   : > { %v2469_v20 = vpop.f32.mrf.mxu2  ;;  %v2482_v15 = vpop.f32.mrf.mxu3 }
 0x553   : > { %v2489_v2 = vadd.f32 %v2482_v15, %v1962_v61  ;;  %v2445_v24 = vpop.f32.mrf.mxu0  ;;  %v2458_v45 = vpop.f32.mrf.mxu1  ;;  %v2488_v13 = vadd.f32 %v2469_v20, %v1943_v60 }
 0x554   : > { %v5558_v45 = vld [vmem:[#allocation47_spill] sm:$0xff] }
 0x555   : > { %v3536_v11 = vmul.f32 -1.442695, %v2489_v2 }
 0x556   : > { %v3956_v56 = vpop.eup %3955 }
 0x557   : > { %v3958_v7 = vpop.eup %3957  ;;  %v2493_v58 = vadd.f32 1.0, %v3956_v56  ;;  %3959 = vpow2.f32 %v3536_v11  ;;  %v1964_v11 = vadd.f32 %v5558_v45, %v5335_v16 }
 0x558   : > { %v2512_v27 = vadd.f32 1.0, %v3958_v7 }
 0x559   : > { %3961 = vrcp.f32 %v2493_v58  ;;  %v2505_v26 = vand.u32 2147483648, %v2493_v58  ;;  %v2503_v10 = vand.u32 2147483647, %v2493_v58  ;;  %vm2499_vm10 = vweird.f32 %v2493_v58 }
 0x55a   : > { %3963 = vrcp.f32 %v2512_v27  ;;  %v2471_v62 = vpop.f32.mrf.mxu2  ;;  %v2484_v0 = vpop.f32.mrf.mxu3  ;;  %v2524_v54 = vand.u32 2147483648, %v2512_v27  ;;  %v2522_v1 = vand.u32 2147483647, %v2512_v27  ;;  %vm2518_vm11 = vweird.f32 %v2512_v27 }
 0x55b   : > { %v2506_v48 = vor.u32 1.1754944e-38, %v2505_v26  ;;  %vm2504_vm14 = vcmp.eq.f32.partialorder %v2503_v10, 8.507059e+37 }
 0x55c   : > { %v2525_v19 = vor.u32 1.1754944e-38, %v2524_v54  ;;  %vm2523_vm15 = vcmp.eq.f32.partialorder %v2522_v1, 8.507059e+37 }
 0x55d   : > { %v3960_v44 = vpop.eup %3959 }
 0x55e   : > { %v2532_v9 = vadd.f32 1.0, %v3960_v44 }
 0x55f   : > { %v3962_v12 = vpop.eup %3961 }
 0x560   : > { %v3964_v17 = vpop.eup %3963  ;;  %v2495_v30 = vmul.f32 %v3962_v12, %v2493_v58  ;;  %3965 = vrcp.f32 %v2532_v9  ;;  %vm2500_vm8 = vweird.f32 %v3962_v12  ;;  %v2544_v41 = vand.u32 2147483648, %v2532_v9 }
 0x561   : > { %v2514_v43 = vmul.f32 %v3964_v17, %v2512_v27  ;;  %3967 = vtanh.f32 %v2488_v13  ;;  %vm2519_vm9 = vweird.f32 %v3964_v17  ;;  %vm2501_vm12 = vmor %vm2499_vm10, %vm2500_vm8  ;;  %vm2538_vm1 = vweird.f32 %v2532_v9  ;;  %v5559_v13 = vld [vmem:[#allocation46_spill] sm:$0xff] }
 0x562   : > { %v2496_v31 = vsub.f32 1.0, %v2495_v30  ;;  %vm2520_vm13 = vmor %vm2518_vm11, %vm2519_vm9  ;;  %v2542_v28 = vand.u32 2147483647, %v2532_v9  ;;  %v2545_v4 = vor.u32 1.1754944e-38, %v2544_v41  ;;  %v1945_v16 = vadd.f32 %v5559_v13, %v5550_v6 }
 0x563   : > { %v2515_v49 = vsub.f32 1.0, %v2514_v43 }
 0x564   : > { %v2497_v52 = vmul.f32 %v3962_v12, %v2496_v31  ;;  %vm2543_vm3 = vcmp.eq.f32.partialorder %v2542_v28, 8.507059e+37 }
 0x565   : > { %v2516_v18 = vmul.f32 %v3964_v17, %v2515_v49 }
 0x566   : > { %v3966_v8 = vpop.eup %3965  ;;  %v2498_v47 = vadd.f32 %v3962_v12, %v2497_v52 }
 0x567   : > { %v2517_v51 = vadd.f32 %v3964_v17, %v2516_v18  ;;  %v2534_v37 = vmul.f32 %v3966_v8, %v2532_v9  ;;  %v3968_v14 = vpop.eup %3967  ;;  %vm2539_vm0 = vweird.f32 %v3966_v8 }
 0x568   : > { %v2502_v21 = vsel %vm2501_vm12, %v3962_v12, %v2498_v47  ;;  %vm2540_vm2 = vmor %vm2538_vm1, %vm2539_vm0 }
 0x569   : > { %v2507_v35 = vsel %vm2504_vm14, %v2506_v48, %v2502_v21  ;;  %v2521_v50 = vsel %vm2520_vm13, %v3964_v17, %v2517_v51  ;;  %v2535_v3 = vsub.f32 1.0, %v2534_v37 }
 0x56a   : > { %v2526_v33 = vsel %vm2523_vm15, %v2525_v19, %v2521_v50  ;;  %v2549_v38 = vmul.f32 %v3968_v14, %v2507_v35 }
 0x56b   : > { %v2548_v36 = vmul.f32 %v2526_v33, %v5386_v34  ;;  %v2536_v39 = vmul.f32 %v3966_v8, %v2535_v3 }
 0x56d   : > { %v5399_v29 = vadd.f32 %v2549_v38, %v2548_v36  ;;  %v2537_v40 = vadd.f32 %v3966_v8, %v2536_v39 }
 0x56f   : > { %3969 = vtanh.f32 %v5399_v29  ;;  %v2541_v22 = vsel %vm2540_vm2, %v3966_v8, %v2537_v40 }
 0x570   : > { %v2546_v53 = vsel %vm2543_vm3, %v2545_v4, %v2541_v22 }
 0x575   : > { %v3970_v42 = vpop.eup %3969 }
 0x576   : > { %v2552_v57 = vmul.f32 %v3970_v42, %v2546_v53 }
 0x578   : > { %3537 = vst [vmem:[%s4783_s17 + $0x10] sm:$0xff] %v2552_v57  ;;  %v2559_v34 = vpack.c.bf16 %v2552_v57, %v2552_v57 }
 0x57a   : > { %2568 = vmatmul.bf16.vlgmr.msrb.gmra.mxu0 %v2559_v34  ;;  %2581 = vmatmul.bf16.vlgmr.msrb.gmra.mxu1 %v2559_v34 }
 0x57b   : > { %2594 = vmatmul.bf16.vlgmr.msrb.gmra.mxu2 %v2559_v34  ;;  %2607 = vmatmul.bf16.vlgmr.msrb.gmra.mxu3 %v2559_v34 }
 0x5f7   : > { %v2569_v59 = vpop.f32.mrf.mxu0  ;;  %v2582_v61 = vpop.f32.mrf.mxu1 }
 0x5f8   : > { %v2612_v20 = vadd.f32 %v2569_v59, %v1907_v23  ;;  %v2613_v15 = vadd.f32 %v2582_v61, %v1926_v55 }
 0x5fa   : > { %v3538_v2 = vmul.f32 -1.442695, %v2612_v20  ;;  %v3539_v24 = vmul.f32 -1.442695, %v2613_v15 }
 0x5fc   : > { %3971 = vpow2.f32 %v3538_v2 }
 0x5fd   : > { %3973 = vpow2.f32 %v3539_v24 }
 0x5fe   : > { %v2595_v56 = vpop.f32.mrf.mxu2  ;;  %v2608_v7 = vpop.f32.mrf.mxu3 }
 0x5ff   : > { %v2615_v58 = vadd.f32 %v2608_v7, %v1964_v11  ;;  %v2571_v27 = vpop.f32.mrf.mxu0  ;;  %v2584_v62 = vpop.f32.mrf.mxu1  ;;  %v2614_v43 = vadd.f32 %v2595_v56, %v1945_v16 }
 0x601   : > { %v3540_v32 = vmul.f32 -1.442695, %v2615_v58 }
 0x602   : > { %v3972_v0 = vpop.eup %3971 }
 0x603   : > { %v3974_v44 = vpop.eup %3973  ;;  %v2619_v63 = vadd.f32 1.0, %v3972_v0  ;;  %3975 = vpow2.f32 %v3540_v32 }
 0x604   : > { %v2638_v46 = vadd.f32 1.0, %v3974_v44 }
 0x605   : > { %3977 = vrcp.f32 %v2619_v63  ;;  %v2631_v10 = vand.u32 2147483648, %v2619_v63  ;;  %v2629_v8 = vand.u32 2147483647, %v2619_v63  ;;  %vm2625_vm6 = vweird.f32 %v2619_v63 }
 0x606   : > { %3979 = vrcp.f32 %v2638_v46  ;;  %v2597_v60 = vpop.f32.mrf.mxu2  ;;  %v2610_v9 = vpop.f32.mrf.mxu3  ;;  %v2650_v18 = vand.u32 2147483648, %v2638_v46  ;;  %v2648_v48 = vand.u32 2147483647, %v2638_v46  ;;  %vm2644_vm7 = vweird.f32 %v2638_v46 }
 0x607   : > { %v2632_v37 = vor.u32 1.1754944e-38, %v2631_v10  ;;  %vm2630_vm10 = vcmp.eq.f32.partialorder %v2629_v8, 8.507059e+37 }
 0x608   : > { %v2651_v14 = vor.u32 1.1754944e-38, %v2650_v18  ;;  %vm2649_vm11 = vcmp.eq.f32.partialorder %v2648_v48, 8.507059e+37 }
 0x609   : > { %v3976_v12 = vpop.eup %3975 }
 0x60a   : > { %v2658_v17 = vadd.f32 1.0, %v3976_v12 }
 0x60b   : > { %v3978_v30 = vpop.eup %3977 }
 0x60c   : > { %v3980_v31 = vpop.eup %3979  ;;  %v2621_v49 = vmul.f32 %v3978_v30, %v2619_v63  ;;  %3981 = vrcp.f32 %v2658_v17  ;;  %vm2626_vm4 = vweird.f32 %v3978_v30  ;;  %v2670_v4 = vand.u32 2147483648, %v2658_v17 }
 0x60d   : > { %v2640_v26 = vmul.f32 %v3980_v31, %v2638_v46  ;;  %3983 = vtanh.f32 %v2614_v43  ;;  %vm2645_vm5 = vweird.f32 %v3980_v31  ;;  %vm2627_vm8 = vmor %vm2625_vm6, %vm2626_vm4  ;;  %vm2664_vm13 = vweird.f32 %v2658_v17 }
 0x60e   : > { %v2622_v54 = vsub.f32 1.0, %v2621_v49  ;;  %vm2646_vm9 = vmor %vm2644_vm7, %vm2645_vm5  ;;  %v2668_v42 = vand.u32 2147483647, %v2658_v17  ;;  %v2671_v57 = vor.u32 1.1754944e-38, %v2670_v4 }
 0x60f   : > { %v2641_v52 = vsub.f32 1.0, %v2640_v26 }
 0x610   : > { %v2623_v1 = vmul.f32 %v3978_v30, %v2622_v54  ;;  %vm2669_vm15 = vcmp.eq.f32.partialorder %v2668_v42, 8.507059e+37 }
 0x611   : > { %v2642_v47 = vmul.f32 %v3980_v31, %v2641_v52 }
 0x612   : > { %v3982_v51 = vpop.eup %3981  ;;  %v2624_v6 = vadd.f32 %v3978_v30, %v2623_v1 }
 0x613   : > { %v2643_v19 = vadd.f32 %v3980_v31, %v2642_v47  ;;  %v2660_v21 = vmul.f32 %v3982_v51, %v2658_v17  ;;  %v3984_v50 = vpop.eup %3983  ;;  %vm2665_vm12 = vweird.f32 %v3982_v51 }
 0x614   : > { %v2628_v35 = vsel %vm2627_vm8, %v3978_v30, %v2624_v6  ;;  %vm2666_vm14 = vmor %vm2664_vm13, %vm2665_vm12 }
 0x615   : > { %v2633_v3 = vsel %vm2630_vm10, %v2632_v37, %v2628_v35  ;;  %v2647_v33 = vsel %vm2646_vm9, %v3980_v31, %v2643_v19  ;;  %v2661_v38 = vsub.f32 1.0, %v2660_v21 }
 0x616   : > { %v2652_v36 = vsel %vm2649_vm11, %v2651_v14, %v2647_v33  ;;  %v2675_v39 = vmul.f32 %v3984_v50, %v2633_v3 }
 0x617   : > { %v2674_v40 = vmul.f32 %v2652_v36, %v5399_v29  ;;  %v2662_v41 = vmul.f32 %v3982_v51, %v2661_v38 }
 0x619   : > { %v2676_v28 = vadd.f32 %v2675_v39, %v2674_v40  ;;  %v2663_v22 = vadd.f32 %v3982_v51, %v2662_v41 }
 0x61b   : > { %3985 = vtanh.f32 %v2676_v28  ;;  %2682 = vst [vmem:[#allocation5] sm:$0xff] %v2676_v28  ;;  %v2667_v53 = vsel %vm2666_vm14, %v3982_v51, %v2663_v22 }
 0x61c   : > { %v2672_v5 = vsel %vm2669_vm15, %v2671_v57, %v2667_v53 }
 0x621   : > { %v3986_v34 = vpop.eup %3985  ;;  %2686 = sbr.rel (%p3542_p1) target bundleno = 1582 (0x62e), region = 112 }
 0x622   : > { %v2678_v23 = vmul.f32 %v3986_v34, %v2672_v5 }
 0x624   : > { %3541 = vst [vmem:[%s4783_s17 + $0x18] sm:$0xff] %v2678_v23 }
 0x625   : > { %2681 = vst [vmem:[#allocation4 + $0x8] sm:$0xff] %v2678_v23 }
 0x626   : > { %v2687_v29 = vld [vmem:[#allocation4] sm:$0xff]  ;;  %v2689_v25 = vld [vmem:[#allocation5 + $0x8] sm:$0xff]  ;;  %v2693_v59 = vld [vmem:[#allocation5] sm:$0xff] }
 0x627   : > { %2688 = vst [vmem:[#allocation24] sm:$0xff] %v2687_v29 }
 0x628   : > { %2690 = vst [vmem:[#allocation26] sm:$0xff] %v2689_v25 }
 0x629   : > { %2694 = vst [vmem:[#allocation29] sm:$0xff] %v2693_v59 }
 0x62c   : > { %v2691_v55 = vld [vmem:[#allocation4 + $0x8] sm:$0xff] }
 0x62d   : > { %2692 = vst [vmem:[#allocation27] sm:$0xff] %v2691_v55 }
 0x62e PF: > { %s5560_s28 = sld [smem:[#allocation56_spill]]  ;;  %s4508_s27 = smov [#allocation24]  }
 0x62f   : > { %s2723_s23 = sshll.u32 %s4508_s27, 4  ;;  %p5561_p4 = scmp.eq.s32.totalorder %s4618_s25, 1  ;;  %s2724_s23 = int_to_ptr.vmem [resolvable:$true] %s2723_s23 }
 0x630   : > { %s4509_s15 = smov [#allocation27]   ;;  %s5562_s4 = sld [smem:[#allocation58_spill]] }
 0x631   : > { %s2747_s12 = sshll.u32 %s4509_s15, 4  ;;  %p5563_p6 = pmov %p5561_p4  ;;  %s2748_s12 = int_to_ptr.vmem [resolvable:$true] %s2747_s12 }
 0x632   : > { %s3687_s14 = sshll.u32 %s4618_s25, 5  ;;  %s5564_s3 = sld [smem:[#allocation55_spill]] }
 0x633   : > { %s2708_s27 = sshll.u32 %s4783_s17, 4  ;;  %s2709_s27 = int_to_ptr.vmem [resolvable:$true] %s2708_s27 }
 0x634   : > { %s2725_s29 = sshll.u32 %s5560_s28, 4  ;;  %s2726_s29 = int_to_ptr.hbm [resolvable:$true] %s2725_s29 }
 0x635   : > { %3728 = dma.vmem_to_hbm [thread:$0]  (%p5561_p4), %s2724_s23, 128, %s2726_s29, [#allocation25]  }
 0x636   : > { %s2749_s26 = sshll.u32 %s5562_s4, 4  ;;  %s2696_s29 = scalar_lea.sflag [#allocation8], %s4752_s30  ;;  %s2750_s26 = int_to_ptr.hbm [resolvable:$true] %s2749_s26 }
 0x637   : > { %3732 = dma.vmem_to_hbm [thread:$0]  (%p5563_p6), %s2748_s12, 128, %s2750_s26, [#allocation28]  }
 0x638   : > { %s2707_s28 = scalar_lea.hbm %s5564_s3, %s3687_s14  ;;  %s4363_s12 = scalar_lea.hbm %s5564_s3, 64 }
 0x639   : > { %s2710_s0 = sshll.u32 %s2707_s28, 4  ;;  %s2711_s0 = int_to_ptr.hbm [resolvable:$true] %s2710_s0 }
 0x63a   : > { %s4357_s23 = sshra.s32 %s2711_s0, 4  ;;  %s4358_s23 = int_to_ptr.hbm [resolvable:$true] %s4357_s23 }
 0x63b   : > { %s4359_s15 = scalar_lea.hbm %s4358_s23, 32  ;;  %p4364_p10 = scmp.lt.s32.totalorder %s4358_s23, %s5564_s3 }
 0x63c   : > { %p4360_p12 = scmp.ne.s32.totalorder %s4358_s23, %s4359_s15  ;;  %p4365_p11 = scmp.lt.s32.totalorder %s4363_s12, %s4359_s15 }
 0x63e   : > { %p4361_p0 = pnand %p4360_p12, %p4719_p2  ;;  %p4366_p5 = por %p4365_p11, %p4364_p10 }
 0x640   : > { %p4362_p8 = pneg %p4361_p0 }
 0x642   : > { %p4367_p13 = pnand %p4366_p5, %p4362_p8 }
 0x644   : > { %4370 = shalt.err (!%p4367_p13)
}
 0x645   : > { %s4510_s30 = smov 128   ;;  %s4511_s17 = smov 8  }
 0x646   : > { %3726 = dma.vmem_to_hbm [thread:$0]  (%p4719_p2), %s2709_s27, 512, %s2711_s0, %s2696_s29, %s4510_s30, %s4510_s30, %s4511_s17  }
 0x647   : > { %s4512_s14 = smov [#allocation26]   ;;  %s5565_s16 = sld [smem:[#allocation57_spill]] }
 0x648   : > { %s2735_s22 = sshll.u32 %s4512_s14, 4  ;;  %p5566_p7 = pmov %p5561_p4  ;;  %s2736_s22 = int_to_ptr.vmem [resolvable:$true] %s2735_s22 }
 0x649   : > { %s5567_s12 = sld [smem:[#allocation59_spill]]  ;;  %s4513_s26 = smov [#allocation29]  }
 0x64a   : > { %s2759_s3 = sshll.u32 %s4513_s26, 4  ;;  %p5568_p3 = pmov %p5561_p4  ;;  %s2760_s3 = int_to_ptr.vmem [resolvable:$true] %s2759_s3 }
 0x64c   : > { %p5569_p2 = pmov %p5568_p3 }
 0x64d   : > { %s2737_s2 = sshll.u32 %s5565_s16, 4  ;;  %s2738_s2 = int_to_ptr.hbm [resolvable:$true] %s2737_s2 }
 0x64e   : > { %3730 = dma.vmem_to_hbm [thread:$0]  (%p5566_p7), %s2736_s22, 128, %s2738_s2, [#allocation25]  }
 0x64f   : > { %s2761_s4 = sshll.u32 %s5567_s12, 4  ;;  %s2762_s4 = int_to_ptr.hbm [resolvable:$true] %s2761_s4 }
 0x650   : > { %3734 = dma.vmem_to_hbm [thread:$0]  (%p5568_p3), %s2760_s3, 128, %s2762_s4, [#allocation28]  }
 0x651   : > { %4468 = dma.done.wait (%p5569_p2), [#allocation25], 256   ;;  %p5570_p1 = pmov %p5569_p2 }
 0x653   : > { %4470 = vsyncadd (%p5570_p1), [#allocation25], 4294967040  ;;  %p5571_p4 = pmov %p5570_p1 }
 0x654   : > { %p5572_p6 = pmov %p5570_p1 }
 0x655   : > { %4472 = dma.done.wait (%p5571_p4), [#allocation28], 256  }
 0x656   : > { %4474 = vsyncadd (%p5572_p6), [#allocation28], 4294967040 }
 0x657 PF: > { %s2793_s0 = sand.u32 1, %s4481_s18   ;;  %p5573_p12 = scmp.ge.s32.totalorder %s4493_s21, 2 }
 0x658   : > { %s2794_s1 = scalar_lea.sflag [#allocation8], %s2793_s0 }
 0x659   : > { %p3777_p0 = pnand %p5573_p12, %p4725_p9 }
 0x65b   : > { %p3778_p8 = pneg %p3777_p0 }
 0x65d   : > { %4476 = dma.done.wait (%p3778_p8), %s2794_s1, 512  }
 0x65e   : > { %4478 = vsyncadd (%p3778_p8), %s2794_s1, 4294966784  ;;  %p36_p10 = scmp.ge.s32.totalorder %s4693_s13, 4   ;;  %s5574_s18 = smov %s4485_s19 }
 0x65f   : > { %s5575_s19 = smov %s4489_s20  ;;  %s5576_s20 = smov %s4705_s5 }
 0x660   : > { %s5577_s21 = smov %s4693_s13  ;;  %38 = sbr.rel (!%p36_p10) target bundleno = 24 (0x18), region = 199 }
 0x665   :  { %2800 = vsyncpa [#allocation7], 1 }
 0x666   :  { %2802 = vsyncpa [#allocation7 + $0x1], 1 }
 0x667   :  { %2803 = vsyncpa [#allocation10], 1 }
 0x668   :  { %2804 = vsyncpa [#allocation13], 1 }
 0x669   :  { %2805 = vsyncpa [#allocation16], 1 }
 0x66a   :  { %2806 = vsyncpa [#allocation19], 1 }
 0x66b   :  { %2807 = vsyncpa [#allocation22], 1 }
 0x66c   :  { %2808 = vsyncpa [#allocation8], 1 }
 0x66d   :  { %2810 = vsyncpa [#allocation8 + $0x1], 1 }
 0x66e   :  { %2811 = vsyncpa [#allocation25], 1 }
 0x66f   :  { %2812 = vsyncpa [#allocation28], 1 }

// kernel: tpu_custom_call.1
= control target key start
LH: loop header
LB: loop body
LE: loop exit
PB: predicated region body
PF: predicated region fallthrough
CT: control target
= control target key end

     0   :  { %s5476_s0 = inlined_call_operand.hbm [shape: bf16[64,128], index: 0, kind: input, shape index: {}]   ;;  %s5477_s1 = inlined_call_operand.hbm [shape: bf16[128,512], index: 1, kind: input, shape index: {}]   ;;  %s5478_s2 = inlined_call_operand.hbm [shape: bf16[128,512], index: 2, kind: input, shape index: {}]   ;;  %s5479_s3 = inlined_call_operand.hbm [shape: f32[1,512], index: 3, kind: input, shape index: {}]   ;;  %s5480_s4 = inlined_call_operand.hbm [shape: f32[8,128], index: 4, kind: input, shape index: {}]   ;;  %s5481_s5 = inlined_call_operand.hbm [shape: f32[8,128], index: 5, kind: input, shape index: {}]   ;;  %s5482_s6 = inlined_call_operand.hbm [shape: bf16[128,512], index: 6, kind: input, shape index: {}]   ;;  %s5483_s7 = inlined_call_operand.hbm [shape: bf16[128,512], index: 7, kind: input, shape index: {}]   ;;  %s5484_s8 = inlined_call_operand.hbm [shape: f32[1,512], index: 8, kind: input, shape index: {}]   ;;  %s5485_s9 = inlined_call_operand.vmem [shape: f32[8,128], index: 9, kind: input, shape index: {}]   ;;  %s5486_s10 = inlined_call_operand.hbm [shape: f32[8,128], index: 10, kind: input, shape index: {}]   ;;  %s5487_s11 = inlined_call_operand.hbm [shape: f32[64,128], index: 11, kind: output, shape index: {0}]   ;;  %s5488_s12 = inlined_call_operand.hbm [shape: f32[8,128], index: 12, kind: output, shape index: {1}]   ;;  %s5489_s13 = inlined_call_operand.hbm [shape: f32[8,128], index: 13, kind: output, shape index: {2}]   ;;  %s5490_s14 = inlined_call_operand.hbm [shape: f32[8,128], index: 14, kind: output, shape index: {3}]   ;;  %s5491_s15 = inlined_call_operand.hbm [shape: f32[8,128], index: 15, kind: output, shape index: {4}]  }
   0x1   :  { %5497 = sst [smem:[#allocation49_spill]] %s5476_s0 }
   0x2   :  { %5498 = sst [smem:[#allocation50_spill]] %s5477_s1 }
   0x3   :  { %5499 = sst [smem:[#allocation51_spill]] %s5478_s2 }
   0x4   :  { %5500 = sst [smem:[#allocation52_spill]] %s5479_s3 }
   0x5   :  { %5501 = sst [smem:[#allocation53_spill]] %s5480_s4 }
   0x6   :  { %5502 = sst [smem:[#allocation54_spill]] %s5481_s5 }
   0x7   :  { %5503 = sst [smem:[#allocation55_spill]] %s5487_s11 }
   0x8   :  { %5504 = sst [smem:[#allocation56_spill]] %s5488_s12 }
   0x9   :  { %5505 = sst [smem:[#allocation57_spill]] %s5489_s13 }
   0xa   :  { %5506 = sst [smem:[#allocation58_spill]] %s5490_s14 }
   0xb   :  { %5507 = sst [smem:[#allocation59_spill]] %s5491_s15 }
   0xc   :  { %21 = vsyncpa [#allocation7], 0 }
   0xd   :  { %23 = vsyncpa [#allocation7 + $0x1], 0 }
   0xe   :  { %24 = vsyncpa [#allocation10], 0 }
   0xf   :  { %25 = vsyncpa [#allocation13], 0 }
  0x10   :  { %26 = vsyncpa [#allocation16], 0 }
  0x11   :  { %27 = vsyncpa [#allocation19], 0 }
  0x12   :  { %28 = vsyncpa [#allocation22], 0 }
  0x13   :  { %29 = vsyncpa [#allocation8], 0 }
  0x14   :  { %31 = vsyncpa [#allocation8 + $0x1], 0 }
  0x15   :  { %32 = vsyncpa [#allocation25], 0 }
  0x16   :  { %33 = vsyncpa [#allocation28], 0  ;;  %s4594_s18 = smov 0   ;;  %s4596_s19 = smov 0  }
  0x17   :  { %s4598_s20 = smov 0   ;;  %s4600_s21 = smov 0  }
  0x18 LB: > { %s5508_s1 = sld [smem:[#allocation50_spill]]  ;;  %s4618_s25 = sadd.s32 4294967295, %s4493_s21   ;;  %s4493_s21 = sphi %s4600_s21, %s5577_s21   ;;  %s4489_s20 = sphi %s4598_s20, %s5576_s20   ;;  %s4485_s19 = sphi %s4596_s19, %s5575_s19   ;;  %s4481_s18 = sphi %s4594_s18, %s5574_s18  }
  0x19   : > { %p2968_p0 = scmp.ge.s32.totalorder %s4493_s21, 1  ;;  %p60_p1 = scmp.eq.s32.totalorder %s4618_s25, 0 }
  0x1a   : > { %p390_p2 = scmp.lt.s32.totalorder %s4493_s21, 3  ;;  %s4495_s27 = smov [#allocation9]  }
  0x1b   : > { %s403_s28 = sshll.u32 %s4495_s27, 4  ;;  %s5510_s3 = sld [smem:[#allocation52_spill]]  ;;  %s404_s28 = int_to_ptr.vmem [resolvable:$true] %s403_s28 }
  0x1c   : > { %p4624_p4 = pnand %p2968_p0, %p390_p2  ;;  %s5512_s5 = sld [smem:[#allocation54_spill]] }
  0x1d   : > { %s4497_s13 = smov 256   ;;  %s4498_s11 = smov 16  }
  0x1e   : > { %s401_s24 = sshll.u32 %s5508_s1, 4  ;;  %p3744_p5 = pneg %p4624_p4  ;;  %s402_s24 = int_to_ptr.hbm [resolvable:$true] %s401_s24 }
  0x1f   : > { %s4496_s1 = smov [#allocation12]   ;;  %s4499_s22 = smov [#allocation15]  }
  0x20   : > { %p4636_p7 = pnand %p3744_p5, %p60_p1  ;;  %s432_s15 = sshll.u32 %s4496_s1, 4  ;;  %s433_s15 = int_to_ptr.vmem [resolvable:$true] %s432_s15 }
  0x21   : > { %s430_s16 = sshll.u32 %s5510_s3, 4  ;;  %s479_s3 = sshll.u32 %s5483_s7, 4  ;;  %s431_s16 = int_to_ptr.hbm [resolvable:$true] %s430_s16  ;;  %s480_s3 = int_to_ptr.hbm [resolvable:$true] %s479_s3 }
  0x22   : > { %s454_s27 = sshll.u32 %s5512_s5, 4  ;;  %s456_s23 = sshll.u32 %s4499_s22, 4  ;;  %s455_s27 = int_to_ptr.hbm [resolvable:$true] %s454_s27  ;;  %s457_s23 = int_to_ptr.vmem [resolvable:$true] %s456_s23 }
  0x23   : > { %3747 = dma.hbm_to_vmem [thread:$0]  (!%p4636_p7), %s402_s24, 4096, %s404_s28, [#allocation10], %s4497_s13, %s4497_s13, %s4498_s11  }
  0x24   : > { %3753 = dma.hbm_to_vmem [thread:$0]  (!%p4636_p7), %s431_s16, 64, %s433_s15, [#allocation13]  }
  0x25   : > { %3759 = dma.hbm_to_vmem [thread:$0]  (!%p4636_p7), %s455_s27, 128, %s457_s23, [#allocation16]  }
  0x26   : > { %s4500_s1 = smov [#allocation18]   ;;  %s5513_s2 = sld [smem:[#allocation51_spill]] }
  0x27   : > { %s481_s5 = sshll.u32 %s4500_s1, 4  ;;  %s5514_s4 = sld [smem:[#allocation53_spill]]  ;;  %s482_s5 = int_to_ptr.vmem [resolvable:$true] %s481_s5 }
  0x28   : > { %3765 = dma.hbm_to_vmem [thread:$0]  (!%p4636_p7), %s480_s3, 4096, %s482_s5, [#allocation19], %s4497_s13, %s4497_s13, %s4498_s11  }
  0x29   : > { %s4501_s29 = smov [#allocation11]   ;;  %s4502_s12 = smov [#allocation14]  }
  0x2a   : > { %s417_s27 = sshll.u32 %s4501_s29, 4  ;;  %s444_s14 = sshll.u32 %s4502_s12, 4  ;;  %s418_s27 = int_to_ptr.vmem [resolvable:$true] %s417_s27  ;;  %s445_s14 = int_to_ptr.vmem [resolvable:$true] %s444_s14 }
  0x2b   : > { %s465_s3 = sshll.u32 %s5482_s6, 4  ;;  %s494_s1 = sshll.u32 %s5484_s8, 4  ;;  %s466_s3 = int_to_ptr.hbm [resolvable:$true] %s465_s3  ;;  %s495_s1 = int_to_ptr.hbm [resolvable:$true] %s494_s1 }
  0x2c   : > { %s415_s24 = sshll.u32 %s5513_s2, 4  ;;  %s4503_s15 = smov [#allocation17]   ;;  %s416_s24 = int_to_ptr.hbm [resolvable:$true] %s415_s24 }
  0x2d   : > { %s442_s16 = sshll.u32 %s5514_s4, 4  ;;  %s4504_s28 = smov [#allocation20]   ;;  %s443_s16 = int_to_ptr.hbm [resolvable:$true] %s442_s16 }
  0x2e   : > { %3750 = dma.hbm_to_vmem [thread:$0]  (!%p4636_p7), %s416_s24, 4096, %s418_s27, [#allocation10], %s4497_s13, %s4497_s13, %s4498_s11  }
  0x2f   : > { %3756 = dma.hbm_to_vmem [thread:$0]  (!%p4636_p7), %s443_s16, 128, %s445_s14, [#allocation13]  }
  0x30   : > { %s467_s24 = sshll.u32 %s4503_s15, 4  ;;  %s496_s16 = sshll.u32 %s4504_s28, 4  ;;  %s468_s24 = int_to_ptr.vmem [resolvable:$true] %s467_s24  ;;  %s497_s16 = int_to_ptr.vmem [resolvable:$true] %s496_s16 }
  0x31   : > { %3762 = dma.hbm_to_vmem [thread:$0]  (!%p4636_p7), %s466_s3, 4096, %s468_s24, [#allocation16], %s4497_s13, %s4497_s13, %s4498_s11  }
  0x32   : > { %s509_s12 = sshll.u32 %s5486_s10, 4  ;;  %s4505_s14 = smov [#allocation21]   ;;  %s510_s12 = int_to_ptr.hbm [resolvable:$true] %s509_s12 }
  0x33   : > { %3768 = dma.hbm_to_vmem [thread:$0]  (!%p4636_p7), %s495_s1, 64, %s497_s16, [#allocation19]  }
  0x34   : > { %s511_s30 = sshll.u32 %s4505_s14, 4  ;;  %s2967_s11 = sadd.s32 4294967294, %s4493_s21   ;;  %s512_s30 = int_to_ptr.vmem [resolvable:$true] %s511_s30 }
  0x35   : > { %3771 = dma.hbm_to_vmem [thread:$0]  (!%p4636_p7), %s510_s12, 128, %s512_s30, [#allocation22]  }
  0x36   : > { %s4693_s13 = sadd.s32 1, %s4493_s21   ;;  %s46_s22 = sadd.s32 1, %s4489_s20 }
  0x37   : > { %s43_s3 = ssub.s32 %s4493_s21, %s4693_s13  ;;  %p53_p8 = scmp.ne.s32.totalorder %s4489_s20, %s4485_s19 }
  0x38   : > { %p44_p9 = scmp.eq.s32.totalorder %s43_s3, 0  ;;  %p54_p10 = scmp.eq.s32.totalorder %s4493_s21, 0 }
  0x39   : > { %p59_p11 = scmp.ne.s32.totalorder %s4485_s19, %s4481_s18  ;;  %p5493_p12 = scmp.eq.s32.totalorder %s4618_s25, 1 }
  0x3a   : > { %s4705_s5 = scalar_select %p44_p9, %s4489_s20, %s46_s22  }
  0x3b   : > { %p4707_p13 = por %p54_p10, %p53_p8  ;;  %p4713_p0 = por %p60_p1, %p59_p11 }
  0x3c   : > { %p4719_p2 = por %p5493_p12, %p53_p8  ;;  %p299_p5 = scmp.eq.s32.totalorder %s2967_s11, 1 }
  0x3d   : > { %p3789_p7 = scmp.lt.s32.totalorder %s4493_s21, 2  ;;  %s522_s15 = sand.u32 1, %s4489_s20  }
  0x3e   : > { %p4725_p9 = por %p299_p5, %p59_p11  ;;  %s2979_s28 = sshll.u32 %s522_s15, 4 }
  0x3f   : > { %s3556_s16 = sshll.u32 %s4493_s21, 4  ;;  %s5519_s0 = sld [smem:[#allocation49_spill]] }
  0x40   : > { %s526_s30 = scalar_lea.vmem [#allocation6], %s2979_s28  ;;  %p4735_p8 = pnand %p3789_p7, %p4707_p13 }
  0x41   : > { %s534_s22 = sshll.u32 %s526_s30, 4  ;;  %s523_s3 = scalar_lea.sflag [#allocation7], %s522_s15  ;;  %s535_s22 = int_to_ptr.vmem [resolvable:$true] %s534_s22 }
  0x42   : > { %p4261_p11 = pneg %p4735_p8 }
  0x45   : > { %s531_s12 = scalar_lea.hbm %s5519_s0, %s3556_s16  ;;  %s4264_s29 = scalar_lea.hbm %s5519_s0, 32 }
  0x46   : > { %s532_s14 = sshll.u32 %s531_s12, 4  ;;  %s533_s14 = int_to_ptr.hbm [resolvable:$true] %s532_s14 }
  0x47   : > { %s4257_s2 = sshra.s32 %s533_s14, 4  ;;  %s4258_s2 = int_to_ptr.hbm [resolvable:$true] %s4257_s2 }
  0x48   : > { %s4259_s4 = scalar_lea.hbm %s4258_s2, 16  ;;  %p4265_p13 = scmp.lt.s32.totalorder %s4258_s2, %s5519_s0 }
  0x49   : > { %p4260_p10 = scmp.ne.s32.totalorder %s4258_s2, %s4259_s4  ;;  %p4266_p7 = scmp.lt.s32.totalorder %s4264_s29, %s4259_s4 }
  0x4b   : > { %p4262_p5 = pnand %p4261_p11, %p4260_p10  ;;  %p4267_p12 = por %p4266_p7, %p4265_p13 }
  0x4d   : > { %p4263_p6 = pneg %p4262_p5 }
  0x4f   : > { %p4268_p3 = pnand %p4267_p12, %p4263_p6 }
  0x51   : > { %4271 = shalt.err (!%p4268_p3)
}
  0x52   : > { %s4506_s15 = smov 64   ;;  %s4507_s12 = smov 4  }
  0x53   : > { %3775 = dma.hbm_to_vmem [thread:$0]  (!%p4735_p8), %s533_s14, 256, %s535_s22, %s523_s3, %s4506_s15, %s4506_s15, %s4507_s12  }
  0x54   : > { %546 = sbr.rel (%p4624_p4) target bundleno = 1623 (0x657), region = 64 }
  0x59   : > { %s4752_s30 = sand.u32 1, %s4485_s19  }
  0x5a   : > { %s2983_s16 = sshll.u32 %s4752_s30, 4  ;;  %s549_s2 = scalar_lea.sflag [#allocation7], %s4752_s30 }
  0x5b   : > { %s4756_s4 = scalar_lea.vmem [#allocation6], %s2983_s16 }
  0x5c   : > { %4444 = dma.done.wait (%p4713_p0), %s549_s2, 256  }
  0x5d   : > { %4446 = vsyncadd (%p4713_p0), %s549_s2, 4294967040 }
  0x5e   : > { %4448 = dma.done.wait (%p60_p1), [#allocation10], 8192  }
  0x5f   : > { %4450 = vsyncadd (%p60_p1), [#allocation10], 4294959104 }
  0x60   : > { %4452 = dma.done.wait (%p60_p1), [#allocation13], 192  }
  0x61   : > { %4454 = vsyncadd (%p60_p1), [#allocation13], 4294967104 }
  0x62   : > { %4456 = dma.done.wait (%p60_p1), [#allocation16], 4224  }
  0x63   : > { %4458 = vsyncadd (%p60_p1), [#allocation16], 4294963072 }
  0x64   : > { %4460 = dma.done.wait (%p60_p1), [#allocation19], 4160  }
  0x65   : > { %4462 = vsyncadd (%p60_p1), [#allocation19], 4294963136 }
  0x66   : > { %4464 = dma.done.wait (%p60_p1), [#allocation22], 128  }
  0x67   : > { %4466 = vsyncadd (%p60_p1), [#allocation22], 4294967168  ;;  %s2993_s26 = sshll.u32 %s4752_s30, 5  ;;  %p5521_p3 = scmp.ne.s32.totalorder %s4618_s25, 0 }
  0x68   : > { %s4783_s17 = scalar_lea.vmem [#allocation23], %s2993_s26 }
  0x69   : > { %650 = sbr.rel (%p5521_p3) target bundleno = 115 (0x73), region = 108 }
  0x6e   : > { %v651_v0 = vld [vmem:[#allocation14] sm:$0xff]  ;;  %v653_v1 = vld [vmem:[#allocation15] sm:$0xff]  ;;  %v658_v3 = vld [vmem:[#allocation21] sm:$0xff] }
  0x6f   : > { %v655_v2 = vld [vmem:[%s5485_s9] sm:$0xff]  ;;  %652 = vst [vmem:[#allocation4] sm:$0xff] %v651_v0 }
  0x70   : > { %654 = vst [vmem:[#allocation5 + $0x8] sm:$0xff] %v653_v1 }
  0x71   : > { %657 = vst [vmem:[#allocation4 + $0x8] sm:$0xff] %v655_v2 }
  0x72   : > { %660 = vst [vmem:[#allocation5] sm:$0xff] %v658_v3 }
  0x73 PF: > { %v3117_v4 = vld [vmem:[#allocation9 + $0xe0] sm:$0xf]  ;;  %v3589_v5 = vld [vmem:[#allocation9 + $0xec] sm:$0xf0]  ;;  %v3587_v6 = vld [vmem:[#allocation9 + $0xe4] sm:$0xf] }
  0x74   : > { %v3118_v7 = vor.u32 %v3589_v5, %v3117_v4  ;;  %v3119_v8 = vld [vmem:[#allocation9 + $0xf0] sm:$0xf0]  ;;  %v3125_v9 = vld [vmem:[#allocation9 + $0xe8] sm:$0xf]  ;;  %v3590_v10 = vld [vmem:[#allocation9 + $0xf4] sm:$0xf0] }
  0x75   : > { %v3122_v11 = vor.u32 %v3587_v6, %v3119_v8  ;;  %v3126_v12 = vor.u32 %v3590_v10, %v3125_v9  ;;  %v3588_v13 = vld [vmem:[#allocation9 + $0xec] sm:$0xf]  ;;  %v3127_v14 = vld [vmem:[#allocation9 + $0xf8] sm:$0xf0]  ;;  %v3101_v15 = vld [vmem:[#allocation9 + $0xc0] sm:$0xf] }
  0x76   : > { %879 = vmatpush.bf16.msra.mxu0 %v3118_v7  ;;  %v3130_v16 = vor.u32 %v3588_v13, %v3127_v14  ;;  %v3585_v17 = vld [vmem:[#allocation9 + $0xcc] sm:$0xf0]  ;;  %v3583_v18 = vld [vmem:[#allocation9 + $0xc4] sm:$0xf]  ;;  %v3103_v19 = vld [vmem:[#allocation9 + $0xd0] sm:$0xf0] }
  0x77   : > { %898 = vmatpush.bf16.msra.mxu1 %v3122_v11  ;;  %917 = vmatpush.bf16.msra.mxu2 %v3126_v12  ;;  %v3102_v20 = vor.u32 %v3585_v17, %v3101_v15  ;;  %v3106_v21 = vor.u32 %v3583_v18, %v3103_v19  ;;  %v3109_v22 = vld [vmem:[#allocation9 + $0xc8] sm:$0xf]  ;;  %v3586_v23 = vld [vmem:[#allocation9 + $0xd4] sm:$0xf0]  ;;  %v3584_v24 = vld [vmem:[#allocation9 + $0xcc] sm:$0xf] }
  0x78   : > { %936 = vmatpush.bf16.msra.mxu3 %v3130_v16  ;;  %v3110_v25 = vor.u32 %v3586_v23, %v3109_v22  ;;  %v3111_v26 = vld [vmem:[#allocation9 + $0xd8] sm:$0xf0]  ;;  %v3085_v27 = vld [vmem:[#allocation9 + $0xa0] sm:$0xf]  ;;  %v3581_v28 = vld [vmem:[#allocation9 + $0xac] sm:$0xf0] }
  0x79   : > { %v3114_v29 = vor.u32 %v3584_v24, %v3111_v26  ;;  %v3579_v30 = vld [vmem:[#allocation9 + $0xa4] sm:$0xf]  ;;  %v3087_v31 = vld [vmem:[#allocation9 + $0xb0] sm:$0xf0]  ;;  %v3093_v32 = vld [vmem:[#allocation9 + $0xa8] sm:$0xf]  ;;  %v3086_v33 = vor.u32 %v3581_v28, %v3085_v27 }
  0x7a   : > { %880 = vmatpush.bf16.msra.mxu0 %v3102_v20  ;;  %v3582_v34 = vld [vmem:[#allocation9 + $0xb4] sm:$0xf0]  ;;  %v3580_v35 = vld [vmem:[#allocation9 + $0xac] sm:$0xf]  ;;  %v3095_v36 = vld [vmem:[#allocation9 + $0xb8] sm:$0xf0]  ;;  %v3090_v37 = vor.u32 %v3579_v30, %v3087_v31 }
  0x7b   : > { %899 = vmatpush.bf16.msra.mxu1 %v3106_v21  ;;  %918 = vmatpush.bf16.msra.mxu2 %v3110_v25  ;;  %v3094_v38 = vor.u32 %v3582_v34, %v3093_v32  ;;  %v3069_v39 = vld [vmem:[#allocation9 + $0x80] sm:$0xf]  ;;  %v3577_v40 = vld [vmem:[#allocation9 + $0x8c] sm:$0xf0]  ;;  %v3575_v41 = vld [vmem:[#allocation9 + $0x84] sm:$0xf]  ;;  %v3098_v42 = vor.u32 %v3580_v35, %v3095_v36 }
  0x7c   : > { %937 = vmatpush.bf16.msra.mxu3 %v3114_v29  ;;  %v3071_v43 = vld [vmem:[#allocation9 + $0x90] sm:$0xf0]  ;;  %v3077_v44 = vld [vmem:[#allocation9 + $0x88] sm:$0xf]  ;;  %v3578_v45 = vld [vmem:[#allocation9 + $0x94] sm:$0xf0]  ;;  %v3070_v48 = vor.u32 %v3577_v40, %v3069_v39 }
  0x7d   : > { %v3576_v46 = vld [vmem:[#allocation9 + $0x8c] sm:$0xf]  ;;  %v3079_v47 = vld [vmem:[#allocation9 + $0x98] sm:$0xf0]  ;;  %v3074_v49 = vor.u32 %v3575_v41, %v3071_v43  ;;  %v3078_v50 = vor.u32 %v3578_v45, %v3077_v44  ;;  %v3053_v51 = vld [vmem:[#allocation9 + $0x60] sm:$0xf] }
  0x7e   : > { %881 = vmatpush.bf16.msra.mxu0 %v3086_v33  ;;  %v3573_v52 = vld [vmem:[#allocation9 + $0x6c] sm:$0xf0]  ;;  %v3571_v53 = vld [vmem:[#allocation9 + $0x64] sm:$0xf]  ;;  %v3082_v54 = vor.u32 %v3576_v46, %v3079_v47  ;;  %v3055_v55 = vld [vmem:[#allocation9 + $0x70] sm:$0xf0] }
  0x7f   : > { %900 = vmatpush.bf16.msra.mxu1 %v3090_v37  ;;  %919 = vmatpush.bf16.msra.mxu2 %v3094_v38  ;;  %v3061_v56 = vld [vmem:[#allocation9 + $0x68] sm:$0xf]  ;;  %v3574_v57 = vld [vmem:[#allocation9 + $0x74] sm:$0xf0]  ;;  %v3572_v58 = vld [vmem:[#allocation9 + $0x6c] sm:$0xf]  ;;  %v3054_v60 = vor.u32 %v3573_v52, %v3053_v51  ;;  %v3058_v61 = vor.u32 %v3571_v53, %v3055_v55 }
  0x80   : > { %938 = vmatpush.bf16.msra.mxu3 %v3098_v42  ;;  %v3063_v59 = vld [vmem:[#allocation9 + $0x78] sm:$0xf0]  ;;  %v3062_v62 = vor.u32 %v3574_v57, %v3061_v56  ;;  %v3037_v63 = vld [vmem:[#allocation9 + $0x40] sm:$0xf]  ;;  %v3569_v0 = vld [vmem:[#allocation9 + $0x4c] sm:$0xf0] }
  0x81   : > { %v3567_v1 = vld [vmem:[#allocation9 + $0x44] sm:$0xf]  ;;  %v3066_v2 = vor.u32 %v3572_v58, %v3063_v59  ;;  %v3039_v3 = vld [vmem:[#allocation9 + $0x50] sm:$0xf0]  ;;  %v3045_v4 = vld [vmem:[#allocation9 + $0x48] sm:$0xf]  ;;  %v3038_v8 = vor.u32 %v3569_v0, %v3037_v63 }
  0x82   : > { %882 = vmatpush.bf16.msra.mxu0 %v3070_v48  ;;  %v3570_v5 = vld [vmem:[#allocation9 + $0x54] sm:$0xf0]  ;;  %v3568_v6 = vld [vmem:[#allocation9 + $0x4c] sm:$0xf]  ;;  %v3047_v7 = vld [vmem:[#allocation9 + $0x58] sm:$0xf0]  ;;  %v3042_v9 = vor.u32 %v3567_v1, %v3039_v3 }
  0x83   : > { %901 = vmatpush.bf16.msra.mxu1 %v3074_v49  ;;  %920 = vmatpush.bf16.msra.mxu2 %v3078_v50  ;;  %v3046_v10 = vor.u32 %v3570_v5, %v3045_v4  ;;  %v3021_v11 = vld [vmem:[#allocation9 + $0x20] sm:$0xf]  ;;  %v3565_v12 = vld [vmem:[#allocation9 + $0x2c] sm:$0xf0]  ;;  %v3563_v13 = vld [vmem:[#allocation9 + $0x24] sm:$0xf]  ;;  %v3050_v14 = vor.u32 %v3568_v6, %v3047_v7 }
  0x84   : > { %939 = vmatpush.bf16.msra.mxu3 %v3082_v54  ;;  %v3023_v15 = vld [vmem:[#allocation9 + $0x30] sm:$0xf0]  ;;  %v3029_v16 = vld [vmem:[#allocation9 + $0x28] sm:$0xf]  ;;  %v3566_v17 = vld [vmem:[#allocation9 + $0x34] sm:$0xf0]  ;;  %v3022_v20 = vor.u32 %v3565_v12, %v3021_v11 }
  0x85   : > { %v3564_v18 = vld [vmem:[#allocation9 + $0x2c] sm:$0xf]  ;;  %v3031_v19 = vld [vmem:[#allocation9 + $0x38] sm:$0xf0]  ;;  %v3005_v21 = vld [vmem:[#allocation9] sm:$0xf]  ;;  %v3026_v22 = vor.u32 %v3563_v13, %v3023_v15  ;;  %v3030_v23 = vor.u32 %v3566_v17, %v3029_v16 }
  0x86   : > { %883 = vmatpush.bf16.msra.mxu0 %v3054_v60  ;;  %v3561_v24 = vld [vmem:[#allocation9 + $0xc] sm:$0xf0]  ;;  %v3559_v25 = vld [vmem:[#allocation9 + $0x4] sm:$0xf]  ;;  %v3007_v26 = vld [vmem:[#allocation9 + $0x10] sm:$0xf0]  ;;  %v3034_v27 = vor.u32 %v3564_v18, %v3031_v19 }
  0x87   : > { %902 = vmatpush.bf16.msra.mxu1 %v3058_v61  ;;  %921 = vmatpush.bf16.msra.mxu2 %v3062_v62  ;;  %v3013_v28 = vld [vmem:[#allocation9 + $0x8] sm:$0xf]  ;;  %v3562_v29 = vld [vmem:[#allocation9 + $0x14] sm:$0xf0]  ;;  %v3560_v30 = vld [vmem:[#allocation9 + $0xc] sm:$0xf]  ;;  %v3006_v34 = vor.u32 %v3561_v24, %v3005_v21  ;;  %v3010_v37 = vor.u32 %v3559_v25, %v3007_v26 }
  0x88   : > { %940 = vmatpush.bf16.msra.mxu3 %v3066_v2  ;;  %v3015_v31 = vld [vmem:[#allocation9 + $0x18] sm:$0xf0]  ;;  %v3245_v32 = vld [vmem:[#allocation11 + $0xe0] sm:$0xf]  ;;  %v3621_v33 = vld [vmem:[#allocation11 + $0xec] sm:$0xf0]  ;;  %v3014_v38 = vor.u32 %v3562_v29, %v3013_v28 }
  0x89   : > { %v3619_v35 = vld [vmem:[#allocation11 + $0xe4] sm:$0xf]  ;;  %v3247_v36 = vld [vmem:[#allocation11 + $0xf0] sm:$0xf0]  ;;  %v3018_v40 = vor.u32 %v3560_v30, %v3015_v31  ;;  %v4791_v41 = vor.u32 %v3621_v33, %v3245_v32  ;;  %v3253_v42 = vld [vmem:[#allocation11 + $0xe8] sm:$0xf] }
  0x8a   : > { %884 = vmatpush.bf16.msra.mxu0 %v3038_v8  ;;  %v3557_v39 = vld [vmem:[%s4756_s4] sm:$0xff]  ;;  %v3622_v43 = vld [vmem:[#allocation11 + $0xf4] sm:$0xf0]  ;;  %v3620_v44 = vld [vmem:[#allocation11 + $0xec] sm:$0xf]  ;;  %v4793_v45 = vor.u32 %v3619_v35, %v3247_v36  ;;  %p3542_p1 = scmp.ne.s32.totalorder %s4618_s25, 1 }
  0x8b   : > { %903 = vmatpush.bf16.msra.mxu1 %v3042_v9  ;;  %922 = vmatpush.bf16.msra.mxu2 %v3046_v10  ;;  %v3255_v46 = vld [vmem:[#allocation11 + $0xf8] sm:$0xf0]  ;;  %v3229_v47 = vld [vmem:[#allocation11 + $0xc0] sm:$0xf]  ;;  %v3617_v48 = vld [vmem:[#allocation11 + $0xcc] sm:$0xf0]  ;;  %v4795_v51 = vor.u32 %v3622_v43, %v3253_v42 }
  0x8c   : > { %941 = vmatpush.bf16.msra.mxu3 %v3050_v14  ;;  %v3615_v49 = vld [vmem:[#allocation11 + $0xc4] sm:$0xf]  ;;  %v3231_v50 = vld [vmem:[#allocation11 + $0xd0] sm:$0xf0]  ;;  %v4798_v52 = vor.u32 %v3620_v44, %v3255_v46  ;;  %v4800_v53 = vor.u32 %v3617_v48, %v3229_v47  ;;  %v3237_v54 = vld [vmem:[#allocation11 + $0xc8] sm:$0xf] }
  0x8d   : > { %v3618_v55 = vld [vmem:[#allocation11 + $0xd4] sm:$0xf0]  ;;  %v3616_v56 = vld [vmem:[#allocation11 + $0xcc] sm:$0xf]  ;;  %v4803_v57 = vor.u32 %v3615_v49, %v3231_v50  ;;  %v3239_v58 = vld [vmem:[#allocation11 + $0xd8] sm:$0xf0] }
  0x8e   : > { %885 = vmatpush.bf16.msra.mxu0 %v3022_v20  ;;  %v3213_v59 = vld [vmem:[#allocation11 + $0xa0] sm:$0xf]  ;;  %v3613_v60 = vld [vmem:[#allocation11 + $0xac] sm:$0xf0]  ;;  %v3611_v61 = vld [vmem:[#allocation11 + $0xa4] sm:$0xf]  ;;  %v4806_v63 = vor.u32 %v3618_v55, %v3237_v54  ;;  %v4810_v0 = vor.u32 %v3616_v56, %v3239_v58 }
  0x8f   : > { %904 = vmatpush.bf16.msra.mxu1 %v3026_v22  ;;  %923 = vmatpush.bf16.msra.mxu2 %v3030_v23  ;;  %v3215_v62 = vld [vmem:[#allocation11 + $0xb0] sm:$0xf0]  ;;  %v4812_v1 = vor.u32 %v3613_v60, %v3213_v59  ;;  %v3221_v2 = vld [vmem:[#allocation11 + $0xa8] sm:$0xf]  ;;  %v3614_v3 = vld [vmem:[#allocation11 + $0xb4] sm:$0xf0] }
  0x90   : > { %942 = vmatpush.bf16.msra.mxu3 %v3034_v27  ;;  %v3612_v4 = vld [vmem:[#allocation11 + $0xac] sm:$0xf]  ;;  %v4815_v5 = vor.u32 %v3611_v61, %v3215_v62  ;;  %v3223_v6 = vld [vmem:[#allocation11 + $0xb8] sm:$0xf0]  ;;  %v3197_v7 = vld [vmem:[#allocation11 + $0x80] sm:$0xf]  ;;  %v4818_v11 = vor.u32 %v3614_v3, %v3221_v2 }
  0x91   : > { %v3609_v8 = vld [vmem:[#allocation11 + $0x8c] sm:$0xf0]  ;;  %v3607_v9 = vld [vmem:[#allocation11 + $0x84] sm:$0xf]  ;;  %v3199_v10 = vld [vmem:[#allocation11 + $0x90] sm:$0xf0]  ;;  %v4822_v12 = vor.u32 %v3612_v4, %v3223_v6 }
  0x92   : > { %886 = vmatpush.bf16.msra.mxu0 %v3006_v34  ;;  %v4824_v13 = vor.u32 %v3609_v8, %v3197_v7  ;;  %v3205_v14 = vld [vmem:[#allocation11 + $0x88] sm:$0xf]  ;;  %v3610_v15 = vld [vmem:[#allocation11 + $0x94] sm:$0xf0]  ;;  %v3608_v16 = vld [vmem:[#allocation11 + $0x8c] sm:$0xf]  ;;  %v4827_v17 = vor.u32 %v3607_v9, %v3199_v10 }
  0x93   : > { %905 = vmatpush.bf16.msra.mxu1 %v3010_v37  ;;  %924 = vmatpush.bf16.msra.mxu2 %v3014_v38  ;;  %v3207_v18 = vld [vmem:[#allocation11 + $0x98] sm:$0xf0]  ;;  %v3181_v19 = vld [vmem:[#allocation11 + $0x60] sm:$0xf]  ;;  %v3605_v20 = vld [vmem:[#allocation11 + $0x6c] sm:$0xf0]  ;;  %v4830_v23 = vor.u32 %v3610_v15, %v3205_v14 }
  0x94   : > { %943 = vmatpush.bf16.msra.mxu3 %v3018_v40  ;;  %v3603_v21 = vld [vmem:[#allocation11 + $0x64] sm:$0xf]  ;;  %v3183_v22 = vld [vmem:[#allocation11 + $0x70] sm:$0xf0]  ;;  %v3558_v24 = vld [vmem:[%s4756_s4 + $0x8] sm:$0xff]  ;;  %v4835_v25 = vor.u32 %v3608_v16, %v3207_v18  ;;  %v4837_v26 = vor.u32 %v3605_v20, %v3181_v19 }
  0x95   : > { %887 = vmatmul.bf16.vlgmr.msra.gmra.mxu0 %v3557_v39  ;;  %v3189_v27 = vld [vmem:[#allocation11 + $0x68] sm:$0xf]  ;;  %v3606_v28 = vld [vmem:[#allocation11 + $0x74] sm:$0xf0]  ;;  %v3604_v29 = vld [vmem:[#allocation11 + $0x6c] sm:$0xf]  ;;  %v4840_v30 = vor.u32 %v3603_v21, %v3183_v22 }
  0x96   : > { %1173 = vmatpush.bf16.msrb.mxu0 %v4791_v41  ;;  %906 = vmatmul.bf16.vlgmr.msra.gmra.mxu1 %v3557_v39  ;;  %v3191_v31 = vld [vmem:[#allocation11 + $0x78] sm:$0xf0]  ;;  %v3165_v32 = vld [vmem:[#allocation11 + $0x40] sm:$0xf]  ;;  %v3601_v33 = vld [vmem:[#allocation11 + $0x4c] sm:$0xf0]  ;;  %v4843_v36 = vor.u32 %v3606_v28, %v3189_v27 }
  0x97   : > { %1186 = vmatpush.bf16.msrb.mxu1 %v4793_v45  ;;  %925 = vmatmul.bf16.vlgmr.msra.gmra.mxu2 %v3557_v39  ;;  %v3599_v34 = vld [vmem:[#allocation11 + $0x44] sm:$0xf]  ;;  %v3167_v35 = vld [vmem:[#allocation11 + $0x50] sm:$0xf0]  ;;  %v4847_v37 = vor.u32 %v3604_v29, %v3191_v31  ;;  %v4849_v38 = vor.u32 %v3601_v33, %v3165_v32  ;;  %v3602_v40 = vld [vmem:[#allocation11 + $0x54] sm:$0xf0] }
  0x98   : > { %944 = vmatmul.bf16.vlgmr.msra.gmra.mxu3 %v3557_v39  ;;  %1199 = vmatpush.bf16.msrb.mxu2 %v4795_v51  ;;  %v3173_v39 = vld [vmem:[#allocation11 + $0x48] sm:$0xf]  ;;  %v3600_v42 = vld [vmem:[#allocation11 + $0x4c] sm:$0xf]  ;;  %v4852_v43 = vor.u32 %v3599_v34, %v3167_v35  ;;  %v3175_v44 = vld [vmem:[#allocation11 + $0x58] sm:$0xf0] }
  0x99   : > { %1212 = vmatpush.bf16.msrb.mxu3 %v4798_v52  ;;  %v3149_v46 = vld [vmem:[#allocation11 + $0x20] sm:$0xf]  ;;  %v3597_v47 = vld [vmem:[#allocation11 + $0x2c] sm:$0xf0]  ;;  %v3595_v48 = vld [vmem:[#allocation11 + $0x24] sm:$0xf]  ;;  %v4855_v50 = vor.u32 %v3602_v40, %v3173_v39  ;;  %v4859_v54 = vor.u32 %v3600_v42, %v3175_v44 }
  0x9a   : > { %1174 = vmatpush.bf16.msrb.mxu0 %v4800_v53  ;;  %v3151_v49 = vld [vmem:[#allocation11 + $0x30] sm:$0xf0]  ;;  %v4861_v55 = vor.u32 %v3597_v47, %v3149_v46  ;;  %v3157_v56 = vld [vmem:[#allocation11 + $0x28] sm:$0xf]  ;;  %v3598_v58 = vld [vmem:[#allocation11 + $0x34] sm:$0xf0] }
  0x9b   : > { %1187 = vmatpush.bf16.msrb.mxu1 %v4803_v57  ;;  %v3596_v59 = vld [vmem:[#allocation11 + $0x2c] sm:$0xf]  ;;  %v4864_v60 = vor.u32 %v3595_v48, %v3151_v49  ;;  %v3159_v61 = vld [vmem:[#allocation11 + $0x38] sm:$0xf0]  ;;  %v3133_v62 = vld [vmem:[#allocation11] sm:$0xf]  ;;  %v4867_v6 = vor.u32 %v3598_v58, %v3157_v56 }
  0x9c   : > { %1200 = vmatpush.bf16.msrb.mxu2 %v4806_v63  ;;  %v3593_v2 = vld [vmem:[#allocation11 + $0xc] sm:$0xf0]  ;;  %v3591_v3 = vld [vmem:[#allocation11 + $0x4] sm:$0xf]  ;;  %v3135_v4 = vld [vmem:[#allocation11 + $0x10] sm:$0xf0]  ;;  %v4871_v7 = vor.u32 %v3596_v59, %v3159_v61 }
  0x9d   : > { %1213 = vmatpush.bf16.msrb.mxu3 %v4810_v0  ;;  %v4873_v8 = vor.u32 %v3593_v2, %v3133_v62  ;;  %v3141_v9 = vld [vmem:[#allocation11 + $0x8] sm:$0xf]  ;;  %v3594_v10 = vld [vmem:[#allocation11 + $0x14] sm:$0xf0]  ;;  %v4876_v14 = vor.u32 %v3591_v3, %v3135_v4  ;;  %v3592_v15 = vld [vmem:[#allocation11 + $0xc] sm:$0xf] }
  0x9e   : > { %1175 = vmatpush.bf16.msrb.mxu0 %v4812_v1  ;;  %v3143_v16 = vld [vmem:[#allocation11 + $0x18] sm:$0xf0]  ;;  %v1003_v18 = vld [vmem:[#allocation4] sm:$0xff]  ;;  %v4879_v19 = vor.u32 %v3594_v10, %v3141_v9 }
  0x9f   : > { %1188 = vmatpush.bf16.msrb.mxu1 %v4815_v5  ;;  %v4883_v20 = vor.u32 %v3592_v15, %v3143_v16  ;;  %v1012_v21 = vpack.c.bf16 %v1003_v18, %v1003_v18  ;;  %v697_v27 = vld [vmem:[#allocation12] sm:$0xf] }
  0xa0   : > { %1201 = vmatpush.bf16.msrb.mxu2 %v4818_v11  ;;  %v699_v28 = vperm.slane %v697_v27, 0  ;;  %v700_v31 = vperm.slane %v697_v27, 1  ;;  %v701_v40 = vperm.slane %v697_v27, 2  ;;  %v702_v42 = vperm.slane %v697_v27, 3 }
  0xa1   : > { %1214 = vmatpush.bf16.msrb.mxu3 %v4822_v12 }
  0xa2   : > { %1176 = vmatpush.bf16.msrb.mxu0 %v4824_v13 }
  0xa3   : > { %1189 = vmatpush.bf16.msrb.mxu1 %v4827_v17 }
  0xa4   : > { %1202 = vmatpush.bf16.msrb.mxu2 %v4830_v23 }
  0xa5   : > { %1215 = vmatpush.bf16.msrb.mxu3 %v4835_v25  ;;  %892 = vmatmul.bf16.gmra.mxu0 %v3558_v24 }
  0xa6   : > { %1177 = vmatpush.bf16.msrb.mxu0 %v4837_v26  ;;  %911 = vmatmul.bf16.gmra.mxu1 %v3558_v24 }
  0xa7   : > { %1190 = vmatpush.bf16.msrb.mxu1 %v4840_v30  ;;  %930 = vmatmul.bf16.gmra.mxu2 %v3558_v24 }
  0xa8   : > { %949 = vmatmul.bf16.gmra.mxu3 %v3558_v24  ;;  %1203 = vmatpush.bf16.msrb.mxu2 %v4843_v36 }
  0xa9   : > { %1216 = vmatpush.bf16.msrb.mxu3 %v4847_v37 }
  0xaa   : > { %1178 = vmatpush.bf16.msrb.mxu0 %v4849_v38 }
  0xab   : > { %1191 = vmatpush.bf16.msrb.mxu1 %v4852_v43 }
  0xac   : > { %1204 = vmatpush.bf16.msrb.mxu2 %v4855_v50 }
  0xad   : > { %1217 = vmatpush.bf16.msrb.mxu3 %v4859_v54 }
  0xae   : > { %1179 = vmatpush.bf16.msrb.mxu0 %v4861_v55 }
  0xaf   : > { %1192 = vmatpush.bf16.msrb.mxu1 %v4864_v60 }
  0xb0   : > { %1205 = vmatpush.bf16.msrb.mxu2 %v4867_v6 }
  0xb1   : > { %1218 = vmatpush.bf16.msrb.mxu3 %v4871_v7 }
  0xb2   : > { %1180 = vmatpush.bf16.msrb.mxu0 %v4873_v8 }
  0xb3   : > { %1193 = vmatpush.bf16.msrb.mxu1 %v4876_v14 }
  0xb4   : > { %1206 = vmatpush.bf16.msrb.mxu2 %v4879_v19 }
  0xb5   : > { %1219 = vmatpush.bf16.msrb.mxu3 %v4883_v20  ;;  %1181 = vmatmul.bf16.vlgmr.msrb.gmra.mxu0 %v1012_v21 }
  0xb6   : > { %1301 = vmatpush.bf16.msra.mxu0 %v4791_v41  ;;  %1194 = vmatmul.bf16.vlgmr.msrb.gmra.mxu1 %v1012_v21 }
  0xb7   : > { %1314 = vmatpush.bf16.msra.mxu1 %v4793_v45  ;;  %1207 = vmatmul.bf16.vlgmr.msrb.gmra.mxu2 %v1012_v21 }
  0xb8   : > { %1327 = vmatpush.bf16.msra.mxu2 %v4795_v51  ;;  %1220 = vmatmul.bf16.vlgmr.msrb.gmra.mxu3 %v1012_v21 }
  0xb9   : > { %1340 = vmatpush.bf16.msra.mxu3 %v4798_v52 }
  0xba   : > { %1302 = vmatpush.bf16.msra.mxu0 %v4800_v53 }
  0xbb   : > { %1315 = vmatpush.bf16.msra.mxu1 %v4803_v57 }
  0xbc   : > { %1328 = vmatpush.bf16.msra.mxu2 %v4806_v63 }
  0xbd   : > { %1341 = vmatpush.bf16.msra.mxu3 %v4810_v0 }
  0xbe   : > { %1303 = vmatpush.bf16.msra.mxu0 %v4812_v1 }
  0xbf   : > { %1316 = vmatpush.bf16.msra.mxu1 %v4815_v5 }
  0xc0   : > { %1329 = vmatpush.bf16.msra.mxu2 %v4818_v11 }
  0xc1   : > { %1342 = vmatpush.bf16.msra.mxu3 %v4822_v12 }
  0xc2   : > { %1304 = vmatpush.bf16.msra.mxu0 %v4824_v13 }
  0xc3   : > { %1317 = vmatpush.bf16.msra.mxu1 %v4827_v17 }
  0xc4   : > { %1330 = vmatpush.bf16.msra.mxu2 %v4830_v23 }
  0xc5   : > { %1343 = vmatpush.bf16.msra.mxu3 %v4835_v25 }
  0xc6   : > { %1305 = vmatpush.bf16.msra.mxu0 %v4837_v26 }
  0xc7   : > { %1318 = vmatpush.bf16.msra.mxu1 %v4840_v30 }
  0xc8   : > { %1331 = vmatpush.bf16.msra.mxu2 %v4843_v36 }
  0xc9   : > { %1344 = vmatpush.bf16.msra.mxu3 %v4847_v37 }
  0xca   : > { %1306 = vmatpush.bf16.msra.mxu0 %v4849_v38 }
  0xcb   : > { %1319 = vmatpush.bf16.msra.mxu1 %v4852_v43 }
  0xcc   : > { %1332 = vmatpush.bf16.msra.mxu2 %v4855_v50 }
  0xcd   : > { %1345 = vmatpush.bf16.msra.mxu3 %v4859_v54 }
  0xce   : > { %1307 = vmatpush.bf16.msra.mxu0 %v4861_v55 }
  0xcf   : > { %1320 = vmatpush.bf16.msra.mxu1 %v4864_v60 }
  0xd0   : > { %1333 = vmatpush.bf16.msra.mxu2 %v4867_v6 }
  0xd1   : > { %1346 = vmatpush.bf16.msra.mxu3 %v4871_v7 }
  0xd2   : > { %1308 = vmatpush.bf16.msra.mxu0 %v4873_v8 }
  0xd3   : > { %1321 = vmatpush.bf16.msra.mxu1 %v4876_v14 }
  0xd4   : > { %1334 = vmatpush.bf16.msra.mxu2 %v4879_v19 }
  0xd5   : > { %1347 = vmatpush.bf16.msra.mxu3 %v4883_v20 }
  0xd6   : > { %1430 = vmatpush.bf16.msrb.mxu0 %v4791_v41 }
  0xd7   : > { %1443 = vmatpush.bf16.msrb.mxu1 %v4793_v45 }
  0xd8   : > { %1456 = vmatpush.bf16.msrb.mxu2 %v4795_v51 }
  0xd9   : > { %1469 = vmatpush.bf16.msrb.mxu3 %v4798_v52 }
  0xda   : > { %1431 = vmatpush.bf16.msrb.mxu0 %v4800_v53 }
  0xdb   : > { %1444 = vmatpush.bf16.msrb.mxu1 %v4803_v57 }
  0xdc   : > { %1457 = vmatpush.bf16.msrb.mxu2 %v4806_v63 }
  0xdd   : > { %1470 = vmatpush.bf16.msrb.mxu3 %v4810_v0 }
  0xde   : > { %1432 = vmatpush.bf16.msrb.mxu0 %v4812_v1 }
  0xdf   : > { %1445 = vmatpush.bf16.msrb.mxu1 %v4815_v5 }
  0xe0   : > { %1458 = vmatpush.bf16.msrb.mxu2 %v4818_v11 }
  0xe1   : > { %1471 = vmatpush.bf16.msrb.mxu3 %v4822_v12 }
  0xe2   : > { %1433 = vmatpush.bf16.msrb.mxu0 %v4824_v13 }
  0xe3   : > { %1446 = vmatpush.bf16.msrb.mxu1 %v4827_v17 }
  0xe4   : > { %1459 = vmatpush.bf16.msrb.mxu2 %v4830_v23 }
  0xe5   : > { %1472 = vmatpush.bf16.msrb.mxu3 %v4835_v25 }
  0xe6   : > { %1434 = vmatpush.bf16.msrb.mxu0 %v4837_v26 }
  0xe7   : > { %1447 = vmatpush.bf16.msrb.mxu1 %v4840_v30 }
  0xe8   : > { %1460 = vmatpush.bf16.msrb.mxu2 %v4843_v36 }
  0xe9   : > { %1473 = vmatpush.bf16.msrb.mxu3 %v4847_v37 }
  0xea   : > { %1435 = vmatpush.bf16.msrb.mxu0 %v4849_v38 }
  0xeb   : > { %1448 = vmatpush.bf16.msrb.mxu1 %v4852_v43 }
  0xec   : > { %1461 = vmatpush.bf16.msrb.mxu2 %v4855_v50 }
  0xed   : > { %1474 = vmatpush.bf16.msrb.mxu3 %v4859_v54 }
  0xee   : > { %1436 = vmatpush.bf16.msrb.mxu0 %v4861_v55 }
  0xef   : > { %1449 = vmatpush.bf16.msrb.mxu1 %v4864_v60 }
  0xf0   : > { %1462 = vmatpush.bf16.msrb.mxu2 %v4867_v6 }
  0xf1   : > { %1475 = vmatpush.bf16.msrb.mxu3 %v4871_v7 }
  0xf2   : > { %1437 = vmatpush.bf16.msrb.mxu0 %v4873_v8 }
  0xf3   : > { %1450 = vmatpush.bf16.msrb.mxu1 %v4876_v14 }
  0xf4   : > { %1463 = vmatpush.bf16.msrb.mxu2 %v4879_v19 }
  0xf5   : > { %1476 = vmatpush.bf16.msrb.mxu3 %v4883_v20 }
 0x112   : > { %v888_v22 = vpop.f32.mrf.mxu0 }
 0x113   : > { %v907_v24 = vpop.f32.mrf.mxu1  ;;  %v889_v16 = vadd.f32 %v888_v22, %v699_v28 }
 0x114   : > { %v908_v21 = vadd.f32 %v907_v24, %v700_v31 }
 0x11a   : > { %v926_v29 = vpop.f32.mrf.mxu2  ;;  %v890_v33 = vpop.f32.mrf.mxu0 }
 0x11b   : > { %v945_v32 = vpop.f32.mrf.mxu3  ;;  %v4952_v34 = vadd.f32 %v890_v33, %v699_v28  ;;  %v909_v35 = vpop.f32.mrf.mxu1 }
 0x11c   : > { %v4954_v39 = vadd.f32 %v909_v35, %v700_v31 }
 0x122   : > { %v928_v44 = vpop.f32.mrf.mxu2  ;;  %v893_v48 = vpop.f32.mrf.mxu0 }
 0x123   : > { %v4956_v46 = vadd.f32 %v928_v44, %v701_v40  ;;  %v947_v47 = vpop.f32.mrf.mxu3  ;;  %v4960_v56 = vadd.f32 %v893_v48, %v699_v28  ;;  %v912_v58 = vpop.f32.mrf.mxu1 }
 0x124   : > { %v4958_v49 = vadd.f32 %v947_v47, %v702_v42  ;;  %v4962_v59 = vadd.f32 %v912_v58, %v700_v31 }
 0x12a   : > { %v931_v61 = vpop.f32.mrf.mxu2  ;;  %v895_v3 = vpop.f32.mrf.mxu0 }
 0x12b   : > { %v4964_v62 = vadd.f32 %v931_v61, %v701_v40  ;;  %v950_v2 = vpop.f32.mrf.mxu3  ;;  %v4968_v9 = vadd.f32 %v895_v3, %v699_v28  ;;  %v914_v10 = vpop.f32.mrf.mxu1  ;;  %v946_v3 = vadd.f32 %v945_v32, %v702_v42 }
 0x12c   : > { %v4966_v4 = vadd.f32 %v950_v2, %v702_v42  ;;  %v4970_v15 = vadd.f32 %v914_v10, %v700_v31 }
 0x12d   : > { %5522 = vst [vmem:[#allocation39_spill] sm:$0xff] %v4964_v62 }
 0x12e   : > { %5523 = vst [vmem:[#allocation40_spill] sm:$0xff] %v4966_v4 }
 0x12f   : > { %5524 = vst [vmem:[#allocation41_spill] sm:$0xff] %v4968_v9 }
 0x130   : > { %5525 = vst [vmem:[#allocation42_spill] sm:$0xff] %v4970_v15 }
 0x132   : > { %v933_v18 = vpop.f32.mrf.mxu2  ;;  %v1182_v35 = vpop.f32.mrf.mxu0 }
 0x133   : > { %v4972_v27 = vadd.f32 %v933_v18, %v701_v40  ;;  %v952_v33 = vpop.f32.mrf.mxu3  ;;  %v1225_v47 = vadd.f32 %v1182_v35, %v889_v16  ;;  %v1195_v48 = vpop.f32.mrf.mxu1 }
 0x134   : > { %v4974_v44 = vadd.f32 %v952_v33, %v702_v42  ;;  %v1226_v58 = vadd.f32 %v1195_v48, %v908_v21  ;;  %v927_v33 = vadd.f32 %v926_v29, %v701_v40 }
 0x135   : > { %5526 = vst [vmem:[#allocation43_spill] sm:$0xff] %v4972_v27  ;;  %v3259_v61 = vmul.f32 -1.442695, %v1225_v47 }
 0x136   : > { %5527 = vst [vmem:[#allocation44_spill] sm:$0xff] %v4974_v44  ;;  %v3260_v2 = vmul.f32 -1.442695, %v1226_v58 }
 0x137   : > { %3859 = vpow2.f32 %v3259_v61 }
 0x138   : > { %3861 = vpow2.f32 %v3260_v2 }
 0x13a   : > { %v1208_v9 = vpop.f32.mrf.mxu2  ;;  %v1184_v15 = vpop.f32.mrf.mxu0 }
 0x13b   : > { %v1221_v10 = vpop.f32.mrf.mxu3  ;;  %v1197_v28 = vpop.f32.mrf.mxu1  ;;  %v1227_v48 = vadd.f32 %v1208_v9, %v927_v33 }
 0x13c   : > { %v1228_v22 = vadd.f32 %v1221_v10, %v946_v3 }
 0x13d   : > { %v3860_v24 = vpop.eup %3859 }
 0x13e   : > { %v3261_v31 = vmul.f32 -1.442695, %v1228_v22  ;;  %v3862_v18 = vpop.eup %3861  ;;  %v1232_v27 = vadd.f32 1.0, %v3860_v24 }
 0x13f   : > { %v1251_v62 = vadd.f32 1.0, %v3862_v18 }
 0x140   : > { %3863 = vpow2.f32 %v3261_v31  ;;  %v1244_v3 = vand.u32 2147483648, %v1232_v27  ;;  %v1242_v28 = vand.u32 2147483647, %v1232_v27  ;;  %vm1238_vm2 = vweird.f32 %v1232_v27 }
 0x141   : > { %3865 = vrcp.f32 %v1232_v27  ;;  %v1263_v10 = vand.u32 2147483648, %v1251_v62  ;;  %v1261_v31 = vand.u32 2147483647, %v1251_v62  ;;  %vm1257_vm3 = vweird.f32 %v1251_v62 }
 0x142   : > { %3867 = vrcp.f32 %v1251_v62  ;;  %v1210_v16 = vpop.f32.mrf.mxu2  ;;  %v1245_v9 = vor.u32 1.1754944e-38, %v1244_v3  ;;  %vm1243_vm6 = vcmp.eq.f32.partialorder %v1242_v28, 8.507059e+37 }
 0x143   : > { %v1223_v21 = vpop.f32.mrf.mxu3  ;;  %v1264_v16 = vor.u32 1.1754944e-38, %v1263_v10  ;;  %vm1262_vm7 = vcmp.eq.f32.partialorder %v1261_v31, 8.507059e+37 }
 0x144   : > { %v1004_v21 = vld [vmem:[#allocation5 + $0x8] sm:$0xff] }
 0x146   : > { %v3864_v35 = vpop.eup %3863 }
 0x147   : > { %v3866_v47 = vpop.eup %3865  ;;  %v1271_v32 = vadd.f32 1.0, %v3864_v35 }
 0x148   : > { %v3868_v42 = vpop.eup %3867  ;;  %v1234_v58 = vmul.f32 %v3866_v47, %v1232_v27  ;;  %vm1239_vm0 = vweird.f32 %v3866_v47 }
 0x149   : > { %v1253_v15 = vmul.f32 %v3868_v42, %v1251_v62  ;;  %3869 = vrcp.f32 %v1271_v32  ;;  %vm1258_vm1 = vweird.f32 %v3868_v42  ;;  %vm1240_vm4 = vmor %vm1238_vm2, %vm1239_vm0  ;;  %v1283_v3 = vand.u32 2147483648, %v1271_v32 }
 0x14a   : > { %v1235_v61 = vsub.f32 1.0, %v1234_v58  ;;  %3871 = vtanh.f32 %v1227_v48  ;;  %vm1259_vm5 = vmor %vm1257_vm3, %vm1258_vm1  ;;  %vm1277_vm9 = vweird.f32 %v1271_v32 }
 0x14b   : > { %v1254_v2 = vsub.f32 1.0, %v1253_v15  ;;  %v1284_v28 = vor.u32 1.1754944e-38, %v1283_v3 }
 0x14c   : > { %v1236_v22 = vmul.f32 %v3866_v47, %v1235_v61 }
 0x14d   : > { %v1255_v24 = vmul.f32 %v3868_v42, %v1254_v2 }
 0x14e   : > { %v1237_v29 = vadd.f32 %v3866_v47, %v1236_v22 }
 0x14f   : > { %v3870_v40 = vpop.eup %3869  ;;  %v1256_v18 = vadd.f32 %v3868_v42, %v1255_v24 }
 0x150   : > { %v1241_v33 = vsel %vm1240_vm4, %v3866_v47, %v1237_v29  ;;  %v1273_v35 = vmul.f32 %v3870_v40, %v1271_v32  ;;  %v3872_v48 = vpop.eup %3871  ;;  %vm1278_vm8 = vweird.f32 %v3870_v40  ;;  %v1281_v47 = vand.u32 2147483647, %v1271_v32 }
 0x151   : > { %v1246_v58 = vsel %vm1243_vm6, %v1245_v9, %v1241_v33  ;;  %v1260_v15 = vsel %vm1259_vm5, %v3868_v42, %v1256_v18  ;;  %vm1279_vm10 = vmor %vm1277_vm9, %vm1278_vm8 }
 0x152   : > { %v1265_v61 = vsel %vm1262_vm7, %v1264_v16, %v1260_v15  ;;  %v1288_v2 = vmul.f32 %v3872_v48, %v1246_v58  ;;  %v1274_v44 = vsub.f32 1.0, %v1273_v35  ;;  %vm1282_vm11 = vcmp.eq.f32.partialorder %v1281_v47, 8.507059e+37 }
 0x153   : > { %v1287_v22 = vmul.f32 %v1265_v61, %v1004_v21 }
 0x154   : > { %v1275_v27 = vmul.f32 %v3870_v40, %v1274_v44 }
 0x155   : > { %v4976_v4 = vadd.f32 %v1288_v2, %v1287_v22 }
 0x156   : > { %v1276_v62 = vadd.f32 %v3870_v40, %v1275_v27 }
 0x157   : > { %3873 = vtanh.f32 %v4976_v4 }
 0x158   : > { %v1280_v10 = vsel %vm1279_vm10, %v3870_v40, %v1276_v62 }
 0x159   : > { %v1285_v24 = vsel %vm1282_vm11, %v1284_v28, %v1280_v10 }
 0x15d   : > { %v3874_v42 = vpop.eup %3873 }
 0x15e   : > { %v4979_v31 = vmul.f32 %v3874_v42, %v1285_v24  ;;  %v3385_v42 = vld [vmem:[#allocation17 + $0xe0] sm:$0xf]  ;;  %v3653_v24 = vld [vmem:[#allocation17 + $0xec] sm:$0xf0] }
 0x160   : > { %v1300_v44 = vpack.c.bf16 %v4979_v31, %v4979_v31 }
 0x162   : > { %1309 = vmatmul.bf16.vlgmr.msra.gmra.mxu0 %v1300_v44  ;;  %1322 = vmatmul.bf16.vlgmr.msra.gmra.mxu1 %v1300_v44 }
 0x163   : > { %1335 = vmatmul.bf16.vlgmr.msra.gmra.mxu2 %v1300_v44  ;;  %1348 = vmatmul.bf16.vlgmr.msra.gmra.mxu3 %v1300_v44  ;;  %v3651_v44 = vld [vmem:[#allocation17 + $0xe4] sm:$0xf] }
 0x164   : > { %1559 = vmatpush.bf16.msra.mxu0 %v4791_v41  ;;  %1572 = vmatpush.bf16.msra.mxu1 %v4793_v45 }
 0x165   : > { %1585 = vmatpush.bf16.msra.mxu2 %v4795_v51  ;;  %1598 = vmatpush.bf16.msra.mxu3 %v4798_v52 }
 0x168   : > { %1560 = vmatpush.bf16.msra.mxu0 %v4800_v53  ;;  %1573 = vmatpush.bf16.msra.mxu1 %v4803_v57 }
 0x169   : > { %1586 = vmatpush.bf16.msra.mxu2 %v4806_v63  ;;  %1599 = vmatpush.bf16.msra.mxu3 %v4810_v0 }
 0x16c   : > { %1561 = vmatpush.bf16.msra.mxu0 %v4812_v1  ;;  %1574 = vmatpush.bf16.msra.mxu1 %v4815_v5 }
 0x16d   : > { %1587 = vmatpush.bf16.msra.mxu2 %v4818_v11  ;;  %1600 = vmatpush.bf16.msra.mxu3 %v4822_v12 }
 0x170   : > { %1562 = vmatpush.bf16.msra.mxu0 %v4824_v13  ;;  %1575 = vmatpush.bf16.msra.mxu1 %v4827_v17 }
 0x171   : > { %1588 = vmatpush.bf16.msra.mxu2 %v4830_v23  ;;  %1601 = vmatpush.bf16.msra.mxu3 %v4835_v25 }
 0x174   : > { %1563 = vmatpush.bf16.msra.mxu0 %v4837_v26  ;;  %1576 = vmatpush.bf16.msra.mxu1 %v4840_v30 }
 0x175   : > { %1589 = vmatpush.bf16.msra.mxu2 %v4843_v36  ;;  %1602 = vmatpush.bf16.msra.mxu3 %v4847_v37 }
 0x178   : > { %1564 = vmatpush.bf16.msra.mxu0 %v4849_v38  ;;  %1577 = vmatpush.bf16.msra.mxu1 %v4852_v43 }
 0x179   : > { %1590 = vmatpush.bf16.msra.mxu2 %v4855_v50  ;;  %1603 = vmatpush.bf16.msra.mxu3 %v4859_v54 }
 0x17c   : > { %1565 = vmatpush.bf16.msra.mxu0 %v4861_v55  ;;  %1578 = vmatpush.bf16.msra.mxu1 %v4864_v60 }
 0x17d   : > { %1591 = vmatpush.bf16.msra.mxu2 %v4867_v6  ;;  %1604 = vmatpush.bf16.msra.mxu3 %v4871_v7 }
 0x180   : > { %1566 = vmatpush.bf16.msra.mxu0 %v4873_v8  ;;  %1579 = vmatpush.bf16.msra.mxu1 %v4876_v14 }
 0x181   : > { %1592 = vmatpush.bf16.msra.mxu2 %v4879_v19  ;;  %1605 = vmatpush.bf16.msra.mxu3 %v4883_v20 }
 0x1df   : > { %v1310_v41 = vpop.f32.mrf.mxu0  ;;  %v1323_v45 = vpop.f32.mrf.mxu1 }
 0x1e0   : > { %v1353_v51 = vadd.f32 %v1310_v41, %v4952_v34  ;;  %v1354_v52 = vadd.f32 %v1323_v45, %v4954_v39  ;;  %v3386_v41 = vor.u32 %v3653_v24, %v3385_v42  ;;  %v3387_v45 = vld [vmem:[#allocation17 + $0xf0] sm:$0xf0] }
 0x1e2   : > { %v3262_v53 = vmul.f32 -1.442695, %v1353_v51  ;;  %v3263_v57 = vmul.f32 -1.442695, %v1354_v52  ;;  %v3393_v51 = vld [vmem:[#allocation17 + $0xe8] sm:$0xf] }
 0x1e3   : > { %v3654_v52 = vld [vmem:[#allocation17 + $0xf4] sm:$0xf0] }
 0x1e4   : > { %3875 = vpow2.f32 %v3262_v53  ;;  %v3390_v53 = vor.u32 %v3651_v44, %v3387_v45  ;;  %v3321_v45 = vld [vmem:[#allocation17 + $0x60] sm:$0xf] }
 0x1e5   : > { %3877 = vpow2.f32 %v3263_v57  ;;  %v3394_v57 = vor.u32 %v3654_v52, %v3393_v51 }
 0x1e6   : > { %v1336_v63 = vpop.f32.mrf.mxu2  ;;  %v1349_v0 = vpop.f32.mrf.mxu3 }
 0x1e7   : > { %v1356_v1 = vadd.f32 %v1349_v0, %v4958_v49  ;;  %v1312_v5 = vpop.f32.mrf.mxu0  ;;  %v1325_v11 = vpop.f32.mrf.mxu1  ;;  %v1355_v43 = vadd.f32 %v1336_v63, %v4956_v46  ;;  %v3652_v63 = vld [vmem:[#allocation17 + $0xec] sm:$0xf]  ;;  %v3395_v0 = vld [vmem:[#allocation17 + $0xf8] sm:$0xf0] }
 0x1e8   : > { %v3398_v11 = vor.u32 %v3652_v63, %v3395_v0  ;;  %v3635_v63 = vld [vmem:[#allocation17 + $0x64] sm:$0xf]  ;;  %v3323_v0 = vld [vmem:[#allocation17 + $0x70] sm:$0xf0] }
 0x1e9   : > { %v3264_v12 = vmul.f32 -1.442695, %v1356_v1 }
 0x1ea   : > { %v3876_v13 = vpop.eup %3875 }
 0x1eb   : > { %v3878_v17 = vpop.eup %3877  ;;  %v1360_v23 = vadd.f32 1.0, %v3876_v13  ;;  %3879 = vpow2.f32 %v3264_v12 }
 0x1ec   : > { %v1379_v25 = vadd.f32 1.0, %v3878_v17  ;;  %v3369_v17 = vld [vmem:[#allocation17 + $0xc0] sm:$0xf] }
 0x1ed   : > { %3881 = vrcp.f32 %v1360_v23  ;;  %v1372_v7 = vand.u32 2147483648, %v1360_v23  ;;  %v1370_v19 = vand.u32 2147483647, %v1360_v23  ;;  %vm1366_vm14 = vweird.f32 %v1360_v23 }
 0x1ee   : > { %3883 = vrcp.f32 %v1379_v25  ;;  %v1338_v26 = vpop.f32.mrf.mxu2  ;;  %v1351_v30 = vpop.f32.mrf.mxu3  ;;  %v1391_v8 = vand.u32 2147483648, %v1379_v25  ;;  %v1389_v34 = vand.u32 2147483647, %v1379_v25  ;;  %vm1385_vm15 = vweird.f32 %v1379_v25 }
 0x1ef   : > { %v1373_v46 = vor.u32 1.1754944e-38, %v1372_v7  ;;  %vm1371_vm2 = vcmp.eq.f32.partialorder %v1370_v19, 8.507059e+37  ;;  %v3371_v30 = vld [vmem:[#allocation17 + $0xd0] sm:$0xf0]  ;;  %v3361_v19 = vld [vmem:[#allocation17 + $0xa8] sm:$0xf] }
 0x1f0   : > { %v1392_v40 = vor.u32 1.1754944e-38, %v1391_v8  ;;  %vm1390_vm3 = vcmp.eq.f32.partialorder %v1389_v34, 8.507059e+37  ;;  %v3643_v8 = vld [vmem:[#allocation17 + $0xa4] sm:$0xf]  ;;  %v3646_v34 = vld [vmem:[#allocation17 + $0xb4] sm:$0xf0] }
 0x1f1   : > { %v3880_v36 = vpop.eup %3879 }
 0x1f2   : > { %v1399_v37 = vadd.f32 1.0, %v3880_v36  ;;  %v3377_v36 = vld [vmem:[#allocation17 + $0xc8] sm:$0xf] }
 0x1f3   : > { %v3882_v38 = vpop.eup %3881 }
 0x1f4   : > { %v3884_v50 = vpop.eup %3883  ;;  %v1362_v54 = vmul.f32 %v3882_v38, %v1360_v23  ;;  %3885 = vrcp.f32 %v1399_v37  ;;  %vm1367_vm12 = vweird.f32 %v3882_v38  ;;  %v1411_v22 = vand.u32 2147483648, %v1399_v37  ;;  %v3649_v23 = vld [vmem:[#allocation17 + $0xcc] sm:$0xf0] }
 0x1f5   : > { %v1381_v55 = vmul.f32 %v3884_v50, %v1379_v25  ;;  %3887 = vtanh.f32 %v1355_v43  ;;  %vm1386_vm13 = vweird.f32 %v3884_v50  ;;  %vm1368_vm0 = vmor %vm1366_vm14, %vm1367_vm12  ;;  %vm1405_vm5 = vweird.f32 %v1399_v37  ;;  %v3647_v25 = vld [vmem:[#allocation17 + $0xc4] sm:$0xf] }
 0x1f6   : > { %v1363_v60 = vsub.f32 1.0, %v1362_v54  ;;  %vm1387_vm1 = vmor %vm1385_vm15, %vm1386_vm13  ;;  %v1409_v27 = vand.u32 2147483647, %v1399_v37  ;;  %v1412_v3 = vor.u32 1.1754944e-38, %v1411_v22  ;;  %v3370_v26 = vor.u32 %v3649_v23, %v3369_v17  ;;  %v3642_v22 = vld [vmem:[#allocation17 + $0x94] sm:$0xf0] }
 0x1f7   : > { %v1382_v6 = vsub.f32 1.0, %v1381_v55  ;;  %v3648_v55 = vld [vmem:[#allocation17 + $0xcc] sm:$0xf] }
 0x1f8   : > { %v1364_v14 = vmul.f32 %v3882_v38, %v1363_v60  ;;  %vm1410_vm7 = vcmp.eq.f32.partialorder %v1409_v27, 8.507059e+37  ;;  %v3379_v60 = vld [vmem:[#allocation17 + $0xd8] sm:$0xf0]  ;;  %v5529_v17 = vld [vmem:[#allocation39_spill] sm:$0xff] }
 0x1f9   : > { %v1383_v20 = vmul.f32 %v3884_v50, %v1382_v6  ;;  %v3645_v6 = vld [vmem:[#allocation17 + $0xac] sm:$0xf0] }
 0x1fa   : > { %v3886_v39 = vpop.eup %3885  ;;  %v1365_v49 = vadd.f32 %v3882_v38, %v1364_v14  ;;  %v3355_v14 = vld [vmem:[#allocation17 + $0xb0] sm:$0xf0] }
 0x1fb   : > { %v1384_v32 = vadd.f32 %v3884_v50, %v1383_v20  ;;  %v1401_v29 = vmul.f32 %v3886_v39, %v1399_v37  ;;  %v3888_v18 = vpop.eup %3887  ;;  %vm1406_vm4 = vweird.f32 %v3886_v39  ;;  %v3650_v37 = vld [vmem:[#allocation17 + $0xd4] sm:$0xf0]  ;;  %v3358_v20 = vor.u32 %v3643_v8, %v3355_v14  ;;  %v3632_v8 = vld [vmem:[#allocation17 + $0x4c] sm:$0xf]  ;;  %v3315_v14 = vld [vmem:[#allocation17 + $0x58] sm:$0xf0] }
 0x1fc   : > { %v1369_v9 = vsel %vm1368_vm0, %v3882_v38, %v1365_v49  ;;  %vm1407_vm6 = vmor %vm1405_vm5, %vm1406_vm4  ;;  %v3378_v54 = vor.u32 %v3650_v37, %v3377_v36  ;;  %v3363_v49 = vld [vmem:[#allocation17 + $0xb8] sm:$0xf0]  ;;  %v3305_v36 = vld [vmem:[#allocation17 + $0x40] sm:$0xf] }
 0x1fd   : > { %v1374_v16 = vsel %vm1371_vm2, %v1373_v46, %v1369_v9  ;;  %v1388_v21 = vsel %vm1387_vm1, %v3884_v50, %v1384_v32  ;;  %v1402_v33 = vsub.f32 1.0, %v1401_v29  ;;  %v3374_v50 = vor.u32 %v3647_v25, %v3371_v30  ;;  %v3337_v9 = vld [vmem:[#allocation17 + $0x80] sm:$0xf]  ;;  %v3331_v30 = vld [vmem:[#allocation17 + $0x78] sm:$0xf0] }
 0x1fe   : > { %v1393_v35 = vsel %vm1390_vm3, %v1392_v40, %v1388_v21  ;;  %v1416_v48 = vmul.f32 %v3888_v18, %v1374_v16  ;;  %v3362_v29 = vor.u32 %v3646_v34, %v3361_v19  ;;  %v3641_v18 = vld [vmem:[#allocation17 + $0x8c] sm:$0xf0]  ;;  %v3639_v16 = vld [vmem:[#allocation17 + $0x84] sm:$0xf]  ;;  %v5528_v21 = vld [vmem:[#allocation40_spill] sm:$0xff] }
 0x1ff   : > { %v1415_v58 = vmul.f32 %v1393_v35, %v4976_v4  ;;  %v1403_v15 = vmul.f32 %v3886_v39, %v1402_v33  ;;  %v3289_v19 = vld [vmem:[#allocation17 + $0x20] sm:$0xf] }
 0x201   : > { %v5020_v61 = vadd.f32 %v1416_v48, %v1415_v58  ;;  %v1404_v2 = vadd.f32 %v3886_v39, %v1403_v15  ;;  %v3338_v58 = vor.u32 %v3641_v18, %v3337_v9  ;;  %v3339_v15 = vld [vmem:[#allocation17 + $0x90] sm:$0xf0]  ;;  %v3627_v9 = vld [vmem:[#allocation17 + $0x24] sm:$0xf] }
 0x202   : > { %v3342_v27 = vor.u32 %v3639_v16, %v3339_v15  ;;  %v3291_v18 = vld [vmem:[#allocation17 + $0x30] sm:$0xf0] }
 0x203   : > { %3889 = vtanh.f32 %v5020_v61  ;;  %v1408_v62 = vsel %vm1407_vm6, %v3886_v39, %v1404_v2  ;;  %v3644_v39 = vld [vmem:[#allocation17 + $0xac] sm:$0xf]  ;;  %v3345_v2 = vld [vmem:[#allocation17 + $0x88] sm:$0xf]  ;;  %v3294_v15 = vor.u32 %v3627_v9, %v3291_v18  ;;  %v3523_v18 = vld [vmem:[#allocation18 + $0xf8] sm:$0xf0] }
 0x204   : > { %v1413_v10 = vsel %vm1410_vm7, %v1412_v3, %v1408_v62  ;;  %v3366_v40 = vor.u32 %v3644_v39, %v3363_v49  ;;  %v3346_v62 = vor.u32 %v3642_v22, %v3345_v2  ;;  %v3640_v3 = vld [vmem:[#allocation17 + $0x8c] sm:$0xf]  ;;  %v3629_v49 = vld [vmem:[#allocation17 + $0x2c] sm:$0xf0]  ;;  %v3630_v2 = vld [vmem:[#allocation17 + $0x34] sm:$0xf0] }
 0x205   : > { %v3628_v22 = vld [vmem:[#allocation17 + $0x2c] sm:$0xf] }
 0x206   : > { %v3684_v9 = vld [vmem:[#allocation18 + $0xec] sm:$0xf] }
 0x209   : > { %v3890_v47 = vpop.eup %3889 }
 0x20a   : > { %v5023_v28 = vmul.f32 %v3890_v47, %v1413_v10  ;;  %v3347_v47 = vld [vmem:[#allocation17 + $0x98] sm:$0xf0] }
 0x20b   : > { %v3350_v42 = vor.u32 %v3640_v3, %v3347_v47 }
 0x20c   : > { %v1429_v4 = vpack.c.bf16 %v5023_v28, %v5023_v28 }
 0x20e   : > { %1438 = vmatmul.bf16.vlgmr.msrb.gmra.mxu0 %v1429_v4  ;;  %1451 = vmatmul.bf16.vlgmr.msrb.gmra.mxu1 %v1429_v4 }
 0x20f   : > { %1464 = vmatmul.bf16.vlgmr.msrb.gmra.mxu2 %v1429_v4  ;;  %1477 = vmatmul.bf16.vlgmr.msrb.gmra.mxu3 %v1429_v4 }
 0x210   : > { %1890 = vmatpush.bf16.msrb.mxu0 %v3386_v41  ;;  %1909 = vmatpush.bf16.msrb.mxu1 %v3390_v53  ;;  %v3637_v53 = vld [vmem:[#allocation17 + $0x6c] sm:$0xf0] }
 0x211   : > { %1928 = vmatpush.bf16.msrb.mxu2 %v3394_v57  ;;  %1947 = vmatpush.bf16.msrb.mxu3 %v3398_v11  ;;  %v3322_v57 = vor.u32 %v3637_v53, %v3321_v45  ;;  %v3329_v11 = vld [vmem:[#allocation17 + $0x68] sm:$0xf] }
 0x212   : > { %v3281_v53 = vld [vmem:[#allocation17 + $0x8] sm:$0xf] }
 0x214   : > { %1891 = vmatpush.bf16.msrb.mxu0 %v3370_v26  ;;  %1910 = vmatpush.bf16.msrb.mxu1 %v3374_v50  ;;  %v3636_v26 = vld [vmem:[#allocation17 + $0x6c] sm:$0xf]  ;;  %v3631_v50 = vld [vmem:[#allocation17 + $0x44] sm:$0xf] }
 0x215   : > { %1929 = vmatpush.bf16.msrb.mxu2 %v3378_v54 }
 0x218   : > { %1911 = vmatpush.bf16.msrb.mxu1 %v3358_v20 }
 0x219   : > { %1930 = vmatpush.bf16.msrb.mxu2 %v3362_v29 }
 0x21c   : > { %1912 = vmatpush.bf16.msrb.mxu1 %v3342_v27  ;;  %v3299_v27 = vld [vmem:[#allocation17 + $0x38] sm:$0xf0] }
 0x21d   : > { %1931 = vmatpush.bf16.msrb.mxu2 %v3346_v62  ;;  %v3302_v47 = vor.u32 %v3628_v22, %v3299_v27  ;;  %v3499_v27 = vld [vmem:[#allocation18 + $0xd0] sm:$0xf0] }
 0x28b   : > { %v1439_v1 = vpop.f32.mrf.mxu0  ;;  %v1452_v5 = vpop.f32.mrf.mxu1 }
 0x28c   : > { %v1482_v12 = vadd.f32 %v1439_v1, %v4960_v56  ;;  %v1483_v13 = vadd.f32 %v1452_v5, %v4962_v59  ;;  %v3353_v56 = vld [vmem:[#allocation17 + $0xa0] sm:$0xf]  ;;  %v3382_v59 = vor.u32 %v3648_v55, %v3379_v60  ;;  %v3326_v5 = vor.u32 %v3635_v63, %v3323_v0  ;;  %v3307_v60 = vld [vmem:[#allocation17 + $0x50] sm:$0xf0] }
 0x28d   : > { %v3354_v7 = vor.u32 %v3645_v6, %v3353_v56  ;;  %v3313_v56 = vld [vmem:[#allocation17 + $0x48] sm:$0xf]  ;;  %v3634_v6 = vld [vmem:[#allocation17 + $0x54] sm:$0xf0] }
 0x28e   : > { %v3265_v38 = vmul.f32 -1.442695, %v1482_v12  ;;  %v3266_v43 = vmul.f32 -1.442695, %v1483_v13  ;;  %1948 = vmatpush.bf16.msrb.mxu3 %v3382_v59  ;;  %v3638_v12 = vld [vmem:[#allocation17 + $0x74] sm:$0xf0]  ;;  %1913 = vmatpush.bf16.msrb.mxu1 %v3326_v5  ;;  %v3314_v29 = vor.u32 %v3634_v6, %v3313_v56 }
 0x28f   : > { %1892 = vmatpush.bf16.msrb.mxu0 %v3354_v7  ;;  %v3330_v25 = vor.u32 %v3638_v12, %v3329_v11  ;;  %v3624_v12 = vld [vmem:[#allocation17 + $0xc] sm:$0xf] }
 0x290   : > { %3891 = vpow2.f32 %v3265_v38  ;;  %v3334_v38 = vor.u32 %v3636_v26, %v3331_v30 }
 0x291   : > { %3893 = vpow2.f32 %v3266_v43  ;;  %v3633_v43 = vld [vmem:[#allocation17 + $0x4c] sm:$0xf0]  ;;  %1932 = vmatpush.bf16.msrb.mxu2 %v3330_v25 }
 0x292   : > { %v1465_v46 = vpop.f32.mrf.mxu2  ;;  %v1478_v32 = vpop.f32.mrf.mxu3  ;;  %1949 = vmatpush.bf16.msrb.mxu3 %v3366_v40  ;;  %v3306_v55 = vor.u32 %v3633_v43, %v3305_v36  ;;  %v3318_v40 = vor.u32 %v3632_v8, %v3315_v14 }
 0x293   : > { %v1485_v33 = vadd.f32 %v1478_v32, %v5528_v21  ;;  %v1441_v35 = vpop.f32.mrf.mxu0  ;;  %v1454_v48 = vpop.f32.mrf.mxu1  ;;  %1893 = vmatpush.bf16.msrb.mxu0 %v3338_v58  ;;  %v1484_v23 = vadd.f32 %v1465_v46, %v5529_v17  ;;  %v3310_v32 = vor.u32 %v3631_v50, %v3307_v60  ;;  %v5532_v21 = vld [vmem:[#allocation41_spill] sm:$0xff] }
 0x294   : > { %v3290_v35 = vor.u32 %v3629_v49, %v3289_v19  ;;  %v3297_v48 = vld [vmem:[#allocation17 + $0x28] sm:$0xf]  ;;  %v1686_v19 = vpack.c.bf16 %v5023_v28, %v4979_v31  ;;  %v3515_v49 = vld [vmem:[#allocation18 + $0xf0] sm:$0xf0]  ;;  %v5095_v28 = vor.u32 %v3684_v9, %v3523_v18  ;;  %v3449_v18 = vld [vmem:[#allocation18 + $0x60] sm:$0xf] }
 0x295   : > { %v3267_v10 = vmul.f32 -1.442695, %v1485_v33  ;;  %1914 = vmatpush.bf16.msrb.mxu1 %v3310_v32  ;;  %1933 = vmatpush.bf16.msrb.mxu2 %v3314_v29  ;;  %v3298_v3 = vor.u32 %v3630_v2, %v3297_v48  ;;  %v3686_v32 = vld [vmem:[#allocation18 + $0xf4] sm:$0xf0]  ;;  %v3679_v2 = vld [vmem:[#allocation18 + $0xc4] sm:$0xf] }
 0x296   : > { %v3892_v4 = vpop.eup %3891  ;;  %1950 = vmatpush.bf16.msrb.mxu3 %v3350_v42  ;;  %v3623_v42 = vld [vmem:[#allocation17 + $0x4] sm:$0xf] }
 0x297   : > { %v3894_v24 = vpop.eup %3893  ;;  %v5030_v44 = vadd.f32 1.0, %v3892_v4  ;;  %3895 = vpow2.f32 %v3267_v10  ;;  %1894 = vmatpush.bf16.msrb.mxu0 %v3322_v57  ;;  %v3273_v10 = vld [vmem:[#allocation17] sm:$0xf]  ;;  %v3625_v4 = vld [vmem:[#allocation17 + $0xc] sm:$0xf0] }
 0x298   : > { %v5032_v41 = vadd.f32 1.0, %v3894_v24  ;;  %v3626_v57 = vld [vmem:[#allocation17 + $0x14] sm:$0xf0] }
 0x299   : > { %3897 = vrcp.f32 %v5030_v44  ;;  %v1499_v1 = vand.u32 2147483647, %v5030_v44  ;;  %v1501_v39 = vand.u32 2147483648, %v5030_v44  ;;  %vm1495_vm12 = vweird.f32 %v5030_v44  ;;  %1915 = vmatpush.bf16.msrb.mxu1 %v3294_v15  ;;  %1934 = vmatpush.bf16.msrb.mxu2 %v3298_v3  ;;  %v3681_v15 = vld [vmem:[#allocation18 + $0xcc] sm:$0xf0] }
 0x29a   : > { %3899 = vrcp.f32 %v5032_v41  ;;  %v1467_v51 = vpop.f32.mrf.mxu2  ;;  %v1480_v52 = vpop.f32.mrf.mxu3  ;;  %1951 = vmatpush.bf16.msrb.mxu3 %v3334_v38  ;;  %v1520_v34 = vand.u32 2147483648, %v5032_v41  ;;  %v1518_v33 = vand.u32 2147483647, %v5032_v41  ;;  %vm1514_vm11 = vweird.f32 %v5032_v41  ;;  %v3682_v3 = vld [vmem:[#allocation18 + $0xd4] sm:$0xf0] }
 0x29b   : > { %1895 = vmatpush.bf16.msrb.mxu0 %v3306_v55  ;;  %vm5051_vm8 = vcmp.eq.f32.partialorder %v1499_v1, 8.507059e+37  ;;  %v3274_v51 = vor.u32 %v3625_v4, %v3273_v10  ;;  %v3275_v52 = vld [vmem:[#allocation17 + $0x10] sm:$0xf0]  ;;  %v1502_v1 = vor.u32 1.1754944e-38, %v1501_v39  ;;  %v5104_v4 = vor.u32 %v3679_v2, %v3499_v27  ;;  %v3670_v27 = vld [vmem:[#allocation18 + $0x74] sm:$0xf0] }
 0x29c   : > { %v1521_v0 = vor.u32 1.1754944e-38, %v1520_v34  ;;  %vm1519_vm15 = vcmp.eq.f32.partialorder %v1518_v33, 8.507059e+37  ;;  %v3278_v17 = vor.u32 %v3623_v42, %v3275_v52  ;;  %v3683_v34 = vld [vmem:[#allocation18 + $0xe4] sm:$0xf]  ;;  %v3677_v52 = vld [vmem:[#allocation18 + $0xac] sm:$0xf0] }
 0x29d   : > { %v3896_v13 = vpop.eup %3895  ;;  %v5090_v29 = vor.u32 %v3683_v34, %v3515_v49 }
 0x29e   : > { %v5038_v37 = vadd.f32 1.0, %v3896_v13  ;;  %1952 = vmatpush.bf16.msrb.mxu3 %v3318_v40  ;;  %v3283_v13 = vld [vmem:[#allocation17 + $0x18] sm:$0xf0]  ;;  %1916 = vmatpush.bf16.msrb.mxu1 %v3278_v17 }
 0x29f   : > { %v5040_v54 = vpop.eup %3897  ;;  %1896 = vmatpush.bf16.msrb.mxu0 %v3290_v35  ;;  %v3286_v36 = vor.u32 %v3624_v12, %v3283_v13  ;;  %v5533_v35 = vld [vmem:[#allocation42_spill] sm:$0xff]  ;;  %v3676_v12 = vld [vmem:[#allocation18 + $0xac] sm:$0xf]  ;;  %v3491_v13 = vld [vmem:[#allocation18 + $0xb8] sm:$0xf0] }
 0x2a0   : > { %v5042_v59 = vpop.eup %3899  ;;  %v1491_v7 = vmul.f32 %v5040_v54, %v5030_v44  ;;  %3901 = vrcp.f32 %v5038_v37  ;;  %vm1496_vm9 = vweird.f32 %v5040_v54  ;;  %v1540_v60 = vand.u32 2147483648, %v5038_v37 }
 0x2a1   : > { %v1510_v20 = vmul.f32 %v5042_v59, %v5032_v41  ;;  %3903 = vtanh.f32 %v1484_v23  ;;  %vm1515_vm10 = vweird.f32 %v5042_v59  ;;  %vm1497_vm13 = vmor %vm1495_vm12, %vm1496_vm9  ;;  %v3282_v23 = vor.u32 %v3626_v57, %v3281_v53 }
 0x2a2   : > { %v1492_v46 = vsub.f32 1.0, %v1491_v7  ;;  %vm1516_vm14 = vmor %vm1514_vm11, %vm1515_vm10  ;;  %1953 = vmatpush.bf16.msrb.mxu3 %v3302_v47  ;;  %vm1534_vm1 = vweird.f32 %v5038_v37  ;;  %v1538_v56 = vand.u32 2147483647, %v5038_v37 }
 0x2a3   : > { %v1511_v16 = vsub.f32 1.0, %v1510_v20  ;;  %1897 = vmatpush.bf16.msrb.mxu0 %v3274_v51  ;;  %1935 = vmatpush.bf16.msrb.mxu2 %v3282_v23  ;;  %v3685_v20 = vld [vmem:[#allocation18 + $0xec] sm:$0xf0]  ;;  %v3481_v51 = vld [vmem:[#allocation18 + $0xa0] sm:$0xf] }
 0x2a4   : > { %v1493_v58 = vmul.f32 %v5040_v54, %v1492_v46  ;;  %vm1539_vm3 = vcmp.eq.f32.partialorder %v1538_v56, 8.507059e+37  ;;  %v3521_v46 = vld [vmem:[#allocation18 + $0xe8] sm:$0xf]  ;;  %v5113_v57 = vor.u32 %v3677_v52, %v3481_v51  ;;  %v3433_v51 = vld [vmem:[#allocation18 + $0x40] sm:$0xf] }
 0x2a5   : > { %v1512_v62 = vmul.f32 %v5042_v59, %v1511_v16  ;;  %v5092_v40 = vor.u32 %v3686_v32, %v3521_v46  ;;  %v3473_v56 = vld [vmem:[#allocation18 + $0x88] sm:$0xf]  ;;  %v3665_v52 = vld [vmem:[#allocation18 + $0x4c] sm:$0xf0] }
 0x2a6   : > { %v3902_v24 = vpop.eup %3901  ;;  %v1494_v45 = vadd.f32 %v5040_v54, %v1493_v58  ;;  %1954 = vmatpush.bf16.msrb.mxu3 %v3286_v36  ;;  %v3497_v58 = vld [vmem:[#allocation18 + $0xc0] sm:$0xf]  ;;  %v3671_v36 = vld [vmem:[#allocation18 + $0x84] sm:$0xf] }
 0x2a7   : > { %v3904_v63 = vpop.eup %3903  ;;  %v1513_v5 = vadd.f32 %v5042_v59, %v1512_v62  ;;  %v1530_v11 = vmul.f32 %v3902_v24, %v5038_v37  ;;  %vm1535_vm0 = vweird.f32 %v3902_v24  ;;  %v3513_v37 = vld [vmem:[#allocation18 + $0xe0] sm:$0xf]  ;;  %v5102_v22 = vor.u32 %v3681_v15, %v3497_v58  ;;  %v3505_v62 = vld [vmem:[#allocation18 + $0xc8] sm:$0xf] }
 0x2a8   : > { %v1498_v44 = vsel %vm1497_vm13, %v5040_v54, %v1494_v45  ;;  %vm1536_vm2 = vmor %vm1534_vm1, %vm1535_vm0  ;;  %v5088_v39 = vor.u32 %v3685_v20, %v3513_v37  ;;  %v5106_v42 = vor.u32 %v3682_v3, %v3505_v62  ;;  %v3507_v45 = vld [vmem:[#allocation18 + $0xd8] sm:$0xf0]  ;;  %v3668_v62 = vld [vmem:[#allocation18 + $0x6c] sm:$0xf] }
 0x2a9   : > { %v1503_v25 = vsel %vm5051_vm8, %v1502_v1, %v1498_v44  ;;  %v1517_v26 = vsel %vm1516_vm14, %v5042_v59, %v1513_v5  ;;  %v1531_v30 = vsub.f32 1.0, %v1530_v11  ;;  %v1541_v59 = vor.u32 1.1754944e-38, %v1540_v60  ;;  %v3489_v1 = vld [vmem:[#allocation18 + $0xa8] sm:$0xf]  ;;  %v3678_v11 = vld [vmem:[#allocation18 + $0xb4] sm:$0xf0] }
 0x2aa   : > { %v1522_v38 = vsel %vm1519_vm15, %v1521_v0, %v1517_v26  ;;  %v1545_v43 = vmul.f32 %v3904_v63, %v1503_v25  ;;  %v3675_v63 = vld [vmem:[#allocation18 + $0xa4] sm:$0xf]  ;;  %v3483_v0 = vld [vmem:[#allocation18 + $0xb0] sm:$0xf0]  ;;  %v5118_v23 = vor.u32 %v3678_v11, %v3489_v1  ;;  %v5120_v25 = vor.u32 %v3676_v12, %v3491_v13  ;;  %v3465_v26 = vld [vmem:[#allocation18 + $0x80] sm:$0xf] }
 0x2ab   : > { %v1544_v41 = vmul.f32 %v1522_v38, %v5020_v61  ;;  %v1532_v50 = vmul.f32 %v3902_v24, %v1531_v30  ;;  %v5115_v5 = vor.u32 %v3675_v63, %v3483_v0  ;;  %v3673_v30 = vld [vmem:[#allocation18 + $0x8c] sm:$0xf0]  ;;  %v5534_v38 = vld [vmem:[#allocation44_spill] sm:$0xff]  ;;  %v3459_v3 = vld [vmem:[#allocation18 + $0x78] sm:$0xf0]  ;;  %v5163_v11 = vor.u32 %v3665_v52, %v3433_v51 }
 0x2ac   : > { %v3467_v60 = vld [vmem:[#allocation18 + $0x90] sm:$0xf0]  ;;  %v5535_v0 = vld [vmem:[#allocation43_spill] sm:$0xff]  ;;  %v3663_v12 = vld [vmem:[#allocation18 + $0x44] sm:$0xf] }
 0x2ad   : > { %v5076_v54 = vadd.f32 %v1545_v43, %v1544_v41  ;;  %v1533_v55 = vadd.f32 %v3902_v24, %v1532_v50  ;;  %v3435_v13 = vld [vmem:[#allocation18 + $0x50] sm:$0xf0]  ;;  %v3657_v51 = vld [vmem:[#allocation18 + $0xc] sm:$0xf0] }
 0x2af   : > { %3905 = vtanh.f32 %v5076_v54  ;;  %v1537_v6 = vsel %vm1536_vm2, %v3902_v24, %v1533_v55  ;;  %v3680_v24 = vld [vmem:[#allocation18 + $0xcc] sm:$0xf]  ;;  %v5124_v55 = vor.u32 %v3673_v30, %v3465_v26 }
 0x2b0   : > { %v1542_v7 = vsel %vm1539_vm3, %v1541_v59, %v1537_v6  ;;  %v5111_v53 = vor.u32 %v3680_v24, %v3507_v45  ;;  %v3674_v6 = vld [vmem:[#allocation18 + $0x94] sm:$0xf0]  ;;  %v5128_v59 = vor.u32 %v3671_v36, %v3467_v60  ;;  %v5156_v45 = vor.u32 %v3668_v62, %v3459_v3  ;;  %v3664_v36 = vld [vmem:[#allocation18 + $0x4c] sm:$0xf]  ;;  %v3427_v3 = vld [vmem:[#allocation18 + $0x38] sm:$0xf0] }
 0x2b5   : > { %v3906_v61 = vpop.eup %3905 }
 0x2b6   : > { %v5082_v8 = vmul.f32 %v3906_v61, %v1542_v7  ;;  %v5130_v61 = vor.u32 %v3674_v6, %v3473_v56  ;;  %v3672_v7 = vld [vmem:[#allocation18 + $0x8c] sm:$0xf]  ;;  %v5176_v56 = vor.u32 %v3663_v12, %v3435_v13  ;;  %v3403_v12 = vld [vmem:[#allocation18 + $0x10] sm:$0xf0]  ;;  %v3409_v13 = vld [vmem:[#allocation18 + $0x8] sm:$0xf] }
 0x2b8   : > { %v1558_v14 = vpack.c.bf16 %v5082_v8, %v5082_v8 }
 0x2ba   : > { %1567 = vmatmul.bf16.vlgmr.msra.gmra.mxu0 %v1558_v14  ;;  %1580 = vmatmul.bf16.vlgmr.msra.gmra.mxu1 %v1558_v14 }
 0x2bb   : > { %1593 = vmatmul.bf16.vlgmr.msra.gmra.mxu2 %v1558_v14  ;;  %1606 = vmatmul.bf16.vlgmr.msra.gmra.mxu3 %v1558_v14  ;;  %v3475_v14 = vld [vmem:[#allocation18 + $0x98] sm:$0xf0] }
 0x2bc   : > { %2183 = vmatpush.bf16.msra.mxu0 %v5088_v39  ;;  %2196 = vmatpush.bf16.msra.mxu1 %v5090_v29  ;;  %v5133_v20 = vor.u32 %v3672_v7, %v3475_v14  ;;  %v3661_v14 = vld [vmem:[#allocation18 + $0x2c] sm:$0xf0] }
 0x2bd   : > { %2209 = vmatpush.bf16.msra.mxu2 %v5092_v40  ;;  %2222 = vmatpush.bf16.msra.mxu3 %v5095_v28 }
 0x2c0   : > { %2184 = vmatpush.bf16.msra.mxu0 %v5102_v22  ;;  %2197 = vmatpush.bf16.msra.mxu1 %v5104_v4 }
 0x2c1   : > { %2210 = vmatpush.bf16.msra.mxu2 %v5106_v42  ;;  %2223 = vmatpush.bf16.msra.mxu3 %v5111_v53 }
 0x2c4   : > { %2185 = vmatpush.bf16.msra.mxu0 %v5113_v57  ;;  %2198 = vmatpush.bf16.msra.mxu1 %v5115_v5 }
 0x2c5   : > { %2211 = vmatpush.bf16.msra.mxu2 %v5118_v23  ;;  %2224 = vmatpush.bf16.msra.mxu3 %v5120_v25 }
 0x2c8   : > { %2186 = vmatpush.bf16.msra.mxu0 %v5124_v55  ;;  %2199 = vmatpush.bf16.msra.mxu1 %v5128_v59 }
 0x2c9   : > { %2212 = vmatpush.bf16.msra.mxu2 %v5130_v61  ;;  %2225 = vmatpush.bf16.msra.mxu3 %v5133_v20 }
 0x2ca   : > { %1898 = vmatmul.bf16.vlgmr.msrb.gmra.mxu0 %v1686_v19  ;;  %1917 = vmatmul.bf16.vlgmr.msrb.gmra.mxu1 %v1686_v19 }
 0x2cb   : > { %1936 = vmatmul.bf16.vlgmr.msrb.gmra.mxu2 %v1686_v19  ;;  %1955 = vmatmul.bf16.vlgmr.msrb.gmra.mxu3 %v1686_v19 }
 0x2cd   : > { %2226 = vmatpush.bf16.msra.mxu3 %v5156_v45 }
 0x337   : > { %v1568_v16 = vpop.f32.mrf.mxu0  ;;  %v1581_v31 = vpop.f32.mrf.mxu1 }
 0x338   : > { %v1611_v33 = vadd.f32 %v1568_v16, %v5532_v21  ;;  %v1612_v48 = vadd.f32 %v1581_v31, %v5533_v35  ;;  %v3669_v31 = vld [vmem:[#allocation18 + $0x6c] sm:$0xf0]  ;;  %v3667_v21 = vld [vmem:[#allocation18 + $0x64] sm:$0xf]  ;;  %v3451_v35 = vld [vmem:[#allocation18 + $0x70] sm:$0xf0] }
 0x339   : > { %v5147_v15 = vor.u32 %v3669_v31, %v3449_v18  ;;  %v5149_v2 = vor.u32 %v3667_v21, %v3451_v35  ;;  %v3660_v35 = vld [vmem:[#allocation18 + $0x2c] sm:$0xf] }
 0x33a   : > { %v3268_v47 = vmul.f32 -1.442695, %v1611_v33  ;;  %v3269_v10 = vmul.f32 -1.442695, %v1612_v48  ;;  %v3457_v48 = vld [vmem:[#allocation18 + $0x68] sm:$0xf] }
 0x33b   : > { %v5154_v24 = vor.u32 %v3670_v27, %v3457_v48  ;;  %2187 = vmatpush.bf16.msra.mxu0 %v5147_v15  ;;  %2200 = vmatpush.bf16.msra.mxu1 %v5149_v2 }
 0x33c   : > { %3907 = vpow2.f32 %v3268_v47 }
 0x33d   : > { %3909 = vpow2.f32 %v3269_v10  ;;  %2213 = vmatpush.bf16.msra.mxu2 %v5154_v24 }
 0x33e   : > { %v1594_v44 = vpop.f32.mrf.mxu2  ;;  %v1607_v17 = vpop.f32.mrf.mxu3 }
 0x33f   : > { %v1614_v43 = vadd.f32 %v1607_v17, %v5534_v38  ;;  %v1570_v41 = vpop.f32.mrf.mxu0  ;;  %v1583_v50 = vpop.f32.mrf.mxu1  ;;  %v1613_v1 = vadd.f32 %v1594_v44, %v5535_v0  ;;  %v3441_v17 = vld [vmem:[#allocation18 + $0x48] sm:$0xf]  ;;  %v3666_v44 = vld [vmem:[#allocation18 + $0x54] sm:$0xf0]  ;;  %v3443_v38 = vld [vmem:[#allocation18 + $0x58] sm:$0xf0]  ;;  %2188 = vmatpush.bf16.msra.mxu0 %v5163_v11  ;;  %2201 = vmatpush.bf16.msra.mxu1 %v5176_v56  ;;  %v5207_v0 = vor.u32 %v3660_v35, %v3427_v3 }
 0x340   : > { %v3417_v50 = vld [vmem:[#allocation18 + $0x20] sm:$0xf]  ;;  %v5178_v6 = vor.u32 %v3666_v44, %v3441_v17  ;;  %v5180_v7 = vor.u32 %v3664_v36, %v3443_v38  ;;  %v3658_v36 = vld [vmem:[#allocation18 + $0x14] sm:$0xf0]  ;;  %v3656_v38 = vld [vmem:[#allocation18 + $0xc] sm:$0xf] }
 0x341   : > { %v3270_v19 = vmul.f32 -1.442695, %v1614_v43 }
 0x342   : > { %v3908_v37 = vpop.eup %3907  ;;  %2214 = vmatpush.bf16.msra.mxu2 %v5178_v6  ;;  %2227 = vmatpush.bf16.msra.mxu3 %v5180_v7 }
 0x343   : > { %v3910_v34 = vpop.eup %3909  ;;  %v5135_v49 = vadd.f32 1.0, %v3908_v37  ;;  %3911 = vpow2.f32 %v3270_v19  ;;  %v3659_v19 = vld [vmem:[#allocation18 + $0x24] sm:$0xf] }
 0x344   : > { %v5138_v46 = vadd.f32 1.0, %v3910_v34 }
 0x345   : > { %3913 = vrcp.f32 %v5135_v49  ;;  %v1628_v16 = vand.u32 2147483647, %v5135_v49  ;;  %v1630_v33 = vand.u32 2147483648, %v5135_v49  ;;  %vm1624_vm5 = vweird.f32 %v5135_v49 }
 0x346   : > { %3915 = vrcp.f32 %v5138_v46  ;;  %v1596_v32 = vpop.f32.mrf.mxu2  ;;  %v1609_v9 = vpop.f32.mrf.mxu3  ;;  %v1649_v47 = vand.u32 2147483648, %v5138_v46  ;;  %v1647_v41 = vand.u32 2147483647, %v5138_v46  ;;  %vm1643_vm9 = vweird.f32 %v5138_v46  ;;  %2228 = vmatpush.bf16.msra.mxu3 %v5207_v0 }
 0x347   : > { %vm5183_vm6 = vcmp.eq.f32.partialorder %v1628_v16, 8.507059e+37  ;;  %v3419_v32 = vld [vmem:[#allocation18 + $0x30] sm:$0xf0]  ;;  %v3425_v9 = vld [vmem:[#allocation18 + $0x28] sm:$0xf] }
 0x348   : > { %v1650_v18 = vor.u32 1.1754944e-38, %v1649_v47  ;;  %v3662_v16 = vld [vmem:[#allocation18 + $0x34] sm:$0xf0]  ;;  %v5202_v27 = vor.u32 %v3659_v19, %v3419_v32  ;;  %v3401_v47 = vld [vmem:[#allocation18] sm:$0xf]  ;;  %vm1648_vm11 = vcmp.eq.f32.partialorder %v1647_v41, 8.507059e+37 }
 0x349   : > { %v3912_v58 = vpop.eup %3911  ;;  %v5204_v62 = vor.u32 %v3662_v16, %v3425_v9  ;;  %v5213_v44 = vor.u32 %v3657_v51, %v3401_v47  ;;  %v1899_v51 = vpop.f32.mrf.mxu0 }
 0x34a   : > { %v5152_v10 = vadd.f32 1.0, %v3912_v58  ;;  %v5200_v58 = vor.u32 %v3661_v14, %v3417_v50  ;;  %2202 = vmatpush.bf16.msra.mxu1 %v5202_v27 }
 0x34b   : > { %v5158_v63 = vpop.eup %3913  ;;  %2215 = vmatpush.bf16.msra.mxu2 %v5204_v62 }
 0x34c   : > { %v5165_v26 = vpop.eup %3915  ;;  %v1620_v30 = vmul.f32 %v5158_v63, %v5135_v49  ;;  %3917 = vrcp.f32 %v5152_v10  ;;  %vm1625_vm4 = vweird.f32 %v5158_v63  ;;  %v1631_v49 = vor.u32 1.1754944e-38, %v1630_v33  ;;  %2189 = vmatpush.bf16.msra.mxu0 %v5200_v58 }
 0x34d   : > { %v1639_v43 = vmul.f32 %v5165_v26, %v5138_v46  ;;  %3919 = vtanh.f32 %v1613_v1  ;;  %vm1644_vm7 = vweird.f32 %v5165_v26  ;;  %vm5192_vm8 = vmor %vm1624_vm5, %vm1625_vm4  ;;  %v3655_v1 = vld [vmem:[#allocation18 + $0x4] sm:$0xf]  ;;  %vm1663_vm13 = vweird.f32 %v5152_v10 }
 0x34e   : > { %v1621_v60 = vsub.f32 1.0, %v1620_v30  ;;  %vm1645_vm10 = vmor %vm1643_vm9, %vm1644_vm7  ;;  %v5222_v46 = vor.u32 %v3655_v1, %v3403_v12  ;;  %v1956_v1 = vpop.f32.mrf.mxu3 }
 0x34f   : > { %v1640_v37 = vsub.f32 1.0, %v1639_v43  ;;  %v3411_v43 = vld [vmem:[#allocation18 + $0x18] sm:$0xf0] }
 0x350   : > { %v1622_v31 = vmul.f32 %v5158_v63, %v1621_v60  ;;  %v5224_v60 = vor.u32 %v3658_v36, %v3409_v13  ;;  %v5230_v9 = vor.u32 %v3656_v38, %v3411_v43  ;;  %2190 = vmatpush.bf16.msra.mxu0 %v5213_v44  ;;  %2203 = vmatpush.bf16.msra.mxu1 %v5222_v46 }
 0x351   : > { %v1641_v48 = vmul.f32 %v5165_v26, %v1640_v37  ;;  %v5305_v12 = vpop.f32.mrf.mxu0 }
 0x352   : > { %v3918_v33 = vpop.eup %3917  ;;  %v1623_v52 = vadd.f32 %v5158_v63, %v1622_v31  ;;  %2216 = vmatpush.bf16.msra.mxu2 %v5224_v60  ;;  %2229 = vmatpush.bf16.msra.mxu3 %v5230_v9 }
 0x353   : > { %v1642_v17 = vadd.f32 %v5165_v26, %v1641_v48  ;;  %v1659_v30 = vmul.f32 %v3918_v33, %v5152_v10  ;;  %v3920_v14 = vpop.eup %3919  ;;  %vm1664_vm12 = vweird.f32 %v3918_v33 }
 0x354   : > { %v1627_v50 = vsel %vm5192_vm8, %v5158_v63, %v1623_v52  ;;  %2308 = vmatpush.bf16.msrb.mxu0 %v5088_v39  ;;  %2321 = vmatpush.bf16.msrb.mxu1 %v5090_v29  ;;  %vm1665_vm14 = vmor %vm1663_vm13, %vm1664_vm12  ;;  %v1937_v52 = vpop.f32.mrf.mxu2 }
 0x355   : > { %v1632_v19 = vsel %vm5183_vm6, %v1631_v49, %v1627_v50  ;;  %v1646_v37 = vsel %vm1645_vm10, %v5165_v26, %v1642_v17  ;;  %v1660_v32 = vsub.f32 1.0, %v1659_v30 }
 0x356   : > { %v1651_v63 = vsel %vm1648_vm11, %v1650_v18, %v1646_v37  ;;  %v1674_v41 = vmul.f32 %v3920_v14, %v1632_v19  ;;  %2334 = vmatpush.bf16.msrb.mxu2 %v5092_v40  ;;  %2347 = vmatpush.bf16.msrb.mxu3 %v5095_v28  ;;  %v1667_v18 = vand.u32 2147483647, %v5152_v10  ;;  %v5311_v30 = vpop.f32.mrf.mxu3  ;;  %v1720_v14 = vld [vmem:[#allocation20] sm:$0xf] }
 0x357   : > { %v1673_v31 = vmul.f32 %v1651_v63, %v5076_v54  ;;  %v1661_v21 = vmul.f32 %v3918_v33, %v1660_v32  ;;  %v1669_v54 = vand.u32 2147483648, %v5152_v10  ;;  %v5325_v32 = vperm.slane %v1720_v14, 0 }
 0x358   : > { %2309 = vmatpush.bf16.msrb.mxu0 %v5102_v22  ;;  %2322 = vmatpush.bf16.msrb.mxu1 %v5104_v4  ;;  %vm1668_vm15 = vcmp.eq.f32.partialorder %v1667_v18, 8.507059e+37  ;;  %v5327_v63 = vperm.slane %v1720_v14, 1 }
 0x359   : > { %v1675_v34 = vadd.f32 %v1674_v41, %v1673_v31  ;;  %v1662_v26 = vadd.f32 %v3918_v33, %v1661_v21  ;;  %v1670_v16 = vor.u32 1.1754944e-38, %v1669_v54  ;;  %v1900_v41 = vadd.f32 %v1899_v51, %v5325_v32 }
 0x35a   : > { %2335 = vmatpush.bf16.msrb.mxu2 %v5106_v42  ;;  %2348 = vmatpush.bf16.msrb.mxu3 %v5111_v53 }
 0x35b   : > { %3921 = vtanh.f32 %v1675_v34  ;;  %1681 = vst [vmem:[#allocation5 + $0x8] sm:$0xff] %v1675_v34  ;;  %v1666_v49 = vsel %vm1665_vm14, %v3918_v33, %v1662_v26  ;;  %v1918_v33 = vpop.f32.mrf.mxu1 }
 0x35c   : > { %v1671_v48 = vsel %vm1668_vm15, %v1670_v16, %v1666_v49  ;;  %2310 = vmatpush.bf16.msrb.mxu0 %v5113_v57  ;;  %2323 = vmatpush.bf16.msrb.mxu1 %v5115_v5  ;;  %v5309_v17 = vpop.f32.mrf.mxu2  ;;  %v1919_v31 = vadd.f32 %v1918_v33, %v5327_v63  ;;  %v5335_v16 = vperm.slane %v1720_v14, 3 }
 0x35d   : > { %5540 = vst [vmem:[#allocation40_spill] sm:$0xff] %v5309_v17 }
 0x35e   : > { %2336 = vmatpush.bf16.msrb.mxu2 %v5118_v23  ;;  %2349 = vmatpush.bf16.msrb.mxu3 %v5120_v25 }
 0x360   : > { %2311 = vmatpush.bf16.msrb.mxu0 %v5124_v55  ;;  %2324 = vmatpush.bf16.msrb.mxu1 %v5128_v59 }
 0x361   : > { %v3922_v35 = vpop.eup %3921 }
 0x362   : > { %v1677_v3 = vmul.f32 %v3922_v35, %v1671_v48  ;;  %2337 = vmatpush.bf16.msrb.mxu2 %v5130_v61  ;;  %2350 = vmatpush.bf16.msrb.mxu3 %v5133_v20 }
 0x363   : > { %v5307_v13 = vpop.f32.mrf.mxu1 }
 0x364   : > { %1680 = vst [vmem:[#allocation4] sm:$0xff] %v1677_v3  ;;  %v1687_v10 = vpack.c.bf16 %v1677_v3, %v5082_v8  ;;  %2312 = vmatpush.bf16.msrb.mxu0 %v5147_v15  ;;  %2325 = vmatpush.bf16.msrb.mxu1 %v5149_v2  ;;  %v2015_v8 = vld [vmem:[#allocation4 + $0x8] sm:$0xff]  ;;  %v1957_v3 = vadd.f32 %v1956_v1, %v5335_v16 }
 0x365   : > { %v2022_v47 = vpack.c.bf16 %v2015_v8, %v2015_v8 }
 0x366   : > { %1903 = vmatmul.bf16.gmra.mxu0 %v1687_v10  ;;  %1922 = vmatmul.bf16.gmra.mxu1 %v1687_v10 }
 0x367   : > { %1941 = vmatmul.bf16.gmra.mxu2 %v1687_v10  ;;  %1960 = vmatmul.bf16.gmra.mxu3 %v1687_v10 }
 0x368   : > { %2338 = vmatpush.bf16.msrb.mxu2 %v5154_v24  ;;  %2351 = vmatpush.bf16.msrb.mxu3 %v5156_v45 }
 0x369   : > { %2313 = vmatpush.bf16.msrb.mxu0 %v5163_v11  ;;  %2326 = vmatpush.bf16.msrb.mxu1 %v5176_v56 }
 0x36c   : > { %2339 = vmatpush.bf16.msrb.mxu2 %v5178_v6  ;;  %2352 = vmatpush.bf16.msrb.mxu3 %v5180_v7 }
 0x36d   : > { %2314 = vmatpush.bf16.msrb.mxu0 %v5200_v58  ;;  %2327 = vmatpush.bf16.msrb.mxu1 %v5202_v27 }
 0x370   : > { %2340 = vmatpush.bf16.msrb.mxu2 %v5204_v62  ;;  %2353 = vmatpush.bf16.msrb.mxu3 %v5207_v0 }
 0x371   : > { %2315 = vmatpush.bf16.msrb.mxu0 %v5213_v44  ;;  %2328 = vmatpush.bf16.msrb.mxu1 %v5222_v46 }
 0x374   : > { %2341 = vmatpush.bf16.msrb.mxu2 %v5224_v60  ;;  %2354 = vmatpush.bf16.msrb.mxu3 %v5230_v9 }
 0x376   : > { %2191 = vmatmul.bf16.vlgmr.msra.gmra.mxu0 %v2022_v47  ;;  %2204 = vmatmul.bf16.vlgmr.msra.gmra.mxu1 %v2022_v47 }
 0x377   : > { %2217 = vmatmul.bf16.vlgmr.msra.gmra.mxu2 %v2022_v47  ;;  %2230 = vmatmul.bf16.vlgmr.msra.gmra.mxu3 %v2022_v47 }
 0x378   : > { %2434 = vmatpush.bf16.msra.mxu0 %v5088_v39  ;;  %2447 = vmatpush.bf16.msra.mxu1 %v5090_v29 }
 0x379   : > { %2460 = vmatpush.bf16.msra.mxu2 %v5092_v40  ;;  %2473 = vmatpush.bf16.msra.mxu3 %v5095_v28 }
 0x37c   : > { %2435 = vmatpush.bf16.msra.mxu0 %v5102_v22  ;;  %2448 = vmatpush.bf16.msra.mxu1 %v5104_v4 }
 0x37d   : > { %2461 = vmatpush.bf16.msra.mxu2 %v5106_v42  ;;  %2474 = vmatpush.bf16.msra.mxu3 %v5111_v53 }
 0x380   : > { %2436 = vmatpush.bf16.msra.mxu0 %v5113_v57  ;;  %2449 = vmatpush.bf16.msra.mxu1 %v5115_v5 }
 0x381   : > { %2462 = vmatpush.bf16.msra.mxu2 %v5118_v23  ;;  %2475 = vmatpush.bf16.msra.mxu3 %v5120_v25 }
 0x384   : > { %2437 = vmatpush.bf16.msra.mxu0 %v5124_v55  ;;  %2450 = vmatpush.bf16.msra.mxu1 %v5128_v59 }
 0x385   : > { %2463 = vmatpush.bf16.msra.mxu2 %v5130_v61  ;;  %2476 = vmatpush.bf16.msra.mxu3 %v5133_v20 }
 0x388   : > { %2438 = vmatpush.bf16.msra.mxu0 %v5147_v15  ;;  %2451 = vmatpush.bf16.msra.mxu1 %v5149_v2 }
 0x389   : > { %2464 = vmatpush.bf16.msra.mxu2 %v5154_v24  ;;  %2477 = vmatpush.bf16.msra.mxu3 %v5156_v45 }
 0x38c   : > { %2439 = vmatpush.bf16.msra.mxu0 %v5163_v11  ;;  %2452 = vmatpush.bf16.msra.mxu1 %v5176_v56 }
 0x38d   : > { %2465 = vmatpush.bf16.msra.mxu2 %v5178_v6  ;;  %2478 = vmatpush.bf16.msra.mxu3 %v5180_v7 }
 0x390   : > { %2440 = vmatpush.bf16.msra.mxu0 %v5200_v58  ;;  %2453 = vmatpush.bf16.msra.mxu1 %v5202_v27 }
 0x391   : > { %2466 = vmatpush.bf16.msra.mxu2 %v5204_v62  ;;  %2479 = vmatpush.bf16.msra.mxu3 %v5207_v0 }
 0x394   : > { %2441 = vmatpush.bf16.msra.mxu0 %v5213_v44  ;;  %2454 = vmatpush.bf16.msra.mxu1 %v5222_v46 }
 0x395   : > { %2467 = vmatpush.bf16.msra.mxu2 %v5224_v60  ;;  %2480 = vmatpush.bf16.msra.mxu3 %v5230_v9 }
 0x3e3   : > { %v5313_v36 = vpop.f32.mrf.mxu0  ;;  %v5315_v38 = vpop.f32.mrf.mxu1 }
 0x3e4   : > { %5541 = vst [vmem:[#allocation39_spill] sm:$0xff] %v5313_v36 }
 0x3e5   : > { %5542 = vst [vmem:[#allocation41_spill] sm:$0xff] %v5315_v38 }
 0x3ea   : > { %v5317_v43 = vpop.f32.mrf.mxu2  ;;  %v5319_v50 = vpop.f32.mrf.mxu3 }
 0x3eb   : > { %5543 = vst [vmem:[#allocation42_spill] sm:$0xff] %v5317_v43  ;;  %v5321_v19 = vpop.f32.mrf.mxu0  ;;  %v5323_v37 = vpop.f32.mrf.mxu1 }
 0x3ec   : > { %5544 = vst [vmem:[#allocation44_spill] sm:$0xff] %v5319_v50 }
 0x3ed   : > { %5545 = vst [vmem:[#allocation43_spill] sm:$0xff] %v5321_v19 }
 0x3ee   : > { %5546 = vst [vmem:[#allocation45_spill] sm:$0xff] %v5323_v37 }
 0x3f2   : > { %v5331_v21 = vpop.f32.mrf.mxu2  ;;  %v5333_v34 = vpop.f32.mrf.mxu3 }
 0x3f3   : > { %5547 = vst [vmem:[#allocation46_spill] sm:$0xff] %v5331_v21  ;;  %v2192_v26 = vpop.f32.mrf.mxu0  ;;  %v2205_v54 = vpop.f32.mrf.mxu1 }
 0x3f4   : > { %5548 = vst [vmem:[#allocation47_spill] sm:$0xff] %v5333_v34  ;;  %v2235_v18 = vadd.f32 %v2192_v26, %v1900_v41  ;;  %v2236_v49 = vadd.f32 %v2205_v54, %v1919_v31  ;;  %v5338_v31 = vperm.slane %v1720_v14, 2 }
 0x3f6   : > { %v3527_v35 = vmul.f32 -1.442695, %v2235_v18  ;;  %v3528_v48 = vmul.f32 -1.442695, %v2236_v49  ;;  %5549 = vst [vmem:[#allocation48_spill] sm:$0xff] %v5338_v31  ;;  %v1938_v1 = vadd.f32 %v1937_v52, %v5338_v31 }
 0x3f8   : > { %3923 = vpow2.f32 %v3527_v35 }
 0x3f9   : > { %3925 = vpow2.f32 %v3528_v48 }
 0x3fa   : > { %v2218_v10 = vpop.f32.mrf.mxu2  ;;  %v2231_v8 = vpop.f32.mrf.mxu3 }
 0x3fb   : > { %v2238_v47 = vadd.f32 %v2231_v8, %v1957_v3  ;;  %v2194_v51 = vpop.f32.mrf.mxu0  ;;  %v2207_v33 = vpop.f32.mrf.mxu1  ;;  %v2237_v48 = vadd.f32 %v2218_v10, %v1938_v1 }
 0x3fd   : > { %v3529_v21 = vmul.f32 -1.442695, %v2238_v47 }
 0x3fe   : > { %v3924_v37 = vpop.eup %3923 }
 0x3ff   : > { %v3926_v34 = vpop.eup %3925  ;;  %v2242_v19 = vadd.f32 1.0, %v3924_v37  ;;  %3927 = vpow2.f32 %v3529_v21 }
 0x400   : > { %v2261_v41 = vadd.f32 1.0, %v3926_v34 }
 0x401   : > { %3929 = vrcp.f32 %v2242_v19  ;;  %v2254_v21 = vand.u32 2147483648, %v2242_v19  ;;  %v2252_v33 = vand.u32 2147483647, %v2242_v19  ;;  %vm2248_vm2 = vweird.f32 %v2242_v19 }
 0x402   : > { %3931 = vrcp.f32 %v2261_v41  ;;  %v2233_v26 = vpop.f32.mrf.mxu3  ;;  %v2220_v54 = vpop.f32.mrf.mxu2  ;;  %v2273_v14 = vand.u32 2147483648, %v2261_v41  ;;  %vm2267_vm3 = vweird.f32 %v2261_v41 }
 0x403   : > { %v2271_v54 = vand.u32 2147483647, %v2261_v41  ;;  %v2255_v10 = vor.u32 1.1754944e-38, %v2254_v21  ;;  %vm2253_vm6 = vcmp.eq.f32.partialorder %v2252_v33, 8.507059e+37 }
 0x405   : > { %v3928_v18 = vpop.eup %3927  ;;  %vm2272_vm7 = vcmp.eq.f32.partialorder %v2271_v54, 8.507059e+37 }
 0x406   : > { %v2281_v49 = vadd.f32 1.0, %v3928_v18 }
 0x407   : > { %v3930_v35 = vpop.eup %3929 }
 0x408   : > { %v3932_v3 = vpop.eup %3931  ;;  %v2244_v8 = vmul.f32 %v3930_v35, %v2242_v19  ;;  %3933 = vrcp.f32 %v2281_v49  ;;  %vm2249_vm0 = vweird.f32 %v3930_v35  ;;  %vm2287_vm9 = vweird.f32 %v2281_v49 }
 0x409   : > { %v2263_v47 = vmul.f32 %v3932_v3, %v2261_v41  ;;  %3935 = vtanh.f32 %v2237_v48  ;;  %vm2268_vm1 = vweird.f32 %v3932_v3  ;;  %vm2250_vm4 = vmor %vm2248_vm2, %vm2249_vm0 }
 0x40a   : > { %v2245_v51 = vsub.f32 1.0, %v2244_v8  ;;  %vm2269_vm5 = vmor %vm2267_vm3, %vm2268_vm1  ;;  %v2274_v8 = vor.u32 1.1754944e-38, %v2273_v14  ;;  %v2293_v14 = vand.u32 2147483648, %v2281_v49 }
 0x40b   : > { %v2264_v37 = vsub.f32 1.0, %v2263_v47  ;;  %v2017_v47 = vld [vmem:[#allocation5] sm:$0xff] }
 0x40c   : > { %v2246_v34 = vmul.f32 %v3930_v35, %v2245_v51 }
 0x40d   : > { %v2265_v26 = vmul.f32 %v3932_v3, %v2264_v37 }
 0x40e   : > { %v3934_v43 = vpop.eup %3933  ;;  %v2247_v52 = vadd.f32 %v3930_v35, %v2246_v34 }
 0x40f   : > { %v2266_v18 = vadd.f32 %v3932_v3, %v2265_v26  ;;  %v2283_v1 = vmul.f32 %v3934_v43, %v2281_v49  ;;  %v3936_v48 = vpop.eup %3935  ;;  %vm2288_vm8 = vweird.f32 %v3934_v43 }
 0x410   : > { %v2251_v50 = vsel %vm2250_vm4, %v3930_v35, %v2247_v52  ;;  %v2291_v35 = vand.u32 2147483647, %v2281_v49  ;;  %vm2289_vm10 = vmor %vm2287_vm9, %vm2288_vm8 }
 0x411   : > { %v2256_v51 = vsel %vm2253_vm6, %v2255_v10, %v2251_v50  ;;  %v2270_v38 = vsel %vm2269_vm5, %v3932_v3, %v2266_v18  ;;  %v2284_v37 = vsub.f32 1.0, %v2283_v1  ;;  %v2294_v50 = vor.u32 1.1754944e-38, %v2293_v14 }
 0x412   : > { %v2275_v36 = vsel %vm2272_vm7, %v2274_v8, %v2270_v38  ;;  %v2298_v17 = vmul.f32 %v3936_v48, %v2256_v51  ;;  %vm2292_vm11 = vcmp.eq.f32.partialorder %v2291_v35, 8.507059e+37 }
 0x413   : > { %v2297_v31 = vmul.f32 %v2275_v36, %v2017_v47  ;;  %v2285_v19 = vmul.f32 %v3934_v43, %v2284_v37 }
 0x415   : > { %v5341_v41 = vadd.f32 %v2298_v17, %v2297_v31  ;;  %v2286_v21 = vadd.f32 %v3934_v43, %v2285_v19 }
 0x417   : > { %3937 = vtanh.f32 %v5341_v41  ;;  %v2290_v34 = vsel %vm2289_vm10, %v3934_v43, %v2286_v21 }
 0x418   : > { %v2295_v33 = vsel %vm2292_vm11, %v2294_v50, %v2290_v34 }
 0x41d   : > { %v3938_v3 = vpop.eup %3937 }
 0x41e   : > { %v2301_v38 = vmul.f32 %v3938_v3, %v2295_v33 }
 0x420   : > { %2302 = vst [vmem:[%s4783_s17] sm:$0xff] %v2301_v38  ;;  %v2307_v36 = vpack.c.bf16 %v2301_v38, %v2301_v38 }
 0x422   : > { %2316 = vmatmul.bf16.vlgmr.msrb.gmra.mxu0 %v2307_v36  ;;  %2329 = vmatmul.bf16.vlgmr.msrb.gmra.mxu1 %v2307_v36 }
 0x423   : > { %2342 = vmatmul.bf16.vlgmr.msrb.gmra.mxu2 %v2307_v36  ;;  %2355 = vmatmul.bf16.vlgmr.msrb.gmra.mxu3 %v2307_v36 }
 0x424   : > { %2560 = vmatpush.bf16.msrb.mxu0 %v5088_v39  ;;  %2573 = vmatpush.bf16.msrb.mxu1 %v5090_v29  ;;  %v1902_v39 = vadd.f32 %v5305_v12, %v5325_v32  ;;  %v1921_v29 = vadd.f32 %v5307_v13, %v5327_v63 }
 0x425   : > { %2586 = vmatpush.bf16.msrb.mxu2 %v5092_v40  ;;  %2599 = vmatpush.bf16.msrb.mxu3 %v5095_v28 }
 0x428   : > { %2561 = vmatpush.bf16.msrb.mxu0 %v5102_v22  ;;  %2574 = vmatpush.bf16.msrb.mxu1 %v5104_v4 }
 0x429   : > { %2587 = vmatpush.bf16.msrb.mxu2 %v5106_v42  ;;  %2600 = vmatpush.bf16.msrb.mxu3 %v5111_v53 }
 0x42c   : > { %2562 = vmatpush.bf16.msrb.mxu0 %v5113_v57  ;;  %2575 = vmatpush.bf16.msrb.mxu1 %v5115_v5  ;;  %v1959_v57 = vadd.f32 %v5311_v30, %v5335_v16 }
 0x42d   : > { %2588 = vmatpush.bf16.msrb.mxu2 %v5118_v23  ;;  %2601 = vmatpush.bf16.msrb.mxu3 %v5120_v25 }
 0x430   : > { %2563 = vmatpush.bf16.msrb.mxu0 %v5124_v55  ;;  %2576 = vmatpush.bf16.msrb.mxu1 %v5128_v59 }
 0x431   : > { %2589 = vmatpush.bf16.msrb.mxu2 %v5130_v61  ;;  %2602 = vmatpush.bf16.msrb.mxu3 %v5133_v20 }
 0x434   : > { %2564 = vmatpush.bf16.msrb.mxu0 %v5147_v15  ;;  %2577 = vmatpush.bf16.msrb.mxu1 %v5149_v2 }
 0x435   : > { %2590 = vmatpush.bf16.msrb.mxu2 %v5154_v24  ;;  %2603 = vmatpush.bf16.msrb.mxu3 %v5156_v45 }
 0x438   : > { %2565 = vmatpush.bf16.msrb.mxu0 %v5163_v11  ;;  %2578 = vmatpush.bf16.msrb.mxu1 %v5176_v56 }
 0x439   : > { %2591 = vmatpush.bf16.msrb.mxu2 %v5178_v6  ;;  %2604 = vmatpush.bf16.msrb.mxu3 %v5180_v7  ;;  %v5550_v6 = vld [vmem:[#allocation48_spill] sm:$0xff] }
 0x43a   : > { %v5551_v7 = vld [vmem:[#allocation40_spill] sm:$0xff] }
 0x43c   : > { %2566 = vmatpush.bf16.msrb.mxu0 %v5200_v58  ;;  %2579 = vmatpush.bf16.msrb.mxu1 %v5202_v27  ;;  %v1940_v58 = vadd.f32 %v5551_v7, %v5550_v6 }
 0x43d   : > { %2592 = vmatpush.bf16.msrb.mxu2 %v5204_v62  ;;  %2605 = vmatpush.bf16.msrb.mxu3 %v5207_v0 }
 0x440   : > { %2567 = vmatpush.bf16.msrb.mxu0 %v5213_v44  ;;  %2580 = vmatpush.bf16.msrb.mxu1 %v5222_v46 }
 0x441   : > { %2593 = vmatpush.bf16.msrb.mxu2 %v5224_v60  ;;  %2606 = vmatpush.bf16.msrb.mxu3 %v5230_v9 }
 0x49f   : > { %v2317_v40 = vpop.f32.mrf.mxu0  ;;  %v2330_v28 = vpop.f32.mrf.mxu1 }
 0x4a0   : > { %v2360_v22 = vadd.f32 %v2317_v40, %v1902_v39  ;;  %v2361_v4 = vadd.f32 %v2330_v28, %v1921_v29  ;;  %v5552_v28 = vld [vmem:[#allocation39_spill] sm:$0xff] }
 0x4a2   : > { %v3530_v42 = vmul.f32 -1.442695, %v2360_v22  ;;  %v3531_v53 = vmul.f32 -1.442695, %v2361_v4  ;;  %v1905_v22 = vadd.f32 %v5552_v28, %v5325_v32  ;;  %v5553_v4 = vld [vmem:[#allocation41_spill] sm:$0xff] }
 0x4a4   : > { %3939 = vpow2.f32 %v3530_v42  ;;  %v1924_v42 = vadd.f32 %v5553_v4, %v5327_v63 }
 0x4a5   : > { %3941 = vpow2.f32 %v3531_v53 }
 0x4a6   : > { %v2343_v5 = vpop.f32.mrf.mxu2  ;;  %v2356_v23 = vpop.f32.mrf.mxu3 }
 0x4a7   : > { %v2363_v25 = vadd.f32 %v2356_v23, %v1959_v57  ;;  %v2319_v55 = vpop.f32.mrf.mxu0  ;;  %v2332_v59 = vpop.f32.mrf.mxu1  ;;  %v2362_v0 = vadd.f32 %v2343_v5, %v1940_v58 }
 0x4a8   : > { %v5554_v59 = vld [vmem:[#allocation44_spill] sm:$0xff] }
 0x4a9   : > { %v3532_v61 = vmul.f32 -1.442695, %v2363_v25 }
 0x4aa   : > { %v3940_v20 = vpop.eup %3939 }
 0x4ab   : > { %v3942_v15 = vpop.eup %3941  ;;  %v2367_v2 = vadd.f32 1.0, %v3940_v20  ;;  %3943 = vpow2.f32 %v3532_v61  ;;  %v1962_v61 = vadd.f32 %v5554_v59, %v5335_v16 }
 0x4ac   : > { %v2386_v24 = vadd.f32 1.0, %v3942_v15 }
 0x4ad   : > { %3945 = vrcp.f32 %v2367_v2  ;;  %v2379_v13 = vand.u32 2147483648, %v2367_v2  ;;  %v2377_v43 = vand.u32 2147483647, %v2367_v2  ;;  %vm2373_vm14 = vweird.f32 %v2367_v2 }
 0x4ae   : > { %3947 = vrcp.f32 %v2386_v24  ;;  %v2345_v45 = vpop.f32.mrf.mxu2  ;;  %v2358_v11 = vpop.f32.mrf.mxu3  ;;  %v2398_v17 = vand.u32 2147483648, %v2386_v24  ;;  %v2396_v49 = vand.u32 2147483647, %v2386_v24  ;;  %vm2392_vm15 = vweird.f32 %v2386_v24 }
 0x4af   : > { %v2380_v52 = vor.u32 1.1754944e-38, %v2379_v13  ;;  %vm2378_vm2 = vcmp.eq.f32.partialorder %v2377_v43, 8.507059e+37 }
 0x4b0   : > { %v2399_v1 = vor.u32 1.1754944e-38, %v2398_v17  ;;  %vm2397_vm3 = vcmp.eq.f32.partialorder %v2396_v49, 8.507059e+37 }
 0x4b1   : > { %v3944_v56 = vpop.eup %3943 }
 0x4b2   : > { %v2406_v27 = vadd.f32 1.0, %v3944_v56 }
 0x4b3   : > { %v3946_v62 = vpop.eup %3945 }
 0x4b4   : > { %v3948_v44 = vpop.eup %3947  ;;  %v2369_v46 = vmul.f32 %v3946_v62, %v2367_v2  ;;  %3949 = vrcp.f32 %v2406_v27  ;;  %vm2374_vm12 = vweird.f32 %v3946_v62  ;;  %v2418_v3 = vand.u32 2147483648, %v2406_v27 }
 0x4b5   : > { %v2388_v60 = vmul.f32 %v3948_v44, %v2386_v24  ;;  %3951 = vtanh.f32 %v2362_v0  ;;  %vm2393_vm13 = vweird.f32 %v3948_v44  ;;  %vm2375_vm0 = vmor %vm2373_vm14, %vm2374_vm12  ;;  %vm2412_vm5 = vweird.f32 %v2406_v27 }
 0x4b6   : > { %v2370_v9 = vsub.f32 1.0, %v2369_v46  ;;  %vm2394_vm1 = vmor %vm2392_vm15, %vm2393_vm13  ;;  %v2416_v33 = vand.u32 2147483647, %v2406_v27  ;;  %v2419_v36 = vor.u32 1.1754944e-38, %v2418_v3  ;;  %v5555_v46 = vld [vmem:[#allocation42_spill] sm:$0xff] }
 0x4b7   : > { %v2389_v12 = vsub.f32 1.0, %v2388_v60  ;;  %v1943_v60 = vadd.f32 %v5555_v46, %v5550_v6 }
 0x4b8   : > { %v2371_v30 = vmul.f32 %v3946_v62, %v2370_v9  ;;  %vm2417_vm7 = vcmp.eq.f32.partialorder %v2416_v33, 8.507059e+37 }
 0x4b9   : > { %v2390_v31 = vmul.f32 %v3948_v44, %v2389_v12 }
 0x4ba   : > { %v3950_v26 = vpop.eup %3949  ;;  %v2372_v54 = vadd.f32 %v3946_v62, %v2371_v30 }
 0x4bb   : > { %v2391_v10 = vadd.f32 %v3948_v44, %v2390_v31  ;;  %v2408_v18 = vmul.f32 %v3950_v26, %v2406_v27  ;;  %v3952_v47 = vpop.eup %3951  ;;  %vm2413_vm4 = vweird.f32 %v3950_v26 }
 0x4bc   : > { %v2376_v8 = vsel %vm2375_vm0, %v3946_v62, %v2372_v54  ;;  %vm2414_vm6 = vmor %vm2412_vm5, %vm2413_vm4 }
 0x4bd   : > { %v2381_v48 = vsel %vm2378_vm2, %v2380_v52, %v2376_v8  ;;  %v2395_v51 = vsel %vm2394_vm1, %v3948_v44, %v2391_v10  ;;  %v2409_v37 = vsub.f32 1.0, %v2408_v18 }
 0x4be   : > { %v2400_v19 = vsel %vm2397_vm3, %v2399_v1, %v2395_v51  ;;  %v2423_v21 = vmul.f32 %v3952_v47, %v2381_v48 }
 0x4bf   : > { %v2422_v14 = vmul.f32 %v2400_v19, %v5341_v41  ;;  %v2410_v35 = vmul.f32 %v3950_v26, %v2409_v37 }
 0x4c1   : > { %v5386_v34 = vadd.f32 %v2423_v21, %v2422_v14  ;;  %v2411_v50 = vadd.f32 %v3950_v26, %v2410_v35 }
 0x4c3   : > { %3953 = vtanh.f32 %v5386_v34  ;;  %v2415_v38 = vsel %vm2414_vm6, %v3950_v26, %v2411_v50 }
 0x4c4   : > { %v2420_v29 = vsel %vm2417_vm7, %v2419_v36, %v2415_v38 }
 0x4c9   : > { %v3954_v39 = vpop.eup %3953 }
 0x4ca   : > { %v2426_v40 = vmul.f32 %v3954_v39, %v2420_v29 }
 0x4cc   : > { %3533 = vst [vmem:[%s4783_s17 + $0x8] sm:$0xff] %v2426_v40  ;;  %v2433_v41 = vpack.c.bf16 %v2426_v40, %v2426_v40 }
 0x4ce   : > { %2442 = vmatmul.bf16.vlgmr.msra.gmra.mxu0 %v2433_v41  ;;  %2455 = vmatmul.bf16.vlgmr.msra.gmra.mxu1 %v2433_v41 }
 0x4cf   : > { %2468 = vmatmul.bf16.vlgmr.msra.gmra.mxu2 %v2433_v41  ;;  %2481 = vmatmul.bf16.vlgmr.msra.gmra.mxu3 %v2433_v41 }
 0x54b   : > { %v2443_v53 = vpop.f32.mrf.mxu0  ;;  %v2456_v57 = vpop.f32.mrf.mxu1 }
 0x54c   : > { %v2486_v5 = vadd.f32 %v2443_v53, %v1905_v22  ;;  %v2487_v23 = vadd.f32 %v2456_v57, %v1924_v42 }
 0x54e   : > { %v3534_v25 = vmul.f32 -1.442695, %v2486_v5  ;;  %v3535_v55 = vmul.f32 -1.442695, %v2487_v23  ;;  %v5556_v5 = vld [vmem:[#allocation43_spill] sm:$0xff] }
 0x54f   : > { %v1907_v23 = vadd.f32 %v5556_v5, %v5325_v32 }
 0x550   : > { %3955 = vpow2.f32 %v3534_v25  ;;  %v5557_v25 = vld [vmem:[#allocation45_spill] sm:$0xff] }
 0x551   : > { %3957 = vpow2.f32 %v3535_v55  ;;  %v1926_v55 = vadd.f32 %v5557_v25, %v5327_v63 }
 0x552   : > { %v2469_v20 = vpop.f32.mrf.mxu2  ;;  %v2482_v15 = vpop.f32.mrf.mxu3 }
 0x553   : > { %v2489_v2 = vadd.f32 %v2482_v15, %v1962_v61  ;;  %v2445_v24 = vpop.f32.mrf.mxu0  ;;  %v2458_v45 = vpop.f32.mrf.mxu1  ;;  %v2488_v13 = vadd.f32 %v2469_v20, %v1943_v60 }
 0x554   : > { %v5558_v45 = vld [vmem:[#allocation47_spill] sm:$0xff] }
 0x555   : > { %v3536_v11 = vmul.f32 -1.442695, %v2489_v2 }
 0x556   : > { %v3956_v56 = vpop.eup %3955 }
 0x557   : > { %v3958_v7 = vpop.eup %3957  ;;  %v2493_v58 = vadd.f32 1.0, %v3956_v56  ;;  %3959 = vpow2.f32 %v3536_v11  ;;  %v1964_v11 = vadd.f32 %v5558_v45, %v5335_v16 }
 0x558   : > { %v2512_v27 = vadd.f32 1.0, %v3958_v7 }
 0x559   : > { %3961 = vrcp.f32 %v2493_v58  ;;  %v2505_v26 = vand.u32 2147483648, %v2493_v58  ;;  %v2503_v10 = vand.u32 2147483647, %v2493_v58  ;;  %vm2499_vm10 = vweird.f32 %v2493_v58 }
 0x55a   : > { %3963 = vrcp.f32 %v2512_v27  ;;  %v2471_v62 = vpop.f32.mrf.mxu2  ;;  %v2484_v0 = vpop.f32.mrf.mxu3  ;;  %v2524_v54 = vand.u32 2147483648, %v2512_v27  ;;  %v2522_v1 = vand.u32 2147483647, %v2512_v27  ;;  %vm2518_vm11 = vweird.f32 %v2512_v27 }
 0x55b   : > { %v2506_v48 = vor.u32 1.1754944e-38, %v2505_v26  ;;  %vm2504_vm14 = vcmp.eq.f32.partialorder %v2503_v10, 8.507059e+37 }
 0x55c   : > { %v2525_v19 = vor.u32 1.1754944e-38, %v2524_v54  ;;  %vm2523_vm15 = vcmp.eq.f32.partialorder %v2522_v1, 8.507059e+37 }
 0x55d   : > { %v3960_v44 = vpop.eup %3959 }
 0x55e   : > { %v2532_v9 = vadd.f32 1.0, %v3960_v44 }
 0x55f   : > { %v3962_v12 = vpop.eup %3961 }
 0x560   : > { %v3964_v17 = vpop.eup %3963  ;;  %v2495_v30 = vmul.f32 %v3962_v12, %v2493_v58  ;;  %3965 = vrcp.f32 %v2532_v9  ;;  %vm2500_vm8 = vweird.f32 %v3962_v12  ;;  %v2544_v41 = vand.u32 2147483648, %v2532_v9 }
 0x561   : > { %v2514_v43 = vmul.f32 %v3964_v17, %v2512_v27  ;;  %3967 = vtanh.f32 %v2488_v13  ;;  %vm2519_vm9 = vweird.f32 %v3964_v17  ;;  %vm2501_vm12 = vmor %vm2499_vm10, %vm2500_vm8  ;;  %vm2538_vm1 = vweird.f32 %v2532_v9  ;;  %v5559_v13 = vld [vmem:[#allocation46_spill] sm:$0xff] }
 0x562   : > { %v2496_v31 = vsub.f32 1.0, %v2495_v30  ;;  %vm2520_vm13 = vmor %vm2518_vm11, %vm2519_vm9  ;;  %v2542_v28 = vand.u32 2147483647, %v2532_v9  ;;  %v2545_v4 = vor.u32 1.1754944e-38, %v2544_v41  ;;  %v1945_v16 = vadd.f32 %v5559_v13, %v5550_v6 }
 0x563   : > { %v2515_v49 = vsub.f32 1.0, %v2514_v43 }
 0x564   : > { %v2497_v52 = vmul.f32 %v3962_v12, %v2496_v31  ;;  %vm2543_vm3 = vcmp.eq.f32.partialorder %v2542_v28, 8.507059e+37 }
 0x565   : > { %v2516_v18 = vmul.f32 %v3964_v17, %v2515_v49 }
 0x566   : > { %v3966_v8 = vpop.eup %3965  ;;  %v2498_v47 = vadd.f32 %v3962_v12, %v2497_v52 }
 0x567   : > { %v2517_v51 = vadd.f32 %v3964_v17, %v2516_v18  ;;  %v2534_v37 = vmul.f32 %v3966_v8, %v2532_v9  ;;  %v3968_v14 = vpop.eup %3967  ;;  %vm2539_vm0 = vweird.f32 %v3966_v8 }
 0x568   : > { %v2502_v21 = vsel %vm2501_vm12, %v3962_v12, %v2498_v47  ;;  %vm2540_vm2 = vmor %vm2538_vm1, %vm2539_vm0 }
 0x569   : > { %v2507_v35 = vsel %vm2504_vm14, %v2506_v48, %v2502_v21  ;;  %v2521_v50 = vsel %vm2520_vm13, %v3964_v17, %v2517_v51  ;;  %v2535_v3 = vsub.f32 1.0, %v2534_v37 }
 0x56a   : > { %v2526_v33 = vsel %vm2523_vm15, %v2525_v19, %v2521_v50  ;;  %v2549_v38 = vmul.f32 %v3968_v14, %v2507_v35 }
 0x56b   : > { %v2548_v36 = vmul.f32 %v2526_v33, %v5386_v34  ;;  %v2536_v39 = vmul.f32 %v3966_v8, %v2535_v3 }
 0x56d   : > { %v5399_v29 = vadd.f32 %v2549_v38, %v2548_v36  ;;  %v2537_v40 = vadd.f32 %v3966_v8, %v2536_v39 }
 0x56f   : > { %3969 = vtanh.f32 %v5399_v29  ;;  %v2541_v22 = vsel %vm2540_vm2, %v3966_v8, %v2537_v40 }
 0x570   : > { %v2546_v53 = vsel %vm2543_vm3, %v2545_v4, %v2541_v22 }
 0x575   : > { %v3970_v42 = vpop.eup %3969 }
 0x576   : > { %v2552_v57 = vmul.f32 %v3970_v42, %v2546_v53 }
 0x578   : > { %3537 = vst [vmem:[%s4783_s17 + $0x10] sm:$0xff] %v2552_v57  ;;  %v2559_v34 = vpack.c.bf16 %v2552_v57, %v2552_v57 }
 0x57a   : > { %2568 = vmatmul.bf16.vlgmr.msrb.gmra.mxu0 %v2559_v34  ;;  %2581 = vmatmul.bf16.vlgmr.msrb.gmra.mxu1 %v2559_v34 }
 0x57b   : > { %2594 = vmatmul.bf16.vlgmr.msrb.gmra.mxu2 %v2559_v34  ;;  %2607 = vmatmul.bf16.vlgmr.msrb.gmra.mxu3 %v2559_v34 }
 0x5f7   : > { %v2569_v59 = vpop.f32.mrf.mxu0  ;;  %v2582_v61 = vpop.f32.mrf.mxu1 }
 0x5f8   : > { %v2612_v20 = vadd.f32 %v2569_v59, %v1907_v23  ;;  %v2613_v15 = vadd.f32 %v2582_v61, %v1926_v55 }
 0x5fa   : > { %v3538_v2 = vmul.f32 -1.442695, %v2612_v20  ;;  %v3539_v24 = vmul.f32 -1.442695, %v2613_v15 }
 0x5fc   : > { %3971 = vpow2.f32 %v3538_v2 }
 0x5fd   : > { %3973 = vpow2.f32 %v3539_v24 }
 0x5fe   : > { %v2595_v56 = vpop.f32.mrf.mxu2  ;;  %v2608_v7 = vpop.f32.mrf.mxu3 }
 0x5ff   : > { %v2615_v58 = vadd.f32 %v2608_v7, %v1964_v11  ;;  %v2571_v27 = vpop.f32.mrf.mxu0  ;;  %v2584_v62 = vpop.f32.mrf.mxu1  ;;  %v2614_v43 = vadd.f32 %v2595_v56, %v1945_v16 }
 0x601   : > { %v3540_v32 = vmul.f32 -1.442695, %v2615_v58 }
 0x602   : > { %v3972_v0 = vpop.eup %3971 }
 0x603   : > { %v3974_v44 = vpop.eup %3973  ;;  %v2619_v63 = vadd.f32 1.0, %v3972_v0  ;;  %3975 = vpow2.f32 %v3540_v32 }
 0x604   : > { %v2638_v46 = vadd.f32 1.0, %v3974_v44 }
 0x605   : > { %3977 = vrcp.f32 %v2619_v63  ;;  %v2631_v10 = vand.u32 2147483648, %v2619_v63  ;;  %v2629_v8 = vand.u32 2147483647, %v2619_v63  ;;  %vm2625_vm6 = vweird.f32 %v2619_v63 }
 0x606   : > { %3979 = vrcp.f32 %v2638_v46  ;;  %v2597_v60 = vpop.f32.mrf.mxu2  ;;  %v2610_v9 = vpop.f32.mrf.mxu3  ;;  %v2650_v18 = vand.u32 2147483648, %v2638_v46  ;;  %v2648_v48 = vand.u32 2147483647, %v2638_v46  ;;  %vm2644_vm7 = vweird.f32 %v2638_v46 }
 0x607   : > { %v2632_v37 = vor.u32 1.1754944e-38, %v2631_v10  ;;  %vm2630_vm10 = vcmp.eq.f32.partialorder %v2629_v8, 8.507059e+37 }
 0x608   : > { %v2651_v14 = vor.u32 1.1754944e-38, %v2650_v18  ;;  %vm2649_vm11 = vcmp.eq.f32.partialorder %v2648_v48, 8.507059e+37 }
 0x609   : > { %v3976_v12 = vpop.eup %3975 }
 0x60a   : > { %v2658_v17 = vadd.f32 1.0, %v3976_v12 }
 0x60b   : > { %v3978_v30 = vpop.eup %3977 }
 0x60c   : > { %v3980_v31 = vpop.eup %3979  ;;  %v2621_v49 = vmul.f32 %v3978_v30, %v2619_v63  ;;  %3981 = vrcp.f32 %v2658_v17  ;;  %vm2626_vm4 = vweird.f32 %v3978_v30  ;;  %v2670_v4 = vand.u32 2147483648, %v2658_v17 }
 0x60d   : > { %v2640_v26 = vmul.f32 %v3980_v31, %v2638_v46  ;;  %3983 = vtanh.f32 %v2614_v43  ;;  %vm2645_vm5 = vweird.f32 %v3980_v31  ;;  %vm2627_vm8 = vmor %vm2625_vm6, %vm2626_vm4  ;;  %vm2664_vm13 = vweird.f32 %v2658_v17 }
 0x60e   : > { %v2622_v54 = vsub.f32 1.0, %v2621_v49  ;;  %vm2646_vm9 = vmor %vm2644_vm7, %vm2645_vm5  ;;  %v2668_v42 = vand.u32 2147483647, %v2658_v17  ;;  %v2671_v57 = vor.u32 1.1754944e-38, %v2670_v4 }
 0x60f   : > { %v2641_v52 = vsub.f32 1.0, %v2640_v26 }
 0x610   : > { %v2623_v1 = vmul.f32 %v3978_v30, %v2622_v54  ;;  %vm2669_vm15 = vcmp.eq.f32.partialorder %v2668_v42, 8.507059e+37 }
 0x611   : > { %v2642_v47 = vmul.f32 %v3980_v31, %v2641_v52 }
 0x612   : > { %v3982_v51 = vpop.eup %3981  ;;  %v2624_v6 = vadd.f32 %v3978_v30, %v2623_v1 }
 0x613   : > { %v2643_v19 = vadd.f32 %v3980_v31, %v2642_v47  ;;  %v2660_v21 = vmul.f32 %v3982_v51, %v2658_v17  ;;  %v3984_v50 = vpop.eup %3983  ;;  %vm2665_vm12 = vweird.f32 %v3982_v51 }
 0x614   : > { %v2628_v35 = vsel %vm2627_vm8, %v3978_v30, %v2624_v6  ;;  %vm2666_vm14 = vmor %vm2664_vm13, %vm2665_vm12 }
 0x615   : > { %v2633_v3 = vsel %vm2630_vm10, %v2632_v37, %v2628_v35  ;;  %v2647_v33 = vsel %vm2646_vm9, %v3980_v31, %v2643_v19  ;;  %v2661_v38 = vsub.f32 1.0, %v2660_v21 }
 0x616   : > { %v2652_v36 = vsel %vm2649_vm11, %v2651_v14, %v2647_v33  ;;  %v2675_v39 = vmul.f32 %v3984_v50, %v2633_v3 }
 0x617   : > { %v2674_v40 = vmul.f32 %v2652_v36, %v5399_v29  ;;  %v2662_v41 = vmul.f32 %v3982_v51, %v2661_v38 }
 0x619   : > { %v2676_v28 = vadd.f32 %v2675_v39, %v2674_v40  ;;  %v2663_v22 = vadd.f32 %v3982_v51, %v2662_v41 }
 0x61b   : > { %3985 = vtanh.f32 %v2676_v28  ;;  %2682 = vst [vmem:[#allocation5] sm:$0xff] %v2676_v28  ;;  %v2667_v53 = vsel %vm2666_vm14, %v3982_v51, %v2663_v22 }
 0x61c   : > { %v2672_v5 = vsel %vm2669_vm15, %v2671_v57, %v2667_v53 }
 0x621   : > { %v3986_v34 = vpop.eup %3985  ;;  %2686 = sbr.rel (%p3542_p1) target bundleno = 1582 (0x62e), region = 112 }
 0x622   : > { %v2678_v23 = vmul.f32 %v3986_v34, %v2672_v5 }
 0x624   : > { %3541 = vst [vmem:[%s4783_s17 + $0x18] sm:$0xff] %v2678_v23 }
 0x625   : > { %2681 = vst [vmem:[#allocation4 + $0x8] sm:$0xff] %v2678_v23 }
 0x626   : > { %v2687_v29 = vld [vmem:[#allocation4] sm:$0xff]  ;;  %v2689_v25 = vld [vmem:[#allocation5 + $0x8] sm:$0xff]  ;;  %v2693_v59 = vld [vmem:[#allocation5] sm:$0xff] }
 0x627   : > { %2688 = vst [vmem:[#allocation24] sm:$0xff] %v2687_v29 }
 0x628   : > { %2690 = vst [vmem:[#allocation26] sm:$0xff] %v2689_v25 }
 0x629   : > { %2694 = vst [vmem:[#allocation29] sm:$0xff] %v2693_v59 }
 0x62c   : > { %v2691_v55 = vld [vmem:[#allocation4 + $0x8] sm:$0xff] }
 0x62d   : > { %2692 = vst [vmem:[#allocation27] sm:$0xff] %v2691_v55 }
 0x62e PF: > { %s5560_s28 = sld [smem:[#allocation56_spill]]  ;;  %s4508_s27 = smov [#allocation24]  }
 0x62f   : > { %s2723_s23 = sshll.u32 %s4508_s27, 4  ;;  %p5561_p4 = scmp.eq.s32.totalorder %s4618_s25, 1  ;;  %s2724_s23 = int_to_ptr.vmem [resolvable:$true] %s2723_s23 }
 0x630   : > { %s4509_s15 = smov [#allocation27]   ;;  %s5562_s4 = sld [smem:[#allocation58_spill]] }
 0x631   : > { %s2747_s12 = sshll.u32 %s4509_s15, 4  ;;  %p5563_p6 = pmov %p5561_p4  ;;  %s2748_s12 = int_to_ptr.vmem [resolvable:$true] %s2747_s12 }
 0x632   : > { %s3687_s14 = sshll.u32 %s4618_s25, 5  ;;  %s5564_s3 = sld [smem:[#allocation55_spill]] }
 0x633   : > { %s2708_s27 = sshll.u32 %s4783_s17, 4  ;;  %s2709_s27 = int_to_ptr.vmem [resolvable:$true] %s2708_s27 }
 0x634   : > { %s2725_s29 = sshll.u32 %s5560_s28, 4  ;;  %s2726_s29 = int_to_ptr.hbm [resolvable:$true] %s2725_s29 }
 0x635   : > { %3728 = dma.vmem_to_hbm [thread:$0]  (%p5561_p4), %s2724_s23, 128, %s2726_s29, [#allocation25]  }
 0x636   : > { %s2749_s26 = sshll.u32 %s5562_s4, 4  ;;  %s2696_s29 = scalar_lea.sflag [#allocation8], %s4752_s30  ;;  %s2750_s26 = int_to_ptr.hbm [resolvable:$true] %s2749_s26 }
 0x637   : > { %3732 = dma.vmem_to_hbm [thread:$0]  (%p5563_p6), %s2748_s12, 128, %s2750_s26, [#allocation28]  }
 0x638   : > { %s2707_s28 = scalar_lea.hbm %s5564_s3, %s3687_s14  ;;  %s4363_s12 = scalar_lea.hbm %s5564_s3, 64 }
 0x639   : > { %s2710_s0 = sshll.u32 %s2707_s28, 4  ;;  %s2711_s0 = int_to_ptr.hbm [resolvable:$true] %s2710_s0 }
 0x63a   : > { %s4357_s23 = sshra.s32 %s2711_s0, 4  ;;  %s4358_s23 = int_to_ptr.hbm [resolvable:$true] %s4357_s23 }
 0x63b   : > { %s4359_s15 = scalar_lea.hbm %s4358_s23, 32  ;;  %p4364_p10 = scmp.lt.s32.totalorder %s4358_s23, %s5564_s3 }
 0x63c   : > { %p4360_p12 = scmp.ne.s32.totalorder %s4358_s23, %s4359_s15  ;;  %p4365_p11 = scmp.lt.s32.totalorder %s4363_s12, %s4359_s15 }
 0x63e   : > { %p4361_p0 = pnand %p4360_p12, %p4719_p2  ;;  %p4366_p5 = por %p4365_p11, %p4364_p10 }
 0x640   : > { %p4362_p8 = pneg %p4361_p0 }
 0x642   : > { %p4367_p13 = pnand %p4366_p5, %p4362_p8 }
 0x644   : > { %4370 = shalt.err (!%p4367_p13)
}
 0x645   : > { %s4510_s30 = smov 128   ;;  %s4511_s17 = smov 8  }
 0x646   : > { %3726 = dma.vmem_to_hbm [thread:$0]  (%p4719_p2), %s2709_s27, 512, %s2711_s0, %s2696_s29, %s4510_s30, %s4510_s30, %s4511_s17  }
 0x647   : > { %s4512_s14 = smov [#allocation26]   ;;  %s5565_s16 = sld [smem:[#allocation57_spill]] }
 0x648   : > { %s2735_s22 = sshll.u32 %s4512_s14, 4  ;;  %p5566_p7 = pmov %p5561_p4  ;;  %s2736_s22 = int_to_ptr.vmem [resolvable:$true] %s2735_s22 }
 0x649   : > { %s5567_s12 = sld [smem:[#allocation59_spill]]  ;;  %s4513_s26 = smov [#allocation29]  }
 0x64a   : > { %s2759_s3 = sshll.u32 %s4513_s26, 4  ;;  %p5568_p3 = pmov %p5561_p4  ;;  %s2760_s3 = int_to_ptr.vmem [resolvable:$true] %s2759_s3 }
 0x64c   : > { %p5569_p2 = pmov %p5568_p3 }
 0x64d   : > { %s2737_s2 = sshll.u32 %s5565_s16, 4  ;;  %s2738_s2 = int_to_ptr.hbm [resolvable:$true] %s2737_s2 }
 0x64e   : > { %3730 = dma.vmem_to_hbm [thread:$0]  (%p5566_p7), %s2736_s22, 128, %s2738_s2, [#allocation25]  }
 0x64f   : > { %s2761_s4 = sshll.u32 %s5567_s12, 4  ;;  %s2762_s4 = int_to_ptr.hbm [resolvable:$true] %s2761_s4 }
 0x650   : > { %3734 = dma.vmem_to_hbm [thread:$0]  (%p5568_p3), %s2760_s3, 128, %s2762_s4, [#allocation28]  }
 0x651   : > { %4468 = dma.done.wait (%p5569_p2), [#allocation25], 256   ;;  %p5570_p1 = pmov %p5569_p2 }
 0x653   : > { %4470 = vsyncadd (%p5570_p1), [#allocation25], 4294967040  ;;  %p5571_p4 = pmov %p5570_p1 }
 0x654   : > { %p5572_p6 = pmov %p5570_p1 }
 0x655   : > { %4472 = dma.done.wait (%p5571_p4), [#allocation28], 256  }
 0x656   : > { %4474 = vsyncadd (%p5572_p6), [#allocation28], 4294967040 }
 0x657 PF: > { %s2793_s0 = sand.u32 1, %s4481_s18   ;;  %p5573_p12 = scmp.ge.s32.totalorder %s4493_s21, 2 }
 0x658   : > { %s2794_s1 = scalar_lea.sflag [#allocation8], %s2793_s0 }
 0x659   : > { %p3777_p0 = pnand %p5573_p12, %p4725_p9 }
 0x65b   : > { %p3778_p8 = pneg %p3777_p0 }
 0x65d   : > { %4476 = dma.done.wait (%p3778_p8), %s2794_s1, 512  }
 0x65e   : > { %4478 = vsyncadd (%p3778_p8), %s2794_s1, 4294966784  ;;  %p36_p10 = scmp.ge.s32.totalorder %s4693_s13, 4   ;;  %s5574_s18 = smov %s4485_s19 }
 0x65f   : > { %s5575_s19 = smov %s4489_s20  ;;  %s5576_s20 = smov %s4705_s5 }
 0x660   : > { %s5577_s21 = smov %s4693_s13  ;;  %38 = sbr.rel (!%p36_p10) target bundleno = 24 (0x18), region = 199 }
 0x665   :  { %2800 = vsyncpa [#allocation7], 1 }
 0x666   :  { %2802 = vsyncpa [#allocation7 + $0x1], 1 }
 0x667   :  { %2803 = vsyncpa [#allocation10], 1 }
 0x668   :  { %2804 = vsyncpa [#allocation13], 1 }
 0x669   :  { %2805 = vsyncpa [#allocation16], 1 }
 0x66a   :  { %2806 = vsyncpa [#allocation19], 1 }
 0x66b   :  { %2807 = vsyncpa [#allocation22], 1 }
 0x66c   :  { %2808 = vsyncpa [#allocation8], 1 }
 0x66d   :  { %2810 = vsyncpa [#allocation8 + $0x1], 1 }
 0x66e   :  { %2811 = vsyncpa [#allocation25], 1 }
 0x66f   :  { %2812 = vsyncpa [#allocation28], 1 }

</bundles_post_ra>
